<compile_context>
chip_gen: v7x
topology: tpu7x:2x2x1
jax: 0.10.0
libtpu: 0.0.40
codegen_flags: <defaults>
</compile_context>

<pallas_src>
import jax
import jax.numpy as jnp
from jax import lax
from jax.experimental import pallas as pl
from jax.experimental.pallas import tpu as pltpu


_HIDDEN = 64   # channels of conv1/conv2/conv3
_C4_PAD = 8    # conv4 Cout (=3) zero-padded to a small, cheap-to-store width


def _new_disc_kernel(x_ref, w1_ref, b1_ref, w2_ref, b2_ref, w3_ref, b3_ref,
                     w4_ref, b4_ref, o_ref, shift_ref):
    """Fused conv1->conv4 for one batch element.

    x_ref:     (1, H, W, Cin)        input tile (VMEM)
    w1_ref:    (Cin, 64)             1x1 weights
    w2/w3_ref: (3, 3, 64, 64)        3x3 weights
    w4_ref:    (3, 3, 64, C4)        3x3 weights, Cout zero-padded to C4
    b*_ref:    (1, Cout)             biases
    o_ref:     (1, H, W, C4)         output tile
    shift_ref: (3, H+2, W, 64)       kw-shifted, H-haloed activation slabs
    """
    _, H, W, Cin = x_ref.shape
    HW = H * W
    C = w1_ref.shape[-1]        # 64 hidden channels
    C4 = w4_ref.shape[-1]       # padded conv4 output channels
    f32 = jnp.float32
    sdt = shift_ref.dtype

    # ---- Halo init (perf-review item 1): zero ONLY the cells stage() never
    # writes.  Rows 0 and H+1 of every slab (the +/-1 row taps), column 0 of
    # the "w-1" slab and column W-1 of the "w+1" slab (the +/-1 column taps).
    zrow = jnp.zeros((1, W, C), sdt)
    zcol = jnp.zeros((H, 1, C), sdt)
    for kw in range(3):                               # static unroll
        shift_ref[kw, 0:1, :, :] = zrow               # top halo row
        shift_ref[kw, H + 1:H + 2, :, :] = zrow       # bottom halo row
    shift_ref[0, 1:H + 1, 0:1, :] = zcol              # left halo, w-1 slab
    shift_ref[2, 1:H + 1, W - 1:W, :] = zcol          # right halo, w+1 slab

    def stage(y):
        """Write activation y (HW, C) f32 as three kw-shifted slabs.

        shift_ref[kw, hp, w, :] == act[hp - 1, w + kw - 1, :] (zero outside),
        so every (kh, kw) tap is just shift_ref[kw, kh:kh+H] -- a free
        leading-axis offset with no per-tap sublane relayout.
        """
        y = y.astype(sdt).reshape(H, W, C)
        shift_ref[1, 1:H + 1, :, :] = y                      # aligned store
        shift_ref[0, 1:H + 1, 1:W, :] = y[:, :W - 1, :]      # column w-1 tap
        shift_ref[2, 1:H + 1, 0:W - 1, :] = y[:, 1:, :]      # column w+1 tap

    def conv3x3(w_ref, b_ref, cout, relu):
        acc = jnp.zeros((HW, cout), f32)
        for kh in range(3):                 # static unroll: 9 MXU matmuls
            for kw in range(3):
                patch = shift_ref[kw, kh:kh + H].reshape(HW, C)
                acc = acc + jnp.dot(patch, w_ref[kh, kw],
                                    preferred_element_type=f32)
        acc = acc + b_ref[...].astype(f32)
        if relu:
            acc = jnp.maximum(acc, 0.0)
        return acc

    # conv1: 1x1, Cin -> 64, ReLU (single small-K MXU matmul).
    x = x_ref[0].reshape(HW, Cin)
    y = jnp.dot(x, w1_ref[...], preferred_element_type=f32)
    y = jnp.maximum(y + b1_ref[...].astype(f32), 0.0)
    stage(y)

    # conv2 / conv3: 3x3, 64 -> 64, ReLU. Intermediates stay in VMEM scratch.
    stage(conv3x3(w2_ref, b2_ref, C, relu=True))
    stage(conv3x3(w3_ref, b3_ref, C, relu=True))

    # conv4: 3x3, 64 -> C4 (zero-padded from 3), no ReLU.
    y = conv3x3(w4_ref, b4_ref, C4, relu=False)
    o_ref[0] = y.reshape(H, W, C4).astype(o_ref.dtype)


def _padded_vmem_bytes(shape, dtype):
    """Rough VMEM footprint of one buffer after (8, 128) tile padding."""
    lead, sub, lane = shape[:-2], shape[-2], shape[-1]
    n = (-(-sub // 8) * 8) * (-(-lane // 128) * 128)
    for d in lead:
        n *= d
    return n * jnp.dtype(dtype).itemsize


def _const_spec(shape):
    """BlockSpec for a weight/bias that never changes across the grid."""
    rank = len(shape)

    def idx(n):
        return (0,) * rank

    # Single-buffered (perf-review item 3): no double-buffer VMEM, no re-DMA.
    return pl.BlockSpec(shape, idx, pipeline_mode=pl.Buffered(1))


def new_disc_forward(x_nchw, params, compute_dtype=None):
    """Full fused forward pass. Input/output NCHW to match the PyTorch module.

    compute_dtype: set to jnp.bfloat16 on v6e/v7x for MXU-native matmuls and
    half-size staging (accumulation stays f32); expect ~1e-2 deviation from an
    f32 reference in that mode.
    """
    (w1, b1), (w2, b2), (w3, b3), (w4, b4) = params
    # grad_reverse is identity in the forward pass (backward-only op).
    x = jnp.transpose(x_nchw, (0, 2, 3, 1))           # NCHW -> NHWC (tiny input)
    dt = jnp.dtype(compute_dtype) if compute_dtype is not None else x.dtype
    x = x.astype(dt)
    N, H, W, Cin = x.shape
    C = _HIDDEN
    C4 = _C4_PAD
    cout = w4.shape[-1]                               # 3 real output channels

    # Weight / bias massaging (tiny, one-time): 1x1 weights as a plain matrix,
    # conv4 Cout zero-padded so the final matmul/store stay cheap.
    w1r = w1.reshape(Cin, C).astype(dt)
    w2c = w2.astype(dt)
    w3c = w3.astype(dt)
    w4p = jnp.pad(w4, ((0, 0), (0, 0), (0, 0), (0, C4 - cout))).astype(dt)
    b1r = b1.reshape(1, C).astype(dt)
    b2r = b2.reshape(1, C).astype(dt)
    b3r = b3.reshape(1, C).astype(dt)
    b4p = jnp.pad(b4, (0, C4 - cout)).reshape(1, C4).astype(dt)

    # Explicit VMEM budget (perf-review item 4): scratch + double-buffered
    # input/output blocks + single-buffered weights, with headroom.
    est = (_padded_vmem_bytes((3, H + 2, W, C), dt)
           + 2 * _padded_vmem_bytes((1, H, W, Cin), dt)
           + 2 * _padded_vmem_bytes((1, H, W, C4), dt)
           + _padded_vmem_bytes((Cin, C), dt)
           + 2 * _padded_vmem_bytes((3, 3, C, C), dt)
           + _padded_vmem_bytes((3, 3, C, C4), dt)
           + 3 * _padded_vmem_bytes((1, C), dt)
           + _padded_vmem_bytes((1, C4), dt))
    vmem_limit = min(96 << 20, max(32 << 20, int(est * 1.25) + (4 << 20)))

    out = pl.pallas_call(
        _new_disc_kernel,
        out_shape=jax.ShapeDtypeStruct((N, H, W, C4), dt),
        grid_spec=pltpu.PrefetchScalarGridSpec(
            num_scalar_prefetch=0,
            grid=(N,),
            in_specs=[
                pl.BlockSpec((1, H, W, Cin), lambda n: (n, 0, 0, 0)),
                _const_spec((Cin, C)),
                _const_spec((1, C)),
                _const_spec((3, 3, C, C)),
                _const_spec((1, C)),
                _const_spec((3, 3, C, C)),
                _const_spec((1, C)),
                _const_spec((3, 3, C, C4)),
                _const_spec((1, C4)),
            ],
            out_specs=pl.BlockSpec((1, H, W, C4), lambda n: (n, 0, 0, 0)),
            scratch_shapes=[pltpu.VMEM((3, H + 2, W, C), dt)],
        ),
        compiler_params=pltpu.CompilerParams(
            dimension_semantics=("parallel",),
            vmem_limit_bytes=vmem_limit),
    )(x, w1r, b1r, w2c, b2r, w3c, b3r, w4p, b4p)

    out = out[..., :cout]                             # drop zero-padded channels
    out = jnp.transpose(out, (0, 3, 1, 2))            # NHWC -> NCHW
    return out.astype(x_nchw.dtype)


def init_params(key, nch):
    """Deterministic synthetic parameters (HWIO weights, per-channel bias)."""
    specs = [
        (1, nch, _HIDDEN),        # conv1: 1x1
        (3, _HIDDEN, _HIDDEN),    # conv2: 3x3
        (3, _HIDDEN, _HIDDEN),    # conv3: 3x3
        (3, _HIDDEN, 3),          # conv4: 3x3, no relu
    ]
    params = []
    for k, cin, cout in specs:
        key, kw, kb = jax.random.split(key, 3)
        fan_in = k * k * cin
        w = jax.random.normal(kw, (k, k, cin, cout), jnp.float32) / jnp.sqrt(fan_in)
        bias = jax.random.normal(kb, (cout,), jnp.float32) * 0.01
        params.append((w, bias))
    return params


def _reference_forward(x_nchw, params):
    """Pure-JAX reference (lax.conv_general_dilated) for correctness check."""
    x = jnp.transpose(x_nchw, (0, 2, 3, 1))
    for i, (w, b) in enumerate(params):
        x = lax.conv_general_dilated(
            x, w, window_strides=(1, 1), padding="SAME",
            dimension_numbers=("NHWC", "HWIO", "NHWC"))
        x = x + b[None, None, None, :]
        if i < 3:
            x = jnp.maximum(x, 0.0)
    return jnp.transpose(x, (0, 3, 1, 2))


if __name__ == "__main__":
    key = jax.random.PRNGKey(0)
    k_x, k_p = jax.random.split(key)

    N, Nch, H, W = 2, 4, 16, 16
    x = jax.random.normal(k_x, (N, Nch, H, W), jnp.float32)
    params = init_params(k_p, Nch)

    out = jax.block_until_ready(new_disc_forward(x, params))
    ref = jax.block_until_ready(_reference_forward(x, params))

    assert out.shape == (N, 3, H, W), out.shape
    max_err = float(jnp.max(jnp.abs(out - ref)))
    assert jnp.allclose(out, ref, atol=1e-4, rtol=1e-4), max_err
    print("KERNEL_OK")
</pallas_src>

<mosaic_0001>
module attributes {stable_mosaic.version = 11 : i64} {
  func.func @_new_disc_kernel(%arg0: i32, %arg1: memref<1x16x16x4xf32, #tpu.memory_space<vmem>>, %arg2: memref<4x64xf32, #tpu.memory_space<vmem>>, %arg3: memref<1x64xf32, #tpu.memory_space<vmem>>, %arg4: memref<3x3x64x64xf32, #tpu.memory_space<vmem>>, %arg5: memref<1x64xf32, #tpu.memory_space<vmem>>, %arg6: memref<3x3x64x64xf32, #tpu.memory_space<vmem>>, %arg7: memref<1x64xf32, #tpu.memory_space<vmem>>, %arg8: memref<3x3x64x8xf32, #tpu.memory_space<vmem>>, %arg9: memref<1x8xf32, #tpu.memory_space<vmem>>, %arg10: memref<1x16x16x8xf32, #tpu.memory_space<vmem>>, %arg11: memref<3x18x16x64xf32, #tpu.memory_space<vmem>>) attributes {dimension_semantics = [#tpu.dimension_semantics<parallel>], iteration_bounds = array<i64: 2>, scalar_prefetch = 0 : i64, scratch_operands = 1 : i64, tpu.core_type = #tpu.core_type<tc>, window_params = [{transform_indices = @transform_0, window_bounds = array<i64: 1, 16, 16, 4>}, {pipeline_mode = #tpu.pipeline_mode<synchronous>, transform_indices = @transform_1, window_bounds = array<i64: 4, 64>}, {pipeline_mode = #tpu.pipeline_mode<synchronous>, transform_indices = @transform_2, window_bounds = array<i64: 1, 64>}, {pipeline_mode = #tpu.pipeline_mode<synchronous>, transform_indices = @transform_3, window_bounds = array<i64: 3, 3, 64, 64>}, {pipeline_mode = #tpu.pipeline_mode<synchronous>, transform_indices = @transform_4, window_bounds = array<i64: 1, 64>}, {pipeline_mode = #tpu.pipeline_mode<synchronous>, transform_indices = @transform_5, window_bounds = array<i64: 3, 3, 64, 64>}, {pipeline_mode = #tpu.pipeline_mode<synchronous>, transform_indices = @transform_6, window_bounds = array<i64: 1, 64>}, {pipeline_mode = #tpu.pipeline_mode<synchronous>, transform_indices = @transform_7, window_bounds = array<i64: 3, 3, 64, 8>}, {pipeline_mode = #tpu.pipeline_mode<synchronous>, transform_indices = @transform_8, window_bounds = array<i64: 1, 8>}, {transform_indices = @transform_9, window_bounds = array<i64: 1, 16, 16, 8>}]} {
    %cst = arith.constant 0.000000e+00 : f32
    %0 = vector.broadcast %cst : f32 to vector<1x16x64xf32>
    %cst_0 = arith.constant 0.000000e+00 : f32
    %1 = vector.broadcast %cst_0 : f32 to vector<16x1x64xf32>
    %c0 = arith.constant 0 : index
    %c0_1 = arith.constant 0 : index
    %c0_2 = arith.constant 0 : index
    %c0_3 = arith.constant 0 : index
    %2 = vector.load %arg11[%c0, %c0_1, %c0_2, %c0_3] : memref<3x18x16x64xf32, #tpu.memory_space<vmem>>, vector<1x1x16x64xf32>
    %3 = vector.shape_cast %2 : vector<1x1x16x64xf32> to vector<1x16x64xf32>
    %4 = vector.shape_cast %0 : vector<1x16x64xf32> to vector<1x1x16x64xf32>
    tpu.vector_store %arg11[%c0, %c0_1, %c0_2, %c0_3], %4 {strides = array<i32>} : memref<3x18x16x64xf32, #tpu.memory_space<vmem>>, vector<1x1x16x64xf32>,
    %c0_4 = arith.constant 0 : index
    %c17 = arith.constant 17 : index
    %c0_5 = arith.constant 0 : index
    %c0_6 = arith.constant 0 : index
    %5 = vector.load %arg11[%c0_4, %c17, %c0_5, %c0_6] : memref<3x18x16x64xf32, #tpu.memory_space<vmem>>, vector<1x1x16x64xf32>
    %6 = vector.shape_cast %5 : vector<1x1x16x64xf32> to vector<1x16x64xf32>
    %7 = vector.shape_cast %0 : vector<1x16x64xf32> to vector<1x1x16x64xf32>
    tpu.vector_store %arg11[%c0_4, %c17, %c0_5, %c0_6], %7 {strides = array<i32>} : memref<3x18x16x64xf32, #tpu.memory_space<vmem>>, vector<1x1x16x64xf32>,
    %c1 = arith.constant 1 : index
    %c0_7 = arith.constant 0 : index
    %c0_8 = arith.constant 0 : index
    %c0_9 = arith.constant 0 : index
    %8 = vector.load %arg11[%c1, %c0_7, %c0_8, %c0_9] : memref<3x18x16x64xf32, #tpu.memory_space<vmem>>, vector<1x1x16x64xf32>
    %9 = vector.shape_cast %8 : vector<1x1x16x64xf32> to vector<1x16x64xf32>
    %10 = vector.shape_cast %0 : vector<1x16x64xf32> to vector<1x1x16x64xf32>
    tpu.vector_store %arg11[%c1, %c0_7, %c0_8, %c0_9], %10 {strides = array<i32>} : memref<3x18x16x64xf32, #tpu.memory_space<vmem>>, vector<1x1x16x64xf32>,
    %c1_10 = arith.constant 1 : index
    %c17_11 = arith.constant 17 : index
    %c0_12 = arith.constant 0 : index
    %c0_13 = arith.constant 0 : index
    %11 = vector.load %arg11[%c1_10, %c17_11, %c0_12, %c0_13] : memref<3x18x16x64xf32, #tpu.memory_space<vmem>>, vector<1x1x16x64xf32>
    %12 = vector.shape_cast %11 : vector<1x1x16x64xf32> to vector<1x16x64xf32>
    %13 = vector.shape_cast %0 : vector<1x16x64xf32> to vector<1x1x16x64xf32>
    tpu.vector_store %arg11[%c1_10, %c17_11, %c0_12, %c0_13], %13 {strides = array<i32>} : memref<3x18x16x64xf32, #tpu.memory_space<vmem>>, vector<1x1x16x64xf32>,
    %c2 = arith.constant 2 : index
    %c0_14 = arith.constant 0 : index
    %c0_15 = arith.constant 0 : index
    %c0_16 = arith.constant 0 : index
    %14 = vector.load %arg11[%c2, %c0_14, %c0_15, %c0_16] : memref<3x18x16x64xf32, #tpu.memory_space<vmem>>, vector<1x1x16x64xf32>
    %15 = vector.shape_cast %14 : vector<1x1x16x64xf32> to vector<1x16x64xf32>
    %16 = vector.shape_cast %0 : vector<1x16x64xf32> to vector<1x1x16x64xf32>
    tpu.vector_store %arg11[%c2, %c0_14, %c0_15, %c0_16], %16 {strides = array<i32>} : memref<3x18x16x64xf32, #tpu.memory_space<vmem>>, vector<1x1x16x64xf32>,
    %c2_17 = arith.constant 2 : index
    %c17_18 = arith.constant 17 : index
    %c0_19 = arith.constant 0 : index
    %c0_20 = arith.constant 0 : index
    %17 = vector.load %arg11[%c2_17, %c17_18, %c0_19, %c0_20] : memref<3x18x16x64xf32, #tpu.memory_space<vmem>>, vector<1x1x16x64xf32>
    %18 = vector.shape_cast %17 : vector<1x1x16x64xf32> to vector<1x16x64xf32>
    %19 = vector.shape_cast %0 : vector<1x16x64xf32> to vector<1x1x16x64xf32>
    tpu.vector_store %arg11[%c2_17, %c17_18, %c0_19, %c0_20], %19 {strides = array<i32>} : memref<3x18x16x64xf32, #tpu.memory_space<vmem>>, vector<1x1x16x64xf32>,
    %c0_21 = arith.constant 0 : index
    %c1_22 = arith.constant 1 : index
    %c0_23 = arith.constant 0 : index
    %c0_24 = arith.constant 0 : index
    %20 = vector.load %arg11[%c0_21, %c1_22, %c0_23, %c0_24] : memref<3x18x16x64xf32, #tpu.memory_space<vmem>>, vector<1x16x1x64xf32>
    %21 = vector.shape_cast %20 : vector<1x16x1x64xf32> to vector<16x1x64xf32>
    %22 = vector.shape_cast %1 : vector<16x1x64xf32> to vector<1x16x1x64xf32>
    tpu.vector_store %arg11[%c0_21, %c1_22, %c0_23, %c0_24], %22 {strides = array<i32>} : memref<3x18x16x64xf32, #tpu.memory_space<vmem>>, vector<1x16x1x64xf32>,
    %c2_25 = arith.constant 2 : index
    %c1_26 = arith.constant 1 : index
    %c15 = arith.constant 15 : index
    %c0_27 = arith.constant 0 : index
    %23 = vector.load %arg11[%c2_25, %c1_26, %c15, %c0_27] : memref<3x18x16x64xf32, #tpu.memory_space<vmem>>, vector<1x16x1x64xf32>
    %24 = vector.shape_cast %23 : vector<1x16x1x64xf32> to vector<16x1x64xf32>
    %25 = vector.shape_cast %1 : vector<16x1x64xf32> to vector<1x16x1x64xf32>
    tpu.vector_store %arg11[%c2_25, %c1_26, %c15, %c0_27], %25 {strides = array<i32>} : memref<3x18x16x64xf32, #tpu.memory_space<vmem>>, vector<1x16x1x64xf32>,
    %c0_28 = arith.constant 0 : index
    %c0_29 = arith.constant 0 : index
    %c0_30 = arith.constant 0 : index
    %c0_31 = arith.constant 0 : index
    %26 = vector.load %arg1[%c0_28, %c0_29, %c0_30, %c0_31] : memref<1x16x16x4xf32, #tpu.memory_space<vmem>>, vector<1x16x16x4xf32>
    %27 = vector.shape_cast %26 : vector<1x16x16x4xf32> to vector<16x16x4xf32>
    %28 = vector.shape_cast %27 : vector<16x16x4xf32> to vector<256x4xf32>
    %c0_32 = arith.constant 0 : index
    %c0_33 = arith.constant 0 : index
    %29 = vector.load %arg2[%c0_32, %c0_33] : memref<4x64xf32, #tpu.memory_space<vmem>>, vector<4x64xf32>
    %cst_34 = arith.constant dense<0.000000e+00> : vector<256x64xf32>
    %30 = tpu.matmul %28, %29, %cst_34 {dimension_numbers = #tpu.dot_dimension_numbers<[1], [0], [0], [1], [0, 0, 1, 1], [], []>} : vector<256x4xf32>, vector<4x64xf32>, vector<256x64xf32> -> vector<256x64xf32>
    %c0_35 = arith.constant 0 : index
    %c0_36 = arith.constant 0 : index
    %31 = vector.load %arg3[%c0_35, %c0_36] : memref<1x64xf32, #tpu.memory_space<vmem>>, vector<1x64xf32>
    %32 = vector.broadcast %31 : vector<1x64xf32> to vector<256x64xf32>
    %33 = arith.addf %30, %32 : vector<256x64xf32>
    %cst_37 = arith.constant 0.000000e+00 : f32
    %34 = vector.broadcast %cst_37 : f32 to vector<256x64xf32>
    %35 = arith.maximumf %33, %34 : vector<256x64xf32>
    %36 = vector.shape_cast %35 : vector<256x64xf32> to vector<16x16x64xf32>
    %c1_38 = arith.constant 1 : index
    %c1_39 = arith.constant 1 : index
    %c0_40 = arith.constant 0 : index
    %c0_41 = arith.constant 0 : index
    %37 = vector.load %arg11[%c1_38, %c1_39, %c0_40, %c0_41] : memref<3x18x16x64xf32, #tpu.memory_space<vmem>>, vector<1x16x16x64xf32>
    %38 = vector.shape_cast %37 : vector<1x16x16x64xf32> to vector<16x16x64xf32>
    %39 = vector.shape_cast %36 : vector<16x16x64xf32> to vector<1x16x16x64xf32>
    tpu.vector_store %arg11[%c1_38, %c1_39, %c0_40, %c0_41], %39 {strides = array<i32>} : memref<3x18x16x64xf32, #tpu.memory_space<vmem>>, vector<1x16x16x64xf32>,
    %40 = vector.extract_strided_slice %36 {offsets = [0, 0, 0], sizes = [16, 15, 64], strides = [1, 1, 1]} : vector<16x16x64xf32> to vector<16x15x64xf32>
    %c0_42 = arith.constant 0 : index
    %c1_43 = arith.constant 1 : index
    %c1_44 = arith.constant 1 : index
    %c0_45 = arith.constant 0 : index
    %41 = vector.load %arg11[%c0_42, %c1_43, %c1_44, %c0_45] : memref<3x18x16x64xf32, #tpu.memory_space<vmem>>, vector<1x16x15x64xf32>
    %42 = vector.shape_cast %41 : vector<1x16x15x64xf32> to vector<16x15x64xf32>
    %43 = vector.shape_cast %40 : vector<16x15x64xf32> to vector<1x16x15x64xf32>
    tpu.vector_store %arg11[%c0_42, %c1_43, %c1_44, %c0_45], %43 {strides = array<i32>} : memref<3x18x16x64xf32, #tpu.memory_space<vmem>>, vector<1x16x15x64xf32>,
    %44 = vector.extract_strided_slice %36 {offsets = [0, 1, 0], sizes = [16, 15, 64], strides = [1, 1, 1]} : vector<16x16x64xf32> to vector<16x15x64xf32>
    %c2_46 = arith.constant 2 : index
    %c1_47 = arith.constant 1 : index
    %c0_48 = arith.constant 0 : index
    %c0_49 = arith.constant 0 : index
    %45 = vector.load %arg11[%c2_46, %c1_47, %c0_48, %c0_49] : memref<3x18x16x64xf32, #tpu.memory_space<vmem>>, vector<1x16x15x64xf32>
    %46 = vector.shape_cast %45 : vector<1x16x15x64xf32> to vector<16x15x64xf32>
    %47 = vector.shape_cast %44 : vector<16x15x64xf32> to vector<1x16x15x64xf32>
    tpu.vector_store %arg11[%c2_46, %c1_47, %c0_48, %c0_49], %47 {strides = array<i32>} : memref<3x18x16x64xf32, #tpu.memory_space<vmem>>, vector<1x16x15x64xf32>,
    %cst_50 = arith.constant 0.000000e+00 : f32
    %48 = vector.broadcast %cst_50 : f32 to vector<256x64xf32>
    %c0_51 = arith.constant 0 : index
    %c0_52 = arith.constant 0 : index
    %c0_53 = arith.constant 0 : index
    %c0_54 = arith.constant 0 : index
    %49 = vector.load %arg11[%c0_51, %c0_52, %c0_53, %c0_54] : memref<3x18x16x64xf32, #tpu.memory_space<vmem>>, vector<1x16x16x64xf32>
    %50 = vector.shape_cast %49 : vector<1x16x16x64xf32> to vector<16x16x64xf32>
    %51 = vector.shape_cast %50 : vector<16x16x64xf32> to vector<256x64xf32>
    %c0_55 = arith.constant 0 : index
    %c0_56 = arith.constant 0 : index
    %c0_57 = arith.constant 0 : index
    %c0_58 = arith.constant 0 : index
    %52 = vector.load %arg4[%c0_55, %c0_56, %c0_57, %c0_58] : memref<3x3x64x64xf32, #tpu.memory_space<vmem>>, vector<1x1x64x64xf32>
    %53 = vector.shape_cast %52 : vector<1x1x64x64xf32> to vector<64x64xf32>
    %cst_59 = arith.constant dense<0.000000e+00> : vector<256x64xf32>
    %54 = tpu.matmul %51, %53, %cst_59 {dimension_numbers = #tpu.dot_dimension_numbers<[1], [0], [0], [1], [0, 0, 1, 1], [], []>} : vector<256x64xf32>, vector<64x64xf32>, vector<256x64xf32> -> vector<256x64xf32>
    %55 = arith.addf %48, %54 : vector<256x64xf32>
    %c1_60 = arith.constant 1 : index
    %c0_61 = arith.constant 0 : index
    %c0_62 = arith.constant 0 : index
    %c0_63 = arith.constant 0 : index
    %56 = vector.load %arg11[%c1_60, %c0_61, %c0_62, %c0_63] : memref<3x18x16x64xf32, #tpu.memory_space<vmem>>, vector<1x16x16x64xf32>
    %57 = vector.shape_cast %56 : vector<1x16x16x64xf32> to vector<16x16x64xf32>
    %58 = vector.shape_cast %57 : vector<16x16x64xf32> to vector<256x64xf32>
    %c0_64 = arith.constant 0 : index
    %c1_65 = arith.constant 1 : index
    %c0_66 = arith.constant 0 : index
    %c0_67 = arith.constant 0 : index
    %59 = vector.load %arg4[%c0_64, %c1_65, %c0_66, %c0_67] : memref<3x3x64x64xf32, #tpu.memory_space<vmem>>, vector<1x1x64x64xf32>
    %60 = vector.shape_cast %59 : vector<1x1x64x64xf32> to vector<64x64xf32>
    %cst_68 = arith.constant dense<0.000000e+00> : vector<256x64xf32>
    %61 = tpu.matmul %58, %60, %cst_68 {dimension_numbers = #tpu.dot_dimension_numbers<[1], [0], [0], [1], [0, 0, 1, 1], [], []>} : vector<256x64xf32>, vector<64x64xf32>, vector<256x64xf32> -> vector<256x64xf32>
    %62 = arith.addf %55, %61 : vector<256x64xf32>
    %c2_69 = arith.constant 2 : index
    %c0_70 = arith.constant 0 : index
    %c0_71 = arith.constant 0 : index
    %c0_72 = arith.constant 0 : index
    %63 = vector.load %arg11[%c2_69, %c0_70, %c0_71, %c0_72] : memref<3x18x16x64xf32, #tpu.memory_space<vmem>>, vector<1x16x16x64xf32>
    %64 = vector.shape_cast %63 : vector<1x16x16x64xf32> to vector<16x16x64xf32>
    %65 = vector.shape_cast %64 : vector<16x16x64xf32> to vector<256x64xf32>
    %c0_73 = arith.constant 0 : index
    %c2_74 = arith.constant 2 : index
    %c0_75 = arith.constant 0 : index
    %c0_76 = arith.constant 0 : index
    %66 = vector.load %arg4[%c0_73, %c2_74, %c0_75, %c0_76] : memref<3x3x64x64xf32, #tpu.memory_space<vmem>>, vector<1x1x64x64xf32>
    %67 = vector.shape_cast %66 : vector<1x1x64x64xf32> to vector<64x64xf32>
    %cst_77 = arith.constant dense<0.000000e+00> : vector<256x64xf32>
    %68 = tpu.matmul %65, %67, %cst_77 {dimension_numbers = #tpu.dot_dimension_numbers<[1], [0], [0], [1], [0, 0, 1, 1], [], []>} : vector<256x64xf32>, vector<64x64xf32>, vector<256x64xf32> -> vector<256x64xf32>
    %69 = arith.addf %62, %68 : vector<256x64xf32>
    %c0_78 = arith.constant 0 : index
    %c1_79 = arith.constant 1 : index
    %c0_80 = arith.constant 0 : index
    %c0_81 = arith.constant 0 : index
    %70 = vector.load %arg11[%c0_78, %c1_79, %c0_80, %c0_81] : memref<3x18x16x64xf32, #tpu.memory_space<vmem>>, vector<1x16x16x64xf32>
    %71 = vector.shape_cast %70 : vector<1x16x16x64xf32> to vector<16x16x64xf32>
    %72 = vector.shape_cast %71 : vector<16x16x64xf32> to vector<256x64xf32>
    %c1_82 = arith.constant 1 : index
    %c0_83 = arith.constant 0 : index
    %c0_84 = arith.constant 0 : index
    %c0_85 = arith.constant 0 : index
    %73 = vector.load %arg4[%c1_82, %c0_83, %c0_84, %c0_85] : memref<3x3x64x64xf32, #tpu.memory_space<vmem>>, vector<1x1x64x64xf32>
    %74 = vector.shape_cast %73 : vector<1x1x64x64xf32> to vector<64x64xf32>
    %cst_86 = arith.constant dense<0.000000e+00> : vector<256x64xf32>
    %75 = tpu.matmul %72, %74, %cst_86 {dimension_numbers = #tpu.dot_dimension_numbers<[1], [0], [0], [1], [0, 0, 1, 1], [], []>} : vector<256x64xf32>, vector<64x64xf32>, vector<256x64xf32> -> vector<256x64xf32>
    %76 = arith.addf %69, %75 : vector<256x64xf32>
    %c1_87 = arith.constant 1 : index
    %c1_88 = arith.constant 1 : index
    %c0_89 = arith.constant 0 : index
    %c0_90 = arith.constant 0 : index
    %77 = vector.load %arg11[%c1_87, %c1_88, %c0_89, %c0_90] : memref<3x18x16x64xf32, #tpu.memory_space<vmem>>, vector<1x16x16x64xf32>
    %78 = vector.shape_cast %77 : vector<1x16x16x64xf32> to vector<16x16x64xf32>
    %79 = vector.shape_cast %78 : vector<16x16x64xf32> to vector<256x64xf32>
    %c1_91 = arith.constant 1 : index
    %c1_92 = arith.constant 1 : index
    %c0_93 = arith.constant 0 : index
    %c0_94 = arith.constant 0 : index
    %80 = vector.load %arg4[%c1_91, %c1_92, %c0_93, %c0_94] : memref<3x3x64x64xf32, #tpu.memory_space<vmem>>, vector<1x1x64x64xf32>
    %81 = vector.shape_cast %80 : vector<1x1x64x64xf32> to vector<64x64xf32>
    %cst_95 = arith.constant dense<0.000000e+00> : vector<256x64xf32>
    %82 = tpu.matmul %79, %81, %cst_95 {dimension_numbers = #tpu.dot_dimension_numbers<[1], [0], [0], [1], [0, 0, 1, 1], [], []>} : vector<256x64xf32>, vector<64x64xf32>, vector<256x64xf32> -> vector<256x64xf32>
    %83 = arith.addf %76, %82 : vector<256x64xf32>
    %c2_96 = arith.constant 2 : index
    %c1_97 = arith.constant 1 : index
    %c0_98 = arith.constant 0 : index
    %c0_99 = arith.constant 0 : index
    %84 = vector.load %arg11[%c2_96, %c1_97, %c0_98, %c0_99] : memref<3x18x16x64xf32, #tpu.memory_space<vmem>>, vector<1x16x16x64xf32>
    %85 = vector.shape_cast %84 : vector<1x16x16x64xf32> to vector<16x16x64xf32>
    %86 = vector.shape_cast %85 : vector<16x16x64xf32> to vector<256x64xf32>
    %c1_100 = arith.constant 1 : index
    %c2_101 = arith.constant 2 : index
    %c0_102 = arith.constant 0 : index
    %c0_103 = arith.constant 0 : index
    %87 = vector.load %arg4[%c1_100, %c2_101, %c0_102, %c0_103] : memref<3x3x64x64xf32, #tpu.memory_space<vmem>>, vector<1x1x64x64xf32>
    %88 = vector.shape_cast %87 : vector<1x1x64x64xf32> to vector<64x64xf32>
    %cst_104 = arith.constant dense<0.000000e+00> : vector<256x64xf32>
    %89 = tpu.matmul %86, %88, %cst_104 {dimension_numbers = #tpu.dot_dimension_numbers<[1], [0], [0], [1], [0, 0, 1, 1], [], []>} : vector<256x64xf32>, vector<64x64xf32>, vector<256x64xf32> -> vector<256x64xf32>
    %90 = arith.addf %83, %89 : vector<256x64xf32>
    %c0_105 = arith.constant 0 : index
    %c2_106 = arith.constant 2 : index
    %c0_107 = arith.constant 0 : index
    %c0_108 = arith.constant 0 : index
    %91 = vector.load %arg11[%c0_105, %c2_106, %c0_107, %c0_108] : memref<3x18x16x64xf32, #tpu.memory_space<vmem>>, vector<1x16x16x64xf32>
    %92 = vector.shape_cast %91 : vector<1x16x16x64xf32> to vector<16x16x64xf32>
    %93 = vector.shape_cast %92 : vector<16x16x64xf32> to vector<256x64xf32>
    %c2_109 = arith.constant 2 : index
    %c0_110 = arith.constant 0 : index
    %c0_111 = arith.constant 0 : index
    %c0_112 = arith.constant 0 : index
    %94 = vector.load %arg4[%c2_109, %c0_110, %c0_111, %c0_112] : memref<3x3x64x64xf32, #tpu.memory_space<vmem>>, vector<1x1x64x64xf32>
    %95 = vector.shape_cast %94 : vector<1x1x64x64xf32> to vector<64x64xf32>
    %cst_113 = arith.constant dense<0.000000e+00> : vector<256x64xf32>
    %96 = tpu.matmul %93, %95, %cst_113 {dimension_numbers = #tpu.dot_dimension_numbers<[1], [0], [0], [1], [0, 0, 1, 1], [], []>} : vector<256x64xf32>, vector<64x64xf32>, vector<256x64xf32> -> vector<256x64xf32>
    %97 = arith.addf %90, %96 : vector<256x64xf32>
    %c1_114 = arith.constant 1 : index
    %c2_115 = arith.constant 2 : index
    %c0_116 = arith.constant 0 : index
    %c0_117 = arith.constant 0 : index
    %98 = vector.load %arg11[%c1_114, %c2_115, %c0_116, %c0_117] : memref<3x18x16x64xf32, #tpu.memory_space<vmem>>, vector<1x16x16x64xf32>
    %99 = vector.shape_cast %98 : vector<1x16x16x64xf32> to vector<16x16x64xf32>
    %100 = vector.shape_cast %99 : vector<16x16x64xf32> to vector<256x64xf32>
    %c2_118 = arith.constant 2 : index
    %c1_119 = arith.constant 1 : index
    %c0_120 = arith.constant 0 : index
    %c0_121 = arith.constant 0 : index
    %101 = vector.load %arg4[%c2_118, %c1_119, %c0_120, %c0_121] : memref<3x3x64x64xf32, #tpu.memory_space<vmem>>, vector<1x1x64x64xf32>
    %102 = vector.shape_cast %101 : vector<1x1x64x64xf32> to vector<64x64xf32>
    %cst_122 = arith.constant dense<0.000000e+00> : vector<256x64xf32>
    %103 = tpu.matmul %100, %102, %cst_122 {dimension_numbers = #tpu.dot_dimension_numbers<[1], [0], [0], [1], [0, 0, 1, 1], [], []>} : vector<256x64xf32>, vector<64x64xf32>, vector<256x64xf32> -> vector<256x64xf32>
    %104 = arith.addf %97, %103 : vector<256x64xf32>
    %c2_123 = arith.constant 2 : index
    %c2_124 = arith.constant 2 : index
    %c0_125 = arith.constant 0 : index
    %c0_126 = arith.constant 0 : index
    %105 = vector.load %arg11[%c2_123, %c2_124, %c0_125, %c0_126] : memref<3x18x16x64xf32, #tpu.memory_space<vmem>>, vector<1x16x16x64xf32>
    %106 = vector.shape_cast %105 : vector<1x16x16x64xf32> to vector<16x16x64xf32>
    %107 = vector.shape_cast %106 : vector<16x16x64xf32> to vector<256x64xf32>
    %c2_127 = arith.constant 2 : index
    %c2_128 = arith.constant 2 : index
    %c0_129 = arith.constant 0 : index
    %c0_130 = arith.constant 0 : index
    %108 = vector.load %arg4[%c2_127, %c2_128, %c0_129, %c0_130] : memref<3x3x64x64xf32, #tpu.memory_space<vmem>>, vector<1x1x64x64xf32>
    %109 = vector.shape_cast %108 : vector<1x1x64x64xf32> to vector<64x64xf32>
    %cst_131 = arith.constant dense<0.000000e+00> : vector<256x64xf32>
    %110 = tpu.matmul %107, %109, %cst_131 {dimension_numbers = #tpu.dot_dimension_numbers<[1], [0], [0], [1], [0, 0, 1, 1], [], []>} : vector<256x64xf32>, vector<64x64xf32>, vector<256x64xf32> -> vector<256x64xf32>
    %111 = arith.addf %104, %110 : vector<256x64xf32>
    %c0_132 = arith.constant 0 : index
    %c0_133 = arith.constant 0 : index
    %112 = vector.load %arg5[%c0_132, %c0_133] : memref<1x64xf32, #tpu.memory_space<vmem>>, vector<1x64xf32>
    %113 = vector.broadcast %112 : vector<1x64xf32> to vector<256x64xf32>
    %114 = arith.addf %111, %113 : vector<256x64xf32>
    %cst_134 = arith.constant 0.000000e+00 : f32
    %115 = vector.broadcast %cst_134 : f32 to vector<256x64xf32>
    %116 = arith.maximumf %114, %115 : vector<256x64xf32>
    %117 = vector.shape_cast %116 : vector<256x64xf32> to vector<16x16x64xf32>
    %c1_135 = arith.constant 1 : index
    %c1_136 = arith.constant 1 : index
    %c0_137 = arith.constant 0 : index
    %c0_138 = arith.constant 0 : index
    %118 = vector.load %arg11[%c1_135, %c1_136, %c0_137, %c0_138] : memref<3x18x16x64xf32, #tpu.memory_space<vmem>>, vector<1x16x16x64xf32>
    %119 = vector.shape_cast %118 : vector<1x16x16x64xf32> to vector<16x16x64xf32>
    %120 = vector.shape_cast %117 : vector<16x16x64xf32> to vector<1x16x16x64xf32>
    tpu.vector_store %arg11[%c1_135, %c1_136, %c0_137, %c0_138], %120 {strides = array<i32>} : memref<3x18x16x64xf32, #tpu.memory_space<vmem>>, vector<1x16x16x64xf32>,
    %121 = vector.extract_strided_slice %117 {offsets = [0, 0, 0], sizes = [16, 15, 64], strides = [1, 1, 1]} : vector<16x16x64xf32> to vector<16x15x64xf32>
    %c0_139 = arith.constant 0 : index
    %c1_140 = arith.constant 1 : index
    %c1_141 = arith.constant 1 : index
    %c0_142 = arith.constant 0 : index
    %122 = vector.load %arg11[%c0_139, %c1_140, %c1_141, %c0_142] : memref<3x18x16x64xf32, #tpu.memory_space<vmem>>, vector<1x16x15x64xf32>
    %123 = vector.shape_cast %122 : vector<1x16x15x64xf32> to vector<16x15x64xf32>
    %124 = vector.shape_cast %121 : vector<16x15x64xf32> to vector<1x16x15x64xf32>
    tpu.vector_store %arg11[%c0_139, %c1_140, %c1_141, %c0_142], %124 {strides = array<i32>} : memref<3x18x16x64xf32, #tpu.memory_space<vmem>>, vector<1x16x15x64xf32>,
    %125 = vector.extract_strided_slice %117 {offsets = [0, 1, 0], sizes = [16, 15, 64], strides = [1, 1, 1]} : vector<16x16x64xf32> to vector<16x15x64xf32>
    %c2_143 = arith.constant 2 : index
    %c1_144 = arith.constant 1 : index
    %c0_145 = arith.constant 0 : index
    %c0_146 = arith.constant 0 : index
    %126 = vector.load %arg11[%c2_143, %c1_144, %c0_145, %c0_146] : memref<3x18x16x64xf32, #tpu.memory_space<vmem>>, vector<1x16x15x64xf32>
    %127 = vector.shape_cast %126 : vector<1x16x15x64xf32> to vector<16x15x64xf32>
    %128 = vector.shape_cast %125 : vector<16x15x64xf32> to vector<1x16x15x64xf32>
    tpu.vector_store %arg11[%c2_143, %c1_144, %c0_145, %c0_146], %128 {strides = array<i32>} : memref<3x18x16x64xf32, #tpu.memory_space<vmem>>, vector<1x16x15x64xf32>,
    %cst_147 = arith.constant 0.000000e+00 : f32
    %129 = vector.broadcast %cst_147 : f32 to vector<256x64xf32>
    %c0_148 = arith.constant 0 : index
    %c0_149 = arith.constant 0 : index
    %c0_150 = arith.constant 0 : index
    %c0_151 = arith.constant 0 : index
    %130 = vector.load %arg11[%c0_148, %c0_149, %c0_150, %c0_151] : memref<3x18x16x64xf32, #tpu.memory_space<vmem>>, vector<1x16x16x64xf32>
    %131 = vector.shape_cast %130 : vector<1x16x16x64xf32> to vector<16x16x64xf32>
    %132 = vector.shape_cast %131 : vector<16x16x64xf32> to vector<256x64xf32>
    %c0_152 = arith.constant 0 : index
    %c0_153 = arith.constant 0 : index
    %c0_154 = arith.constant 0 : index
    %c0_155 = arith.constant 0 : index
    %133 = vector.load %arg6[%c0_152, %c0_153, %c0_154, %c0_155] : memref<3x3x64x64xf32, #tpu.memory_space<vmem>>, vector<1x1x64x64xf32>
    %134 = vector.shape_cast %133 : vector<1x1x64x64xf32> to vector<64x64xf32>
    %cst_156 = arith.constant dense<0.000000e+00> : vector<256x64xf32>
    %135 = tpu.matmul %132, %134, %cst_156 {dimension_numbers = #tpu.dot_dimension_numbers<[1], [0], [0], [1], [0, 0, 1, 1], [], []>} : vector<256x64xf32>, vector<64x64xf32>, vector<256x64xf32> -> vector<256x64xf32>
    %136 = arith.addf %129, %135 : vector<256x64xf32>
    %c1_157 = arith.constant 1 : index
    %c0_158 = arith.constant 0 : index
    %c0_159 = arith.constant 0 : index
    %c0_160 = arith.constant 0 : index
    %137 = vector.load %arg11[%c1_157, %c0_158, %c0_159, %c0_160] : memref<3x18x16x64xf32, #tpu.memory_space<vmem>>, vector<1x16x16x64xf32>
    %138 = vector.shape_cast %137 : vector<1x16x16x64xf32> to vector<16x16x64xf32>
    %139 = vector.shape_cast %138 : vector<16x16x64xf32> to vector<256x64xf32>
    %c0_161 = arith.constant 0 : index
    %c1_162 = arith.constant 1 : index
    %c0_163 = arith.constant 0 : index
    %c0_164 = arith.constant 0 : index
    %140 = vector.load %arg6[%c0_161, %c1_162, %c0_163, %c0_164] : memref<3x3x64x64xf32, #tpu.memory_space<vmem>>, vector<1x1x64x64xf32>
    %141 = vector.shape_cast %140 : vector<1x1x64x64xf32> to vector<64x64xf32>
    %cst_165 = arith.constant dense<0.000000e+00> : vector<256x64xf32>
    %142 = tpu.matmul %139, %141, %cst_165 {dimension_numbers = #tpu.dot_dimension_numbers<[1], [0], [0], [1], [0, 0, 1, 1], [], []>} : vector<256x64xf32>, vector<64x64xf32>, vector<256x64xf32> -> vector<256x64xf32>
    %143 = arith.addf %136, %142 : vector<256x64xf32>
    %c2_166 = arith.constant 2 : index
    %c0_167 = arith.constant 0 : index
    %c0_168 = arith.constant 0 : index
    %c0_169 = arith.constant 0 : index
    %144 = vector.load %arg11[%c2_166, %c0_167, %c0_168, %c0_169] : memref<3x18x16x64xf32, #tpu.memory_space<vmem>>, vector<1x16x16x64xf32>
    %145 = vector.shape_cast %144 : vector<1x16x16x64xf32> to vector<16x16x64xf32>
    %146 = vector.shape_cast %145 : vector<16x16x64xf32> to vector<256x64xf32>
    %c0_170 = arith.constant 0 : index
    %c2_171 = arith.constant 2 : index
    %c0_172 = arith.constant 0 : index
    %c0_173 = arith.constant 0 : index
    %147 = vector.load %arg6[%c0_170, %c2_171, %c0_172, %c0_173] : memref<3x3x64x64xf32, #tpu.memory_space<vmem>>, vector<1x1x64x64xf32>
    %148 = vector.shape_cast %147 : vector<1x1x64x64xf32> to vector<64x64xf32>
    %cst_174 = arith.constant dense<0.000000e+00> : vector<256x64xf32>
    %149 = tpu.matmul %146, %148, %cst_174 {dimension_numbers = #tpu.dot_dimension_numbers<[1], [0], [0], [1], [0, 0, 1, 1], [], []>} : vector<256x64xf32>, vector<64x64xf32>, vector<256x64xf32> -> vector<256x64xf32>
    %150 = arith.addf %143, %149 : vector<256x64xf32>
    %c0_175 = arith.constant 0 : index
    %c1_176 = arith.constant 1 : index
    %c0_177 = arith.constant 0 : index
    %c0_178 = arith.constant 0 : index
    %151 = vector.load %arg11[%c0_175, %c1_176, %c0_177, %c0_178] : memref<3x18x16x64xf32, #tpu.memory_space<vmem>>, vector<1x16x16x64xf32>
    %152 = vector.shape_cast %151 : vector<1x16x16x64xf32> to vector<16x16x64xf32>
    %153 = vector.shape_cast %152 : vector<16x16x64xf32> to vector<256x64xf32>
    %c1_179 = arith.constant 1 : index
    %c0_180 = arith.constant 0 : index
    %c0_181 = arith.constant 0 : index
    %c0_182 = arith.constant 0 : index
    %154 = vector.load %arg6[%c1_179, %c0_180, %c0_181, %c0_182] : memref<3x3x64x64xf32, #tpu.memory_space<vmem>>, vector<1x1x64x64xf32>
    %155 = vector.shape_cast %154 : vector<1x1x64x64xf32> to vector<64x64xf32>
    %cst_183 = arith.constant dense<0.000000e+00> : vector<256x64xf32>
    %156 = tpu.matmul %153, %155, %cst_183 {dimension_numbers = #tpu.dot_dimension_numbers<[1], [0], [0], [1], [0, 0, 1, 1], [], []>} : vector<256x64xf32>, vector<64x64xf32>, vector<256x64xf32> -> vector<256x64xf32>
    %157 = arith.addf %150, %156 : vector<256x64xf32>
    %c1_184 = arith.constant 1 : index
    %c1_185 = arith.constant 1 : index
    %c0_186 = arith.constant 0 : index
    %c0_187 = arith.constant 0 : index
    %158 = vector.load %arg11[%c1_184, %c1_185, %c0_186, %c0_187] : memref<3x18x16x64xf32, #tpu.memory_space<vmem>>, vector<1x16x16x64xf32>
    %159 = vector.shape_cast %158 : vector<1x16x16x64xf32> to vector<16x16x64xf32>
    %160 = vector.shape_cast %159 : vector<16x16x64xf32> to vector<256x64xf32>
    %c1_188 = arith.constant 1 : index
    %c1_189 = arith.constant 1 : index
    %c0_190 = arith.constant 0 : index
    %c0_191 = arith.constant 0 : index
    %161 = vector.load %arg6[%c1_188, %c1_189, %c0_190, %c0_191] : memref<3x3x64x64xf32, #tpu.memory_space<vmem>>, vector<1x1x64x64xf32>
    %162 = vector.shape_cast %161 : vector<1x1x64x64xf32> to vector<64x64xf32>
    %cst_192 = arith.constant dense<0.000000e+00> : vector<256x64xf32>
    %163 = tpu.matmul %160, %162, %cst_192 {dimension_numbers = #tpu.dot_dimension_numbers<[1], [0], [0], [1], [0, 0, 1, 1], [], []>} : vector<256x64xf32>, vector<64x64xf32>, vector<256x64xf32> -> vector<256x64xf32>
    %164 = arith.addf %157, %163 : vector<256x64xf32>
    %c2_193 = arith.constant 2 : index
    %c1_194 = arith.constant 1 : index
    %c0_195 = arith.constant 0 : index
    %c0_196 = arith.constant 0 : index
    %165 = vector.load %arg11[%c2_193, %c1_194, %c0_195, %c0_196] : memref<3x18x16x64xf32, #tpu.memory_space<vmem>>, vector<1x16x16x64xf32>
    %166 = vector.shape_cast %165 : vector<1x16x16x64xf32> to vector<16x16x64xf32>
    %167 = vector.shape_cast %166 : vector<16x16x64xf32> to vector<256x64xf32>
    %c1_197 = arith.constant 1 : index
    %c2_198 = arith.constant 2 : index
    %c0_199 = arith.constant 0 : index
    %c0_200 = arith.constant 0 : index
    %168 = vector.load %arg6[%c1_197, %c2_198, %c0_199, %c0_200] : memref<3x3x64x64xf32, #tpu.memory_space<vmem>>, vector<1x1x64x64xf32>
    %169 = vector.shape_cast %168 : vector<1x1x64x64xf32> to vector<64x64xf32>
    %cst_201 = arith.constant dense<0.000000e+00> : vector<256x64xf32>
    %170 = tpu.matmul %167, %169, %cst_201 {dimension_numbers = #tpu.dot_dimension_numbers<[1], [0], [0], [1], [0, 0, 1, 1], [], []>} : vector<256x64xf32>, vector<64x64xf32>, vector<256x64xf32> -> vector<256x64xf32>
    %171 = arith.addf %164, %170 : vector<256x64xf32>
    %c0_202 = arith.constant 0 : index
    %c2_203 = arith.constant 2 : index
    %c0_204 = arith.constant 0 : index
    %c0_205 = arith.constant 0 : index
    %172 = vector.load %arg11[%c0_202, %c2_203, %c0_204, %c0_205] : memref<3x18x16x64xf32, #tpu.memory_space<vmem>>, vector<1x16x16x64xf32>
    %173 = vector.shape_cast %172 : vector<1x16x16x64xf32> to vector<16x16x64xf32>
    %174 = vector.shape_cast %173 : vector<16x16x64xf32> to vector<256x64xf32>
    %c2_206 = arith.constant 2 : index
    %c0_207 = arith.constant 0 : index
    %c0_208 = arith.constant 0 : index
    %c0_209 = arith.constant 0 : index
    %175 = vector.load %arg6[%c2_206, %c0_207, %c0_208, %c0_209] : memref<3x3x64x64xf32, #tpu.memory_space<vmem>>, vector<1x1x64x64xf32>
    %176 = vector.shape_cast %175 : vector<1x1x64x64xf32> to vector<64x64xf32>
    %cst_210 = arith.constant dense<0.000000e+00> : vector<256x64xf32>
    %177 = tpu.matmul %174, %176, %cst_210 {dimension_numbers = #tpu.dot_dimension_numbers<[1], [0], [0], [1], [0, 0, 1, 1], [], []>} : vector<256x64xf32>, vector<64x64xf32>, vector<256x64xf32> -> vector<256x64xf32>
    %178 = arith.addf %171, %177 : vector<256x64xf32>
    %c1_211 = arith.constant 1 : index
    %c2_212 = arith.constant 2 : index
    %c0_213 = arith.constant 0 : index
    %c0_214 = arith.constant 0 : index
    %179 = vector.load %arg11[%c1_211, %c2_212, %c0_213, %c0_214] : memref<3x18x16x64xf32, #tpu.memory_space<vmem>>, vector<1x16x16x64xf32>
    %180 = vector.shape_cast %179 : vector<1x16x16x64xf32> to vector<16x16x64xf32>
    %181 = vector.shape_cast %180 : vector<16x16x64xf32> to vector<256x64xf32>
    %c2_215 = arith.constant 2 : index
    %c1_216 = arith.constant 1 : index
    %c0_217 = arith.constant 0 : index
    %c0_218 = arith.constant 0 : index
    %182 = vector.load %arg6[%c2_215, %c1_216, %c0_217, %c0_218] : memref<3x3x64x64xf32, #tpu.memory_space<vmem>>, vector<1x1x64x64xf32>
    %183 = vector.shape_cast %182 : vector<1x1x64x64xf32> to vector<64x64xf32>
    %cst_219 = arith.constant dense<0.000000e+00> : vector<256x64xf32>
    %184 = tpu.matmul %181, %183, %cst_219 {dimension_numbers = #tpu.dot_dimension_numbers<[1], [0], [0], [1], [0, 0, 1, 1], [], []>} : vector<256x64xf32>, vector<64x64xf32>, vector<256x64xf32> -> vector<256x64xf32>
    %185 = arith.addf %178, %184 : vector<256x64xf32>
    %c2_220 = arith.constant 2 : index
    %c2_221 = arith.constant 2 : index
    %c0_222 = arith.constant 0 : index
    %c0_223 = arith.constant 0 : index
    %186 = vector.load %arg11[%c2_220, %c2_221, %c0_222, %c0_223] : memref<3x18x16x64xf32, #tpu.memory_space<vmem>>, vector<1x16x16x64xf32>
    %187 = vector.shape_cast %186 : vector<1x16x16x64xf32> to vector<16x16x64xf32>
    %188 = vector.shape_cast %187 : vector<16x16x64xf32> to vector<256x64xf32>
    %c2_224 = arith.constant 2 : index
    %c2_225 = arith.constant 2 : index
    %c0_226 = arith.constant 0 : index
    %c0_227 = arith.constant 0 : index
    %189 = vector.load %arg6[%c2_224, %c2_225, %c0_226, %c0_227] : memref<3x3x64x64xf32, #tpu.memory_space<vmem>>, vector<1x1x64x64xf32>
    %190 = vector.shape_cast %189 : vector<1x1x64x64xf32> to vector<64x64xf32>
    %cst_228 = arith.constant dense<0.000000e+00> : vector<256x64xf32>
    %191 = tpu.matmul %188, %190, %cst_228 {dimension_numbers = #tpu.dot_dimension_numbers<[1], [0], [0], [1], [0, 0, 1, 1], [], []>} : vector<256x64xf32>, vector<64x64xf32>, vector<256x64xf32> -> vector<256x64xf32>
    %192 = arith.addf %185, %191 : vector<256x64xf32>
    %c0_229 = arith.constant 0 : index
    %c0_230 = arith.constant 0 : index
    %193 = vector.load %arg7[%c0_229, %c0_230] : memref<1x64xf32, #tpu.memory_space<vmem>>, vector<1x64xf32>
    %194 = vector.broadcast %193 : vector<1x64xf32> to vector<256x64xf32>
    %195 = arith.addf %192, %194 : vector<256x64xf32>
    %cst_231 = arith.constant 0.000000e+00 : f32
    %196 = vector.broadcast %cst_231 : f32 to vector<256x64xf32>
    %197 = arith.maximumf %195, %196 : vector<256x64xf32>
    %198 = vector.shape_cast %197 : vector<256x64xf32> to vector<16x16x64xf32>
    %c1_232 = arith.constant 1 : index
    %c1_233 = arith.constant 1 : index
    %c0_234 = arith.constant 0 : index
    %c0_235 = arith.constant 0 : index
    %199 = vector.load %arg11[%c1_232, %c1_233, %c0_234, %c0_235] : memref<3x18x16x64xf32, #tpu.memory_space<vmem>>, vector<1x16x16x64xf32>
    %200 = vector.shape_cast %199 : vector<1x16x16x64xf32> to vector<16x16x64xf32>
    %201 = vector.shape_cast %198 : vector<16x16x64xf32> to vector<1x16x16x64xf32>
    tpu.vector_store %arg11[%c1_232, %c1_233, %c0_234, %c0_235], %201 {strides = array<i32>} : memref<3x18x16x64xf32, #tpu.memory_space<vmem>>, vector<1x16x16x64xf32>,
    %202 = vector.extract_strided_slice %198 {offsets = [0, 0, 0], sizes = [16, 15, 64], strides = [1, 1, 1]} : vector<16x16x64xf32> to vector<16x15x64xf32>
    %c0_236 = arith.constant 0 : index
    %c1_237 = arith.constant 1 : index
    %c1_238 = arith.constant 1 : index
    %c0_239 = arith.constant 0 : index
    %203 = vector.load %arg11[%c0_236, %c1_237, %c1_238, %c0_239] : memref<3x18x16x64xf32, #tpu.memory_space<vmem>>, vector<1x16x15x64xf32>
    %204 = vector.shape_cast %203 : vector<1x16x15x64xf32> to vector<16x15x64xf32>
    %205 = vector.shape_cast %202 : vector<16x15x64xf32> to vector<1x16x15x64xf32>
    tpu.vector_store %arg11[%c0_236, %c1_237, %c1_238, %c0_239], %205 {strides = array<i32>} : memref<3x18x16x64xf32, #tpu.memory_space<vmem>>, vector<1x16x15x64xf32>,
    %206 = vector.extract_strided_slice %198 {offsets = [0, 1, 0], sizes = [16, 15, 64], strides = [1, 1, 1]} : vector<16x16x64xf32> to vector<16x15x64xf32>
    %c2_240 = arith.constant 2 : index
    %c1_241 = arith.constant 1 : index
    %c0_242 = arith.constant 0 : index
    %c0_243 = arith.constant 0 : index
    %207 = vector.load %arg11[%c2_240, %c1_241, %c0_242, %c0_243] : memref<3x18x16x64xf32, #tpu.memory_space<vmem>>, vector<1x16x15x64xf32>
    %208 = vector.shape_cast %207 : vector<1x16x15x64xf32> to vector<16x15x64xf32>
    %209 = vector.shape_cast %206 : vector<16x15x64xf32> to vector<1x16x15x64xf32>
    tpu.vector_store %arg11[%c2_240, %c1_241, %c0_242, %c0_243], %209 {strides = array<i32>} : memref<3x18x16x64xf32, #tpu.memory_space<vmem>>, vector<1x16x15x64xf32>,
    %cst_244 = arith.constant 0.000000e+00 : f32
    %210 = vector.broadcast %cst_244 : f32 to vector<256x8xf32>
    %c0_245 = arith.constant 0 : index
    %c0_246 = arith.constant 0 : index
    %c0_247 = arith.constant 0 : index
    %c0_248 = arith.constant 0 : index
    %211 = vector.load %arg11[%c0_245, %c0_246, %c0_247, %c0_248] : memref<3x18x16x64xf32, #tpu.memory_space<vmem>>, vector<1x16x16x64xf32>
    %212 = vector.shape_cast %211 : vector<1x16x16x64xf32> to vector<16x16x64xf32>
    %213 = vector.shape_cast %212 : vector<16x16x64xf32> to vector<256x64xf32>
    %c0_249 = arith.constant 0 : index
    %c0_250 = arith.constant 0 : index
    %c0_251 = arith.constant 0 : index
    %c0_252 = arith.constant 0 : index
    %214 = vector.load %arg8[%c0_249, %c0_250, %c0_251, %c0_252] : memref<3x3x64x8xf32, #tpu.memory_space<vmem>>, vector<1x1x64x8xf32>
    %215 = vector.shape_cast %214 : vector<1x1x64x8xf32> to vector<64x8xf32>
    %cst_253 = arith.constant dense<0.000000e+00> : vector<256x8xf32>
    %216 = tpu.matmul %213, %215, %cst_253 {dimension_numbers = #tpu.dot_dimension_numbers<[1], [0], [0], [1], [0, 0, 1, 1], [], []>} : vector<256x64xf32>, vector<64x8xf32>, vector<256x8xf32> -> vector<256x8xf32>
    %217 = arith.addf %210, %216 : vector<256x8xf32>
    %c1_254 = arith.constant 1 : index
    %c0_255 = arith.constant 0 : index
    %c0_256 = arith.constant 0 : index
    %c0_257 = arith.constant 0 : index
    %218 = vector.load %arg11[%c1_254, %c0_255, %c0_256, %c0_257] : memref<3x18x16x64xf32, #tpu.memory_space<vmem>>, vector<1x16x16x64xf32>
    %219 = vector.shape_cast %218 : vector<1x16x16x64xf32> to vector<16x16x64xf32>
    %220 = vector.shape_cast %219 : vector<16x16x64xf32> to vector<256x64xf32>
    %c0_258 = arith.constant 0 : index
    %c1_259 = arith.constant 1 : index
    %c0_260 = arith.constant 0 : index
    %c0_261 = arith.constant 0 : index
    %221 = vector.load %arg8[%c0_258, %c1_259, %c0_260, %c0_261] : memref<3x3x64x8xf32, #tpu.memory_space<vmem>>, vector<1x1x64x8xf32>
    %222 = vector.shape_cast %221 : vector<1x1x64x8xf32> to vector<64x8xf32>
    %cst_262 = arith.constant dense<0.000000e+00> : vector<256x8xf32>
    %223 = tpu.matmul %220, %222, %cst_262 {dimension_numbers = #tpu.dot_dimension_numbers<[1], [0], [0], [1], [0, 0, 1, 1], [], []>} : vector<256x64xf32>, vector<64x8xf32>, vector<256x8xf32> -> vector<256x8xf32>
    %224 = arith.addf %217, %223 : vector<256x8xf32>
    %c2_263 = arith.constant 2 : index
    %c0_264 = arith.constant 0 : index
    %c0_265 = arith.constant 0 : index
    %c0_266 = arith.constant 0 : index
    %225 = vector.load %arg11[%c2_263, %c0_264, %c0_265, %c0_266] : memref<3x18x16x64xf32, #tpu.memory_space<vmem>>, vector<1x16x16x64xf32>
    %226 = vector.shape_cast %225 : vector<1x16x16x64xf32> to vector<16x16x64xf32>
    %227 = vector.shape_cast %226 : vector<16x16x64xf32> to vector<256x64xf32>
    %c0_267 = arith.constant 0 : index
    %c2_268 = arith.constant 2 : index
    %c0_269 = arith.constant 0 : index
    %c0_270 = arith.constant 0 : index
    %228 = vector.load %arg8[%c0_267, %c2_268, %c0_269, %c0_270] : memref<3x3x64x8xf32, #tpu.memory_space<vmem>>, vector<1x1x64x8xf32>
    %229 = vector.shape_cast %228 : vector<1x1x64x8xf32> to vector<64x8xf32>
    %cst_271 = arith.constant dense<0.000000e+00> : vector<256x8xf32>
    %230 = tpu.matmul %227, %229, %cst_271 {dimension_numbers = #tpu.dot_dimension_numbers<[1], [0], [0], [1], [0, 0, 1, 1], [], []>} : vector<256x64xf32>, vector<64x8xf32>, vector<256x8xf32> -> vector<256x8xf32>
    %231 = arith.addf %224, %230 : vector<256x8xf32>
    %c0_272 = arith.constant 0 : index
    %c1_273 = arith.constant 1 : index
    %c0_274 = arith.constant 0 : index
    %c0_275 = arith.constant 0 : index
    %232 = vector.load %arg11[%c0_272, %c1_273, %c0_274, %c0_275] : memref<3x18x16x64xf32, #tpu.memory_space<vmem>>, vector<1x16x16x64xf32>
    %233 = vector.shape_cast %232 : vector<1x16x16x64xf32> to vector<16x16x64xf32>
    %234 = vector.shape_cast %233 : vector<16x16x64xf32> to vector<256x64xf32>
    %c1_276 = arith.constant 1 : index
    %c0_277 = arith.constant 0 : index
    %c0_278 = arith.constant 0 : index
    %c0_279 = arith.constant 0 : index
    %235 = vector.load %arg8[%c1_276, %c0_277, %c0_278, %c0_279] : memref<3x3x64x8xf32, #tpu.memory_space<vmem>>, vector<1x1x64x8xf32>
    %236 = vector.shape_cast %235 : vector<1x1x64x8xf32> to vector<64x8xf32>
    %cst_280 = arith.constant dense<0.000000e+00> : vector<256x8xf32>
    %237 = tpu.matmul %234, %236, %cst_280 {dimension_numbers = #tpu.dot_dimension_numbers<[1], [0], [0], [1], [0, 0, 1, 1], [], []>} : vector<256x64xf32>, vector<64x8xf32>, vector<256x8xf32> -> vector<256x8xf32>
    %238 = arith.addf %231, %237 : vector<256x8xf32>
    %c1_281 = arith.constant 1 : index
    %c1_282 = arith.constant 1 : index
    %c0_283 = arith.constant 0 : index
    %c0_284 = arith.constant 0 : index
    %239 = vector.load %arg11[%c1_281, %c1_282, %c0_283, %c0_284] : memref<3x18x16x64xf32, #tpu.memory_space<vmem>>, vector<1x16x16x64xf32>
    %240 = vector.shape_cast %239 : vector<1x16x16x64xf32> to vector<16x16x64xf32>
    %241 = vector.shape_cast %240 : vector<16x16x64xf32> to vector<256x64xf32>
    %c1_285 = arith.constant 1 : index
    %c1_286 = arith.constant 1 : index
    %c0_287 = arith.constant 0 : index
    %c0_288 = arith.constant 0 : index
    %242 = vector.load %arg8[%c1_285, %c1_286, %c0_287, %c0_288] : memref<3x3x64x8xf32, #tpu.memory_space<vmem>>, vector<1x1x64x8xf32>
    %243 = vector.shape_cast %242 : vector<1x1x64x8xf32> to vector<64x8xf32>
    %cst_289 = arith.constant dense<0.000000e+00> : vector<256x8xf32>
    %244 = tpu.matmul %241, %243, %cst_289 {dimension_numbers = #tpu.dot_dimension_numbers<[1], [0], [0], [1], [0, 0, 1, 1], [], []>} : vector<256x64xf32>, vector<64x8xf32>, vector<256x8xf32> -> vector<256x8xf32>
    %245 = arith.addf %238, %244 : vector<256x8xf32>
    %c2_290 = arith.constant 2 : index
    %c1_291 = arith.constant 1 : index
    %c0_292 = arith.constant 0 : index
    %c0_293 = arith.constant 0 : index
    %246 = vector.load %arg11[%c2_290, %c1_291, %c0_292, %c0_293] : memref<3x18x16x64xf32, #tpu.memory_space<vmem>>, vector<1x16x16x64xf32>
    %247 = vector.shape_cast %246 : vector<1x16x16x64xf32> to vector<16x16x64xf32>
    %248 = vector.shape_cast %247 : vector<16x16x64xf32> to vector<256x64xf32>
    %c1_294 = arith.constant 1 : index
    %c2_295 = arith.constant 2 : index
    %c0_296 = arith.constant 0 : index
    %c0_297 = arith.constant 0 : index
    %249 = vector.load %arg8[%c1_294, %c2_295, %c0_296, %c0_297] : memref<3x3x64x8xf32, #tpu.memory_space<vmem>>, vector<1x1x64x8xf32>
    %250 = vector.shape_cast %249 : vector<1x1x64x8xf32> to vector<64x8xf32>
    %cst_298 = arith.constant dense<0.000000e+00> : vector<256x8xf32>
    %251 = tpu.matmul %248, %250, %cst_298 {dimension_numbers = #tpu.dot_dimension_numbers<[1], [0], [0], [1], [0, 0, 1, 1], [], []>} : vector<256x64xf32>, vector<64x8xf32>, vector<256x8xf32> -> vector<256x8xf32>
    %252 = arith.addf %245, %251 : vector<256x8xf32>
    %c0_299 = arith.constant 0 : index
    %c2_300 = arith.constant 2 : index
    %c0_301 = arith.constant 0 : index
    %c0_302 = arith.constant 0 : index
    %253 = vector.load %arg11[%c0_299, %c2_300, %c0_301, %c0_302] : memref<3x18x16x64xf32, #tpu.memory_space<vmem>>, vector<1x16x16x64xf32>
    %254 = vector.shape_cast %253 : vector<1x16x16x64xf32> to vector<16x16x64xf32>
    %255 = vector.shape_cast %254 : vector<16x16x64xf32> to vector<256x64xf32>
    %c2_303 = arith.constant 2 : index
    %c0_304 = arith.constant 0 : index
    %c0_305 = arith.constant 0 : index
    %c0_306 = arith.constant 0 : index
    %256 = vector.load %arg8[%c2_303, %c0_304, %c0_305, %c0_306] : memref<3x3x64x8xf32, #tpu.memory_space<vmem>>, vector<1x1x64x8xf32>
    %257 = vector.shape_cast %256 : vector<1x1x64x8xf32> to vector<64x8xf32>
    %cst_307 = arith.constant dense<0.000000e+00> : vector<256x8xf32>
    %258 = tpu.matmul %255, %257, %cst_307 {dimension_numbers = #tpu.dot_dimension_numbers<[1], [0], [0], [1], [0, 0, 1, 1], [], []>} : vector<256x64xf32>, vector<64x8xf32>, vector<256x8xf32> -> vector<256x8xf32>
    %259 = arith.addf %252, %258 : vector<256x8xf32>
    %c1_308 = arith.constant 1 : index
    %c2_309 = arith.constant 2 : index
    %c0_310 = arith.constant 0 : index
    %c0_311 = arith.constant 0 : index
    %260 = vector.load %arg11[%c1_308, %c2_309, %c0_310, %c0_311] : memref<3x18x16x64xf32, #tpu.memory_space<vmem>>, vector<1x16x16x64xf32>
    %261 = vector.shape_cast %260 : vector<1x16x16x64xf32> to vector<16x16x64xf32>
    %262 = vector.shape_cast %261 : vector<16x16x64xf32> to vector<256x64xf32>
    %c2_312 = arith.constant 2 : index
    %c1_313 = arith.constant 1 : index
    %c0_314 = arith.constant 0 : index
    %c0_315 = arith.constant 0 : index
    %263 = vector.load %arg8[%c2_312, %c1_313, %c0_314, %c0_315] : memref<3x3x64x8xf32, #tpu.memory_space<vmem>>, vector<1x1x64x8xf32>
    %264 = vector.shape_cast %263 : vector<1x1x64x8xf32> to vector<64x8xf32>
    %cst_316 = arith.constant dense<0.000000e+00> : vector<256x8xf32>
    %265 = tpu.matmul %262, %264, %cst_316 {dimension_numbers = #tpu.dot_dimension_numbers<[1], [0], [0], [1], [0, 0, 1, 1], [], []>} : vector<256x64xf32>, vector<64x8xf32>, vector<256x8xf32> -> vector<256x8xf32>
    %266 = arith.addf %259, %265 : vector<256x8xf32>
    %c2_317 = arith.constant 2 : index
    %c2_318 = arith.constant 2 : index
    %c0_319 = arith.constant 0 : index
    %c0_320 = arith.constant 0 : index
    %267 = vector.load %arg11[%c2_317, %c2_318, %c0_319, %c0_320] : memref<3x18x16x64xf32, #tpu.memory_space<vmem>>, vector<1x16x16x64xf32>
    %268 = vector.shape_cast %267 : vector<1x16x16x64xf32> to vector<16x16x64xf32>
    %269 = vector.shape_cast %268 : vector<16x16x64xf32> to vector<256x64xf32>
    %c2_321 = arith.constant 2 : index
    %c2_322 = arith.constant 2 : index
    %c0_323 = arith.constant 0 : index
    %c0_324 = arith.constant 0 : index
    %270 = vector.load %arg8[%c2_321, %c2_322, %c0_323, %c0_324] : memref<3x3x64x8xf32, #tpu.memory_space<vmem>>, vector<1x1x64x8xf32>
    %271 = vector.shape_cast %270 : vector<1x1x64x8xf32> to vector<64x8xf32>
    %cst_325 = arith.constant dense<0.000000e+00> : vector<256x8xf32>
    %272 = tpu.matmul %269, %271, %cst_325 {dimension_numbers = #tpu.dot_dimension_numbers<[1], [0], [0], [1], [0, 0, 1, 1], [], []>} : vector<256x64xf32>, vector<64x8xf32>, vector<256x8xf32> -> vector<256x8xf32>
    %273 = arith.addf %266, %272 : vector<256x8xf32>
    %c0_326 = arith.constant 0 : index
    %c0_327 = arith.constant 0 : index
    %274 = vector.load %arg9[%c0_326, %c0_327] : memref<1x8xf32, #tpu.memory_space<vmem>>, vector<1x8xf32>
    %275 = vector.broadcast %274 : vector<1x8xf32> to vector<256x8xf32>
    %276 = arith.addf %273, %275 : vector<256x8xf32>
    %277 = vector.shape_cast %276 : vector<256x8xf32> to vector<16x16x8xf32>
    %c0_328 = arith.constant 0 : index
    %c0_329 = arith.constant 0 : index
    %c0_330 = arith.constant 0 : index
    %c0_331 = arith.constant 0 : index
    %278 = vector.load %arg10[%c0_328, %c0_329, %c0_330, %c0_331] : memref<1x16x16x8xf32, #tpu.memory_space<vmem>>, vector<1x16x16x8xf32>
    %279 = vector.shape_cast %278 : vector<1x16x16x8xf32> to vector<16x16x8xf32>
    %280 = vector.shape_cast %277 : vector<16x16x8xf32> to vector<1x16x16x8xf32>
    tpu.vector_store %arg10[%c0_328, %c0_329, %c0_330, %c0_331], %280 {strides = array<i32>} : memref<1x16x16x8xf32, #tpu.memory_space<vmem>>, vector<1x16x16x8xf32>,
    return
  }
  func.func @transform_0(%arg0: i32) -> (i32, i32, i32, i32) {
    %c0_i32 = arith.constant 0 : i32
    %c0_i32_0 = arith.constant 0 : i32
    %c0_i32_1 = arith.constant 0 : i32
    %c0_i32_2 = arith.constant 0 : i32
    return %arg0, %c0_i32, %c0_i32_0, %c0_i32_1 : i32, i32, i32, i32
  }
  func.func @transform_1(%arg0: i32) -> (i32, i32) {
    %c0_i32 = arith.constant 0 : i32
    %c0_i32_0 = arith.constant 0 : i32
    %c0_i32_1 = arith.constant 0 : i32
    return %c0_i32, %c0_i32_0 : i32, i32
  }
  func.func @transform_2(%arg0: i32) -> (i32, i32) {
    %c0_i32 = arith.constant 0 : i32
    %c0_i32_0 = arith.constant 0 : i32
    %c0_i32_1 = arith.constant 0 : i32
    return %c0_i32, %c0_i32_0 : i32, i32
  }
  func.func @transform_3(%arg0: i32) -> (i32, i32, i32, i32) {
    %c0_i32 = arith.constant 0 : i32
    %c0_i32_0 = arith.constant 0 : i32
    %c0_i32_1 = arith.constant 0 : i32
    %c0_i32_2 = arith.constant 0 : i32
    %c0_i32_3 = arith.constant 0 : i32
    return %c0_i32, %c0_i32_0, %c0_i32_1, %c0_i32_2 : i32, i32, i32, i32
  }
  func.func @transform_4(%arg0: i32) -> (i32, i32) {
    %c0_i32 = arith.constant 0 : i32
    %c0_i32_0 = arith.constant 0 : i32
    %c0_i32_1 = arith.constant 0 : i32
    return %c0_i32, %c0_i32_0 : i32, i32
  }
  func.func @transform_5(%arg0: i32) -> (i32, i32, i32, i32) {
    %c0_i32 = arith.constant 0 : i32
    %c0_i32_0 = arith.constant 0 : i32
    %c0_i32_1 = arith.constant 0 : i32
    %c0_i32_2 = arith.constant 0 : i32
    %c0_i32_3 = arith.constant 0 : i32
    return %c0_i32, %c0_i32_0, %c0_i32_1, %c0_i32_2 : i32, i32, i32, i32
  }
  func.func @transform_6(%arg0: i32) -> (i32, i32) {
    %c0_i32 = arith.constant 0 : i32
    %c0_i32_0 = arith.constant 0 : i32
    %c0_i32_1 = arith.constant 0 : i32
    return %c0_i32, %c0_i32_0 : i32, i32
  }
  func.func @transform_7(%arg0: i32) -> (i32, i32, i32, i32) {
    %c0_i32 = arith.constant 0 : i32
    %c0_i32_0 = arith.constant 0 : i32
    %c0_i32_1 = arith.constant 0 : i32
    %c0_i32_2 = arith.constant 0 : i32
    %c0_i32_3 = arith.constant 0 : i32
    return %c0_i32, %c0_i32_0, %c0_i32_1, %c0_i32_2 : i32, i32, i32, i32
  }
  func.func @transform_8(%arg0: i32) -> (i32, i32) {
    %c0_i32 = arith.constant 0 : i32
    %c0_i32_0 = arith.constant 0 : i32
    %c0_i32_1 = arith.constant 0 : i32
    return %c0_i32, %c0_i32_0 : i32, i32
  }
  func.func @transform_9(%arg0: i32) -> (i32, i32, i32, i32) {
    %c0_i32 = arith.constant 0 : i32
    %c0_i32_0 = arith.constant 0 : i32
    %c0_i32_1 = arith.constant 0 : i32
    %c0_i32_2 = arith.constant 0 : i32
    return %arg0, %c0_i32, %c0_i32_0, %c0_i32_1 : i32, i32, i32, i32
  }
}

</mosaic_0001>

<bundles_post_ra>
// kernel: tpu_custom_call.1
= control target key start
LH: loop header
LB: loop body
LE: loop exit
PB: predicated region body
PF: predicated region fallthrough
CT: control target
= control target key end

     0   :  { %s17063_s30 = smov 0   ;;  %s20548_s0 = inlined_call_operand.vmem [shape: f32[2,16,16,4], index: 0, kind: input, shape index: {}]   ;;  %s20549_s1 = inlined_call_operand.vmem [shape: f32[4,64], index: 1, kind: input, shape index: {}]   ;;  %s20550_s2 = inlined_call_operand.vmem [shape: f32[1,64], index: 2, kind: input, shape index: {}]   ;;  %s20551_s3 = inlined_call_operand.vmem [shape: f32[3,3,64,64], index: 3, kind: input, shape index: {}]   ;;  %s20552_s4 = inlined_call_operand.vmem [shape: f32[1,64], index: 4, kind: input, shape index: {}]   ;;  %s20553_s5 = inlined_call_operand.vmem [shape: f32[3,3,64,64], index: 5, kind: input, shape index: {}]   ;;  %s20554_s6 = inlined_call_operand.vmem [shape: f32[1,64], index: 6, kind: input, shape index: {}]   ;;  %s20555_s7 = inlined_call_operand.vmem [shape: f32[3,3,64,8], index: 7, kind: input, shape index: {}]   ;;  %s20556_s8 = inlined_call_operand.vmem [shape: f32[1,8], index: 8, kind: input, shape index: {}]   ;;  %s20557_s9 = inlined_call_operand.vmem [shape: f32[2,16,16,8], index: 9, kind: output, shape index: {}]  }
   0x1 LB: > { %s11790_s10 = sadd.s32 4294967295, %s17010_s30   ;;  %p11794_p0 = scmp.ge.s32.totalorder %s17010_s30, 1  ;;  %s17010_s30 = sphi %s17063_s30, %s19_s30  }
   0x2   : > { %p287_p1 = scmp.lt.s32.totalorder %s17010_s30, 3 }
   0x4   : > { %p288_p2 = pnand %p11794_p0, %p287_p1 }
   0x6   : > { %291 = sbr.rel (%p288_p2) target bundleno = 2251 (0x8cb), region = 56 }
   0xd   : > { %v418_v0 = vld [vmem:[%s20549_s1] sm:$0xf]  ;;  %vm523_vm0 = vcmask 1043456   ;;  %p323_p3 = scmp.lt.s32.totalorder %s11790_s10, 1  ;;  %v11834_v2 = vld [vmem:[%s20551_s3 + $0x48] sm:$0xff]  ;;  %v11835_v7 = vld [vmem:[%s20551_s3 + $0x50] sm:$0xff] }
   0xe   : > { %v11833_v1 = vld [vmem:[%s20551_s3 + $0x40] sm:$0xff]  ;;  %14009 = vmatprep.subr.msk.mxu0 %vm523_vm0, %v418_v0  ;;  %v11986_v4 = vld [vmem:[%s20551_s3 + $0x108] sm:$0xff]  ;;  %v11836_v8 = vld [vmem:[%s20551_s3 + $0x58] sm:$0xff]  ;;  %vm426_vm1 = vcmask 31744   ;;  %vm333_vm2 = vcmask 523264   ;;  %v17012_v48 = vmov 0.0  }
   0xf   : > { %v11985_v3 = vld [vmem:[%s20551_s3 + $0x100] sm:$0xff]  ;;  %14010 = vmatpush3.msk.msra.mxu0 %vm523_vm0, %v418_v0  ;;  %s20865_s10 = smov (!%p323_p3, %s11790_s10), 1  ;;  %v15787_v5 = vpack.c.bf16 %v11834_v2, %v11833_v1  ;;  %v15791_v12 = vpack.c.bf16 %v11836_v8, %v11835_v7  ;;  %v11987_v42 = vld [vmem:[%s20551_s3 + $0x110] sm:$0xff]  ;;  %v11988_v43 = vld [vmem:[%s20551_s3 + $0x118] sm:$0xff]  ;;  %340 = vst.msk [vmem:[#allocation2 + $0x120] sm:$0xff] %vm333_vm2, %v17012_v48  ;;  %vm352_vm3 = vcmask 516096  }
  0x10   : > { %v15851_v6 = vpack.c.bf16 %v11986_v4, %v11985_v3  ;;  %s12894_s25 = sshll.u32 %s20865_s10, 8  ;;  %v15855_v44 = vpack.c.bf16 %v11988_v43, %v11987_v42  ;;  %v11837_v45 = vld [vmem:[%s20551_s3 + $0x60] sm:$0xff]  ;;  %v11838_v46 = vld [vmem:[%s20551_s3 + $0x68] sm:$0xff]  ;;  %334 = vst.msk [vmem:[#allocation2] sm:$0xff] %vm333_vm2, %v17012_v48  ;;  %335 = vst.msk [vmem:[#allocation2 + $0x8] sm:$0xff] %vm333_vm2, %v17012_v48  ;;  %vm818_vm4 = vcmask 522240  }
  0x11   : > { %15788 = vmatprep.subr.bf16.mxu0 %v15787_v5  ;;  %s17100_s28 = scalar_lea.vmem %s20548_s0, %s12894_s25  ;;  %v15795_v47 = vpack.c.bf16 %v11838_v46, %v11837_v45  ;;  %337 = vst.msk [vmem:[#allocation2 + $0x110] sm:$0xff] %vm333_vm2, %v17012_v48  ;;  %338 = vst.msk [vmem:[#allocation2 + $0x118] sm:$0xff] %vm333_vm2, %v17012_v48  ;;  %v11989_v49 = vld [vmem:[%s20551_s3 + $0x120] sm:$0xff]  ;;  %v11990_v50 = vld [vmem:[%s20551_s3 + $0x128] sm:$0xff]  ;;  %vm850_vm5 = vcmask 523265   ;;  %s20447_s27 = scalar_lea.vmem %s20557_s9, %s12894_s25  ;;  %vm11702_vm6 = vcmask 64512  }
  0x12   : > { %15852 = vmatprep.subr.bf16.mxu1 %v15851_v6  ;;  %v386_v9 = vld [vmem:[%s17100_s28] sm:$0xff]  ;;  %v387_v10 = vld [vmem:[%s17100_s28 + $0x8] sm:$0xff]  ;;  %v388_v11 = vld [vmem:[%s17100_s28 + $0x10] sm:$0xff]  ;;  %341 = vst.msk [vmem:[#allocation2 + $0x128] sm:$0xff] %vm333_vm2, %v17012_v48  ;;  %v15859_v52 = vpack.c.bf16 %v11990_v50, %v11989_v49 }
  0x13   : > { %15854 = vmatpush3.bf16.msra.mxu1 %v15851_v6  ;;  %14011 = vmatprep.mubr.msk.f32.mxu0 %vm426_vm1, %v386_v9  ;;  %v389_v13 = vld [vmem:[%s17100_s28 + $0x18] sm:$0xff]  ;;  %v390_v14 = vld [vmem:[%s17100_s28 + $0x20] sm:$0xff]  ;;  %v391_v15 = vld [vmem:[%s17100_s28 + $0x28] sm:$0xff]  ;;  %343 = vst.msk [vmem:[#allocation2 + $0x230] sm:$0xff] %vm333_vm2, %v17012_v48 }
  0x14   : > { %14012 = vmatmul.mubr.msk.f32.vlgmr.msra.gmra.mrb[0].mxu0 %vm426_vm1, %v387_v10  ;;  %v392_v16 = vld [vmem:[%s17100_s28 + $0x30] sm:$0xff]  ;;  %v393_v17 = vld [vmem:[%s17100_s28 + $0x38] sm:$0xff]  ;;  %v394_v18 = vld [vmem:[%s17100_s28 + $0x40] sm:$0xff]  ;;  %344 = vst.msk [vmem:[#allocation2 + $0x238] sm:$0xff] %vm333_vm2, %v17012_v48  ;;  %15856 = vmatprep.subr.bf16.mxu1 %v15855_v44 }
  0x15   : > { %14014 = vmatprep.mubr.msk.f32.mxu0 %vm426_vm1, %v388_v11  ;;  %15790 = vmatpush3.bf16.msra.mxu0 %v15787_v5  ;;  %v395_v19 = vld [vmem:[%s17100_s28 + $0x48] sm:$0xff]  ;;  %v396_v20 = vld [vmem:[%s17100_s28 + $0x50] sm:$0xff]  ;;  %v397_v21 = vld [vmem:[%s17100_s28 + $0x58] sm:$0xff]  ;;  %346 = vst.msk [vmem:[#allocation2 + $0x240] sm:$0xff] %vm333_vm2, %v17012_v48 }
  0x16   : > { %15792 = vmatprep.subr.bf16.mxu0 %v15791_v12  ;;  %v398_v22 = vld [vmem:[%s17100_s28 + $0x60] sm:$0xff]  ;;  %v399_v23 = vld [vmem:[%s17100_s28 + $0x68] sm:$0xff]  ;;  %v400_v24 = vld [vmem:[%s17100_s28 + $0x70] sm:$0xff]  ;;  %347 = vst.msk [vmem:[#allocation2 + $0x248] sm:$0xff] %vm333_vm2, %v17012_v48 }
  0x17   : > { %v401_v25 = vld [vmem:[%s17100_s28 + $0x78] sm:$0xff]  ;;  %v402_v26 = vld [vmem:[%s17100_s28 + $0x80] sm:$0xff]  ;;  %v403_v27 = vld [vmem:[%s17100_s28 + $0x88] sm:$0xff]  ;;  %349 = vst.msk [vmem:[#allocation2 + $0x350] sm:$0xff] %vm333_vm2, %v17012_v48  ;;  %15858 = vmatpush3.bf16.msra.mxu1 %v15855_v44 }
  0x18   : > { %14015 = vmatmul.mubr.msk.f32.gmra.mrb[2].mxu0 %vm426_vm1, %v389_v13  ;;  %v404_v28 = vld [vmem:[%s17100_s28 + $0x90] sm:$0xff]  ;;  %v405_v29 = vld [vmem:[%s17100_s28 + $0x98] sm:$0xff]  ;;  %v406_v30 = vld [vmem:[%s17100_s28 + $0xa0] sm:$0xff]  ;;  %350 = vst.msk [vmem:[#allocation2 + $0x358] sm:$0xff] %vm333_vm2, %v17012_v48  ;;  %15860 = vmatprep.subr.bf16.mxu1 %v15859_v52 }
  0x19   : > { %14017 = vmatprep.mubr.msk.f32.mxu0 %vm426_vm1, %v390_v14  ;;  %15794 = vmatpush3.bf16.msra.mxu0 %v15791_v12  ;;  %v407_v31 = vld [vmem:[%s17100_s28 + $0xa8] sm:$0xff]  ;;  %v408_v32 = vld [vmem:[%s17100_s28 + $0xb0] sm:$0xff]  ;;  %v409_v33 = vld [vmem:[%s17100_s28 + $0xb8] sm:$0xff]  ;;  %353 = vst.msk [vmem:[#allocation2 + $0x10] sm:$0x1] %vm352_vm3, %v17012_v48 }
  0x1a   : > { %v410_v34 = vld [vmem:[%s17100_s28 + $0xc0] sm:$0xff]  ;;  %v411_v35 = vld [vmem:[%s17100_s28 + $0xc8] sm:$0xff]  ;;  %v412_v36 = vld [vmem:[%s17100_s28 + $0xd0] sm:$0xff]  ;;  %15796 = vmatprep.subr.bf16.mxu0 %v15795_v47  ;;  %354 = vst.msk [vmem:[#allocation2 + $0x20] sm:$0x1] %vm352_vm3, %v17012_v48 }
  0x1b   : > { %v413_v37 = vld [vmem:[%s17100_s28 + $0xd8] sm:$0xff]  ;;  %v414_v38 = vld [vmem:[%s17100_s28 + $0xe0] sm:$0xff]  ;;  %v415_v39 = vld [vmem:[%s17100_s28 + $0xe8] sm:$0xff]  ;;  %355 = vst.msk [vmem:[#allocation2 + $0x30] sm:$0x1] %vm352_vm3, %v17012_v48  ;;  %15862 = vmatpush3.bf16.msra.mxu1 %v15859_v52 }
  0x1c   : > { %14018 = vmatmul.mubr.msk.f32.gmra.mrb[4].mxu0 %vm426_vm1, %v391_v15  ;;  %v416_v40 = vld [vmem:[%s17100_s28 + $0xf0] sm:$0xff]  ;;  %v417_v41 = vld [vmem:[%s17100_s28 + $0xf8] sm:$0xff]  ;;  %356 = vst.msk [vmem:[#allocation2 + $0x40] sm:$0x1] %vm352_vm3, %v17012_v48  ;;  %357 = vst.msk [vmem:[#allocation2 + $0x50] sm:$0x1] %vm352_vm3, %v17012_v48 }
  0x1d   : > { %14020 = vmatprep.mubr.msk.f32.mxu0 %vm426_vm1, %v392_v16  ;;  %v11839_v51 = vld [vmem:[%s20551_s3 + $0x70] sm:$0xff]  ;;  %15798 = vmatpush3.bf16.msra.mxu0 %v15795_v47  ;;  %v11840_v53 = vld [vmem:[%s20551_s3 + $0x78] sm:$0xff]  ;;  %358 = vst.msk [vmem:[#allocation2 + $0x60] sm:$0x1] %vm352_vm3, %v17012_v48  ;;  %359 = vst.msk [vmem:[#allocation2 + $0x70] sm:$0x1] %vm352_vm3, %v17012_v48 }
  0x1e   : > { %360 = vst.msk [vmem:[#allocation2 + $0x80] sm:$0x1] %vm352_vm3, %v17012_v48  ;;  %361 = vst.msk [vmem:[#allocation2 + $0x90] sm:$0x1] %vm352_vm3, %v17012_v48  ;;  %v15799_v54 = vpack.c.bf16 %v11840_v53, %v11839_v51  ;;  %v11991_v55 = vld [vmem:[%s20551_s3 + $0x130] sm:$0xff]  ;;  %v11992_v56 = vld [vmem:[%s20551_s3 + $0x138] sm:$0xff] }
  0x1f   : > { %362 = vst.msk [vmem:[#allocation2 + $0xa0] sm:$0x1] %vm352_vm3, %v17012_v48  ;;  %363 = vst.msk [vmem:[#allocation2 + $0xb0] sm:$0x1] %vm352_vm3, %v17012_v48  ;;  %v923_v57 = vld [vmem:[#allocation2 + $0x120] sm:$0xff]  ;;  %v15863_v58 = vpack.c.bf16 %v11992_v56, %v11991_v55  ;;  %v924_v59 = vld [vmem:[#allocation2 + $0x128] sm:$0xff] }
  0x20   : > { %14021 = vmatmul.mubr.msk.f32.gmra.mrb[6].mxu0 %vm426_vm1, %v393_v17  ;;  %364 = vst.msk [vmem:[#allocation2 + $0xc0] sm:$0x1] %vm352_vm3, %v17012_v48  ;;  %365 = vst.msk [vmem:[#allocation2 + $0xd0] sm:$0x1] %vm352_vm3, %v17012_v48  ;;  %15800 = vmatprep.subr.bf16.mxu0 %v15799_v54  ;;  %v12025_v60 = vld [vmem:[%s20551_s3 + $0x140] sm:$0xff]  ;;  %v12026_v61 = vld [vmem:[%s20551_s3 + $0x148] sm:$0xff] }
  0x21   : > { %14023 = vmatprep.mubr.msk.f32.mxu0 %vm426_vm1, %v394_v18  ;;  %366 = vst.msk [vmem:[#allocation2 + $0xe0] sm:$0x1] %vm352_vm3, %v17012_v48  ;;  %367 = vst.msk [vmem:[#allocation2 + $0xf0] sm:$0x1] %vm352_vm3, %v17012_v48  ;;  %15802 = vmatpush3.bf16.msra.mxu0 %v15799_v54  ;;  %v17248_v62 = vpack.c.bf16 %v12026_v61, %v12025_v60  ;;  %v915_v63 = vld [vmem:[%s20551_s3] sm:$0xff]  ;;  %v916_v0 = vld [vmem:[%s20551_s3 + $0x8] sm:$0xff] }
  0x22   : > { %368 = vst.msk [vmem:[#allocation2 + $0x100] sm:$0x1] %vm352_vm3, %v17012_v48  ;;  %370 = vst.msk [vmem:[#allocation2 + $0x25f] sm:$0x1] %vm352_vm3, %v17012_v48  ;;  %15864 = vmatprep.subr.bf16.mxu1 %v15863_v58  ;;  %v15803_v1 = vpack.c.bf16 %v916_v0, %v915_v63  ;;  %v917_v2 = vld [vmem:[%s20551_s3 + $0x10] sm:$0xff]  ;;  %v918_v3 = vld [vmem:[%s20551_s3 + $0x18] sm:$0xff] }
  0x23   : > { %371 = vst.msk [vmem:[#allocation2 + $0x26f] sm:$0x1] %vm352_vm3, %v17012_v48  ;;  %372 = vst.msk [vmem:[#allocation2 + $0x27f] sm:$0x1] %vm352_vm3, %v17012_v48  ;;  %15866 = vmatpush3.bf16.msra.mxu1 %v15863_v58  ;;  %v15807_v4 = vpack.c.bf16 %v918_v3, %v917_v2  ;;  %v919_v5 = vld [vmem:[%s20551_s3 + $0x20] sm:$0xff]  ;;  %v920_v6 = vld [vmem:[%s20551_s3 + $0x28] sm:$0xff] }
  0x24   : > { %14024 = vmatmul.mubr.msk.f32.gmra.mrb[8].mxu0 %vm426_vm1, %v395_v19  ;;  %373 = vst.msk [vmem:[#allocation2 + $0x28f] sm:$0x1] %vm352_vm3, %v17012_v48  ;;  %374 = vst.msk [vmem:[#allocation2 + $0x29f] sm:$0x1] %vm352_vm3, %v17012_v48  ;;  %15868 = vmatprep.subr.bf16.mxu1 %v17248_v62  ;;  %v15811_v7 = vpack.c.bf16 %v920_v6, %v919_v5  ;;  %v921_v8 = vld [vmem:[%s20551_s3 + $0x30] sm:$0xff]  ;;  %v922_v9 = vld [vmem:[%s20551_s3 + $0x38] sm:$0xff] }
  0x25   : > { %14026 = vmatprep.mubr.msk.f32.mxu0 %vm426_vm1, %v396_v20  ;;  %375 = vst.msk [vmem:[#allocation2 + $0x2af] sm:$0x1] %vm352_vm3, %v17012_v48  ;;  %376 = vst.msk [vmem:[#allocation2 + $0x2bf] sm:$0x1] %vm352_vm3, %v17012_v48  ;;  %15804 = vmatprep.subr.bf16.mxu0 %v15803_v1  ;;  %v15815_v10 = vpack.c.bf16 %v922_v9, %v921_v8  ;;  %v11905_v11 = vld [vmem:[%s20551_s3 + $0x80] sm:$0xff]  ;;  %v11906_v12 = vld [vmem:[%s20551_s3 + $0x88] sm:$0xff] }
  0x26   : > { %377 = vst.msk [vmem:[#allocation2 + $0x2cf] sm:$0x1] %vm352_vm3, %v17012_v48  ;;  %378 = vst.msk [vmem:[#allocation2 + $0x2df] sm:$0x1] %vm352_vm3, %v17012_v48  ;;  %v17281_v13 = vpack.c.bf16 %v11906_v12, %v11905_v11  ;;  %v17287_v14 = vld [vmem:[%s20550_s2] ss:$0 sm:$0xff] }
  0x27   : > { %379 = vst.msk [vmem:[#allocation2 + $0x2ef] sm:$0x1] %vm352_vm3, %v17012_v48  ;;  %380 = vst.msk [vmem:[#allocation2 + $0x2ff] sm:$0x1] %vm352_vm3, %v17012_v48  ;;  %v12029_v42 = vld [vmem:[%s20551_s3 + $0x160] sm:$0xff]  ;;  %v12030_v43 = vld [vmem:[%s20551_s3 + $0x168] sm:$0xff] }
  0x28   : > { %14027 = vmatmul.mubr.msk.f32.gmra.mrb[10].mxu0 %vm426_vm1, %v397_v21  ;;  %381 = vst.msk [vmem:[#allocation2 + $0x30f] sm:$0x1] %vm352_vm3, %v17012_v48  ;;  %382 = vst.msk [vmem:[#allocation2 + $0x31f] sm:$0x1] %vm352_vm3, %v17012_v48  ;;  %v15875_v50 = vpack.c.bf16 %v12030_v43, %v12029_v42  ;;  %v12031_v53 = vld [vmem:[%s20551_s3 + $0x170] sm:$0xff]  ;;  %v12032_v54 = vld [vmem:[%s20551_s3 + $0x178] sm:$0xff] }
  0x29   : > { %14029 = vmatprep.mubr.msk.f32.mxu0 %vm426_vm1, %v398_v22  ;;  %383 = vst.msk [vmem:[#allocation2 + $0x32f] sm:$0x1] %vm352_vm3, %v17012_v48  ;;  %384 = vst.msk [vmem:[#allocation2 + $0x33f] sm:$0x1] %vm352_vm3, %v17012_v48  ;;  %v15879_v61 = vpack.c.bf16 %v12032_v54, %v12031_v53  ;;  %v12065_v0 = vld [vmem:[%s20551_s3 + $0x180] sm:$0xff] }
  0x2a   : > { %385 = vst.msk [vmem:[#allocation2 + $0x34f] sm:$0x1] %vm352_vm3, %v17012_v48 }
  0x2c   : > { %14030 = vmatmul.mubr.msk.f32.gmra.mrb[12].mxu0 %vm426_vm1, %v399_v23 }
  0x2d   : > { %14032 = vmatprep.mubr.msk.f32.mxu0 %vm426_vm1, %v400_v24 }
  0x30   : > { %14033 = vmatmul.mubr.msk.f32.gmra.mrb[14].mxu0 %vm426_vm1, %v401_v25 }
  0x31   : > { %14035 = vmatprep.mubr.msk.f32.mxu0 %vm426_vm1, %v402_v26 }
  0x34   : > { %14036 = vmatmul.mubr.msk.f32.gmra.mrb[16].mxu0 %vm426_vm1, %v403_v27 }
  0x35   : > { %14038 = vmatprep.mubr.msk.f32.mxu0 %vm426_vm1, %v404_v28 }
  0x38   : > { %14039 = vmatmul.mubr.msk.f32.gmra.mrb[18].mxu0 %vm426_vm1, %v405_v29 }
  0x39   : > { %14041 = vmatprep.mubr.msk.f32.mxu0 %vm426_vm1, %v406_v30 }
  0x3c   : > { %14042 = vmatmul.mubr.msk.f32.gmra.mrb[20].mxu0 %vm426_vm1, %v407_v31  ;;  %v12027_v31 = vld [vmem:[%s20551_s3 + $0x150] sm:$0xff] }
  0x3d   : > { %14044 = vmatprep.mubr.msk.f32.mxu0 %vm426_vm1, %v408_v32  ;;  %v12028_v32 = vld [vmem:[%s20551_s3 + $0x158] sm:$0xff] }
  0x40   : > { %14045 = vmatmul.mubr.msk.f32.gmra.mrb[22].mxu0 %vm426_vm1, %v409_v33 }
  0x41   : > { %14047 = vmatprep.mubr.msk.f32.mxu0 %vm426_vm1, %v410_v34 }
  0x44   : > { %14048 = vmatmul.mubr.msk.f32.gmra.mrb[24].mxu0 %vm426_vm1, %v411_v35 }
  0x45   : > { %14050 = vmatprep.mubr.msk.f32.mxu0 %vm426_vm1, %v412_v36 }
  0x48   : > { %14051 = vmatmul.mubr.msk.f32.gmra.mrb[26].mxu0 %vm426_vm1, %v413_v37 }
  0x49   : > { %14053 = vmatprep.mubr.msk.f32.mxu0 %vm426_vm1, %v414_v38 }
  0x4c   : > { %14054 = vmatmul.mubr.msk.f32.gmra.mrb[28].mxu0 %vm426_vm1, %v415_v39  ;;  %v15871_v39 = vpack.c.bf16 %v12028_v32, %v12027_v31 }
  0x4d   : > { %14056 = vmatprep.mubr.msk.f32.mxu0 %vm426_vm1, %v416_v40 }
  0x50   : > { %14057 = vmatmul.mubr.msk.f32.gmra.mrb[30].mxu0 %vm426_vm1, %v417_v41 }
  0x51   : > { %14075 = vmatprep.mubr.msk.f32.mxu0 %vm333_vm2, %v923_v57 }
  0x54   : > { %14076 = vmatmul.mubr.msk.f32.vlgmr.msra.gmra.mrb[32].mxu0 %vm333_vm2, %v924_v59 }
  0x55   : > { %15806 = vmatpush3.bf16.msra.mxu0 %v15803_v1  ;;  %v12066_v1 = vld [vmem:[%s20551_s3 + $0x188] sm:$0xff] }
  0x56   : > { %15808 = vmatprep.subr.bf16.mxu0 %v15807_v4  ;;  %v17372_v8 = vpack.c.bf16 %v12066_v1, %v12065_v0 }
  0x59   : > { %15810 = vmatpush3.bf16.msra.mxu0 %v15807_v4 }
  0x5a   : > { %15812 = vmatprep.subr.bf16.mxu0 %v15811_v7 }
  0x5d   : > { %15814 = vmatpush3.bf16.msra.mxu0 %v15811_v7 }
  0x5e   : > { %15816 = vmatprep.subr.bf16.mxu0 %v15815_v10 }
  0x61   : > { %15818 = vmatpush3.bf16.msra.mxu0 %v15815_v10 }
  0x62   : > { %15820 = vmatprep.subr.bf16.mxu0 %v17281_v13 }
  0xe7   : > { %v14013_v15 = vpop.f32.mrb[0].mxu0 }
  0xe8   : > { %v599_v16 = vadd.f32 %v14013_v15, %v17287_v14  ;;  %v593_v17 = vpop.f32.mrb[1].mxu0 }
  0xe9   : > { %v594_v18 = vadd.f32 %v17287_v14, %v593_v17 }
  0xea   : > { %v753_v19 = vmax.f32 %v599_v16, 0.0 }
  0xeb   : > { %v752_v20 = vmax.f32 %v594_v18, 0.0  ;;  %v14016_v21 = vpop.f32.mrb[2].mxu0 }
  0xec   : > { %786 = vst.msk [vmem:[#allocation2 + $0x138] sm:$0xff] %vm333_vm2, %v753_v19  ;;  %852 = vst.msk [vmem:[#allocation2 + $0x257] sm:$0xff] %vm333_vm2, %v753_v19  ;;  %v609_v22 = vadd.f32 %v14016_v21, %v17287_v14  ;;  %v603_v23 = vpop.f32.mrb[3].mxu0 }
  0xed   : > { %819 = vst.msk [vmem:[#allocation2 + $0x19] sm:$0x7f] %vm818_vm4, %v753_v19  ;;  %v604_v24 = vadd.f32 %v17287_v14, %v603_v23 }
  0xee   : > { %785 = vst.msk [vmem:[#allocation2 + $0x130] sm:$0xff] %vm333_vm2, %v752_v20  ;;  %817 = vst.msk [vmem:[#allocation2 + $0x11] sm:$0xff] %vm333_vm2, %v752_v20  ;;  %v755_v25 = vmax.f32 %v609_v22, 0.0 }
  0xef   : > { %851 = vst.msk [vmem:[#allocation2 + $0x24f] sm:$0xfe] %vm850_vm5, %v752_v20  ;;  %v754_v26 = vmax.f32 %v604_v24, 0.0  ;;  %v14019_v27 = vpop.f32.mrb[4].mxu0 }
  0xf0   : > { %788 = vst.msk [vmem:[#allocation2 + $0x148] sm:$0xff] %vm333_vm2, %v755_v25  ;;  %854 = vst.msk [vmem:[#allocation2 + $0x267] sm:$0xff] %vm333_vm2, %v755_v25  ;;  %v619_v28 = vadd.f32 %v14019_v27, %v17287_v14  ;;  %v613_v29 = vpop.f32.mrb[5].mxu0 }
  0xf1   : > { %821 = vst.msk [vmem:[#allocation2 + $0x29] sm:$0x7f] %vm818_vm4, %v755_v25  ;;  %v614_v30 = vadd.f32 %v17287_v14, %v613_v29 }
  0xf2   : > { %787 = vst.msk [vmem:[#allocation2 + $0x140] sm:$0xff] %vm333_vm2, %v754_v26  ;;  %820 = vst.msk [vmem:[#allocation2 + $0x21] sm:$0xff] %vm333_vm2, %v754_v26  ;;  %v757_v33 = vmax.f32 %v619_v28, 0.0 }
  0xf3   : > { %853 = vst.msk [vmem:[#allocation2 + $0x25f] sm:$0xfe] %vm850_vm5, %v754_v26  ;;  %v756_v34 = vmax.f32 %v614_v30, 0.0  ;;  %v14022_v35 = vpop.f32.mrb[6].mxu0  ;;  %v926_v41 = vld [vmem:[#allocation2 + $0x138] sm:$0xff] }
  0xf4   : > { %790 = vst.msk [vmem:[#allocation2 + $0x158] sm:$0xff] %vm333_vm2, %v757_v33  ;;  %856 = vst.msk [vmem:[#allocation2 + $0x277] sm:$0xff] %vm333_vm2, %v757_v33  ;;  %v629_v36 = vadd.f32 %v14022_v35, %v17287_v14  ;;  %v623_v37 = vpop.f32.mrb[7].mxu0 }
  0xf5   : > { %823 = vst.msk [vmem:[#allocation2 + $0x39] sm:$0x7f] %vm818_vm4, %v757_v33  ;;  %v925_v38 = vld [vmem:[#allocation2 + $0x130] sm:$0xff]  ;;  %v624_v40 = vadd.f32 %v17287_v14, %v623_v37 }
  0xf6   : > { %789 = vst.msk [vmem:[#allocation2 + $0x150] sm:$0xff] %vm333_vm2, %v756_v34  ;;  %822 = vst.msk [vmem:[#allocation2 + $0x31] sm:$0xff] %vm333_vm2, %v756_v34  ;;  %14078 = vmatprep.mubr.msk.f32.mxu0 %vm333_vm2, %v925_v38  ;;  %14331 = vmatprep.mubr.msk.f32.mxu1 %vm333_vm2, %v925_v38  ;;  %v759_v44 = vmax.f32 %v629_v36, 0.0 }
  0xf7   : > { %855 = vst.msk [vmem:[#allocation2 + $0x26f] sm:$0xfe] %vm850_vm5, %v756_v34  ;;  %14079 = vmatmul.mubr.msk.f32.gmra.mrb[34].mxu0 %vm333_vm2, %v926_v41  ;;  %14332 = vmatmul.mubr.msk.f32.vlgmr.msra.gmra.mrb[0].mxu1 %vm333_vm2, %v926_v41  ;;  %v758_v45 = vmax.f32 %v624_v40, 0.0  ;;  %v14025_v46 = vpop.f32.mrb[8].mxu0  ;;  %v928_v52 = vld [vmem:[#allocation2 + $0x148] sm:$0xff] }
  0xf8   : > { %15870 = vmatpush3.bf16.msra.mxu1 %v17248_v62  ;;  %792 = vst.msk [vmem:[#allocation2 + $0x168] sm:$0xff] %vm333_vm2, %v759_v44  ;;  %858 = vst.msk [vmem:[#allocation2 + $0x287] sm:$0xff] %vm333_vm2, %v759_v44  ;;  %v639_v47 = vadd.f32 %v14025_v46, %v17287_v14  ;;  %v633_v48 = vpop.f32.mrb[9].mxu0 }
  0xf9   : > { %825 = vst.msk [vmem:[#allocation2 + $0x49] sm:$0x7f] %vm818_vm4, %v759_v44  ;;  %v927_v49 = vld [vmem:[#allocation2 + $0x140] sm:$0xff]  ;;  %15872 = vmatprep.subr.bf16.mxu1 %v15871_v39  ;;  %v634_v51 = vadd.f32 %v17287_v14, %v633_v48 }
  0xfa   : > { %791 = vst.msk [vmem:[#allocation2 + $0x160] sm:$0xff] %vm333_vm2, %v758_v45  ;;  %824 = vst.msk [vmem:[#allocation2 + $0x41] sm:$0xff] %vm333_vm2, %v758_v45  ;;  %14081 = vmatprep.mubr.msk.f32.mxu0 %vm333_vm2, %v927_v49  ;;  %14334 = vmatprep.mubr.msk.f32.mxu1 %vm333_vm2, %v927_v49  ;;  %v761_v55 = vmax.f32 %v639_v47, 0.0 }
  0xfb   : > { %857 = vst.msk [vmem:[#allocation2 + $0x27f] sm:$0xfe] %vm850_vm5, %v758_v45  ;;  %14082 = vmatmul.mubr.msk.f32.gmra.mrb[36].mxu0 %vm333_vm2, %v928_v52  ;;  %14335 = vmatmul.mubr.msk.f32.gmra.mrb[2].mxu1 %vm333_vm2, %v928_v52  ;;  %v760_v56 = vmax.f32 %v634_v51, 0.0  ;;  %v14028_v57 = vpop.f32.mrb[10].mxu0  ;;  %v930_v63 = vld [vmem:[#allocation2 + $0x158] sm:$0xff] }
  0xfc   : > { %15874 = vmatpush3.bf16.msra.mxu1 %v15871_v39  ;;  %794 = vst.msk [vmem:[#allocation2 + $0x178] sm:$0xff] %vm333_vm2, %v761_v55  ;;  %860 = vst.msk [vmem:[#allocation2 + $0x297] sm:$0xff] %vm333_vm2, %v761_v55  ;;  %v649_v58 = vadd.f32 %v14028_v57, %v17287_v14  ;;  %v643_v59 = vpop.f32.mrb[11].mxu0 }
  0xfd   : > { %827 = vst.msk [vmem:[#allocation2 + $0x59] sm:$0x7f] %vm818_vm4, %v761_v55  ;;  %v929_v60 = vld [vmem:[#allocation2 + $0x150] sm:$0xff]  ;;  %15876 = vmatprep.subr.bf16.mxu1 %v15875_v50  ;;  %v644_v62 = vadd.f32 %v17287_v14, %v643_v59 }
  0xfe   : > { %793 = vst.msk [vmem:[#allocation2 + $0x170] sm:$0xff] %vm333_vm2, %v760_v56  ;;  %826 = vst.msk [vmem:[#allocation2 + $0x51] sm:$0xff] %vm333_vm2, %v760_v56  ;;  %14084 = vmatprep.mubr.msk.f32.mxu0 %vm333_vm2, %v929_v60  ;;  %14337 = vmatprep.mubr.msk.f32.mxu1 %vm333_vm2, %v929_v60  ;;  %v763_v2 = vmax.f32 %v649_v58, 0.0 }
  0xff   : > { %859 = vst.msk [vmem:[#allocation2 + $0x28f] sm:$0xfe] %vm850_vm5, %v760_v56  ;;  %14085 = vmatmul.mubr.msk.f32.gmra.mrb[38].mxu0 %vm333_vm2, %v930_v63  ;;  %14338 = vmatmul.mubr.msk.f32.gmra.mrb[4].mxu1 %vm333_vm2, %v930_v63  ;;  %v762_v3 = vmax.f32 %v644_v62, 0.0  ;;  %v14031_v4 = vpop.f32.mrb[12].mxu0  ;;  %v932_v10 = vld [vmem:[#allocation2 + $0x168] sm:$0xff] }
 0x100   : > { %15878 = vmatpush3.bf16.msra.mxu1 %v15875_v50  ;;  %796 = vst.msk [vmem:[#allocation2 + $0x188] sm:$0xff] %vm333_vm2, %v763_v2  ;;  %862 = vst.msk [vmem:[#allocation2 + $0x2a7] sm:$0xff] %vm333_vm2, %v763_v2  ;;  %v659_v5 = vadd.f32 %v14031_v4, %v17287_v14  ;;  %v653_v6 = vpop.f32.mrb[13].mxu0 }
 0x101   : > { %829 = vst.msk [vmem:[#allocation2 + $0x69] sm:$0x7f] %vm818_vm4, %v763_v2  ;;  %v931_v7 = vld [vmem:[#allocation2 + $0x160] sm:$0xff]  ;;  %15880 = vmatprep.subr.bf16.mxu1 %v15879_v61  ;;  %v654_v9 = vadd.f32 %v17287_v14, %v653_v6 }
 0x102   : > { %795 = vst.msk [vmem:[#allocation2 + $0x180] sm:$0xff] %vm333_vm2, %v762_v3  ;;  %828 = vst.msk [vmem:[#allocation2 + $0x61] sm:$0xff] %vm333_vm2, %v762_v3  ;;  %14087 = vmatprep.mubr.msk.f32.mxu0 %vm333_vm2, %v931_v7  ;;  %14340 = vmatprep.mubr.msk.f32.mxu1 %vm333_vm2, %v931_v7  ;;  %v765_v11 = vmax.f32 %v659_v5, 0.0 }
 0x103   : > { %861 = vst.msk [vmem:[#allocation2 + $0x29f] sm:$0xfe] %vm850_vm5, %v762_v3  ;;  %14088 = vmatmul.mubr.msk.f32.gmra.mrb[40].mxu0 %vm333_vm2, %v932_v10  ;;  %14341 = vmatmul.mubr.msk.f32.gmra.mrb[6].mxu1 %vm333_vm2, %v932_v10  ;;  %v764_v12 = vmax.f32 %v654_v9, 0.0  ;;  %v14034_v15 = vpop.f32.mrb[14].mxu0  ;;  %v934_v20 = vld [vmem:[#allocation2 + $0x178] sm:$0xff] }
 0x104   : > { %15882 = vmatpush3.bf16.msra.mxu1 %v15879_v61  ;;  %798 = vst.msk [vmem:[#allocation2 + $0x198] sm:$0xff] %vm333_vm2, %v765_v11  ;;  %864 = vst.msk [vmem:[#allocation2 + $0x2b7] sm:$0xff] %vm333_vm2, %v765_v11  ;;  %v669_v16 = vadd.f32 %v14034_v15, %v17287_v14  ;;  %v663_v17 = vpop.f32.mrb[15].mxu0 }
 0x105   : > { %831 = vst.msk [vmem:[#allocation2 + $0x79] sm:$0x7f] %vm818_vm4, %v765_v11  ;;  %v933_v18 = vld [vmem:[#allocation2 + $0x170] sm:$0xff]  ;;  %15884 = vmatprep.subr.bf16.mxu1 %v17372_v8  ;;  %v664_v19 = vadd.f32 %v17287_v14, %v663_v17 }
 0x106   : > { %797 = vst.msk [vmem:[#allocation2 + $0x190] sm:$0xff] %vm333_vm2, %v764_v12  ;;  %830 = vst.msk [vmem:[#allocation2 + $0x71] sm:$0xff] %vm333_vm2, %v764_v12  ;;  %14090 = vmatprep.mubr.msk.f32.mxu0 %vm333_vm2, %v933_v18  ;;  %14343 = vmatprep.mubr.msk.f32.mxu1 %vm333_vm2, %v933_v18  ;;  %v767_v21 = vmax.f32 %v669_v16, 0.0 }
 0x107   : > { %863 = vst.msk [vmem:[#allocation2 + $0x2af] sm:$0xfe] %vm850_vm5, %v764_v12  ;;  %14091 = vmatmul.mubr.msk.f32.gmra.mrb[42].mxu0 %vm333_vm2, %v934_v20  ;;  %14344 = vmatmul.mubr.msk.f32.gmra.mrb[8].mxu1 %vm333_vm2, %v934_v20  ;;  %v766_v22 = vmax.f32 %v664_v19, 0.0  ;;  %v14037_v23 = vpop.f32.mrb[16].mxu0  ;;  %v936_v28 = vld [vmem:[#allocation2 + $0x188] sm:$0xff] }
 0x108   : > { %800 = vst.msk [vmem:[#allocation2 + $0x1a8] sm:$0xff] %vm333_vm2, %v767_v21  ;;  %866 = vst.msk [vmem:[#allocation2 + $0x2c7] sm:$0xff] %vm333_vm2, %v767_v21  ;;  %v679_v24 = vadd.f32 %v14037_v23, %v17287_v14  ;;  %v673_v25 = vpop.f32.mrb[17].mxu0 }
 0x109   : > { %833 = vst.msk [vmem:[#allocation2 + $0x89] sm:$0x7f] %vm818_vm4, %v767_v21  ;;  %v935_v26 = vld [vmem:[#allocation2 + $0x180] sm:$0xff]  ;;  %v674_v27 = vadd.f32 %v17287_v14, %v673_v25 }
 0x10a   : > { %799 = vst.msk [vmem:[#allocation2 + $0x1a0] sm:$0xff] %vm333_vm2, %v766_v22  ;;  %832 = vst.msk [vmem:[#allocation2 + $0x81] sm:$0xff] %vm333_vm2, %v766_v22  ;;  %14093 = vmatprep.mubr.msk.f32.mxu0 %vm333_vm2, %v935_v26  ;;  %14346 = vmatprep.mubr.msk.f32.mxu1 %vm333_vm2, %v935_v26  ;;  %v769_v29 = vmax.f32 %v679_v24, 0.0 }
 0x10b   : > { %865 = vst.msk [vmem:[#allocation2 + $0x2bf] sm:$0xfe] %vm850_vm5, %v766_v22  ;;  %14094 = vmatmul.mubr.msk.f32.gmra.mrb[44].mxu0 %vm333_vm2, %v936_v28  ;;  %14347 = vmatmul.mubr.msk.f32.gmra.mrb[10].mxu1 %vm333_vm2, %v936_v28  ;;  %v768_v30 = vmax.f32 %v674_v27, 0.0  ;;  %v14040_v31 = vpop.f32.mrb[18].mxu0  ;;  %v938_v36 = vld [vmem:[#allocation2 + $0x198] sm:$0xff]  ;;  %v883_v28 = vld [vmem:[#allocation2] sm:$0xff] }
 0x10c   : > { %802 = vst.msk [vmem:[#allocation2 + $0x1b8] sm:$0xff] %vm333_vm2, %v769_v29  ;;  %868 = vst.msk [vmem:[#allocation2 + $0x2d7] sm:$0xff] %vm333_vm2, %v769_v29  ;;  %v689_v32 = vadd.f32 %v14040_v31, %v17287_v14  ;;  %v683_v33 = vpop.f32.mrb[19].mxu0  ;;  %v11908_v31 = vld [vmem:[%s20551_s3 + $0x98] sm:$0xff] }
 0x10d   : > { %835 = vst.msk [vmem:[#allocation2 + $0x99] sm:$0x7f] %vm818_vm4, %v769_v29  ;;  %v937_v34 = vld [vmem:[#allocation2 + $0x190] sm:$0xff]  ;;  %v684_v35 = vadd.f32 %v17287_v14, %v683_v33 }
 0x10e   : > { %801 = vst.msk [vmem:[#allocation2 + $0x1b0] sm:$0xff] %vm333_vm2, %v768_v30  ;;  %834 = vst.msk [vmem:[#allocation2 + $0x91] sm:$0xff] %vm333_vm2, %v768_v30  ;;  %14096 = vmatprep.mubr.msk.f32.mxu0 %vm333_vm2, %v937_v34  ;;  %14349 = vmatprep.mubr.msk.f32.mxu1 %vm333_vm2, %v937_v34  ;;  %v771_v37 = vmax.f32 %v689_v32, 0.0  ;;  %v884_v32 = vld [vmem:[#allocation2 + $0x8] sm:$0xff] }
 0x10f   : > { %867 = vst.msk [vmem:[#allocation2 + $0x2cf] sm:$0xfe] %vm850_vm5, %v768_v30  ;;  %14097 = vmatmul.mubr.msk.f32.gmra.mrb[46].mxu0 %vm333_vm2, %v938_v36  ;;  %14350 = vmatmul.mubr.msk.f32.gmra.mrb[12].mxu1 %vm333_vm2, %v938_v36  ;;  %v770_v38 = vmax.f32 %v684_v35, 0.0  ;;  %v14043_v39 = vpop.f32.mrb[20].mxu0  ;;  %v940_v44 = vld [vmem:[#allocation2 + $0x1a8] sm:$0xff]  ;;  %v11907_v30 = vld [vmem:[%s20551_s3 + $0x90] sm:$0xff] }
 0x110   : > { %804 = vst.msk [vmem:[#allocation2 + $0x1c8] sm:$0xff] %vm333_vm2, %v771_v37  ;;  %870 = vst.msk [vmem:[#allocation2 + $0x2e7] sm:$0xff] %vm333_vm2, %v771_v37  ;;  %v699_v40 = vadd.f32 %v14043_v39, %v17287_v14  ;;  %v693_v41 = vpop.f32.mrb[21].mxu0  ;;  %v12067_v35 = vld [vmem:[%s20551_s3 + $0x190] sm:$0xff]  ;;  %v12068_v36 = vld [vmem:[%s20551_s3 + $0x198] sm:$0xff] }
 0x111   : > { %837 = vst.msk [vmem:[#allocation2 + $0xa9] sm:$0x7f] %vm818_vm4, %v771_v37  ;;  %v939_v42 = vld [vmem:[#allocation2 + $0x1a0] sm:$0xff]  ;;  %v694_v43 = vadd.f32 %v17287_v14, %v693_v41  ;;  %v15823_v37 = vpack.c.bf16 %v11908_v31, %v11907_v30  ;;  %v17529_v39 = vld [vmem:[#allocation2 + $0x250] sm:$0xff] }
 0x112   : > { %803 = vst.msk [vmem:[#allocation2 + $0x1c0] sm:$0xff] %vm333_vm2, %v770_v38  ;;  %836 = vst.msk [vmem:[#allocation2 + $0xa1] sm:$0xff] %vm333_vm2, %v770_v38  ;;  %14099 = vmatprep.mubr.msk.f32.mxu0 %vm333_vm2, %v939_v42  ;;  %14352 = vmatprep.mubr.msk.f32.mxu1 %vm333_vm2, %v939_v42  ;;  %v773_v45 = vmax.f32 %v699_v40, 0.0  ;;  %v15887_v40 = vpack.c.bf16 %v12068_v36, %v12067_v35  ;;  %v11909_v41 = vld [vmem:[%s20551_s3 + $0xa0] sm:$0xff]  ;;  %v17539_v42 = vld [vmem:[#allocation2 + $0x18] sm:$0xff] }
 0x113   : > { %869 = vst.msk [vmem:[#allocation2 + $0x2df] sm:$0xfe] %vm850_vm5, %v770_v38  ;;  %14100 = vmatmul.mubr.msk.f32.gmra.mrb[48].mxu0 %vm333_vm2, %v940_v44  ;;  %14353 = vmatmul.mubr.msk.f32.gmra.mrb[14].mxu1 %vm333_vm2, %v940_v44  ;;  %v772_v46 = vmax.f32 %v694_v43, 0.0  ;;  %v14046_v47 = vpop.f32.mrb[22].mxu0  ;;  %v942_v52 = vld [vmem:[#allocation2 + $0x1b8] sm:$0xff]  ;;  %v17527_v38 = vld [vmem:[#allocation2 + $0x10] sm:$0xff] }
 0x114   : > { %806 = vst.msk [vmem:[#allocation2 + $0x1d8] sm:$0xff] %vm333_vm2, %v773_v45  ;;  %872 = vst.msk [vmem:[#allocation2 + $0x2f7] sm:$0xff] %vm333_vm2, %v773_v45  ;;  %v709_v48 = vadd.f32 %v14046_v47, %v17287_v14  ;;  %v703_v49 = vpop.f32.mrb[23].mxu0  ;;  %v17541_v43 = vld [vmem:[#allocation2 + $0x258] sm:$0xff]  ;;  %v11910_v44 = vld [vmem:[%s20551_s3 + $0xa8] sm:$0xff] }
 0x115   : > { %839 = vst.msk [vmem:[#allocation2 + $0xb9] sm:$0x7f] %vm818_vm4, %v773_v45  ;;  %v941_v50 = vld [vmem:[#allocation2 + $0x1b0] sm:$0xff]  ;;  %v704_v51 = vadd.f32 %v17287_v14, %v703_v49  ;;  %20695 = vst [vmem:[#allocation5_spill] sm:$0xff] %v17527_v38  ;;  %v12069_v45 = vld [vmem:[%s20551_s3 + $0x1a0] sm:$0xff]  ;;  %v15827_v49 = vpack.c.bf16 %v11910_v44, %v11909_v41 }
 0x116   : > { %805 = vst.msk [vmem:[#allocation2 + $0x1d0] sm:$0xff] %vm333_vm2, %v772_v46  ;;  %838 = vst.msk [vmem:[#allocation2 + $0xb1] sm:$0xff] %vm333_vm2, %v772_v46  ;;  %14102 = vmatprep.mubr.msk.f32.mxu0 %vm333_vm2, %v941_v50  ;;  %14355 = vmatprep.mubr.msk.f32.mxu1 %vm333_vm2, %v941_v50  ;;  %v775_v53 = vmax.f32 %v709_v48, 0.0  ;;  %v17561_v47 = vld [vmem:[#allocation2 + $0x260] sm:$0xff]  ;;  %v12071_v48 = vld [vmem:[%s20551_s3 + $0x1b0] sm:$0xff] }
 0x117   : > { %871 = vst.msk [vmem:[#allocation2 + $0x2ef] sm:$0xfe] %vm850_vm5, %v772_v46  ;;  %14103 = vmatmul.mubr.msk.f32.gmra.mrb[50].mxu0 %vm333_vm2, %v942_v52  ;;  %14356 = vmatmul.mubr.msk.f32.gmra.mrb[16].mxu1 %vm333_vm2, %v942_v52  ;;  %v774_v54 = vmax.f32 %v704_v51, 0.0  ;;  %v14049_v55 = vpop.f32.mrb[24].mxu0  ;;  %v944_v60 = vld [vmem:[#allocation2 + $0x1c8] sm:$0xff]  ;;  %20696 = vst [vmem:[#allocation6_spill] sm:$0xff] %v17539_v42 }
 0x118   : > { %808 = vst.msk [vmem:[#allocation2 + $0x1e8] sm:$0xff] %vm333_vm2, %v775_v53  ;;  %874 = vst.msk [vmem:[#allocation2 + $0x307] sm:$0xff] %vm333_vm2, %v775_v53  ;;  %v719_v56 = vadd.f32 %v14049_v55, %v17287_v14  ;;  %v713_v57 = vpop.f32.mrb[25].mxu0  ;;  %v12070_v46 = vld [vmem:[%s20551_s3 + $0x1a8] sm:$0xff]  ;;  %v11911_v50 = vld [vmem:[%s20551_s3 + $0xb0] sm:$0xff] }
 0x119   : > { %841 = vst.msk [vmem:[#allocation2 + $0xc9] sm:$0x7f] %vm818_vm4, %v775_v53  ;;  %v943_v58 = vld [vmem:[#allocation2 + $0x1c0] sm:$0xff]  ;;  %v714_v59 = vadd.f32 %v17287_v14, %v713_v57  ;;  %v17571_v51 = vld [vmem:[#allocation2 + $0x28] sm:$0xff]  ;;  %v15891_v52 = vpack.c.bf16 %v12070_v46, %v12069_v45  ;;  %v11912_v53 = vld [vmem:[%s20551_s3 + $0xb8] sm:$0xff] }
 0x11a   : > { %807 = vst.msk [vmem:[#allocation2 + $0x1e0] sm:$0xff] %vm333_vm2, %v774_v54  ;;  %840 = vst.msk [vmem:[#allocation2 + $0xc1] sm:$0xff] %vm333_vm2, %v774_v54  ;;  %14105 = vmatprep.mubr.msk.f32.mxu0 %vm333_vm2, %v943_v58  ;;  %14358 = vmatprep.mubr.msk.f32.mxu1 %vm333_vm2, %v943_v58  ;;  %v777_v61 = vmax.f32 %v719_v56, 0.0  ;;  %v17584_v55 = vld [vmem:[#allocation2 + $0x270] sm:$0xff]  ;;  %v12072_v56 = vld [vmem:[%s20551_s3 + $0x1b8] sm:$0xff]  ;;  %v15831_v58 = vpack.c.bf16 %v11912_v53, %v11911_v50 }
 0x11b   : > { %873 = vst.msk [vmem:[#allocation2 + $0x2ff] sm:$0xfe] %vm850_vm5, %v774_v54  ;;  %14106 = vmatmul.mubr.msk.f32.gmra.mrb[52].mxu0 %vm333_vm2, %v944_v60  ;;  %14359 = vmatmul.mubr.msk.f32.gmra.mrb[18].mxu1 %vm333_vm2, %v944_v60  ;;  %v776_v62 = vmax.f32 %v714_v59, 0.0  ;;  %v14052_v63 = vpop.f32.mrb[26].mxu0  ;;  %v946_v4 = vld [vmem:[#allocation2 + $0x1d8] sm:$0xff]  ;;  %v17582_v54 = vld [vmem:[#allocation2 + $0x30] sm:$0xff] }
 0x11c   : > { %810 = vst.msk [vmem:[#allocation2 + $0x1f8] sm:$0xff] %vm333_vm2, %v777_v61  ;;  %876 = vst.msk [vmem:[#allocation2 + $0x317] sm:$0xff] %vm333_vm2, %v777_v61  ;;  %v729_v0 = vadd.f32 %v14052_v63, %v17287_v14  ;;  %v723_v1 = vpop.f32.mrb[27].mxu0  ;;  %v17593_v57 = vld [vmem:[#allocation2 + $0x278] sm:$0xff]  ;;  %v12105_v59 = vld [vmem:[%s20551_s3 + $0x1c0] sm:$0xff] }
 0x11d   : > { %843 = vst.msk [vmem:[#allocation2 + $0xd9] sm:$0x7f] %vm818_vm4, %v777_v61  ;;  %v945_v2 = vld [vmem:[#allocation2 + $0x1d0] sm:$0xff]  ;;  %v724_v3 = vadd.f32 %v17287_v14, %v723_v1  ;;  %v17598_v60 = vld [vmem:[#allocation2 + $0x38] sm:$0xff]  ;;  %v15895_v61 = vpack.c.bf16 %v12072_v56, %v12071_v48  ;;  %v11946_v63 = vld [vmem:[%s20551_s3 + $0xc8] sm:$0xff] }
 0x11e   : > { %809 = vst.msk [vmem:[#allocation2 + $0x1f0] sm:$0xff] %vm333_vm2, %v776_v62  ;;  %842 = vst.msk [vmem:[#allocation2 + $0xd1] sm:$0xff] %vm333_vm2, %v776_v62  ;;  %14108 = vmatprep.mubr.msk.f32.mxu0 %vm333_vm2, %v945_v2  ;;  %14361 = vmatprep.mubr.msk.f32.mxu1 %vm333_vm2, %v945_v2  ;;  %v779_v5 = vmax.f32 %v729_v0, 0.0  ;;  %v17610_v0 = vld [vmem:[#allocation2 + $0x40] sm:$0xff]  ;;  %v12106_v2 = vld [vmem:[%s20551_s3 + $0x1c8] sm:$0xff] }
 0x11f   : > { %875 = vst.msk [vmem:[#allocation2 + $0x30f] sm:$0xfe] %vm850_vm5, %v776_v62  ;;  %14109 = vmatmul.mubr.msk.f32.gmra.mrb[54].mxu0 %vm333_vm2, %v946_v4  ;;  %14362 = vmatmul.mubr.msk.f32.gmra.mrb[20].mxu1 %vm333_vm2, %v946_v4  ;;  %v778_v6 = vmax.f32 %v724_v3, 0.0  ;;  %v14055_v7 = vpop.f32.mrb[28].mxu0  ;;  %v948_v15 = vld [vmem:[#allocation2 + $0x1e8] sm:$0xff]  ;;  %v11945_v62 = vld [vmem:[%s20551_s3 + $0xc0] sm:$0xff] }
 0x120   : > { %812 = vst.msk [vmem:[#allocation2 + $0x208] sm:$0xff] %vm333_vm2, %v779_v5  ;;  %878 = vst.msk [vmem:[#allocation2 + $0x327] sm:$0xff] %vm333_vm2, %v779_v5  ;;  %v739_v9 = vadd.f32 %v14055_v7, %v17287_v14  ;;  %v733_v10 = vpop.f32.mrb[29].mxu0  ;;  %v17612_v1 = vld [vmem:[#allocation2 + $0x280] sm:$0xff]  ;;  %v17621_v3 = vpack.c.bf16 %v11946_v63, %v11945_v62  ;;  %v17623_v4 = vld [vmem:[#allocation2 + $0x48] sm:$0xff] }
 0x121   : > { %845 = vst.msk [vmem:[#allocation2 + $0xe9] sm:$0x7f] %vm818_vm4, %v779_v5  ;;  %v947_v11 = vld [vmem:[#allocation2 + $0x1e0] sm:$0xff]  ;;  %v734_v12 = vadd.f32 %v17287_v14, %v733_v10  ;;  %v17625_v5 = vld [vmem:[#allocation2 + $0x288] sm:$0xff]  ;;  %v17633_v7 = vld [vmem:[#allocation2 + $0x50] sm:$0xff] }
 0x122   : > { %811 = vst.msk [vmem:[#allocation2 + $0x200] sm:$0xff] %vm333_vm2, %v778_v6  ;;  %844 = vst.msk [vmem:[#allocation2 + $0xe1] sm:$0xff] %vm333_vm2, %v778_v6  ;;  %14111 = vmatprep.mubr.msk.f32.mxu0 %vm333_vm2, %v947_v11  ;;  %14364 = vmatprep.mubr.msk.f32.mxu1 %vm333_vm2, %v947_v11  ;;  %v781_v16 = vmax.f32 %v739_v9, 0.0  ;;  %v17635_v9 = vld [vmem:[#allocation2 + $0x290] sm:$0xff]  ;;  %v17642_v10 = vld [vmem:[#allocation2 + $0x58] sm:$0xff] }
 0x123   : > { %877 = vst.msk [vmem:[#allocation2 + $0x31f] sm:$0xfe] %vm850_vm5, %v778_v6  ;;  %14112 = vmatmul.mubr.msk.f32.gmra.mrb[56].mxu0 %vm333_vm2, %v948_v15  ;;  %14365 = vmatmul.mubr.msk.f32.gmra.mrb[22].mxu1 %vm333_vm2, %v948_v15  ;;  %v780_v17 = vmax.f32 %v734_v12, 0.0  ;;  %v14058_v18 = vpop.f32.mrb[30].mxu0  ;;  %v950_v23 = vld [vmem:[#allocation2 + $0x1f8] sm:$0xff]  ;;  %v17627_v6 = vpack.c.bf16 %v12106_v2, %v12105_v59  ;;  %v17651_v12 = vld [vmem:[#allocation2 + $0x60] sm:$0xff] }
 0x124   : > { %814 = vst.msk [vmem:[#allocation2 + $0x218] sm:$0xff] %vm333_vm2, %v781_v16  ;;  %880 = vst.msk [vmem:[#allocation2 + $0x337] sm:$0xff] %vm333_vm2, %v781_v16  ;;  %v749_v19 = vadd.f32 %v14058_v18, %v17287_v14  ;;  %v743_v20 = vpop.f32.mrb[31].mxu0  ;;  %v17644_v11 = vld [vmem:[#allocation2 + $0x298] sm:$0xff]  ;;  %v17653_v15 = vld [vmem:[#allocation2 + $0x2a0] sm:$0xff] }
 0x125   : > { %847 = vst.msk [vmem:[#allocation2 + $0xf9] sm:$0x7f] %vm818_vm4, %v781_v16  ;;  %v949_v21 = vld [vmem:[#allocation2 + $0x1f0] sm:$0xff]  ;;  %v744_v22 = vadd.f32 %v17287_v14, %v743_v20  ;;  %v17659_v16 = vld [vmem:[#allocation2 + $0x68] sm:$0xff]  ;;  %v17675_v20 = vld [vmem:[#allocation2 + $0x78] sm:$0xff] }
 0x126   : > { %813 = vst.msk [vmem:[#allocation2 + $0x210] sm:$0xff] %vm333_vm2, %v780_v17  ;;  %846 = vst.msk [vmem:[#allocation2 + $0xf1] sm:$0xff] %vm333_vm2, %v780_v17  ;;  %14114 = vmatprep.mubr.msk.f32.mxu0 %vm333_vm2, %v949_v21  ;;  %14367 = vmatprep.mubr.msk.f32.mxu1 %vm333_vm2, %v949_v21  ;;  %v783_v24 = vmax.f32 %v749_v19, 0.0  ;;  %v17667_v18 = vld [vmem:[#allocation2 + $0x70] sm:$0xff]  ;;  %v17677_v21 = vld [vmem:[#allocation2 + $0x2b8] sm:$0xff] }
 0x127   : > { %879 = vst.msk [vmem:[#allocation2 + $0x32f] sm:$0xfe] %vm850_vm5, %v780_v17  ;;  %14115 = vmatmul.mubr.msk.f32.gmra.mrb[58].mxu0 %vm333_vm2, %v950_v23  ;;  %14368 = vmatmul.mubr.msk.f32.gmra.mrb[24].mxu1 %vm333_vm2, %v950_v23  ;;  %v782_v25 = vmax.f32 %v744_v22, 0.0  ;;  %v952_v14 = vld [vmem:[#allocation2 + $0x208] sm:$0xff]  ;;  %v17669_v19 = vld [vmem:[#allocation2 + $0x2b0] sm:$0xff]  ;;  %v17683_v22 = vld [vmem:[#allocation2 + $0x80] sm:$0xff] }
 0x128   : > { %816 = vst.msk [vmem:[#allocation2 + $0x228] sm:$0xff] %vm333_vm2, %v783_v24  ;;  %882 = vst.msk [vmem:[#allocation2 + $0x347] sm:$0xff] %vm333_vm2, %v783_v24  ;;  %v17661_v17 = vld [vmem:[#allocation2 + $0x2a8] sm:$0xff]  ;;  %v17685_v23 = vld [vmem:[#allocation2 + $0x2c0] sm:$0xff] }
 0x129   : > { %849 = vst.msk [vmem:[#allocation2 + $0x109] sm:$0x7f] %vm818_vm4, %v783_v24  ;;  %v951_v26 = vld [vmem:[#allocation2 + $0x200] sm:$0xff]  ;;  %v17691_v24 = vld [vmem:[#allocation2 + $0x88] sm:$0xff]  ;;  %v17731_v35 = vld [vmem:[#allocation2 + $0xb0] sm:$0xff] }
 0x12a   : > { %815 = vst.msk [vmem:[#allocation2 + $0x220] sm:$0xff] %vm333_vm2, %v782_v25  ;;  %848 = vst.msk [vmem:[#allocation2 + $0x101] sm:$0xff] %vm333_vm2, %v782_v25  ;;  %14117 = vmatprep.mubr.msk.f32.mxu0 %vm333_vm2, %v951_v26  ;;  %14370 = vmatprep.mubr.msk.f32.mxu1 %vm333_vm2, %v951_v26  ;;  %v17699_v26 = vld [vmem:[#allocation2 + $0x90] sm:$0xff]  ;;  %v17717_v30 = vld [vmem:[#allocation2 + $0x2e0] sm:$0xff] }
 0x12b   : > { %881 = vst.msk [vmem:[#allocation2 + $0x33f] sm:$0xfe] %vm850_vm5, %v782_v25  ;;  %14118 = vmatmul.mubr.msk.f32.gmra.mrb[60].mxu0 %vm333_vm2, %v952_v14  ;;  %14371 = vmatmul.mubr.msk.f32.gmra.mrb[26].mxu1 %vm333_vm2, %v952_v14  ;;  %v954_v29 = vld [vmem:[#allocation2 + $0x218] sm:$0xff]  ;;  %v17693_v25 = vld [vmem:[#allocation2 + $0x2c8] sm:$0xff]  ;;  %v17701_v14 = vld [vmem:[#allocation2 + $0x2d0] sm:$0xff] }
 0x12c   : > { %v17723_v31 = vld [vmem:[#allocation2 + $0xa8] sm:$0xff]  ;;  %v17733_v36 = vld [vmem:[#allocation2 + $0x2f0] sm:$0xff]  ;;  %v17747_v41 = vld [vmem:[#allocation2 + $0xc0] sm:$0xff] }
 0x12d   : > { %v953_v27 = vld [vmem:[#allocation2 + $0x210] sm:$0xff]  ;;  %v17749_v44 = vld [vmem:[#allocation2 + $0x300] sm:$0xff]  ;;  %v17755_v45 = vld [vmem:[#allocation2 + $0xc8] sm:$0xff] }
 0x12e   : > { %14120 = vmatprep.mubr.msk.f32.mxu0 %vm333_vm2, %v953_v27  ;;  %14373 = vmatprep.mubr.msk.f32.mxu1 %vm333_vm2, %v953_v27  ;;  %v17707_v27 = vld [vmem:[#allocation2 + $0x98] sm:$0xff]  ;;  %v17757_v46 = vld [vmem:[#allocation2 + $0x308] sm:$0xff]  ;;  %v17763_v48 = vld [vmem:[#allocation2 + $0xd0] sm:$0xff] }
 0x12f   : > { %14121 = vmatmul.mubr.msk.f32.gmra.mrb[62].mxu0 %vm333_vm2, %v954_v29  ;;  %14374 = vmatmul.mubr.msk.f32.gmra.mrb[28].mxu1 %vm333_vm2, %v954_v29  ;;  %v17516_v34 = vld [vmem:[#allocation2 + $0x228] sm:$0xff]  ;;  %v17715_v29 = vld [vmem:[#allocation2 + $0xa0] sm:$0xff]  ;;  %v17771_v50 = vld [vmem:[#allocation2 + $0xd8] sm:$0xff] }
 0x130   : > { %14139 = vmatprep.mubr.msk.f32.mxu0 %vm333_vm2, %v883_v28  ;;  %20694 = vst [vmem:[#allocation4_spill] sm:$0xff] %v17516_v34  ;;  %v17709_v28 = vld [vmem:[#allocation2 + $0x2d8] sm:$0xff]  ;;  %v17779_v53 = vld [vmem:[#allocation2 + $0xe0] sm:$0xff]  ;;  %v17789_v59 = vld [vmem:[#allocation2 + $0x328] sm:$0xff] }
 0x131   : > { %v17512_v33 = vld [vmem:[#allocation2 + $0x220] sm:$0xff]  ;;  %20697 = vst [vmem:[#allocation7_spill] sm:$0xff] %v17789_v59  ;;  %v17797_v62 = vld [vmem:[#allocation2 + $0x330] sm:$0xff]  ;;  %v17803_v2 = vld [vmem:[#allocation2 + $0xf8] sm:$0xff] }
 0x132   : > { %20693 = vst [vmem:[#allocation3_spill] sm:$0xff] %v17512_v33  ;;  %14376 = vmatprep.mubr.msk.f32.mxu1 %vm333_vm2, %v17512_v33  ;;  %v17781_v56 = vld [vmem:[#allocation2 + $0x320] sm:$0xff]  ;;  %20699 = vst [vmem:[#allocation9_spill] sm:$0xff] %v17797_v62 }
 0x133   : > { %14140 = vmatmul.mubr.msk.f32.vlgmr.msra.gmra.mrb[32].mxu0 %vm333_vm2, %v884_v32  ;;  %14377 = vmatmul.mubr.msk.f32.gmra.mrb[30].mxu1 %vm333_vm2, %v17516_v34  ;;  %v17725_v32 = vld [vmem:[#allocation2 + $0x2e8] sm:$0xff]  ;;  %v1606_v63 = vld [vmem:[#allocation2 + $0x240] sm:$0xff]  ;;  %20700 = vst [vmem:[#allocation10_spill] sm:$0xff] %v17803_v2  ;;  %v17805_v34 = vld [vmem:[#allocation2 + $0x338] sm:$0xff] }
 0x134   : > { %14142 = vmatprep.mubr.msk.f32.mxu0 %vm333_vm2, %v17527_v38  ;;  %14395 = vmatprep.mubr.msk.f32.mxu1 %vm333_vm2, %v17529_v39  ;;  %20701 = vst [vmem:[#allocation11_spill] sm:$0xff] %v17805_v34  ;;  %v17811_v33 = vld [vmem:[#allocation2 + $0x340] sm:$0xff]  ;;  %v11948_v38 = vld [vmem:[%s20551_s3 + $0xd8] sm:$0xff] }
 0x135   : > { %15822 = vmatpush3.bf16.msra.mxu0 %v17281_v13  ;;  %v17550_v13 = vld [vmem:[#allocation2 + $0x20] sm:$0xff]  ;;  %20702 = vst [vmem:[#allocation12_spill] sm:$0xff] %v17811_v33 }
 0x136   : > { %15824 = vmatprep.subr.bf16.mxu0 %v15823_v37 }
 0x137   : > { %14143 = vmatmul.mubr.msk.f32.gmra.mrb[34].mxu0 %vm333_vm2, %v17539_v42  ;;  %14396 = vmatmul.mubr.msk.f32.vlgmr.msra.gmra.mrb[0].mxu1 %vm333_vm2, %v17541_v43  ;;  %v11947_v42 = vld [vmem:[%s20551_s3 + $0xd0] sm:$0xff] }
 0x138   : > { %15886 = vmatpush3.bf16.msra.mxu1 %v17372_v8  ;;  %14145 = vmatprep.mubr.msk.f32.mxu0 %vm333_vm2, %v17550_v13  ;;  %v17573_v8 = vld [vmem:[#allocation2 + $0x268] sm:$0xff] }
 0x139   : > { %14398 = vmatprep.mubr.msk.f32.mxu1 %vm333_vm2, %v17561_v47  ;;  %15888 = vmatprep.subr.bf16.mxu1 %v15887_v40 }
 0x13a   : > { %15826 = vmatpush3.bf16.msra.mxu0 %v15823_v37  ;;  %v17739_v37 = vld [vmem:[#allocation2 + $0xb8] sm:$0xff] }
 0x13b   : > { %14146 = vmatmul.mubr.msk.f32.gmra.mrb[36].mxu0 %vm333_vm2, %v17571_v51  ;;  %14399 = vmatmul.mubr.msk.f32.gmra.mrb[2].mxu1 %vm333_vm2, %v17573_v8 }
 0x13c   : > { %14148 = vmatprep.mubr.msk.f32.mxu0 %vm333_vm2, %v17582_v54  ;;  %14401 = vmatprep.mubr.msk.f32.mxu1 %vm333_vm2, %v17584_v55 }
 0x13d   : > { %15890 = vmatpush3.bf16.msra.mxu1 %v15887_v40  ;;  %15828 = vmatprep.subr.bf16.mxu0 %v15827_v49  ;;  %v17741_v40 = vld [vmem:[#allocation2 + $0x2f8] sm:$0xff] }
 0x13e   : > { %15892 = vmatprep.subr.bf16.mxu1 %v15891_v52  ;;  %15830 = vmatpush3.bf16.msra.mxu0 %v15827_v49  ;;  %v17765_v49 = vld [vmem:[#allocation2 + $0x310] sm:$0xff] }
 0x13f   : > { %14149 = vmatmul.mubr.msk.f32.gmra.mrb[38].mxu0 %vm333_vm2, %v17598_v60  ;;  %14402 = vmatmul.mubr.msk.f32.gmra.mrb[4].mxu1 %vm333_vm2, %v17593_v57 }
 0x140   : > { %14151 = vmatprep.mubr.msk.f32.mxu0 %vm333_vm2, %v17610_v0  ;;  %14404 = vmatprep.mubr.msk.f32.mxu1 %vm333_vm2, %v17612_v1 }
 0x141   : > { %15894 = vmatpush3.bf16.msra.mxu1 %v15891_v52  ;;  %15832 = vmatprep.subr.bf16.mxu0 %v15831_v58  ;;  %v17773_v52 = vld [vmem:[#allocation2 + $0x318] sm:$0xff] }
 0x142   : > { %15896 = vmatprep.subr.bf16.mxu1 %v15895_v61  ;;  %15834 = vmatpush3.bf16.msra.mxu0 %v15831_v58  ;;  %v17787_v58 = vld [vmem:[#allocation2 + $0xe8] sm:$0xff] }
 0x143   : > { %14152 = vmatmul.mubr.msk.f32.gmra.mrb[40].mxu0 %vm333_vm2, %v17623_v4  ;;  %14405 = vmatmul.mubr.msk.f32.gmra.mrb[6].mxu1 %vm333_vm2, %v17625_v5 }
 0x144   : > { %14154 = vmatprep.mubr.msk.f32.mxu0 %vm333_vm2, %v17633_v7  ;;  %14407 = vmatprep.mubr.msk.f32.mxu1 %vm333_vm2, %v17635_v9 }
 0x145   : > { %15898 = vmatpush3.bf16.msra.mxu1 %v15895_v61  ;;  %15836 = vmatprep.subr.bf16.mxu0 %v17621_v3  ;;  %v17795_v61 = vld [vmem:[#allocation2 + $0xf0] sm:$0xff] }
 0x146   : > { %15900 = vmatprep.subr.bf16.mxu1 %v17627_v6  ;;  %20698 = vst [vmem:[#allocation8_spill] sm:$0xff] %v17795_v61 }
 0x147   : > { %14155 = vmatmul.mubr.msk.f32.gmra.mrb[42].mxu0 %vm333_vm2, %v17642_v10  ;;  %14408 = vmatmul.mubr.msk.f32.gmra.mrb[8].mxu1 %vm333_vm2, %v17644_v11 }
 0x148   : > { %14157 = vmatprep.mubr.msk.f32.mxu0 %vm333_vm2, %v17651_v12  ;;  %14410 = vmatprep.mubr.msk.f32.mxu1 %vm333_vm2, %v17653_v15 }
 0x14b   : > { %14158 = vmatmul.mubr.msk.f32.gmra.mrb[44].mxu0 %vm333_vm2, %v17659_v16  ;;  %14411 = vmatmul.mubr.msk.f32.gmra.mrb[10].mxu1 %vm333_vm2, %v17661_v17 }
 0x14c   : > { %14160 = vmatprep.mubr.msk.f32.mxu0 %vm333_vm2, %v17667_v18  ;;  %14413 = vmatprep.mubr.msk.f32.mxu1 %vm333_vm2, %v17669_v19 }
 0x14f   : > { %14161 = vmatmul.mubr.msk.f32.gmra.mrb[46].mxu0 %vm333_vm2, %v17675_v20  ;;  %14414 = vmatmul.mubr.msk.f32.gmra.mrb[12].mxu1 %vm333_vm2, %v17677_v21 }
 0x150   : > { %14163 = vmatprep.mubr.msk.f32.mxu0 %vm333_vm2, %v17683_v22  ;;  %14416 = vmatprep.mubr.msk.f32.mxu1 %vm333_vm2, %v17685_v23 }
 0x153   : > { %14164 = vmatmul.mubr.msk.f32.gmra.mrb[48].mxu0 %vm333_vm2, %v17691_v24  ;;  %14417 = vmatmul.mubr.msk.f32.gmra.mrb[14].mxu1 %vm333_vm2, %v17693_v25 }
 0x154   : > { %14166 = vmatprep.mubr.msk.f32.mxu0 %vm333_vm2, %v17699_v26  ;;  %14419 = vmatprep.mubr.msk.f32.mxu1 %vm333_vm2, %v17701_v14 }
 0x157   : > { %14167 = vmatmul.mubr.msk.f32.gmra.mrb[50].mxu0 %vm333_vm2, %v17707_v27  ;;  %14420 = vmatmul.mubr.msk.f32.gmra.mrb[16].mxu1 %vm333_vm2, %v17709_v28 }
 0x158   : > { %14169 = vmatprep.mubr.msk.f32.mxu0 %vm333_vm2, %v17715_v29  ;;  %14422 = vmatprep.mubr.msk.f32.mxu1 %vm333_vm2, %v17717_v30 }
 0x15b   : > { %14170 = vmatmul.mubr.msk.f32.gmra.mrb[52].mxu0 %vm333_vm2, %v17723_v31  ;;  %14423 = vmatmul.mubr.msk.f32.gmra.mrb[18].mxu1 %vm333_vm2, %v17725_v32 }
 0x15c   : > { %14172 = vmatprep.mubr.msk.f32.mxu0 %vm333_vm2, %v17731_v35  ;;  %14425 = vmatprep.mubr.msk.f32.mxu1 %vm333_vm2, %v17733_v36 }
 0x15f   : > { %14173 = vmatmul.mubr.msk.f32.gmra.mrb[54].mxu0 %vm333_vm2, %v17739_v37  ;;  %14426 = vmatmul.mubr.msk.f32.gmra.mrb[20].mxu1 %vm333_vm2, %v17741_v40 }
 0x160   : > { %14175 = vmatprep.mubr.msk.f32.mxu0 %vm333_vm2, %v17747_v41  ;;  %14428 = vmatprep.mubr.msk.f32.mxu1 %vm333_vm2, %v17749_v44 }
 0x163   : > { %14176 = vmatmul.mubr.msk.f32.gmra.mrb[56].mxu0 %vm333_vm2, %v17755_v45  ;;  %14429 = vmatmul.mubr.msk.f32.gmra.mrb[22].mxu1 %vm333_vm2, %v17757_v46 }
 0x164   : > { %14178 = vmatprep.mubr.msk.f32.mxu0 %vm333_vm2, %v17763_v48  ;;  %14431 = vmatprep.mubr.msk.f32.mxu1 %vm333_vm2, %v17765_v49 }
 0x167   : > { %14179 = vmatmul.mubr.msk.f32.gmra.mrb[58].mxu0 %vm333_vm2, %v17771_v50  ;;  %14432 = vmatmul.mubr.msk.f32.gmra.mrb[24].mxu1 %vm333_vm2, %v17773_v52 }
 0x168   : > { %14181 = vmatprep.mubr.msk.f32.mxu0 %vm333_vm2, %v17779_v53  ;;  %14434 = vmatprep.mubr.msk.f32.mxu1 %vm333_vm2, %v17781_v56 }
 0x16b   : > { %14182 = vmatmul.mubr.msk.f32.gmra.mrb[60].mxu0 %vm333_vm2, %v17787_v58  ;;  %14435 = vmatmul.mubr.msk.f32.gmra.mrb[26].mxu1 %vm333_vm2, %v17789_v59  ;;  %v12108_v59 = vld [vmem:[%s20551_s3 + $0x1d8] sm:$0xff] }
 0x16c   : > { %14184 = vmatprep.mubr.msk.f32.mxu0 %vm333_vm2, %v17795_v61  ;;  %14437 = vmatprep.mubr.msk.f32.mxu1 %vm333_vm2, %v17797_v62  ;;  %v1607_v62 = vld [vmem:[#allocation2 + $0x248] sm:$0xff]  ;;  %v15839_v61 = vpack.c.bf16 %v11948_v38, %v11947_v42 }
 0x16d   : > { %v11950_v38 = vld [vmem:[%s20551_s3 + $0xe8] sm:$0xff] }
 0x16f   : > { %14185 = vmatmul.mubr.msk.f32.gmra.mrb[62].mxu0 %vm333_vm2, %v17803_v2  ;;  %14438 = vmatmul.mubr.msk.f32.gmra.mrb[28].mxu1 %vm333_vm2, %v17805_v34  ;;  %v17822_v2 = vld [vmem:[#allocation2 + $0x348] sm:$0xff]  ;;  %v12107_v34 = vld [vmem:[%s20551_s3 + $0x1d0] sm:$0xff] }
 0x170   : > { %14440 = vmatprep.mubr.msk.f32.mxu1 %vm333_vm2, %v17811_v33  ;;  %14203 = vmatprep.mubr.msk.f32.mxu0 %vm333_vm2, %v1606_v63  ;;  %20703 = vst [vmem:[#allocation13_spill] sm:$0xff] %v17822_v2  ;;  %v15903_v63 = vpack.c.bf16 %v12108_v59, %v12107_v34  ;;  %v11949_v33 = vld [vmem:[%s20551_s3 + $0xe0] sm:$0xff]  ;;  %v11952_v59 = vld [vmem:[%s20551_s3 + $0xf8] sm:$0xff] }
 0x171   : > { %v12109_v34 = vld [vmem:[%s20551_s3 + $0x1e0] sm:$0xff]  ;;  %v15843_v42 = vpack.c.bf16 %v11950_v38, %v11949_v33  ;;  %v12111_v33 = vld [vmem:[%s20551_s3 + $0x1f0] sm:$0xff] }
 0x172   : > { %v12145_v38 = vld [vmem:[%s20551_s3 + $0x200] sm:$0xff] }
 0x173   : > { %14204 = vmatmul.mubr.msk.f32.vlgmr.msra.gmra.mrb[32].mxu0 %vm333_vm2, %v1607_v62  ;;  %14441 = vmatmul.mubr.msk.f32.gmra.mrb[30].mxu1 %vm333_vm2, %v17822_v2  ;;  %v12148_v2 = vld [vmem:[%s20551_s3 + $0x218] sm:$0xff] }
 0x174   : > { %14206 = vmatprep.mubr.msk.f32.mxu0 %vm333_vm2, %v17529_v39  ;;  %14459 = vmatprep.mubr.msk.f32.mxu1 %vm333_vm2, %v17550_v13  ;;  %v12110_v39 = vld [vmem:[%s20551_s3 + $0x1e8] sm:$0xff] }
 0x175   : > { %15838 = vmatpush3.bf16.msra.mxu0 %v17621_v3  ;;  %v11951_v3 = vld [vmem:[%s20551_s3 + $0xf0] sm:$0xff] }
 0x176   : > { %15840 = vmatprep.subr.bf16.mxu0 %v15839_v61 }
 0x177   : > { %14207 = vmatmul.mubr.msk.f32.gmra.mrb[34].mxu0 %vm333_vm2, %v17541_v43  ;;  %14460 = vmatmul.mubr.msk.f32.vlgmr.msra.gmra.mrb[0].mxu1 %vm333_vm2, %v17571_v51  ;;  %v15907_v43 = vpack.c.bf16 %v12110_v39, %v12109_v34  ;;  %v12146_v34 = vld [vmem:[%s20551_s3 + $0x208] sm:$0xff] }
 0x178   : > { %15902 = vmatpush3.bf16.msra.mxu1 %v17627_v6  ;;  %14209 = vmatprep.mubr.msk.f32.mxu0 %vm333_vm2, %v17561_v47  ;;  %v12112_v6 = vld [vmem:[%s20551_s3 + $0x1f8] sm:$0xff]  ;;  %v20704_v39 = vld [vmem:[#allocation8_spill] sm:$0xff] }
 0x179   : > { %14462 = vmatprep.mubr.msk.f32.mxu1 %vm333_vm2, %v17582_v54  ;;  %15904 = vmatprep.subr.bf16.mxu1 %v15903_v63  ;;  %v15911_v62 = vpack.c.bf16 %v12112_v6, %v12111_v33  ;;  %v3213_v33 = vld [vmem:[#allocation2 + $0x110] sm:$0xff]  ;;  %v17986_v6 = vld [vmem:[#allocation2 + $0x108] sm:$0xff] }
 0x17a   : > { %15842 = vmatpush3.bf16.msra.mxu0 %v15839_v61  ;;  %v15847_v61 = vpack.c.bf16 %v11952_v59, %v11951_v3  ;;  %v17980_v3 = vld [vmem:[#allocation2 + $0x100] sm:$0xff]  ;;  %v20707_v59 = vld [vmem:[#allocation9_spill] sm:$0xff] }
 0x17b   : > { %14210 = vmatmul.mubr.msk.f32.gmra.mrb[36].mxu0 %vm333_vm2, %v17573_v8  ;;  %14463 = vmatmul.mubr.msk.f32.gmra.mrb[2].mxu1 %vm333_vm2, %v17598_v60 }
 0x17c   : > { %14212 = vmatprep.mubr.msk.f32.mxu0 %vm333_vm2, %v17584_v55  ;;  %14465 = vmatprep.mubr.msk.f32.mxu1 %vm333_vm2, %v17610_v0 }
 0x17d   : > { %15906 = vmatpush3.bf16.msra.mxu1 %v15903_v63  ;;  %15844 = vmatprep.subr.bf16.mxu0 %v15843_v42  ;;  %v17893_v63 = vpack.c.bf16 %v12146_v34, %v12145_v38  ;;  %v3214_v38 = vld [vmem:[#allocation2 + $0x118] sm:$0xff]  ;;  %v12147_v34 = vld [vmem:[%s20551_s3 + $0x210] sm:$0xff] }
 0x17e   : > { %15908 = vmatprep.subr.bf16.mxu1 %v15907_v43  ;;  %15846 = vmatpush3.bf16.msra.mxu0 %v15843_v42  ;;  %v20705_v42 = vld [vmem:[#allocation7_spill] sm:$0xff] }
 0x17f   : > { %14213 = vmatmul.mubr.msk.f32.gmra.mrb[38].mxu0 %vm333_vm2, %v17593_v57  ;;  %14466 = vmatmul.mubr.msk.f32.gmra.mrb[4].mxu1 %vm333_vm2, %v17623_v4 }
 0x180   : > { %14215 = vmatprep.mubr.msk.f32.mxu0 %vm333_vm2, %v17612_v1  ;;  %14468 = vmatprep.mubr.msk.f32.mxu1 %vm333_vm2, %v17633_v7 }
 0x181   : > { %15910 = vmatpush3.bf16.msra.mxu1 %v15907_v43  ;;  %15848 = vmatprep.subr.bf16.mxu0 %v15847_v61  ;;  %v20706_v43 = vld [vmem:[#allocation10_spill] sm:$0xff] }
 0x182   : > { %15912 = vmatprep.subr.bf16.mxu1 %v15911_v62  ;;  %15850 = vmatpush3.bf16.msra.mxu0 %v15847_v61  ;;  %v20708_v61 = vld [vmem:[#allocation11_spill] sm:$0xff] }
 0x183   : > { %14216 = vmatmul.mubr.msk.f32.gmra.mrb[40].mxu0 %vm333_vm2, %v17625_v5  ;;  %14469 = vmatmul.mubr.msk.f32.gmra.mrb[6].mxu1 %vm333_vm2, %v17642_v10 }
 0x184   : > { %14218 = vmatprep.mubr.msk.f32.mxu0 %vm333_vm2, %v17635_v9  ;;  %14471 = vmatprep.mubr.msk.f32.mxu1 %vm333_vm2, %v17651_v12 }
 0x185   : > { %15914 = vmatpush3.bf16.msra.mxu1 %v15911_v62  ;;  %v20709_v62 = vld [vmem:[#allocation5_spill] sm:$0xff] }
 0x186   : > { %15916 = vmatprep.subr.bf16.mxu1 %v17893_v63 }
 0x187   : > { %14219 = vmatmul.mubr.msk.f32.gmra.mrb[42].mxu0 %vm333_vm2, %v17644_v11  ;;  %14472 = vmatmul.mubr.msk.f32.gmra.mrb[8].mxu1 %vm333_vm2, %v17659_v16 }
 0x188   : > { %14221 = vmatprep.mubr.msk.f32.mxu0 %vm333_vm2, %v17653_v15  ;;  %14474 = vmatprep.mubr.msk.f32.mxu1 %vm333_vm2, %v17667_v18 }
 0x18b   : > { %14222 = vmatmul.mubr.msk.f32.gmra.mrb[44].mxu0 %vm333_vm2, %v17661_v17  ;;  %14475 = vmatmul.mubr.msk.f32.gmra.mrb[10].mxu1 %vm333_vm2, %v17675_v20 }
 0x18c   : > { %14224 = vmatprep.mubr.msk.f32.mxu0 %vm333_vm2, %v17669_v19  ;;  %14477 = vmatprep.mubr.msk.f32.mxu1 %vm333_vm2, %v17683_v22 }
 0x18f   : > { %14225 = vmatmul.mubr.msk.f32.gmra.mrb[46].mxu0 %vm333_vm2, %v17677_v21  ;;  %14478 = vmatmul.mubr.msk.f32.gmra.mrb[12].mxu1 %vm333_vm2, %v17691_v24 }
 0x190   : > { %14227 = vmatprep.mubr.msk.f32.mxu0 %vm333_vm2, %v17685_v23  ;;  %14480 = vmatprep.mubr.msk.f32.mxu1 %vm333_vm2, %v17699_v26 }
 0x193   : > { %14228 = vmatmul.mubr.msk.f32.gmra.mrb[48].mxu0 %vm333_vm2, %v17693_v25  ;;  %14481 = vmatmul.mubr.msk.f32.gmra.mrb[14].mxu1 %vm333_vm2, %v17707_v27 }
 0x194   : > { %14230 = vmatprep.mubr.msk.f32.mxu0 %vm333_vm2, %v17701_v14  ;;  %14483 = vmatprep.mubr.msk.f32.mxu1 %vm333_vm2, %v17715_v29 }
 0x197   : > { %14231 = vmatmul.mubr.msk.f32.gmra.mrb[50].mxu0 %vm333_vm2, %v17709_v28  ;;  %14484 = vmatmul.mubr.msk.f32.gmra.mrb[16].mxu1 %vm333_vm2, %v17723_v31 }
 0x198   : > { %14233 = vmatprep.mubr.msk.f32.mxu0 %vm333_vm2, %v17717_v30  ;;  %14486 = vmatprep.mubr.msk.f32.mxu1 %vm333_vm2, %v17731_v35 }
 0x19b   : > { %14234 = vmatmul.mubr.msk.f32.gmra.mrb[52].mxu0 %vm333_vm2, %v17725_v32  ;;  %14487 = vmatmul.mubr.msk.f32.gmra.mrb[18].mxu1 %vm333_vm2, %v17739_v37 }
 0x19c   : > { %14236 = vmatprep.mubr.msk.f32.mxu0 %vm333_vm2, %v17733_v36  ;;  %14489 = vmatprep.mubr.msk.f32.mxu1 %vm333_vm2, %v17747_v41 }
 0x19f   : > { %14237 = vmatmul.mubr.msk.f32.gmra.mrb[54].mxu0 %vm333_vm2, %v17741_v40  ;;  %14490 = vmatmul.mubr.msk.f32.gmra.mrb[20].mxu1 %vm333_vm2, %v17755_v45 }
 0x1a0   : > { %14239 = vmatprep.mubr.msk.f32.mxu0 %vm333_vm2, %v17749_v44  ;;  %14492 = vmatprep.mubr.msk.f32.mxu1 %vm333_vm2, %v17763_v48 }
 0x1a3   : > { %14240 = vmatmul.mubr.msk.f32.gmra.mrb[56].mxu0 %vm333_vm2, %v17757_v46  ;;  %14493 = vmatmul.mubr.msk.f32.gmra.mrb[22].mxu1 %vm333_vm2, %v17771_v50 }
 0x1a4   : > { %14242 = vmatprep.mubr.msk.f32.mxu0 %vm333_vm2, %v17765_v49  ;;  %14495 = vmatprep.mubr.msk.f32.mxu1 %vm333_vm2, %v17779_v53 }
 0x1a7   : > { %14243 = vmatmul.mubr.msk.f32.gmra.mrb[58].mxu0 %vm333_vm2, %v17773_v52  ;;  %14496 = vmatmul.mubr.msk.f32.gmra.mrb[24].mxu1 %vm333_vm2, %v17787_v58 }
 0x1a8   : > { %14245 = vmatprep.mubr.msk.f32.mxu0 %vm333_vm2, %v17781_v56  ;;  %14498 = vmatprep.mubr.msk.f32.mxu1 %vm333_vm2, %v20704_v39 }
 0x1ab   : > { %14246 = vmatmul.mubr.msk.f32.gmra.mrb[60].mxu0 %vm333_vm2, %v20705_v42  ;;  %14499 = vmatmul.mubr.msk.f32.gmra.mrb[26].mxu1 %vm333_vm2, %v20706_v43  ;;  %v12149_v42 = vld [vmem:[%s20551_s3 + $0x220] sm:$0xff] }
 0x1ac   : > { %14248 = vmatprep.mubr.msk.f32.mxu0 %vm333_vm2, %v20707_v59  ;;  %14501 = vmatprep.mubr.msk.f32.mxu1 %vm333_vm2, %v17980_v3  ;;  %v20710_v59 = vld [vmem:[#allocation6_spill] sm:$0xff] }
 0x1af   : > { %14249 = vmatmul.mubr.msk.f32.gmra.mrb[62].mxu0 %vm333_vm2, %v20708_v61  ;;  %14502 = vmatmul.mubr.msk.f32.gmra.mrb[28].mxu1 %vm333_vm2, %v17986_v6  ;;  %v3578_v61 = vld [vmem:[#allocation2 + $0x140] sm:$0xff] }
 0x1b0   : > { %14267 = vmatprep.mubr.msk.f32.mxu0 %vm333_vm2, %v20709_v62  ;;  %14504 = vmatprep.mubr.msk.f32.mxu1 %vm333_vm2, %v3213_v33  ;;  %v15919_v33 = vpack.c.bf16 %v12148_v2, %v12147_v34  ;;  %v3579_v62 = vld [vmem:[#allocation2 + $0x148] sm:$0xff]  ;;  %v3585_v34 = vld [vmem:[#allocation2 + $0x178] sm:$0xff] }
 0x1b3   : > { %14268 = vmatmul.mubr.msk.f32.vlgmr.msra.gmra.mrb[32].mxu0 %vm333_vm2, %v20710_v59  ;;  %14505 = vmatmul.mubr.msk.f32.gmra.mrb[30].mxu1 %vm333_vm2, %v3214_v38  ;;  %v12150_v59 = vld [vmem:[%s20551_s3 + $0x228] sm:$0xff]  ;;  %v12151_v38 = vld [vmem:[%s20551_s3 + $0x230] sm:$0xff] }
 0x1b4   : > { %14270 = vmatprep.mubr.msk.f32.mxu0 %vm333_vm2, %v17550_v13  ;;  %14523 = vmatprep.mubr.msk.f32.mxu1 %vm333_vm2, %v3578_v61  ;;  %v3580_v13 = vld [vmem:[#allocation2 + $0x150] sm:$0xff]  ;;  %v15923_v2 = vpack.c.bf16 %v12150_v59, %v12149_v42  ;;  %v3582_v61 = vld [vmem:[#allocation2 + $0x160] sm:$0xff] }
 0x1b5   : > { %v3584_v42 = vld [vmem:[#allocation2 + $0x170] sm:$0xff] }
 0x1b7   : > { %14271 = vmatmul.mubr.msk.f32.gmra.mrb[34].mxu0 %vm333_vm2, %v17571_v51  ;;  %14524 = vmatmul.mubr.msk.f32.vlgmr.msra.gmra.mrb[0].mxu1 %vm333_vm2, %v3579_v62  ;;  %v3581_v51 = vld [vmem:[#allocation2 + $0x158] sm:$0xff]  ;;  %v4571_v62 = vld [vmem:[%s20553_s5 + $0x28] sm:$0xff] }
 0x1b8   : > { %15918 = vmatpush3.bf16.msra.mxu1 %v17893_v63  ;;  %14273 = vmatprep.mubr.msk.f32.mxu0 %vm333_vm2, %v17582_v54  ;;  %v12152_v54 = vld [vmem:[%s20551_s3 + $0x238] sm:$0xff]  ;;  %v3583_v63 = vld [vmem:[#allocation2 + $0x168] sm:$0xff] }
 0x1b9   : > { %14526 = vmatprep.mubr.msk.f32.mxu1 %vm333_vm2, %v3580_v13  ;;  %15920 = vmatprep.subr.bf16.mxu1 %v15919_v33 }
 0x1bb   : > { %14274 = vmatmul.mubr.msk.f32.gmra.mrb[36].mxu0 %vm333_vm2, %v17598_v60  ;;  %14527 = vmatmul.mubr.msk.f32.gmra.mrb[2].mxu1 %vm333_vm2, %v3581_v51  ;;  %v15927_v60 = vpack.c.bf16 %v12152_v54, %v12151_v38  ;;  %v4572_v38 = vld [vmem:[%s20553_s5 + $0x30] sm:$0xff]  ;;  %v4573_v54 = vld [vmem:[%s20553_s5 + $0x38] sm:$0xff] }
 0x1bc   : > { %14276 = vmatprep.mubr.msk.f32.mxu0 %vm333_vm2, %v17610_v0  ;;  %14529 = vmatprep.mubr.msk.f32.mxu1 %vm333_vm2, %v3582_v61  ;;  %v3586_v0 = vld [vmem:[#allocation2 + $0x180] sm:$0xff] }
 0x1bd   : > { %15922 = vmatpush3.bf16.msra.mxu1 %v15919_v33  ;;  %v20712_v33 = vld [vmem:[#allocation4_spill] sm:$0xff] }
 0x1be   : > { %15924 = vmatprep.subr.bf16.mxu1 %v15923_v2 }
 0x1bf   : > { %14277 = vmatmul.mubr.msk.f32.gmra.mrb[38].mxu0 %vm333_vm2, %v17623_v4  ;;  %14530 = vmatmul.mubr.msk.f32.gmra.mrb[4].mxu1 %vm333_vm2, %v3583_v63  ;;  %v3587_v4 = vld [vmem:[#allocation2 + $0x188] sm:$0xff] }
 0x1c0   : > { %14279 = vmatprep.mubr.msk.f32.mxu0 %vm333_vm2, %v17633_v7  ;;  %14532 = vmatprep.mubr.msk.f32.mxu1 %vm333_vm2, %v3584_v42  ;;  %v3588_v7 = vld [vmem:[#allocation2 + $0x190] sm:$0xff] }
 0x1c1   : > { %15926 = vmatpush3.bf16.msra.mxu1 %v15923_v2 }
 0x1c2   : > { %15928 = vmatprep.subr.bf16.mxu1 %v15927_v60 }
 0x1c3   : > { %14280 = vmatmul.mubr.msk.f32.gmra.mrb[40].mxu0 %vm333_vm2, %v17642_v10  ;;  %14533 = vmatmul.mubr.msk.f32.gmra.mrb[6].mxu1 %vm333_vm2, %v3585_v34  ;;  %v3589_v10 = vld [vmem:[#allocation2 + $0x198] sm:$0xff] }
 0x1c4   : > { %14282 = vmatprep.mubr.msk.f32.mxu0 %vm333_vm2, %v17651_v12  ;;  %14535 = vmatprep.mubr.msk.f32.mxu1 %vm333_vm2, %v3586_v0  ;;  %v3590_v12 = vld [vmem:[#allocation2 + $0x1a0] sm:$0xff] }
 0x1c5   : > { %15930 = vmatpush3.bf16.msra.mxu1 %v15927_v60  ;;  %v15959_v60 = vpack.c.bf16 %v4573_v54, %v4572_v38 }
 0x1c7   : > { %14283 = vmatmul.mubr.msk.f32.gmra.mrb[42].mxu0 %vm333_vm2, %v17659_v16  ;;  %14536 = vmatmul.mubr.msk.f32.gmra.mrb[8].mxu1 %vm333_vm2, %v3587_v4  ;;  %v3591_v16 = vld [vmem:[#allocation2 + $0x1a8] sm:$0xff]  ;;  %v12258_v4 = vld [vmem:[%s20553_s5 + $0x80] sm:$0xff] }
 0x1c8   : > { %14285 = vmatprep.mubr.msk.f32.mxu0 %vm333_vm2, %v17667_v18  ;;  %14538 = vmatprep.mubr.msk.f32.mxu1 %vm333_vm2, %v3588_v7  ;;  %v3592_v18 = vld [vmem:[#allocation2 + $0x1b0] sm:$0xff]  ;;  %v12259_v7 = vld [vmem:[%s20553_s5 + $0x88] sm:$0xff] }
 0x1cb   : > { %14286 = vmatmul.mubr.msk.f32.gmra.mrb[44].mxu0 %vm333_vm2, %v17675_v20  ;;  %14539 = vmatmul.mubr.msk.f32.gmra.mrb[10].mxu1 %vm333_vm2, %v3589_v10  ;;  %v3593_v20 = vld [vmem:[#allocation2 + $0x1b8] sm:$0xff]  ;;  %v18233_v10 = vpack.c.bf16 %v12259_v7, %v12258_v4 }
 0x1cc   : > { %14288 = vmatprep.mubr.msk.f32.mxu0 %vm333_vm2, %v17683_v22  ;;  %14541 = vmatprep.mubr.msk.f32.mxu1 %vm333_vm2, %v3590_v12  ;;  %v3594_v22 = vld [vmem:[#allocation2 + $0x1c0] sm:$0xff] }
 0x1cf   : > { %14289 = vmatmul.mubr.msk.f32.gmra.mrb[46].mxu0 %vm333_vm2, %v17691_v24  ;;  %14542 = vmatmul.mubr.msk.f32.gmra.mrb[12].mxu1 %vm333_vm2, %v3591_v16  ;;  %v3595_v24 = vld [vmem:[#allocation2 + $0x1c8] sm:$0xff] }
 0x1d0   : > { %14291 = vmatprep.mubr.msk.f32.mxu0 %vm333_vm2, %v17699_v26  ;;  %14544 = vmatprep.mubr.msk.f32.mxu1 %vm333_vm2, %v3592_v18  ;;  %v3596_v26 = vld [vmem:[#allocation2 + $0x1d0] sm:$0xff] }
 0x1d3   : > { %14292 = vmatmul.mubr.msk.f32.gmra.mrb[48].mxu0 %vm333_vm2, %v17707_v27  ;;  %14545 = vmatmul.mubr.msk.f32.gmra.mrb[14].mxu1 %vm333_vm2, %v3593_v20  ;;  %v3597_v27 = vld [vmem:[#allocation2 + $0x1d8] sm:$0xff] }
 0x1d4   : > { %14294 = vmatprep.mubr.msk.f32.mxu0 %vm333_vm2, %v17715_v29  ;;  %14547 = vmatprep.mubr.msk.f32.mxu1 %vm333_vm2, %v3594_v22  ;;  %v3598_v29 = vld [vmem:[#allocation2 + $0x1e0] sm:$0xff] }
 0x1d7   : > { %14295 = vmatmul.mubr.msk.f32.gmra.mrb[50].mxu0 %vm333_vm2, %v17723_v31  ;;  %14548 = vmatmul.mubr.msk.f32.gmra.mrb[16].mxu1 %vm333_vm2, %v3595_v24  ;;  %v3599_v31 = vld [vmem:[#allocation2 + $0x1e8] sm:$0xff] }
 0x1d8   : > { %14297 = vmatprep.mubr.msk.f32.mxu0 %vm333_vm2, %v17731_v35  ;;  %14550 = vmatprep.mubr.msk.f32.mxu1 %vm333_vm2, %v3596_v26  ;;  %v3600_v35 = vld [vmem:[#allocation2 + $0x1f0] sm:$0xff] }
 0x1db   : > { %14298 = vmatmul.mubr.msk.f32.gmra.mrb[52].mxu0 %vm333_vm2, %v17739_v37  ;;  %14551 = vmatmul.mubr.msk.f32.gmra.mrb[18].mxu1 %vm333_vm2, %v3597_v27  ;;  %v3601_v37 = vld [vmem:[#allocation2 + $0x1f8] sm:$0xff] }
 0x1dc   : > { %14300 = vmatprep.mubr.msk.f32.mxu0 %vm333_vm2, %v17747_v41  ;;  %14553 = vmatprep.mubr.msk.f32.mxu1 %vm333_vm2, %v3598_v29  ;;  %v3602_v41 = vld [vmem:[#allocation2 + $0x200] sm:$0xff] }
 0x1df   : > { %14301 = vmatmul.mubr.msk.f32.gmra.mrb[54].mxu0 %vm333_vm2, %v17755_v45  ;;  %14554 = vmatmul.mubr.msk.f32.gmra.mrb[20].mxu1 %vm333_vm2, %v3599_v31  ;;  %v3603_v45 = vld [vmem:[#allocation2 + $0x208] sm:$0xff] }
 0x1e0   : > { %14303 = vmatprep.mubr.msk.f32.mxu0 %vm333_vm2, %v17763_v48  ;;  %14556 = vmatprep.mubr.msk.f32.mxu1 %vm333_vm2, %v3600_v35  ;;  %v3604_v48 = vld [vmem:[#allocation2 + $0x210] sm:$0xff] }
 0x1e3   : > { %14304 = vmatmul.mubr.msk.f32.gmra.mrb[56].mxu0 %vm333_vm2, %v17771_v50  ;;  %14557 = vmatmul.mubr.msk.f32.gmra.mrb[22].mxu1 %vm333_vm2, %v3601_v37  ;;  %v3605_v50 = vld [vmem:[#allocation2 + $0x218] sm:$0xff] }
 0x1e4   : > { %14306 = vmatprep.mubr.msk.f32.mxu0 %vm333_vm2, %v17779_v53  ;;  %14559 = vmatprep.mubr.msk.f32.mxu1 %vm333_vm2, %v3602_v41  ;;  %v20711_v53 = vld [vmem:[#allocation3_spill] sm:$0xff] }
 0x1e7   : > { %14307 = vmatmul.mubr.msk.f32.gmra.mrb[58].mxu0 %vm333_vm2, %v17787_v58  ;;  %14560 = vmatmul.mubr.msk.f32.gmra.mrb[24].mxu1 %vm333_vm2, %v3603_v45  ;;  %v3608_v58 = vld [vmem:[#allocation2 + $0x230] sm:$0xff] }
 0x1e8   : > { %14309 = vmatprep.mubr.msk.f32.mxu0 %vm333_vm2, %v20704_v39  ;;  %14562 = vmatprep.mubr.msk.f32.mxu1 %vm333_vm2, %v3604_v48  ;;  %v3609_v39 = vld [vmem:[#allocation2 + $0x238] sm:$0xff] }
 0x1eb   : > { %14310 = vmatmul.mubr.msk.f32.gmra.mrb[60].mxu0 %vm333_vm2, %v20706_v43  ;;  %14563 = vmatmul.mubr.msk.f32.gmra.mrb[26].mxu1 %vm333_vm2, %v3605_v50  ;;  %v4569_v43 = vld [vmem:[%s20553_s5 + $0x18] sm:$0xff] }
 0x1ec   : > { %14312 = vmatprep.mubr.msk.f32.mxu0 %vm333_vm2, %v17980_v3  ;;  %14565 = vmatprep.mubr.msk.f32.mxu1 %vm333_vm2, %v20711_v53 }
 0x1ef   : > { %14313 = vmatmul.mubr.msk.f32.gmra.mrb[62].mxu0 %vm333_vm2, %v17986_v6  ;;  %14566 = vmatmul.mubr.msk.f32.gmra.mrb[28].mxu1 %vm333_vm2, %v20712_v33  ;;  %v4570_v6 = vld [vmem:[%s20553_s5 + $0x20] sm:$0xff] }
 0x1f0   : > { %14568 = vmatprep.mubr.msk.f32.mxu1 %vm333_vm2, %v3608_v58  ;;  %v15955_v59 = vpack.c.bf16 %v4571_v62, %v4570_v6 }
 0x1f3   : > { %14569 = vmatmul.mubr.msk.f32.gmra.mrb[30].mxu1 %vm333_vm2, %v3609_v39 }
 0x1f4   : > { %14587 = vmatprep.mubr.msk.f32.mxu1 %vm333_vm2, %v17561_v47  ;;  %v12186_v47 = vld [vmem:[%s20553_s5 + $0x40] sm:$0xff] }
 0x1f7   : > { %14588 = vmatmul.mubr.msk.f32.vlgmr.msra.gmra.mrb[0].mxu1 %vm333_vm2, %v17573_v8  ;;  %v12187_v8 = vld [vmem:[%s20553_s5 + $0x48] sm:$0xff] }
 0x1f8   : > { %14590 = vmatprep.mubr.msk.f32.mxu1 %vm333_vm2, %v17584_v55  ;;  %v15931_v55 = vpack.c.bf16 %v12187_v8, %v12186_v47 }
 0x1fa   : > { %15932 = vmatprep.subr.bf16.mxu0 %v15931_v55 }
 0x1fb   : > { %14591 = vmatmul.mubr.msk.f32.gmra.mrb[2].mxu1 %vm333_vm2, %v17593_v57  ;;  %15934 = vmatpush3.bf16.msra.mxu0 %v15931_v55  ;;  %v12188_v57 = vld [vmem:[%s20553_s5 + $0x50] sm:$0xff] }
 0x1fc   : > { %14593 = vmatprep.mubr.msk.f32.mxu1 %vm333_vm2, %v17612_v1  ;;  %v12189_v1 = vld [vmem:[%s20553_s5 + $0x58] sm:$0xff] }
 0x1ff   : > { %14594 = vmatmul.mubr.msk.f32.gmra.mrb[4].mxu1 %vm333_vm2, %v17625_v5  ;;  %v20713_v5 = vld [vmem:[#allocation7_spill] sm:$0xff] }
 0x200   : > { %14596 = vmatprep.mubr.msk.f32.mxu1 %vm333_vm2, %v17635_v9  ;;  %v15935_v9 = vpack.c.bf16 %v12189_v1, %v12188_v57 }
 0x202   : > { %15936 = vmatprep.subr.bf16.mxu0 %v15935_v9 }
 0x203   : > { %14597 = vmatmul.mubr.msk.f32.gmra.mrb[6].mxu1 %vm333_vm2, %v17644_v11  ;;  %v20714_v11 = vld [vmem:[#allocation9_spill] sm:$0xff]  ;;  %15938 = vmatpush3.bf16.msra.mxu0 %v15935_v9 }
 0x204   : > { %14599 = vmatprep.mubr.msk.f32.mxu1 %vm333_vm2, %v17653_v15  ;;  %v20715_v15 = vld [vmem:[#allocation11_spill] sm:$0xff] }
 0x207   : > { %14600 = vmatmul.mubr.msk.f32.gmra.mrb[8].mxu1 %vm333_vm2, %v17661_v17  ;;  %v20716_v17 = vld [vmem:[#allocation12_spill] sm:$0xff] }
 0x208   : > { %14602 = vmatprep.mubr.msk.f32.mxu1 %vm333_vm2, %v17669_v19  ;;  %v4003_v19 = vld [vmem:[#allocation2 + $0x350] sm:$0xff] }
 0x20b   : > { %14603 = vmatmul.mubr.msk.f32.gmra.mrb[10].mxu1 %vm333_vm2, %v17677_v21  ;;  %v20717_v21 = vld [vmem:[#allocation13_spill] sm:$0xff] }
 0x20c   : > { %14605 = vmatprep.mubr.msk.f32.mxu1 %vm333_vm2, %v17685_v23  ;;  %v4004_v23 = vld [vmem:[#allocation2 + $0x358] sm:$0xff] }
 0x20f   : > { %14606 = vmatmul.mubr.msk.f32.gmra.mrb[12].mxu1 %vm333_vm2, %v17693_v25  ;;  %v12190_v25 = vld [vmem:[%s20553_s5 + $0x60] sm:$0xff] }
 0x210   : > { %14608 = vmatprep.mubr.msk.f32.mxu1 %vm333_vm2, %v17701_v14  ;;  %v12191_v14 = vld [vmem:[%s20553_s5 + $0x68] sm:$0xff] }
 0x213   : > { %14609 = vmatmul.mubr.msk.f32.gmra.mrb[14].mxu1 %vm333_vm2, %v17709_v28  ;;  %v15939_v28 = vpack.c.bf16 %v12191_v14, %v12190_v25 }
 0x214   : > { %14611 = vmatprep.mubr.msk.f32.mxu1 %vm333_vm2, %v17717_v30  ;;  %v12192_v30 = vld [vmem:[%s20553_s5 + $0x70] sm:$0xff] }
 0x215   : > { %15940 = vmatprep.subr.bf16.mxu0 %v15939_v28 }
 0x216   : > { %15942 = vmatpush3.bf16.msra.mxu0 %v15939_v28 }
 0x217   : > { %14612 = vmatmul.mubr.msk.f32.gmra.mrb[16].mxu1 %vm333_vm2, %v17725_v32  ;;  %v12193_v32 = vld [vmem:[%s20553_s5 + $0x78] sm:$0xff] }
 0x218   : > { %14614 = vmatprep.mubr.msk.f32.mxu1 %vm333_vm2, %v17733_v36  ;;  %v15943_v36 = vpack.c.bf16 %v12193_v32, %v12192_v30 }
 0x21a   : > { %15944 = vmatprep.subr.bf16.mxu0 %v15943_v36 }
 0x21b   : > { %14615 = vmatmul.mubr.msk.f32.gmra.mrb[18].mxu1 %vm333_vm2, %v17741_v40  ;;  %15946 = vmatpush3.bf16.msra.mxu0 %v15943_v36  ;;  %v4574_v40 = vld [vmem:[#allocation2 + $0x120] sm:$0xff] }
 0x21c   : > { %14617 = vmatprep.mubr.msk.f32.mxu1 %vm333_vm2, %v17749_v44  ;;  %14651 = vmatprep.mubr.msk.f32.mxu0 %vm333_vm2, %v4574_v40  ;;  %v4575_v44 = vld [vmem:[#allocation2 + $0x128] sm:$0xff] }
 0x21e   : > { %14652 = vmatmul.mubr.msk.f32.vlgmr.msra.gmra.mrb[64].mxu0 %vm333_vm2, %v4575_v44 }
 0x21f   : > { %14618 = vmatmul.mubr.msk.f32.gmra.mrb[20].mxu1 %vm333_vm2, %v17757_v46  ;;  %v4566_v46 = vld [vmem:[%s20553_s5] sm:$0xff] }
 0x220   : > { %14620 = vmatprep.mubr.msk.f32.mxu1 %vm333_vm2, %v17765_v49  ;;  %v4567_v49 = vld [vmem:[%s20553_s5 + $0x8] sm:$0xff] }
 0x223   : > { %14621 = vmatmul.mubr.msk.f32.gmra.mrb[22].mxu1 %vm333_vm2, %v17773_v52  ;;  %v15947_v52 = vpack.c.bf16 %v4567_v49, %v4566_v46 }
 0x224   : > { %14623 = vmatprep.mubr.msk.f32.mxu1 %vm333_vm2, %v17781_v56  ;;  %v4568_v56 = vld [vmem:[%s20553_s5 + $0x10] sm:$0xff] }
 0x225   : > { %15948 = vmatprep.subr.bf16.mxu0 %v15947_v52  ;;  %v15951_v3 = vpack.c.bf16 %v4569_v43, %v4568_v56 }
 0x226   : > { %15950 = vmatpush3.bf16.msra.mxu0 %v15947_v52 }
 0x227   : > { %14624 = vmatmul.mubr.msk.f32.gmra.mrb[24].mxu1 %vm333_vm2, %v20713_v5  ;;  %15952 = vmatprep.subr.bf16.mxu0 %v15951_v3  ;;  %v18287_v5 = vld [vmem:[%s20552_s4] ss:$0 sm:$0xff] }
 0x228   : > { %14626 = vmatprep.mubr.msk.f32.mxu1 %vm333_vm2, %v20714_v11 }
 0x22a   : > { %15954 = vmatpush3.bf16.msra.mxu0 %v15951_v3 }
 0x22b   : > { %14627 = vmatmul.mubr.msk.f32.gmra.mrb[26].mxu1 %vm333_vm2, %v20715_v15  ;;  %15956 = vmatprep.subr.bf16.mxu0 %v15955_v59 }
 0x22c   : > { %14629 = vmatprep.mubr.msk.f32.mxu1 %vm333_vm2, %v20716_v17 }
 0x22e   : > { %15958 = vmatpush3.bf16.msra.mxu0 %v15955_v59 }
 0x22f   : > { %14630 = vmatmul.mubr.msk.f32.gmra.mrb[28].mxu1 %vm333_vm2, %v20717_v21  ;;  %15960 = vmatprep.subr.bf16.mxu0 %v15959_v60 }
 0x230   : > { %14632 = vmatprep.mubr.msk.f32.mxu1 %vm333_vm2, %v4003_v19 }
 0x232   : > { %15962 = vmatpush3.bf16.msra.mxu0 %v15959_v60 }
 0x233   : > { %14633 = vmatmul.mubr.msk.f32.gmra.mrb[30].mxu1 %vm333_vm2, %v4004_v23  ;;  %15964 = vmatprep.subr.bf16.mxu0 %v18233_v10 }
 0x286   : > { %v14269_v13 = vpop.f32.mrb[32].mxu0 }
 0x287   : > { %v2203_v51 = vpop.f32.mrb[33].mxu0 }
 0x28a   : > { %v14272_v2 = vpop.f32.mrb[34].mxu0 }
 0x28b   : > { %v2213_v61 = vpop.f32.mrb[35].mxu0 }
 0x28e   : > { %v14275_v63 = vpop.f32.mrb[36].mxu0 }
 0x28f   : > { %v2223_v42 = vpop.f32.mrb[37].mxu0 }
 0x292   : > { %v18223_v34 = vpop.f32.mrb[38].mxu0 }
 0x293   : > { %v18225_v0 = vpop.f32.mrb[39].mxu0 }
 0x296   : > { %v18235_v12 = vpop.f32.mrb[40].mxu0 }
 0x297   : > { %v18237_v16 = vpop.f32.mrb[41].mxu0 }
 0x29a   : > { %v18240_v18 = vpop.f32.mrb[42].mxu0 }
 0x29b   : > { %v18242_v20 = vpop.f32.mrb[43].mxu0 }
 0x29e   : > { %v18244_v22 = vpop.f32.mrb[44].mxu0 }
 0x29f   : > { %v18246_v24 = vpop.f32.mrb[45].mxu0 }
 0x2a2   : > { %v18248_v26 = vpop.f32.mrb[46].mxu0 }
 0x2a3   : > { %v18250_v27 = vpop.f32.mrb[47].mxu0 }
 0x2a6   : > { %v18252_v29 = vpop.f32.mrb[48].mxu0 }
 0x2a7   : > { %v18254_v31 = vpop.f32.mrb[49].mxu0 }
 0x2aa   : > { %v18256_v35 = vpop.f32.mrb[50].mxu0 }
 0x2ab   : > { %v18258_v37 = vpop.f32.mrb[51].mxu0 }
 0x2ae   : > { %v18260_v41 = vpop.f32.mrb[52].mxu0 }
 0x2af   : > { %v18262_v45 = vpop.f32.mrb[53].mxu0 }
 0x2b2   : > { %v18264_v48 = vpop.f32.mrb[54].mxu0 }
 0x2b3   : > { %v18266_v50 = vpop.f32.mrb[55].mxu0 }
 0x2b6   : > { %v18268_v53 = vpop.f32.mrb[56].mxu0 }
 0x2b7   : > { %v18270_v58 = vpop.f32.mrb[57].mxu0 }
 0x2ba   : > { %v18272_v33 = vpop.f32.mrb[58].mxu0 }
 0x2bb   : > { %v18274_v39 = vpop.f32.mrb[59].mxu0 }
 0x2be   : > { %v18276_v47 = vpop.f32.mrb[60].mxu0 }
 0x2bf   : > { %v18278_v8 = vpop.f32.mrb[61].mxu0 }
 0x2c2   : > { %v18280_v55 = vpop.f32.mrb[62].mxu0 }
 0x2c3   : > { %v18282_v57 = vpop.f32.mrb[63].mxu0 }
 0x2ca   : > { %v14589_v1 = vpop.f32.mrb[0].mxu1 }
 0x2cb   : > { %v16227_v9 = vadd.f32 %v14589_v1, %v14269_v13  ;;  %v4176_v11 = vpop.f32.mrb[1].mxu1 }
 0x2cc   : > { %v16228_v15 = vadd.f32 %v4176_v11, %v2203_v51 }
 0x2cd   : > { %v4375_v17 = vadd.f32 %v16227_v9, %v18287_v5 }
 0x2ce   : > { %v4374_v19 = vadd.f32 %v16228_v15, %v18287_v5  ;;  %v14592_v21 = vpop.f32.mrb[2].mxu1 }
 0x2cf   : > { %v4407_v23 = vmax.f32 %v4375_v17, 0.0  ;;  %v16229_v25 = vadd.f32 %v14592_v21, %v14272_v2  ;;  %v4186_v14 = vpop.f32.mrb[3].mxu1 }
 0x2d0   : > { %v4406_v28 = vmax.f32 %v4374_v19, 0.0  ;;  %v16230_v30 = vadd.f32 %v4186_v14, %v2213_v61 }
 0x2d1   : > { %4439 = vst.msk [vmem:[#allocation2 + $0x138] sm:$0xff] %vm333_vm2, %v4407_v23  ;;  %4503 = vst.msk [vmem:[#allocation2 + $0x257] sm:$0xff] %vm333_vm2, %v4407_v23  ;;  %v4377_v32 = vadd.f32 %v16229_v25, %v18287_v5 }
 0x2d2   : > { %4471 = vst.msk [vmem:[#allocation2 + $0x19] sm:$0x7f] %vm818_vm4, %v4407_v23  ;;  %v4376_v36 = vadd.f32 %v16230_v30, %v18287_v5  ;;  %v14595_v40 = vpop.f32.mrb[4].mxu1 }
 0x2d3   : > { %4438 = vst.msk [vmem:[#allocation2 + $0x130] sm:$0xff] %vm333_vm2, %v4406_v28  ;;  %4470 = vst.msk [vmem:[#allocation2 + $0x11] sm:$0xff] %vm333_vm2, %v4406_v28  ;;  %v4409_v44 = vmax.f32 %v4377_v32, 0.0  ;;  %v16231_v46 = vadd.f32 %v14595_v40, %v14275_v63  ;;  %v4196_v49 = vpop.f32.mrb[5].mxu1 }
 0x2d4   : > { %4502 = vst.msk [vmem:[#allocation2 + $0x24f] sm:$0xfe] %vm850_vm5, %v4406_v28  ;;  %v4408_v52 = vmax.f32 %v4376_v36, 0.0  ;;  %v16232_v56 = vadd.f32 %v4196_v49, %v2223_v42 }
 0x2d5   : > { %4441 = vst.msk [vmem:[#allocation2 + $0x148] sm:$0xff] %vm333_vm2, %v4409_v44  ;;  %4505 = vst.msk [vmem:[#allocation2 + $0x267] sm:$0xff] %vm333_vm2, %v4409_v44  ;;  %v4379_v43 = vadd.f32 %v16231_v46, %v18287_v5 }
 0x2d6   : > { %4473 = vst.msk [vmem:[#allocation2 + $0x29] sm:$0x7f] %vm818_vm4, %v4409_v44  ;;  %v4378_v3 = vadd.f32 %v16232_v56, %v18287_v5  ;;  %v14598_v6 = vpop.f32.mrb[6].mxu1 }
 0x2d7   : > { %4440 = vst.msk [vmem:[#allocation2 + $0x140] sm:$0xff] %vm333_vm2, %v4408_v52  ;;  %4472 = vst.msk [vmem:[#allocation2 + $0x21] sm:$0xff] %vm333_vm2, %v4408_v52  ;;  %v4411_v62 = vmax.f32 %v4379_v43, 0.0  ;;  %v16233_v59 = vadd.f32 %v14598_v6, %v18223_v34  ;;  %v4206_v13 = vpop.f32.mrb[7].mxu1 }
 0x2d8   : > { %4504 = vst.msk [vmem:[#allocation2 + $0x25f] sm:$0xfe] %vm850_vm5, %v4408_v52  ;;  %v4410_v51 = vmax.f32 %v4378_v3, 0.0  ;;  %v16234_v2 = vadd.f32 %v4206_v13, %v18225_v0  ;;  %v18321_v60 = vld [vmem:[#allocation2 + $0x138] sm:$0xff] }
 0x2d9   : > { %4443 = vst.msk [vmem:[#allocation2 + $0x158] sm:$0xff] %vm333_vm2, %v4411_v62  ;;  %4507 = vst.msk [vmem:[#allocation2 + $0x277] sm:$0xff] %vm333_vm2, %v4411_v62  ;;  %v4381_v61 = vadd.f32 %v16233_v59, %v18287_v5 }
 0x2da   : > { %4475 = vst.msk [vmem:[#allocation2 + $0x39] sm:$0x7f] %vm818_vm4, %v4411_v62  ;;  %v18313_v38 = vld [vmem:[#allocation2 + $0x130] sm:$0xff]  ;;  %v4380_v54 = vadd.f32 %v16234_v2, %v18287_v5  ;;  %v14601_v63 = vpop.f32.mrb[8].mxu1 }
 0x2db   : > { %4442 = vst.msk [vmem:[#allocation2 + $0x150] sm:$0xff] %vm333_vm2, %v4410_v51  ;;  %4474 = vst.msk [vmem:[#allocation2 + $0x31] sm:$0xff] %vm333_vm2, %v4410_v51  ;;  %14654 = vmatprep.mubr.msk.f32.mxu0 %vm333_vm2, %v18313_v38  ;;  %v4413_v42 = vmax.f32 %v4381_v61, 0.0  ;;  %v16235_v34 = vadd.f32 %v14601_v63, %v18235_v12  ;;  %v4216_v0 = vpop.f32.mrb[9].mxu1 }
 0x2dc   : > { %4506 = vst.msk [vmem:[#allocation2 + $0x26f] sm:$0xfe] %vm850_vm5, %v4410_v51  ;;  %14655 = vmatmul.mubr.msk.f32.gmra.mrb[66].mxu0 %vm333_vm2, %v18321_v60  ;;  %v4412_v4 = vmax.f32 %v4380_v54, 0.0  ;;  %v16236_v7 = vadd.f32 %v4216_v0, %v18237_v16  ;;  %v18339_v16 = vld [vmem:[#allocation2 + $0x148] sm:$0xff] }
 0x2dd   : > { %4445 = vst.msk [vmem:[#allocation2 + $0x168] sm:$0xff] %vm333_vm2, %v4413_v42  ;;  %4509 = vst.msk [vmem:[#allocation2 + $0x287] sm:$0xff] %vm333_vm2, %v4413_v42  ;;  %v4383_v1 = vadd.f32 %v16235_v34, %v18287_v5 }
 0x2de   : > { %4477 = vst.msk [vmem:[#allocation2 + $0x49] sm:$0x7f] %vm818_vm4, %v4413_v42  ;;  %v18331_v9 = vld [vmem:[#allocation2 + $0x140] sm:$0xff]  ;;  %v4382_v12 = vadd.f32 %v16236_v7, %v18287_v5  ;;  %v14604_v11 = vpop.f32.mrb[10].mxu1 }
 0x2df   : > { %4444 = vst.msk [vmem:[#allocation2 + $0x160] sm:$0xff] %vm333_vm2, %v4412_v4  ;;  %4476 = vst.msk [vmem:[#allocation2 + $0x41] sm:$0xff] %vm333_vm2, %v4412_v4  ;;  %14657 = vmatprep.mubr.msk.f32.mxu0 %vm333_vm2, %v18331_v9  ;;  %v4415_v15 = vmax.f32 %v4383_v1, 0.0  ;;  %v16237_v17 = vadd.f32 %v14604_v11, %v18240_v18  ;;  %v4226_v19 = vpop.f32.mrb[11].mxu1 }
 0x2e0   : > { %4508 = vst.msk [vmem:[#allocation2 + $0x27f] sm:$0xfe] %vm850_vm5, %v4412_v4  ;;  %14658 = vmatmul.mubr.msk.f32.gmra.mrb[68].mxu0 %vm333_vm2, %v18339_v16  ;;  %v4414_v21 = vmax.f32 %v4382_v12, 0.0  ;;  %v16238_v23 = vadd.f32 %v4226_v19, %v18242_v20  ;;  %v18357_v20 = vld [vmem:[#allocation2 + $0x158] sm:$0xff] }
 0x2e1   : > { %4447 = vst.msk [vmem:[#allocation2 + $0x178] sm:$0xff] %vm333_vm2, %v4415_v15  ;;  %4511 = vst.msk [vmem:[#allocation2 + $0x297] sm:$0xff] %vm333_vm2, %v4415_v15  ;;  %v4385_v25 = vadd.f32 %v16237_v17, %v18287_v5 }
 0x2e2   : > { %4479 = vst.msk [vmem:[#allocation2 + $0x59] sm:$0x7f] %vm818_vm4, %v4415_v15  ;;  %v18349_v14 = vld [vmem:[#allocation2 + $0x150] sm:$0xff]  ;;  %v4384_v18 = vadd.f32 %v16238_v23, %v18287_v5  ;;  %v14607_v28 = vpop.f32.mrb[12].mxu1 }
 0x2e3   : > { %4446 = vst.msk [vmem:[#allocation2 + $0x170] sm:$0xff] %vm333_vm2, %v4414_v21  ;;  %4478 = vst.msk [vmem:[#allocation2 + $0x51] sm:$0xff] %vm333_vm2, %v4414_v21  ;;  %14660 = vmatprep.mubr.msk.f32.mxu0 %vm333_vm2, %v18349_v14  ;;  %v4417_v30 = vmax.f32 %v4385_v25, 0.0  ;;  %v16239_v32 = vadd.f32 %v14607_v28, %v18244_v22  ;;  %v4236_v36 = vpop.f32.mrb[13].mxu1 }
 0x2e4   : > { %4510 = vst.msk [vmem:[#allocation2 + $0x28f] sm:$0xfe] %vm850_vm5, %v4414_v21  ;;  %14661 = vmatmul.mubr.msk.f32.gmra.mrb[70].mxu0 %vm333_vm2, %v18357_v20  ;;  %v4416_v40 = vmax.f32 %v4384_v18, 0.0  ;;  %v16240_v44 = vadd.f32 %v4236_v36, %v18246_v24  ;;  %v18375_v24 = vld [vmem:[#allocation2 + $0x168] sm:$0xff] }
 0x2e5   : > { %4449 = vst.msk [vmem:[#allocation2 + $0x188] sm:$0xff] %vm333_vm2, %v4417_v30  ;;  %4513 = vst.msk [vmem:[#allocation2 + $0x2a7] sm:$0xff] %vm333_vm2, %v4417_v30  ;;  %v4387_v46 = vadd.f32 %v16239_v32, %v18287_v5 }
 0x2e6   : > { %4481 = vst.msk [vmem:[#allocation2 + $0x69] sm:$0x7f] %vm818_vm4, %v4417_v30  ;;  %v18367_v49 = vld [vmem:[#allocation2 + $0x160] sm:$0xff]  ;;  %v4386_v22 = vadd.f32 %v16240_v44, %v18287_v5  ;;  %v14610_v52 = vpop.f32.mrb[14].mxu1 }
 0x2e7   : > { %4448 = vst.msk [vmem:[#allocation2 + $0x180] sm:$0xff] %vm333_vm2, %v4416_v40  ;;  %4480 = vst.msk [vmem:[#allocation2 + $0x61] sm:$0xff] %vm333_vm2, %v4416_v40  ;;  %14663 = vmatprep.mubr.msk.f32.mxu0 %vm333_vm2, %v18367_v49  ;;  %v4419_v56 = vmax.f32 %v4387_v46, 0.0  ;;  %v16241_v43 = vadd.f32 %v14610_v52, %v18248_v26  ;;  %v4246_v3 = vpop.f32.mrb[15].mxu1 }
 0x2e8   : > { %4512 = vst.msk [vmem:[#allocation2 + $0x29f] sm:$0xfe] %vm850_vm5, %v4416_v40  ;;  %14664 = vmatmul.mubr.msk.f32.gmra.mrb[72].mxu0 %vm333_vm2, %v18375_v24  ;;  %v4418_v6 = vmax.f32 %v4386_v22, 0.0  ;;  %v16242_v62 = vadd.f32 %v4246_v3, %v18250_v27  ;;  %v18393_v27 = vld [vmem:[#allocation2 + $0x178] sm:$0xff] }
 0x2e9   : > { %4451 = vst.msk [vmem:[#allocation2 + $0x198] sm:$0xff] %vm333_vm2, %v4419_v56  ;;  %4515 = vst.msk [vmem:[#allocation2 + $0x2b7] sm:$0xff] %vm333_vm2, %v4419_v56  ;;  %v4389_v59 = vadd.f32 %v16241_v43, %v18287_v5 }
 0x2ea   : > { %4483 = vst.msk [vmem:[#allocation2 + $0x79] sm:$0x7f] %vm818_vm4, %v4419_v56  ;;  %v18385_v13 = vld [vmem:[#allocation2 + $0x170] sm:$0xff]  ;;  %v4388_v26 = vadd.f32 %v16242_v62, %v18287_v5  ;;  %v14613_v51 = vpop.f32.mrb[16].mxu1 }
 0x2eb   : > { %4450 = vst.msk [vmem:[#allocation2 + $0x190] sm:$0xff] %vm333_vm2, %v4418_v6  ;;  %4482 = vst.msk [vmem:[#allocation2 + $0x71] sm:$0xff] %vm333_vm2, %v4418_v6  ;;  %14666 = vmatprep.mubr.msk.f32.mxu0 %vm333_vm2, %v18385_v13  ;;  %v4421_v2 = vmax.f32 %v4389_v59, 0.0  ;;  %v16243_v61 = vadd.f32 %v14613_v51, %v18252_v29  ;;  %v4256_v54 = vpop.f32.mrb[17].mxu1 }
 0x2ec   : > { %4514 = vst.msk [vmem:[#allocation2 + $0x2af] sm:$0xfe] %vm850_vm5, %v4418_v6  ;;  %14667 = vmatmul.mubr.msk.f32.gmra.mrb[74].mxu0 %vm333_vm2, %v18393_v27  ;;  %v4420_v63 = vmax.f32 %v4388_v26, 0.0  ;;  %v16244_v42 = vadd.f32 %v4256_v54, %v18254_v31  ;;  %v18411_v31 = vld [vmem:[#allocation2 + $0x188] sm:$0xff] }
 0x2ed   : > { %4453 = vst.msk [vmem:[#allocation2 + $0x1a8] sm:$0xff] %vm333_vm2, %v4421_v2  ;;  %4517 = vst.msk [vmem:[#allocation2 + $0x2c7] sm:$0xff] %vm333_vm2, %v4421_v2  ;;  %v4391_v34 = vadd.f32 %v16243_v61, %v18287_v5 }
 0x2ee   : > { %4485 = vst.msk [vmem:[#allocation2 + $0x89] sm:$0x7f] %vm818_vm4, %v4421_v2  ;;  %v18403_v0 = vld [vmem:[#allocation2 + $0x180] sm:$0xff]  ;;  %v4390_v29 = vadd.f32 %v16244_v42, %v18287_v5  ;;  %v14616_v4 = vpop.f32.mrb[18].mxu1 }
 0x2ef   : > { %4452 = vst.msk [vmem:[#allocation2 + $0x1a0] sm:$0xff] %vm333_vm2, %v4420_v63  ;;  %4484 = vst.msk [vmem:[#allocation2 + $0x81] sm:$0xff] %vm333_vm2, %v4420_v63  ;;  %14669 = vmatprep.mubr.msk.f32.mxu0 %vm333_vm2, %v18403_v0  ;;  %v4423_v7 = vmax.f32 %v4391_v34, 0.0  ;;  %v16245_v1 = vadd.f32 %v14616_v4, %v18256_v35  ;;  %v4266_v12 = vpop.f32.mrb[19].mxu1 }
 0x2f0   : > { %4516 = vst.msk [vmem:[#allocation2 + $0x2bf] sm:$0xfe] %vm850_vm5, %v4420_v63  ;;  %14670 = vmatmul.mubr.msk.f32.gmra.mrb[76].mxu0 %vm333_vm2, %v18411_v31  ;;  %v4422_v11 = vmax.f32 %v4390_v29, 0.0  ;;  %v16246_v15 = vadd.f32 %v4266_v12, %v18258_v37  ;;  %v18429_v37 = vld [vmem:[#allocation2 + $0x198] sm:$0xff] }
 0x2f1   : > { %4455 = vst.msk [vmem:[#allocation2 + $0x1b8] sm:$0xff] %vm333_vm2, %v4423_v7  ;;  %4519 = vst.msk [vmem:[#allocation2 + $0x2d7] sm:$0xff] %vm333_vm2, %v4423_v7  ;;  %v4393_v17 = vadd.f32 %v16245_v1, %v18287_v5 }
 0x2f2   : > { %4487 = vst.msk [vmem:[#allocation2 + $0x99] sm:$0x7f] %vm818_vm4, %v4423_v7  ;;  %v18421_v19 = vld [vmem:[#allocation2 + $0x190] sm:$0xff]  ;;  %v4392_v35 = vadd.f32 %v16246_v15, %v18287_v5  ;;  %v14619_v21 = vpop.f32.mrb[20].mxu1 }
 0x2f3   : > { %4454 = vst.msk [vmem:[#allocation2 + $0x1b0] sm:$0xff] %vm333_vm2, %v4422_v11  ;;  %4486 = vst.msk [vmem:[#allocation2 + $0x91] sm:$0xff] %vm333_vm2, %v4422_v11  ;;  %14672 = vmatprep.mubr.msk.f32.mxu0 %vm333_vm2, %v18421_v19  ;;  %v4425_v23 = vmax.f32 %v4393_v17, 0.0  ;;  %v16247_v25 = vadd.f32 %v14619_v21, %v18260_v41  ;;  %v4276_v18 = vpop.f32.mrb[21].mxu1 }
 0x2f4   : > { %4518 = vst.msk [vmem:[#allocation2 + $0x2cf] sm:$0xfe] %vm850_vm5, %v4422_v11  ;;  %14673 = vmatmul.mubr.msk.f32.gmra.mrb[78].mxu0 %vm333_vm2, %v18429_v37  ;;  %v4424_v28 = vmax.f32 %v4392_v35, 0.0  ;;  %v16248_v30 = vadd.f32 %v4276_v18, %v18262_v45  ;;  %v18447_v45 = vld [vmem:[#allocation2 + $0x1a8] sm:$0xff] }
 0x2f5   : > { %4457 = vst.msk [vmem:[#allocation2 + $0x1c8] sm:$0xff] %vm333_vm2, %v4425_v23  ;;  %4521 = vst.msk [vmem:[#allocation2 + $0x2e7] sm:$0xff] %vm333_vm2, %v4425_v23  ;;  %v4395_v32 = vadd.f32 %v16247_v25, %v18287_v5 }
 0x2f6   : > { %4489 = vst.msk [vmem:[#allocation2 + $0xa9] sm:$0x7f] %vm818_vm4, %v4425_v23  ;;  %v18439_v36 = vld [vmem:[#allocation2 + $0x1a0] sm:$0xff]  ;;  %v4394_v41 = vadd.f32 %v16248_v30, %v18287_v5  ;;  %v14622_v40 = vpop.f32.mrb[22].mxu1 }
 0x2f7   : > { %4456 = vst.msk [vmem:[#allocation2 + $0x1c0] sm:$0xff] %vm333_vm2, %v4424_v28  ;;  %4488 = vst.msk [vmem:[#allocation2 + $0xa1] sm:$0xff] %vm333_vm2, %v4424_v28  ;;  %14675 = vmatprep.mubr.msk.f32.mxu0 %vm333_vm2, %v18439_v36  ;;  %v4427_v44 = vmax.f32 %v4395_v32, 0.0  ;;  %v16249_v46 = vadd.f32 %v14622_v40, %v18264_v48  ;;  %v4286_v22 = vpop.f32.mrb[23].mxu1 }
 0x2f8   : > { %4520 = vst.msk [vmem:[#allocation2 + $0x2df] sm:$0xfe] %vm850_vm5, %v4424_v28  ;;  %14676 = vmatmul.mubr.msk.f32.gmra.mrb[80].mxu0 %vm333_vm2, %v18447_v45  ;;  %v4426_v52 = vmax.f32 %v4394_v41, 0.0  ;;  %v16250_v56 = vadd.f32 %v4286_v22, %v18266_v50  ;;  %v18465_v50 = vld [vmem:[#allocation2 + $0x1b8] sm:$0xff] }
 0x2f9   : > { %4459 = vst.msk [vmem:[#allocation2 + $0x1d8] sm:$0xff] %vm333_vm2, %v4427_v44  ;;  %4523 = vst.msk [vmem:[#allocation2 + $0x2f7] sm:$0xff] %vm333_vm2, %v4427_v44  ;;  %v4397_v43 = vadd.f32 %v16249_v46, %v18287_v5 }
 0x2fa   : > { %4491 = vst.msk [vmem:[#allocation2 + $0xb9] sm:$0x7f] %vm818_vm4, %v4427_v44  ;;  %v18457_v3 = vld [vmem:[#allocation2 + $0x1b0] sm:$0xff]  ;;  %v4396_v48 = vadd.f32 %v16250_v56, %v18287_v5  ;;  %v14625_v6 = vpop.f32.mrb[24].mxu1 }
 0x2fb   : > { %4458 = vst.msk [vmem:[#allocation2 + $0x1d0] sm:$0xff] %vm333_vm2, %v4426_v52  ;;  %4490 = vst.msk [vmem:[#allocation2 + $0xb1] sm:$0xff] %vm333_vm2, %v4426_v52  ;;  %14678 = vmatprep.mubr.msk.f32.mxu0 %vm333_vm2, %v18457_v3  ;;  %v4429_v62 = vmax.f32 %v4397_v43, 0.0  ;;  %v16251_v59 = vadd.f32 %v14625_v6, %v18268_v53  ;;  %v4296_v26 = vpop.f32.mrb[25].mxu1  ;;  %v4534_v6 = vld [vmem:[#allocation2] sm:$0xff] }
 0x2fc   : > { %4522 = vst.msk [vmem:[#allocation2 + $0x2ef] sm:$0xfe] %vm850_vm5, %v4426_v52  ;;  %14679 = vmatmul.mubr.msk.f32.gmra.mrb[82].mxu0 %vm333_vm2, %v18465_v50  ;;  %v4428_v51 = vmax.f32 %v4396_v48, 0.0  ;;  %v16252_v2 = vadd.f32 %v4296_v26, %v18270_v58  ;;  %v18483_v58 = vld [vmem:[#allocation2 + $0x1c8] sm:$0xff]  ;;  %v12261_v26 = vld [vmem:[%s20553_s5 + $0x98] sm:$0xff] }
 0x2fd   : > { %4461 = vst.msk [vmem:[#allocation2 + $0x1e8] sm:$0xff] %vm333_vm2, %v4429_v62  ;;  %4525 = vst.msk [vmem:[#allocation2 + $0x307] sm:$0xff] %vm333_vm2, %v4429_v62  ;;  %v4399_v61 = vadd.f32 %v16251_v59, %v18287_v5  ;;  %v12260_v59 = vld [vmem:[%s20553_s5 + $0x90] sm:$0xff] }
 0x2fe   : > { %4493 = vst.msk [vmem:[#allocation2 + $0xc9] sm:$0x7f] %vm818_vm4, %v4429_v62  ;;  %v18475_v54 = vld [vmem:[#allocation2 + $0x1c0] sm:$0xff]  ;;  %v4398_v53 = vadd.f32 %v16252_v2, %v18287_v5  ;;  %v14628_v63 = vpop.f32.mrb[26].mxu1  ;;  %v15967_v2 = vpack.c.bf16 %v12261_v26, %v12260_v59 }
 0x2ff   : > { %4460 = vst.msk [vmem:[#allocation2 + $0x1e0] sm:$0xff] %vm333_vm2, %v4428_v51  ;;  %4492 = vst.msk [vmem:[#allocation2 + $0xc1] sm:$0xff] %vm333_vm2, %v4428_v51  ;;  %14681 = vmatprep.mubr.msk.f32.mxu0 %vm333_vm2, %v18475_v54  ;;  %v4431_v42 = vmax.f32 %v4399_v61, 0.0  ;;  %v16253_v34 = vadd.f32 %v14628_v63, %v18272_v33  ;;  %v4306_v29 = vpop.f32.mrb[27].mxu1  ;;  %v12262_v61 = vld [vmem:[%s20553_s5 + $0xa0] sm:$0xff]  ;;  %v18577_v63 = vld [vmem:[#allocation2 + $0x10] sm:$0xff] }
 0x300   : > { %4524 = vst.msk [vmem:[#allocation2 + $0x2ff] sm:$0xfe] %vm850_vm5, %v4428_v51  ;;  %14682 = vmatmul.mubr.msk.f32.gmra.mrb[84].mxu0 %vm333_vm2, %v18483_v58  ;;  %v4430_v4 = vmax.f32 %v4398_v53, 0.0  ;;  %v16254_v7 = vadd.f32 %v4306_v29, %v18274_v39  ;;  %v18501_v39 = vld [vmem:[#allocation2 + $0x1d8] sm:$0xff]  ;;  %v4535_v51 = vld [vmem:[#allocation2 + $0x8] sm:$0xff]  ;;  %v12264_v29 = vld [vmem:[%s20553_s5 + $0xb0] sm:$0xff] }
 0x301   : > { %4463 = vst.msk [vmem:[#allocation2 + $0x1f8] sm:$0xff] %vm333_vm2, %v4431_v42  ;;  %4527 = vst.msk [vmem:[#allocation2 + $0x317] sm:$0xff] %vm333_vm2, %v4431_v42  ;;  %v4401_v1 = vadd.f32 %v16253_v34, %v18287_v5  ;;  %v12263_v53 = vld [vmem:[%s20553_s5 + $0xa8] sm:$0xff]  ;;  %v18582_v34 = vld [vmem:[#allocation2 + $0x18] sm:$0xff] }
 0x302   : > { %4495 = vst.msk [vmem:[#allocation2 + $0xd9] sm:$0x7f] %vm818_vm4, %v4431_v42  ;;  %v18493_v12 = vld [vmem:[#allocation2 + $0x1d0] sm:$0xff]  ;;  %v4400_v33 = vadd.f32 %v16254_v7, %v18287_v5  ;;  %v14631_v11 = vpop.f32.mrb[28].mxu1  ;;  %v15971_v42 = vpack.c.bf16 %v12263_v53, %v12262_v61  ;;  %v18592_v7 = vld [vmem:[#allocation2 + $0x20] sm:$0xff]  ;;  %v18674_v59 = vld [vmem:[#allocation2 + $0xb8] sm:$0xff] }
 0x303   : > { %4462 = vst.msk [vmem:[#allocation2 + $0x1f0] sm:$0xff] %vm333_vm2, %v4430_v4  ;;  %4494 = vst.msk [vmem:[#allocation2 + $0xd1] sm:$0xff] %vm333_vm2, %v4430_v4  ;;  %14684 = vmatprep.mubr.msk.f32.mxu0 %vm333_vm2, %v18493_v12  ;;  %v4433_v15 = vmax.f32 %v4401_v1, 0.0  ;;  %v16255_v17 = vadd.f32 %v14631_v11, %v18276_v47  ;;  %v4316_v35 = vpop.f32.mrb[29].mxu1  ;;  %v18596_v1 = vld [vmem:[#allocation2 + $0x28] sm:$0xff] }
 0x304   : > { %4526 = vst.msk [vmem:[#allocation2 + $0x30f] sm:$0xfe] %vm850_vm5, %v4430_v4  ;;  %14685 = vmatmul.mubr.msk.f32.gmra.mrb[86].mxu0 %vm333_vm2, %v18501_v39  ;;  %v4432_v21 = vmax.f32 %v4400_v33, 0.0  ;;  %v16256_v23 = vadd.f32 %v4316_v35, %v18278_v8  ;;  %v18519_v8 = vld [vmem:[#allocation2 + $0x1e8] sm:$0xff]  ;;  %v12265_v4 = vld [vmem:[%s20553_s5 + $0xb8] sm:$0xff]  ;;  %v12298_v33 = vld [vmem:[%s20553_s5 + $0xc0] sm:$0xff] }
 0x305   : > { %4465 = vst.msk [vmem:[#allocation2 + $0x208] sm:$0xff] %vm333_vm2, %v4433_v15  ;;  %4529 = vst.msk [vmem:[#allocation2 + $0x327] sm:$0xff] %vm333_vm2, %v4433_v15  ;;  %v4403_v25 = vadd.f32 %v16255_v17, %v18287_v5  ;;  %v12299_v11 = vld [vmem:[%s20553_s5 + $0xc8] sm:$0xff]  ;;  %v18610_v35 = vld [vmem:[#allocation2 + $0x38] sm:$0xff] }
 0x306   : > { %4497 = vst.msk [vmem:[#allocation2 + $0xe9] sm:$0x7f] %vm818_vm4, %v4433_v15  ;;  %v18511_v18 = vld [vmem:[#allocation2 + $0x1e0] sm:$0xff]  ;;  %v4402_v47 = vadd.f32 %v16256_v23, %v18287_v5  ;;  %v14634_v28 = vpop.f32.mrb[30].mxu1  ;;  %v18606_v15 = vld [vmem:[#allocation2 + $0x30] sm:$0xff]  ;;  %v15979_v17 = vpack.c.bf16 %v12299_v11, %v12298_v33  ;;  %v18618_v23 = vld [vmem:[#allocation2 + $0x48] sm:$0xff] }
 0x307   : > { %4464 = vst.msk [vmem:[#allocation2 + $0x200] sm:$0xff] %vm333_vm2, %v4432_v21  ;;  %4496 = vst.msk [vmem:[#allocation2 + $0xe1] sm:$0xff] %vm333_vm2, %v4432_v21  ;;  %14687 = vmatprep.mubr.msk.f32.mxu0 %vm333_vm2, %v18511_v18  ;;  %v4435_v30 = vmax.f32 %v4403_v25, 0.0  ;;  %v16257_v32 = vadd.f32 %v14634_v28, %v18280_v55  ;;  %v4326_v41 = vpop.f32.mrb[31].mxu1  ;;  %v18622_v25 = vld [vmem:[#allocation2 + $0x50] sm:$0xff]  ;;  %v18630_v28 = vld [vmem:[#allocation2 + $0x60] sm:$0xff] }
 0x308   : > { %4528 = vst.msk [vmem:[#allocation2 + $0x31f] sm:$0xfe] %vm850_vm5, %v4432_v21  ;;  %14688 = vmatmul.mubr.msk.f32.gmra.mrb[88].mxu0 %vm333_vm2, %v18519_v8  ;;  %v4434_v40 = vmax.f32 %v4402_v47, 0.0  ;;  %v16258_v44 = vadd.f32 %v4326_v41, %v18282_v57  ;;  %v18537_v57 = vld [vmem:[#allocation2 + $0x1f8] sm:$0xff]  ;;  %v18614_v21 = vld [vmem:[#allocation2 + $0x40] sm:$0xff]  ;;  %v12300_v33 = vld [vmem:[%s20553_s5 + $0xd0] sm:$0xff] }
 0x309   : > { %4467 = vst.msk [vmem:[#allocation2 + $0x218] sm:$0xff] %vm333_vm2, %v4435_v30  ;;  %4531 = vst.msk [vmem:[#allocation2 + $0x337] sm:$0xff] %vm333_vm2, %v4435_v30  ;;  %v4405_v46 = vadd.f32 %v16257_v32, %v18287_v5  ;;  %v18626_v47 = vld [vmem:[#allocation2 + $0x58] sm:$0xff]  ;;  %v18638_v32 = vld [vmem:[#allocation2 + $0x70] sm:$0xff] }
 0x30a   : > { %4499 = vst.msk [vmem:[#allocation2 + $0xf9] sm:$0x7f] %vm818_vm4, %v4435_v30  ;;  %v18529_v22 = vld [vmem:[#allocation2 + $0x1f0] sm:$0xff]  ;;  %v4404_v55 = vadd.f32 %v16258_v44, %v18287_v5  ;;  %20719 = vst [vmem:[#allocation10_spill] sm:$0xff] %v18537_v57  ;;  %v18634_v30 = vld [vmem:[#allocation2 + $0x68] sm:$0xff] }
 0x30b   : > { %20718 = vst [vmem:[#allocation8_spill] sm:$0xff] %v18529_v22  ;;  %4466 = vst.msk [vmem:[#allocation2 + $0x210] sm:$0xff] %vm333_vm2, %v4434_v40  ;;  %14690 = vmatprep.mubr.msk.f32.mxu0 %vm333_vm2, %v18529_v22  ;;  %v4437_v52 = vmax.f32 %v4405_v46, 0.0  ;;  %v18642_v41 = vld [vmem:[#allocation2 + $0x78] sm:$0xff]  ;;  %v18650_v44 = vld [vmem:[#allocation2 + $0x88] sm:$0xff] }
 0x30c   : > { %4530 = vst.msk [vmem:[#allocation2 + $0x32f] sm:$0xfe] %vm850_vm5, %v4434_v40  ;;  %14691 = vmatmul.mubr.msk.f32.gmra.mrb[90].mxu0 %vm333_vm2, %v18537_v57  ;;  %v4436_v56 = vmax.f32 %v4404_v55, 0.0  ;;  %v18551_v5 = vld [vmem:[#allocation2 + $0x208] sm:$0xff]  ;;  %v18654_v46 = vld [vmem:[#allocation2 + $0x90] sm:$0xff]  ;;  %v18658_v55 = vld [vmem:[#allocation2 + $0x98] sm:$0xff] }
 0x30d   : > { %4498 = vst.msk [vmem:[#allocation2 + $0xf1] sm:$0xff] %vm333_vm2, %v4434_v40  ;;  %4469 = vst.msk [vmem:[#allocation2 + $0x228] sm:$0xff] %vm333_vm2, %v4437_v52  ;;  %v18646_v40 = vld [vmem:[#allocation2 + $0x80] sm:$0xff]  ;;  %v18690_v61 = vld [vmem:[#allocation2 + $0xd8] sm:$0xff] }
 0x30e   : > { %4501 = vst.msk [vmem:[#allocation2 + $0x109] sm:$0x7f] %vm818_vm4, %v4437_v52  ;;  %v18544_v43 = vld [vmem:[#allocation2 + $0x200] sm:$0xff]  ;;  %20721 = vst [vmem:[#allocation6_spill] sm:$0xff] %v18551_v5  ;;  %v12301_v11 = vld [vmem:[%s20553_s5 + $0xd8] sm:$0xff] }
 0x30f   : > { %4533 = vst.msk [vmem:[#allocation2 + $0x347] sm:$0xff] %vm333_vm2, %v4437_v52  ;;  %20720 = vst [vmem:[#allocation5_spill] sm:$0xff] %v18544_v43  ;;  %14693 = vmatprep.mubr.msk.f32.mxu0 %vm333_vm2, %v18544_v43  ;;  %v18662_v52 = vld [vmem:[#allocation2 + $0xa0] sm:$0xff]  ;;  %v12303_v43 = vld [vmem:[%s20553_s5 + $0xe8] sm:$0xff] }
 0x310   : > { %4468 = vst.msk [vmem:[#allocation2 + $0x220] sm:$0xff] %vm333_vm2, %v4436_v56  ;;  %4500 = vst.msk [vmem:[#allocation2 + $0x101] sm:$0xff] %vm333_vm2, %v4436_v56  ;;  %14694 = vmatmul.mubr.msk.f32.gmra.mrb[92].mxu0 %vm333_vm2, %v18551_v5  ;;  %v18559_v62 = vld [vmem:[#allocation2 + $0x218] sm:$0xff]  ;;  %v18678_v26 = vld [vmem:[#allocation2 + $0xc0] sm:$0xff] }
 0x311   : > { %4532 = vst.msk [vmem:[#allocation2 + $0x33f] sm:$0xfe] %vm850_vm5, %v4436_v56  ;;  %20723 = vst [vmem:[#allocation4_spill] sm:$0xff] %v18559_v62  ;;  %v18666_v56 = vld [vmem:[#allocation2 + $0xa8] sm:$0xff]  ;;  %v18694_v53 = vld [vmem:[#allocation2 + $0xe0] sm:$0xff] }
 0x312   : > { %v18555_v48 = vld [vmem:[#allocation2 + $0x210] sm:$0xff]  ;;  %v12302_v5 = vld [vmem:[%s20553_s5 + $0xe0] sm:$0xff]  ;;  %v18728_v22 = vld [vmem:[#allocation2 + $0x258] sm:$0xff] }
 0x313   : > { %20722 = vst [vmem:[#allocation3_spill] sm:$0xff] %v18555_v48  ;;  %14696 = vmatprep.mubr.msk.f32.mxu0 %vm333_vm2, %v18555_v48  ;;  %v15983_v48 = vpack.c.bf16 %v12301_v11, %v12300_v33  ;;  %v18724_v57 = vld [vmem:[#allocation2 + $0x250] sm:$0xff]  ;;  %20725 = vst [vmem:[#allocation9_spill] sm:$0xff] %v18728_v22  ;;  %v12305_v11 = vld [vmem:[%s20553_s5 + $0xf8] sm:$0xff] }
 0x314   : > { %14697 = vmatmul.mubr.msk.f32.gmra.mrb[94].mxu0 %vm333_vm2, %v18559_v62  ;;  %v5258_v62 = vld [vmem:[#allocation2 + $0x248] sm:$0xff]  ;;  %20724 = vst [vmem:[#allocation7_spill] sm:$0xff] %v18724_v57  ;;  %v12304_v33 = vld [vmem:[%s20553_s5 + $0xf0] sm:$0xff] }
 0x315   : > { %14715 = vmatprep.mubr.msk.f32.mxu0 %vm333_vm2, %v4534_v6  ;;  %v18670_v6 = vld [vmem:[#allocation2 + $0xb0] sm:$0xff] }
 0x318   : > { %14716 = vmatmul.mubr.msk.f32.vlgmr.msra.gmra.mrb[64].mxu0 %vm333_vm2, %v4535_v51  ;;  %v18682_v51 = vld [vmem:[#allocation2 + $0xc8] sm:$0xff] }
 0x319   : > { %15966 = vmatpush3.bf16.msra.mxu0 %v18233_v10  ;;  %14718 = vmatprep.mubr.msk.f32.mxu0 %vm333_vm2, %v18577_v63  ;;  %v15975_v10 = vpack.c.bf16 %v12265_v4, %v12264_v29  ;;  %v18702_v29 = vld [vmem:[#allocation2 + $0xf0] sm:$0xff]  ;;  %v5257_v4 = vld [vmem:[#allocation2 + $0x240] sm:$0xff] }
 0x31a   : > { %15968 = vmatprep.subr.bf16.mxu0 %v15967_v2 }
 0x31c   : > { %14719 = vmatmul.mubr.msk.f32.gmra.mrb[66].mxu0 %vm333_vm2, %v18582_v34 }
 0x31d   : > { %14721 = vmatprep.mubr.msk.f32.mxu0 %vm333_vm2, %v18592_v7  ;;  %15970 = vmatpush3.bf16.msra.mxu0 %v15967_v2  ;;  %v18686_v2 = vld [vmem:[#allocation2 + $0xd0] sm:$0xff] }
 0x31e   : > { %15972 = vmatprep.subr.bf16.mxu0 %v15971_v42 }
 0x320   : > { %14722 = vmatmul.mubr.msk.f32.gmra.mrb[68].mxu0 %vm333_vm2, %v18596_v1 }
 0x321   : > { %14724 = vmatprep.mubr.msk.f32.mxu0 %vm333_vm2, %v18606_v15  ;;  %15974 = vmatpush3.bf16.msra.mxu0 %v15971_v42  ;;  %v18698_v42 = vld [vmem:[#allocation2 + $0xe8] sm:$0xff] }
 0x322   : > { %15976 = vmatprep.subr.bf16.mxu0 %v15975_v10 }
 0x324   : > { %14725 = vmatmul.mubr.msk.f32.gmra.mrb[70].mxu0 %vm333_vm2, %v18610_v35 }
 0x325   : > { %14727 = vmatprep.mubr.msk.f32.mxu0 %vm333_vm2, %v18614_v21  ;;  %15978 = vmatpush3.bf16.msra.mxu0 %v15975_v10  ;;  %v18706_v10 = vld [vmem:[#allocation2 + $0xf8] sm:$0xff] }
 0x326   : > { %15980 = vmatprep.subr.bf16.mxu0 %v15979_v17 }
 0x328   : > { %14728 = vmatmul.mubr.msk.f32.gmra.mrb[72].mxu0 %vm333_vm2, %v18618_v23 }
 0x329   : > { %14730 = vmatprep.mubr.msk.f32.mxu0 %vm333_vm2, %v18622_v25 }
 0x32c   : > { %14731 = vmatmul.mubr.msk.f32.gmra.mrb[74].mxu0 %vm333_vm2, %v18626_v47 }
 0x32d   : > { %14733 = vmatprep.mubr.msk.f32.mxu0 %vm333_vm2, %v18630_v28 }
 0x330   : > { %14734 = vmatmul.mubr.msk.f32.gmra.mrb[76].mxu0 %vm333_vm2, %v18634_v30 }
 0x331   : > { %14736 = vmatprep.mubr.msk.f32.mxu0 %vm333_vm2, %v18638_v32 }
 0x334   : > { %14737 = vmatmul.mubr.msk.f32.gmra.mrb[78].mxu0 %vm333_vm2, %v18642_v41 }
 0x335   : > { %14739 = vmatprep.mubr.msk.f32.mxu0 %vm333_vm2, %v18646_v40 }
 0x338   : > { %14740 = vmatmul.mubr.msk.f32.gmra.mrb[80].mxu0 %vm333_vm2, %v18650_v44 }
 0x339   : > { %14742 = vmatprep.mubr.msk.f32.mxu0 %vm333_vm2, %v18654_v46 }
 0x33c   : > { %14743 = vmatmul.mubr.msk.f32.gmra.mrb[82].mxu0 %vm333_vm2, %v18658_v55 }
 0x33d   : > { %14745 = vmatprep.mubr.msk.f32.mxu0 %vm333_vm2, %v18662_v52 }
 0x340   : > { %14746 = vmatmul.mubr.msk.f32.gmra.mrb[84].mxu0 %vm333_vm2, %v18666_v56 }
 0x341   : > { %14748 = vmatprep.mubr.msk.f32.mxu0 %vm333_vm2, %v18670_v6 }
 0x344   : > { %14749 = vmatmul.mubr.msk.f32.gmra.mrb[86].mxu0 %vm333_vm2, %v18674_v59 }
 0x345   : > { %14751 = vmatprep.mubr.msk.f32.mxu0 %vm333_vm2, %v18678_v26 }
 0x348   : > { %14752 = vmatmul.mubr.msk.f32.gmra.mrb[88].mxu0 %vm333_vm2, %v18682_v51 }
 0x349   : > { %14754 = vmatprep.mubr.msk.f32.mxu0 %vm333_vm2, %v18686_v2 }
 0x34c   : > { %14755 = vmatmul.mubr.msk.f32.gmra.mrb[90].mxu0 %vm333_vm2, %v18690_v61 }
 0x34d   : > { %14757 = vmatprep.mubr.msk.f32.mxu0 %vm333_vm2, %v18694_v53 }
 0x350   : > { %14758 = vmatmul.mubr.msk.f32.gmra.mrb[92].mxu0 %vm333_vm2, %v18698_v42 }
 0x351   : > { %14760 = vmatprep.mubr.msk.f32.mxu0 %vm333_vm2, %v18702_v29 }
 0x354   : > { %14761 = vmatmul.mubr.msk.f32.gmra.mrb[94].mxu0 %vm333_vm2, %v18706_v10 }
 0x355   : > { %14779 = vmatprep.mubr.msk.f32.mxu0 %vm333_vm2, %v5257_v4  ;;  %v15987_v4 = vpack.c.bf16 %v12303_v43, %v12302_v5  ;;  %v15991_v43 = vpack.c.bf16 %v12305_v11, %v12304_v33  ;;  %v18742_v5 = vld [vmem:[#allocation2 + $0x268] sm:$0xff]  ;;  %v18756_v33 = vld [vmem:[#allocation2 + $0x278] sm:$0xff]  ;;  %v18760_v11 = vld [vmem:[#allocation2 + $0x280] sm:$0xff] }
 0x356   : > { %20726 = vst [vmem:[#allocation11_spill] sm:$0xff] %v18742_v5  ;;  %20727 = vst [vmem:[#allocation12_spill] sm:$0xff] %v18760_v11 }
 0x358   : > { %14780 = vmatmul.mubr.msk.f32.vlgmr.msra.gmra.mrb[64].mxu0 %vm333_vm2, %v5258_v62  ;;  %v18738_v62 = vld [vmem:[#allocation2 + $0x260] sm:$0xff] }
 0x359   : > { %15982 = vmatpush3.bf16.msra.mxu0 %v15979_v17  ;;  %14782 = vmatprep.mubr.msk.f32.mxu0 %vm333_vm2, %v18724_v57  ;;  %v12338_v17 = vld [vmem:[%s20553_s5 + $0x100] sm:$0xff]  ;;  %v12339_v57 = vld [vmem:[%s20553_s5 + $0x108] sm:$0xff] }
 0x35a   : > { %15984 = vmatprep.subr.bf16.mxu0 %v15983_v48 }
 0x35c   : > { %14783 = vmatmul.mubr.msk.f32.gmra.mrb[66].mxu0 %vm333_vm2, %v18728_v22  ;;  %v18752_v22 = vld [vmem:[#allocation2 + $0x270] sm:$0xff] }
 0x35d   : > { %14785 = vmatprep.mubr.msk.f32.mxu0 %vm333_vm2, %v18738_v62  ;;  %15986 = vmatpush3.bf16.msra.mxu0 %v15983_v48  ;;  %v15995_v48 = vpack.c.bf16 %v12339_v57, %v12338_v17  ;;  %v18772_v57 = vld [vmem:[#allocation2 + $0x298] sm:$0xff]  ;;  %v18776_v17 = vld [vmem:[#allocation2 + $0x2a0] sm:$0xff] }
 0x35e   : > { %15988 = vmatprep.subr.bf16.mxu0 %v15987_v4  ;;  %20730 = vst [vmem:[#allocation15_spill] sm:$0xff] %v18772_v57  ;;  %20731 = vst [vmem:[#allocation16_spill] sm:$0xff] %v18776_v17 }
 0x360   : > { %14786 = vmatmul.mubr.msk.f32.gmra.mrb[68].mxu0 %vm333_vm2, %v18742_v5  ;;  %v18764_v5 = vld [vmem:[#allocation2 + $0x288] sm:$0xff] }
 0x361   : > { %14788 = vmatprep.mubr.msk.f32.mxu0 %vm333_vm2, %v18752_v22  ;;  %15990 = vmatpush3.bf16.msra.mxu0 %v15987_v4  ;;  %20728 = vst [vmem:[#allocation13_spill] sm:$0xff] %v18764_v5  ;;  %v18768_v4 = vld [vmem:[#allocation2 + $0x290] sm:$0xff] }
 0x362   : > { %15992 = vmatprep.subr.bf16.mxu0 %v15991_v43  ;;  %20729 = vst [vmem:[#allocation14_spill] sm:$0xff] %v18768_v4 }
 0x364   : > { %14789 = vmatmul.mubr.msk.f32.gmra.mrb[70].mxu0 %vm333_vm2, %v18756_v33 }
 0x365   : > { %14791 = vmatprep.mubr.msk.f32.mxu0 %vm333_vm2, %v18760_v11  ;;  %15994 = vmatpush3.bf16.msra.mxu0 %v15991_v43  ;;  %v18780_v43 = vld [vmem:[#allocation2 + $0x2a8] sm:$0xff] }
 0x366   : > { %15996 = vmatprep.subr.bf16.mxu0 %v15995_v48  ;;  %20732 = vst [vmem:[#allocation17_spill] sm:$0xff] %v18780_v43  ;;  %v12343_v11 = vld [vmem:[%s20553_s5 + $0x128] sm:$0xff] }
 0x368   : > { %14792 = vmatmul.mubr.msk.f32.gmra.mrb[72].mxu0 %vm333_vm2, %v18764_v5  ;;  %v18784_v5 = vld [vmem:[#allocation2 + $0x2b0] sm:$0xff] }
 0x369   : > { %14794 = vmatprep.mubr.msk.f32.mxu0 %vm333_vm2, %v18768_v4  ;;  %20733 = vst [vmem:[#allocation18_spill] sm:$0xff] %v18784_v5  ;;  %v18788_v4 = vld [vmem:[#allocation2 + $0x2b8] sm:$0xff] }
 0x36a   : > { %20734 = vst [vmem:[#allocation19_spill] sm:$0xff] %v18788_v4 }
 0x36c   : > { %14795 = vmatmul.mubr.msk.f32.gmra.mrb[74].mxu0 %vm333_vm2, %v18772_v57  ;;  %v18792_v57 = vld [vmem:[#allocation2 + $0x2c0] sm:$0xff] }
 0x36d   : > { %14797 = vmatprep.mubr.msk.f32.mxu0 %vm333_vm2, %v18776_v17  ;;  %20735 = vst [vmem:[#allocation20_spill] sm:$0xff] %v18792_v57  ;;  %v18796_v17 = vld [vmem:[#allocation2 + $0x2c8] sm:$0xff] }
 0x36e   : > { %20736 = vst [vmem:[#allocation21_spill] sm:$0xff] %v18796_v17 }
 0x370   : > { %14798 = vmatmul.mubr.msk.f32.gmra.mrb[76].mxu0 %vm333_vm2, %v18780_v43  ;;  %v18800_v43 = vld [vmem:[#allocation2 + $0x2d0] sm:$0xff] }
 0x371   : > { %14800 = vmatprep.mubr.msk.f32.mxu0 %vm333_vm2, %v18784_v5  ;;  %20737 = vst [vmem:[#allocation22_spill] sm:$0xff] %v18800_v43  ;;  %v18804_v5 = vld [vmem:[#allocation2 + $0x2d8] sm:$0xff] }
 0x372   : > { %20738 = vst [vmem:[#allocation23_spill] sm:$0xff] %v18804_v5 }
 0x374   : > { %14801 = vmatmul.mubr.msk.f32.gmra.mrb[78].mxu0 %vm333_vm2, %v18788_v4  ;;  %v18808_v4 = vld [vmem:[#allocation2 + $0x2e0] sm:$0xff] }
 0x375   : > { %14803 = vmatprep.mubr.msk.f32.mxu0 %vm333_vm2, %v18792_v57  ;;  %20739 = vst [vmem:[#allocation24_spill] sm:$0xff] %v18808_v4  ;;  %v18812_v57 = vld [vmem:[#allocation2 + $0x2e8] sm:$0xff] }
 0x376   : > { %20740 = vst [vmem:[#allocation25_spill] sm:$0xff] %v18812_v57 }
 0x378   : > { %14804 = vmatmul.mubr.msk.f32.gmra.mrb[80].mxu0 %vm333_vm2, %v18796_v17  ;;  %v18816_v17 = vld [vmem:[#allocation2 + $0x2f0] sm:$0xff] }
 0x379   : > { %14806 = vmatprep.mubr.msk.f32.mxu0 %vm333_vm2, %v18800_v43  ;;  %20741 = vst [vmem:[#allocation26_spill] sm:$0xff] %v18816_v17  ;;  %v18820_v43 = vld [vmem:[#allocation2 + $0x2f8] sm:$0xff] }
 0x37a   : > { %20742 = vst [vmem:[#allocation27_spill] sm:$0xff] %v18820_v43 }
 0x37c   : > { %14807 = vmatmul.mubr.msk.f32.gmra.mrb[82].mxu0 %vm333_vm2, %v18804_v5  ;;  %v18824_v5 = vld [vmem:[#allocation2 + $0x300] sm:$0xff] }
 0x37d   : > { %14809 = vmatprep.mubr.msk.f32.mxu0 %vm333_vm2, %v18808_v4  ;;  %20743 = vst [vmem:[#allocation28_spill] sm:$0xff] %v18824_v5  ;;  %v18828_v4 = vld [vmem:[#allocation2 + $0x308] sm:$0xff] }
 0x37e   : > { %20744 = vst [vmem:[#allocation29_spill] sm:$0xff] %v18828_v4 }
 0x380   : > { %14810 = vmatmul.mubr.msk.f32.gmra.mrb[84].mxu0 %vm333_vm2, %v18812_v57  ;;  %v18832_v57 = vld [vmem:[#allocation2 + $0x310] sm:$0xff] }
 0x381   : > { %14812 = vmatprep.mubr.msk.f32.mxu0 %vm333_vm2, %v18816_v17  ;;  %20745 = vst [vmem:[#allocation30_spill] sm:$0xff] %v18832_v57  ;;  %v18836_v17 = vld [vmem:[#allocation2 + $0x318] sm:$0xff] }
 0x382   : > { %20746 = vst [vmem:[#allocation31_spill] sm:$0xff] %v18836_v17 }
 0x384   : > { %14813 = vmatmul.mubr.msk.f32.gmra.mrb[86].mxu0 %vm333_vm2, %v18820_v43  ;;  %v18840_v43 = vld [vmem:[#allocation2 + $0x320] sm:$0xff] }
 0x385   : > { %14815 = vmatprep.mubr.msk.f32.mxu0 %vm333_vm2, %v18824_v5  ;;  %20747 = vst [vmem:[#allocation32_spill] sm:$0xff] %v18840_v43  ;;  %v18844_v5 = vld [vmem:[#allocation2 + $0x328] sm:$0xff] }
 0x386   : > { %20748 = vst [vmem:[#allocation33_spill] sm:$0xff] %v18844_v5 }
 0x388   : > { %14816 = vmatmul.mubr.msk.f32.gmra.mrb[88].mxu0 %vm333_vm2, %v18828_v4  ;;  %v18848_v4 = vld [vmem:[#allocation2 + $0x330] sm:$0xff] }
 0x389   : > { %14818 = vmatprep.mubr.msk.f32.mxu0 %vm333_vm2, %v18832_v57  ;;  %20749 = vst [vmem:[#allocation34_spill] sm:$0xff] %v18848_v4  ;;  %v18852_v57 = vld [vmem:[#allocation2 + $0x338] sm:$0xff] }
 0x38a   : > { %20750 = vst [vmem:[#allocation35_spill] sm:$0xff] %v18852_v57 }
 0x38c   : > { %14819 = vmatmul.mubr.msk.f32.gmra.mrb[90].mxu0 %vm333_vm2, %v18836_v17  ;;  %v12340_v17 = vld [vmem:[%s20553_s5 + $0x110] sm:$0xff] }
 0x38d   : > { %14821 = vmatprep.mubr.msk.f32.mxu0 %vm333_vm2, %v18840_v43  ;;  %v12341_v43 = vld [vmem:[%s20553_s5 + $0x118] sm:$0xff] }
 0x390   : > { %14822 = vmatmul.mubr.msk.f32.gmra.mrb[92].mxu0 %vm333_vm2, %v18844_v5  ;;  %v15999_v5 = vpack.c.bf16 %v12341_v43, %v12340_v17  ;;  %v12345_v17 = vld [vmem:[%s20553_s5 + $0x138] sm:$0xff]  ;;  %v12380_v43 = vld [vmem:[%s20553_s5 + $0x150] sm:$0xff] }
 0x391   : > { %14824 = vmatprep.mubr.msk.f32.mxu0 %vm333_vm2, %v18848_v4  ;;  %v12342_v4 = vld [vmem:[%s20553_s5 + $0x120] sm:$0xff] }
 0x394   : > { %14825 = vmatmul.mubr.msk.f32.gmra.mrb[94].mxu0 %vm333_vm2, %v18852_v57  ;;  %v16003_v57 = vpack.c.bf16 %v12343_v11, %v12342_v4  ;;  %v12379_v11 = vld [vmem:[%s20553_s5 + $0x148] sm:$0xff] }
 0x395   : > { %14843 = vmatprep.mubr.msk.f32.mxu0 %vm333_vm2, %v18577_v63  ;;  %v12344_v63 = vld [vmem:[%s20553_s5 + $0x130] sm:$0xff] }
 0x398   : > { %14844 = vmatmul.mubr.msk.f32.vlgmr.msra.gmra.mrb[64].mxu0 %vm333_vm2, %v18582_v34  ;;  %v16007_v34 = vpack.c.bf16 %v12345_v17, %v12344_v63  ;;  %v12381_v63 = vld [vmem:[%s20553_s5 + $0x158] sm:$0xff] }
 0x399   : > { %15998 = vmatpush3.bf16.msra.mxu0 %v15995_v48  ;;  %14846 = vmatprep.mubr.msk.f32.mxu0 %vm333_vm2, %v18592_v7  ;;  %v12378_v48 = vld [vmem:[%s20553_s5 + $0x140] sm:$0xff]  ;;  %v16015_v17 = vpack.c.bf16 %v12381_v63, %v12380_v43  ;;  %v12385_v43 = vld [vmem:[%s20553_s5 + $0x178] sm:$0xff] }
 0x39a   : > { %16000 = vmatprep.subr.bf16.mxu0 %v15999_v5  ;;  %v16011_v4 = vpack.c.bf16 %v12379_v11, %v12378_v48  ;;  %v12383_v48 = vld [vmem:[%s20553_s5 + $0x168] sm:$0xff]  ;;  %v12458_v63 = vld [vmem:[%s20553_s5 + $0x1c0] sm:$0xff] }
 0x39c   : > { %14847 = vmatmul.mubr.msk.f32.gmra.mrb[66].mxu0 %vm333_vm2, %v18596_v1 }
 0x39d   : > { %14849 = vmatprep.mubr.msk.f32.mxu0 %vm333_vm2, %v18606_v15  ;;  %16002 = vmatpush3.bf16.msra.mxu0 %v15999_v5  ;;  %v18940_v5 = vld [vmem:[#allocation2 + $0x100] sm:$0xff] }
 0x39e   : > { %16004 = vmatprep.subr.bf16.mxu0 %v16003_v57 }
 0x3a0   : > { %14850 = vmatmul.mubr.msk.f32.gmra.mrb[68].mxu0 %vm333_vm2, %v18610_v35 }
 0x3a1   : > { %14852 = vmatprep.mubr.msk.f32.mxu0 %vm333_vm2, %v18614_v21  ;;  %16006 = vmatpush3.bf16.msra.mxu0 %v16003_v57  ;;  %v18944_v57 = vld [vmem:[#allocation2 + $0x108] sm:$0xff] }
 0x3a2   : > { %16008 = vmatprep.subr.bf16.mxu0 %v16007_v34 }
 0x3a4   : > { %14853 = vmatmul.mubr.msk.f32.gmra.mrb[70].mxu0 %vm333_vm2, %v18618_v23 }
 0x3a5   : > { %14855 = vmatprep.mubr.msk.f32.mxu0 %vm333_vm2, %v18622_v25  ;;  %16010 = vmatpush3.bf16.msra.mxu0 %v16007_v34  ;;  %v12382_v34 = vld [vmem:[%s20553_s5 + $0x160] sm:$0xff] }
 0x3a6   : > { %16012 = vmatprep.subr.bf16.mxu0 %v16011_v4  ;;  %v16019_v11 = vpack.c.bf16 %v12383_v48, %v12382_v34  ;;  %v20760_v34 = vld [vmem:[#allocation12_spill] sm:$0xff] }
 0x3a8   : > { %14856 = vmatmul.mubr.msk.f32.gmra.mrb[72].mxu0 %vm333_vm2, %v18626_v47 }
 0x3a9   : > { %14858 = vmatprep.mubr.msk.f32.mxu0 %vm333_vm2, %v18630_v28 }
 0x3ac   : > { %14859 = vmatmul.mubr.msk.f32.gmra.mrb[74].mxu0 %vm333_vm2, %v18634_v30 }
 0x3ad   : > { %14861 = vmatprep.mubr.msk.f32.mxu0 %vm333_vm2, %v18638_v32 }
 0x3b0   : > { %14862 = vmatmul.mubr.msk.f32.gmra.mrb[76].mxu0 %vm333_vm2, %v18642_v41 }
 0x3b1   : > { %14864 = vmatprep.mubr.msk.f32.mxu0 %vm333_vm2, %v18646_v40 }
 0x3b4   : > { %14865 = vmatmul.mubr.msk.f32.gmra.mrb[78].mxu0 %vm333_vm2, %v18650_v44 }
 0x3b5   : > { %14867 = vmatprep.mubr.msk.f32.mxu0 %vm333_vm2, %v18654_v46 }
 0x3b8   : > { %14868 = vmatmul.mubr.msk.f32.gmra.mrb[80].mxu0 %vm333_vm2, %v18658_v55 }
 0x3b9   : > { %14870 = vmatprep.mubr.msk.f32.mxu0 %vm333_vm2, %v18662_v52 }
 0x3bc   : > { %14871 = vmatmul.mubr.msk.f32.gmra.mrb[82].mxu0 %vm333_vm2, %v18666_v56 }
 0x3bd   : > { %14873 = vmatprep.mubr.msk.f32.mxu0 %vm333_vm2, %v18670_v6 }
 0x3c0   : > { %14874 = vmatmul.mubr.msk.f32.gmra.mrb[84].mxu0 %vm333_vm2, %v18674_v59 }
 0x3c1   : > { %14876 = vmatprep.mubr.msk.f32.mxu0 %vm333_vm2, %v18678_v26 }
 0x3c4   : > { %14877 = vmatmul.mubr.msk.f32.gmra.mrb[86].mxu0 %vm333_vm2, %v18682_v51 }
 0x3c5   : > { %14879 = vmatprep.mubr.msk.f32.mxu0 %vm333_vm2, %v18686_v2 }
 0x3c8   : > { %14880 = vmatmul.mubr.msk.f32.gmra.mrb[88].mxu0 %vm333_vm2, %v18690_v61 }
 0x3c9   : > { %14882 = vmatprep.mubr.msk.f32.mxu0 %vm333_vm2, %v18694_v53 }
 0x3cc   : > { %14883 = vmatmul.mubr.msk.f32.gmra.mrb[90].mxu0 %vm333_vm2, %v18698_v42 }
 0x3cd   : > { %14885 = vmatprep.mubr.msk.f32.mxu0 %vm333_vm2, %v18702_v29 }
 0x3d0   : > { %14886 = vmatmul.mubr.msk.f32.gmra.mrb[92].mxu0 %vm333_vm2, %v18706_v10 }
 0x3d1   : > { %14888 = vmatprep.mubr.msk.f32.mxu0 %vm333_vm2, %v18940_v5 }
 0x3d4   : > { %14889 = vmatmul.mubr.msk.f32.gmra.mrb[94].mxu0 %vm333_vm2, %v18944_v57 }
 0x3d5   : > { %14907 = vmatprep.mubr.msk.f32.mxu0 %vm333_vm2, %v18313_v38  ;;  %v12384_v38 = vld [vmem:[%s20553_s5 + $0x170] sm:$0xff] }
 0x3d8   : > { %14908 = vmatmul.mubr.msk.f32.vlgmr.msra.gmra.mrb[64].mxu0 %vm333_vm2, %v18321_v60  ;;  %v16023_v60 = vpack.c.bf16 %v12385_v43, %v12384_v38  ;;  %v20762_v38 = vld [vmem:[#allocation14_spill] sm:$0xff]  ;;  %v20763_v43 = vld [vmem:[#allocation15_spill] sm:$0xff] }
 0x3d9   : > { %16014 = vmatpush3.bf16.msra.mxu0 %v16011_v4  ;;  %14910 = vmatprep.mubr.msk.f32.mxu0 %vm333_vm2, %v18331_v9  ;;  %v12418_v9 = vld [vmem:[%s20553_s5 + $0x180] sm:$0xff]  ;;  %v12419_v4 = vld [vmem:[%s20553_s5 + $0x188] sm:$0xff] }
 0x3da   : > { %16016 = vmatprep.subr.bf16.mxu0 %v16015_v17 }
 0x3dc   : > { %14911 = vmatmul.mubr.msk.f32.gmra.mrb[66].mxu0 %vm333_vm2, %v18339_v16  ;;  %v16027_v16 = vpack.c.bf16 %v12419_v4, %v12418_v9  ;;  %v20765_v9 = vld [vmem:[#allocation17_spill] sm:$0xff]  ;;  %v20766_v4 = vld [vmem:[#allocation18_spill] sm:$0xff] }
 0x3dd   : > { %14913 = vmatprep.mubr.msk.f32.mxu0 %vm333_vm2, %v18349_v14  ;;  %16018 = vmatpush3.bf16.msra.mxu0 %v16015_v17  ;;  %v20751_v14 = vld [vmem:[#allocation8_spill] sm:$0xff] }
 0x3de   : > { %16020 = vmatprep.subr.bf16.mxu0 %v16019_v11  ;;  %v12459_v17 = vld [vmem:[%s20553_s5 + $0x1c8] sm:$0xff] }
 0x3df   : > { %v16043_v48 = vpack.c.bf16 %v12459_v17, %v12458_v63  ;;  %v19128_v63 = vld [vmem:[#allocation2 + $0x348] sm:$0xff]  ;;  %v12460_v17 = vld [vmem:[%s20553_s5 + $0x1d0] sm:$0xff] }
 0x3e0   : > { %14914 = vmatmul.mubr.msk.f32.gmra.mrb[68].mxu0 %vm333_vm2, %v18357_v20  ;;  %v20752_v20 = vld [vmem:[#allocation10_spill] sm:$0xff] }
 0x3e1   : > { %14916 = vmatprep.mubr.msk.f32.mxu0 %vm333_vm2, %v18367_v49  ;;  %16022 = vmatpush3.bf16.msra.mxu0 %v16019_v11  ;;  %v20753_v49 = vld [vmem:[#allocation5_spill] sm:$0xff]  ;;  %20785 = vst [vmem:[#allocation10_spill] sm:$0xff] %v19128_v63 }
 0x3e2   : > { %16024 = vmatprep.subr.bf16.mxu0 %v16023_v60  ;;  %v20761_v11 = vld [vmem:[#allocation13_spill] sm:$0xff] }
 0x3e4   : > { %14917 = vmatmul.mubr.msk.f32.gmra.mrb[70].mxu0 %vm333_vm2, %v18375_v24  ;;  %v20754_v24 = vld [vmem:[#allocation6_spill] sm:$0xff] }
 0x3e5   : > { %14919 = vmatprep.mubr.msk.f32.mxu0 %vm333_vm2, %v18385_v13  ;;  %16026 = vmatpush3.bf16.msra.mxu0 %v16023_v60  ;;  %v20755_v13 = vld [vmem:[#allocation3_spill] sm:$0xff]  ;;  %v20764_v60 = vld [vmem:[#allocation16_spill] sm:$0xff] }
 0x3e6   : > { %16028 = vmatprep.subr.bf16.mxu0 %v16027_v16 }
 0x3e8   : > { %14920 = vmatmul.mubr.msk.f32.gmra.mrb[72].mxu0 %vm333_vm2, %v18393_v27  ;;  %v20756_v27 = vld [vmem:[#allocation4_spill] sm:$0xff] }
 0x3e9   : > { %14922 = vmatprep.mubr.msk.f32.mxu0 %vm333_vm2, %v18403_v0  ;;  %v19032_v0 = vld [vmem:[#allocation2 + $0x220] sm:$0xff] }
 0x3ec   : > { %14923 = vmatmul.mubr.msk.f32.gmra.mrb[74].mxu0 %vm333_vm2, %v18411_v31  ;;  %v19036_v31 = vld [vmem:[#allocation2 + $0x228] sm:$0xff] }
 0x3ed   : > { %14925 = vmatprep.mubr.msk.f32.mxu0 %vm333_vm2, %v18421_v19  ;;  %v12420_v19 = vld [vmem:[%s20553_s5 + $0x190] sm:$0xff] }
 0x3f0   : > { %14926 = vmatmul.mubr.msk.f32.gmra.mrb[76].mxu0 %vm333_vm2, %v18429_v37  ;;  %v12421_v37 = vld [vmem:[%s20553_s5 + $0x198] sm:$0xff] }
 0x3f1   : > { %14928 = vmatprep.mubr.msk.f32.mxu0 %vm333_vm2, %v18439_v36  ;;  %v20757_v36 = vld [vmem:[#allocation7_spill] sm:$0xff] }
 0x3f4   : > { %14929 = vmatmul.mubr.msk.f32.gmra.mrb[78].mxu0 %vm333_vm2, %v18447_v45  ;;  %v16031_v45 = vpack.c.bf16 %v12421_v37, %v12420_v19  ;;  %v20774_v19 = vld [vmem:[#allocation26_spill] sm:$0xff]  ;;  %v20775_v37 = vld [vmem:[#allocation27_spill] sm:$0xff] }
 0x3f5   : > { %14931 = vmatprep.mubr.msk.f32.mxu0 %vm333_vm2, %v18457_v3  ;;  %v12422_v3 = vld [vmem:[%s20553_s5 + $0x1a0] sm:$0xff] }
 0x3f8   : > { %14932 = vmatmul.mubr.msk.f32.gmra.mrb[80].mxu0 %vm333_vm2, %v18465_v50  ;;  %v12423_v50 = vld [vmem:[%s20553_s5 + $0x1a8] sm:$0xff] }
 0x3f9   : > { %14934 = vmatprep.mubr.msk.f32.mxu0 %vm333_vm2, %v18475_v54  ;;  %v20758_v54 = vld [vmem:[#allocation9_spill] sm:$0xff] }
 0x3fc   : > { %14935 = vmatmul.mubr.msk.f32.gmra.mrb[82].mxu0 %vm333_vm2, %v18483_v58  ;;  %v16035_v58 = vpack.c.bf16 %v12423_v50, %v12422_v3  ;;  %v20778_v3 = vld [vmem:[#allocation30_spill] sm:$0xff]  ;;  %v20779_v50 = vld [vmem:[#allocation31_spill] sm:$0xff] }
 0x3fd   : > { %14937 = vmatprep.mubr.msk.f32.mxu0 %vm333_vm2, %v18493_v12  ;;  %v12424_v12 = vld [vmem:[%s20553_s5 + $0x1b0] sm:$0xff] }
 0x400   : > { %14938 = vmatmul.mubr.msk.f32.gmra.mrb[84].mxu0 %vm333_vm2, %v18501_v39  ;;  %v12425_v39 = vld [vmem:[%s20553_s5 + $0x1b8] sm:$0xff] }
 0x401   : > { %14940 = vmatprep.mubr.msk.f32.mxu0 %vm333_vm2, %v18511_v18  ;;  %v20759_v18 = vld [vmem:[#allocation11_spill] sm:$0xff] }
 0x404   : > { %14941 = vmatmul.mubr.msk.f32.gmra.mrb[86].mxu0 %vm333_vm2, %v18519_v8  ;;  %v16039_v8 = vpack.c.bf16 %v12425_v39, %v12424_v12  ;;  %v20782_v12 = vld [vmem:[#allocation34_spill] sm:$0xff]  ;;  %v20783_v39 = vld [vmem:[#allocation35_spill] sm:$0xff] }
 0x405   : > { %14943 = vmatprep.mubr.msk.f32.mxu0 %vm333_vm2, %v20751_v14  ;;  %v20768_v14 = vld [vmem:[#allocation20_spill] sm:$0xff] }
 0x408   : > { %14944 = vmatmul.mubr.msk.f32.gmra.mrb[88].mxu0 %vm333_vm2, %v20752_v20  ;;  %v20769_v20 = vld [vmem:[#allocation21_spill] sm:$0xff] }
 0x409   : > { %14946 = vmatprep.mubr.msk.f32.mxu0 %vm333_vm2, %v20753_v49  ;;  %v20770_v49 = vld [vmem:[#allocation22_spill] sm:$0xff] }
 0x40c   : > { %14947 = vmatmul.mubr.msk.f32.gmra.mrb[90].mxu0 %vm333_vm2, %v20754_v24  ;;  %v20771_v24 = vld [vmem:[#allocation23_spill] sm:$0xff] }
 0x40d   : > { %14949 = vmatprep.mubr.msk.f32.mxu0 %vm333_vm2, %v20755_v13  ;;  %v20772_v13 = vld [vmem:[#allocation24_spill] sm:$0xff] }
 0x410   : > { %14950 = vmatmul.mubr.msk.f32.gmra.mrb[92].mxu0 %vm333_vm2, %v20756_v27  ;;  %v20773_v27 = vld [vmem:[#allocation25_spill] sm:$0xff] }
 0x411   : > { %14952 = vmatprep.mubr.msk.f32.mxu0 %vm333_vm2, %v19032_v0 }
 0x414   : > { %14953 = vmatmul.mubr.msk.f32.gmra.mrb[94].mxu0 %vm333_vm2, %v19036_v31 }
 0x415   : > { %14971 = vmatprep.mubr.msk.f32.mxu0 %vm333_vm2, %v20757_v36  ;;  %v20776_v36 = vld [vmem:[#allocation28_spill] sm:$0xff] }
 0x418   : > { %14972 = vmatmul.mubr.msk.f32.vlgmr.msra.gmra.mrb[64].mxu0 %vm333_vm2, %v20758_v54  ;;  %v20780_v54 = vld [vmem:[#allocation32_spill] sm:$0xff] }
 0x419   : > { %16030 = vmatpush3.bf16.msra.mxu0 %v16027_v16  ;;  %14974 = vmatprep.mubr.msk.f32.mxu0 %vm333_vm2, %v18738_v62  ;;  %v20767_v16 = vld [vmem:[#allocation19_spill] sm:$0xff] }
 0x41a   : > { %16032 = vmatprep.subr.bf16.mxu0 %v16031_v45 }
 0x41c   : > { %14975 = vmatmul.mubr.msk.f32.gmra.mrb[66].mxu0 %vm333_vm2, %v20759_v18 }
 0x41d   : > { %14977 = vmatprep.mubr.msk.f32.mxu0 %vm333_vm2, %v18752_v22  ;;  %16034 = vmatpush3.bf16.msra.mxu0 %v16031_v45  ;;  %v20777_v45 = vld [vmem:[#allocation29_spill] sm:$0xff] }
 0x41e   : > { %16036 = vmatprep.subr.bf16.mxu0 %v16035_v58 }
 0x420   : > { %14978 = vmatmul.mubr.msk.f32.gmra.mrb[68].mxu0 %vm333_vm2, %v18756_v33 }
 0x421   : > { %14980 = vmatprep.mubr.msk.f32.mxu0 %vm333_vm2, %v20760_v34  ;;  %16038 = vmatpush3.bf16.msra.mxu0 %v16035_v58  ;;  %v20781_v58 = vld [vmem:[#allocation33_spill] sm:$0xff] }
 0x422   : > { %16040 = vmatprep.subr.bf16.mxu0 %v16039_v8 }
 0x424   : > { %14981 = vmatmul.mubr.msk.f32.gmra.mrb[70].mxu0 %vm333_vm2, %v20761_v11 }
 0x425   : > { %14983 = vmatprep.mubr.msk.f32.mxu0 %vm333_vm2, %v20762_v38  ;;  %16042 = vmatpush3.bf16.msra.mxu0 %v16039_v8  ;;  %v19124_v8 = vld [vmem:[#allocation2 + $0x340] sm:$0xff] }
 0x426   : > { %16044 = vmatprep.subr.bf16.mxu0 %v16043_v48  ;;  %20784 = vst [vmem:[#allocation8_spill] sm:$0xff] %v19124_v8 }
 0x428   : > { %14984 = vmatmul.mubr.msk.f32.gmra.mrb[72].mxu0 %vm333_vm2, %v20763_v43 }
 0x429   : > { %14986 = vmatprep.mubr.msk.f32.mxu0 %vm333_vm2, %v20764_v60 }
 0x42c   : > { %14987 = vmatmul.mubr.msk.f32.gmra.mrb[74].mxu0 %vm333_vm2, %v20765_v9 }
 0x42d   : > { %14989 = vmatprep.mubr.msk.f32.mxu0 %vm333_vm2, %v20766_v4 }
 0x430   : > { %14990 = vmatmul.mubr.msk.f32.gmra.mrb[76].mxu0 %vm333_vm2, %v20767_v16 }
 0x431   : > { %14992 = vmatprep.mubr.msk.f32.mxu0 %vm333_vm2, %v20768_v14 }
 0x434   : > { %14993 = vmatmul.mubr.msk.f32.gmra.mrb[78].mxu0 %vm333_vm2, %v20769_v20 }
 0x435   : > { %14995 = vmatprep.mubr.msk.f32.mxu0 %vm333_vm2, %v20770_v49 }
 0x438   : > { %14996 = vmatmul.mubr.msk.f32.gmra.mrb[80].mxu0 %vm333_vm2, %v20771_v24 }
 0x439   : > { %14998 = vmatprep.mubr.msk.f32.mxu0 %vm333_vm2, %v20772_v13 }
 0x43c   : > { %14999 = vmatmul.mubr.msk.f32.gmra.mrb[82].mxu0 %vm333_vm2, %v20773_v27 }
 0x43d   : > { %15001 = vmatprep.mubr.msk.f32.mxu0 %vm333_vm2, %v20774_v19 }
 0x440   : > { %15002 = vmatmul.mubr.msk.f32.gmra.mrb[84].mxu0 %vm333_vm2, %v20775_v37 }
 0x441   : > { %15004 = vmatprep.mubr.msk.f32.mxu0 %vm333_vm2, %v20776_v36 }
 0x444   : > { %15005 = vmatmul.mubr.msk.f32.gmra.mrb[86].mxu0 %vm333_vm2, %v20777_v45 }
 0x445   : > { %15007 = vmatprep.mubr.msk.f32.mxu0 %vm333_vm2, %v20778_v3 }
 0x448   : > { %15008 = vmatmul.mubr.msk.f32.gmra.mrb[88].mxu0 %vm333_vm2, %v20779_v50 }
 0x449   : > { %15010 = vmatprep.mubr.msk.f32.mxu0 %vm333_vm2, %v20780_v54 }
 0x44c   : > { %15011 = vmatmul.mubr.msk.f32.gmra.mrb[90].mxu0 %vm333_vm2, %v20781_v58  ;;  %v12461_v58 = vld [vmem:[%s20553_s5 + $0x1d8] sm:$0xff] }
 0x44d   : > { %15013 = vmatprep.mubr.msk.f32.mxu0 %vm333_vm2, %v20782_v12  ;;  %v12463_v12 = vld [vmem:[%s20553_s5 + $0x1e8] sm:$0xff] }
 0x450   : > { %15014 = vmatmul.mubr.msk.f32.gmra.mrb[92].mxu0 %vm333_vm2, %v20783_v39  ;;  %v16047_v39 = vpack.c.bf16 %v12461_v58, %v12460_v17  ;;  %v12465_v58 = vld [vmem:[%s20553_s5 + $0x1f8] sm:$0xff] }
 0x451   : > { %15016 = vmatprep.mubr.msk.f32.mxu0 %vm333_vm2, %v19124_v8  ;;  %v12462_v8 = vld [vmem:[%s20553_s5 + $0x1e0] sm:$0xff]  ;;  %v7234_v17 = vld [vmem:[#allocation2 + $0x178] sm:$0xff] }
 0x454   : > { %15017 = vmatmul.mubr.msk.f32.gmra.mrb[94].mxu0 %vm333_vm2, %v19128_v63  ;;  %v16051_v63 = vpack.c.bf16 %v12463_v12, %v12462_v8  ;;  %v7232_v8 = vld [vmem:[#allocation2 + $0x168] sm:$0xff] }
 0x455   : > { %15035 = vmatprep.mubr.msk.f32.mxu0 %vm333_vm2, %v18592_v7  ;;  %v12464_v7 = vld [vmem:[%s20553_s5 + $0x1f0] sm:$0xff] }
 0x458   : > { %15036 = vmatmul.mubr.msk.f32.vlgmr.msra.gmra.mrb[64].mxu0 %vm333_vm2, %v18596_v1  ;;  %v16055_v1 = vpack.c.bf16 %v12465_v58, %v12464_v7  ;;  %v7235_v7 = vld [vmem:[#allocation2 + $0x180] sm:$0xff]  ;;  %v7236_v58 = vld [vmem:[#allocation2 + $0x188] sm:$0xff] }
 0x459   : > { %16046 = vmatpush3.bf16.msra.mxu0 %v16043_v48  ;;  %15038 = vmatprep.mubr.msk.f32.mxu0 %vm333_vm2, %v18606_v15  ;;  %v12498_v15 = vld [vmem:[%s20553_s5 + $0x200] sm:$0xff]  ;;  %v12499_v48 = vld [vmem:[%s20553_s5 + $0x208] sm:$0xff] }
 0x45a   : > { %16048 = vmatprep.subr.bf16.mxu0 %v16047_v39 }
 0x45c   : > { %15039 = vmatmul.mubr.msk.f32.gmra.mrb[66].mxu0 %vm333_vm2, %v18610_v35  ;;  %v16059_v35 = vpack.c.bf16 %v12499_v48, %v12498_v15  ;;  %v7238_v15 = vld [vmem:[#allocation2 + $0x198] sm:$0xff]  ;;  %v7239_v48 = vld [vmem:[#allocation2 + $0x1a0] sm:$0xff] }
 0x45d   : > { %15041 = vmatprep.mubr.msk.f32.mxu0 %vm333_vm2, %v18614_v21  ;;  %16050 = vmatpush3.bf16.msra.mxu0 %v16047_v39  ;;  %v6863_v21 = vld [vmem:[#allocation2 + $0x110] sm:$0xff] }
 0x45e   : > { %16052 = vmatprep.subr.bf16.mxu0 %v16051_v63 }
 0x460   : > { %15042 = vmatmul.mubr.msk.f32.gmra.mrb[68].mxu0 %vm333_vm2, %v18618_v23  ;;  %v6864_v23 = vld [vmem:[#allocation2 + $0x118] sm:$0xff] }
 0x461   : > { %15044 = vmatprep.mubr.msk.f32.mxu0 %vm333_vm2, %v18622_v25  ;;  %16054 = vmatpush3.bf16.msra.mxu0 %v16051_v63  ;;  %v7227_v25 = vld [vmem:[#allocation2 + $0x140] sm:$0xff]  ;;  %v7233_v63 = vld [vmem:[#allocation2 + $0x170] sm:$0xff] }
 0x462   : > { %16056 = vmatprep.subr.bf16.mxu0 %v16055_v1 }
 0x464   : > { %15045 = vmatmul.mubr.msk.f32.gmra.mrb[70].mxu0 %vm333_vm2, %v18626_v47  ;;  %v12500_v47 = vld [vmem:[%s20553_s5 + $0x210] sm:$0xff] }
 0x465   : > { %15047 = vmatprep.mubr.msk.f32.mxu0 %vm333_vm2, %v18630_v28  ;;  %16058 = vmatpush3.bf16.msra.mxu0 %v16055_v1  ;;  %v12501_v28 = vld [vmem:[%s20553_s5 + $0x218] sm:$0xff]  ;;  %v7237_v1 = vld [vmem:[#allocation2 + $0x190] sm:$0xff] }
 0x466   : > { %16060 = vmatprep.subr.bf16.mxu0 %v16059_v35 }
 0x468   : > { %15048 = vmatmul.mubr.msk.f32.gmra.mrb[72].mxu0 %vm333_vm2, %v18634_v30  ;;  %v12539_v30 = vld [vmem:[%s20555_s7 + $0x40] sm:$0xff] }
 0x469   : > { %15050 = vmatprep.mubr.msk.f32.mxu0 %vm333_vm2, %v18638_v32  ;;  %v12540_v32 = vld [vmem:[%s20555_s7 + $0x48] sm:$0xff] }
 0x46c   : > { %15051 = vmatmul.mubr.msk.f32.gmra.mrb[74].mxu0 %vm333_vm2, %v18642_v41  ;;  %v12541_v41 = vld [vmem:[%s20555_s7 + $0x50] sm:$0xff] }
 0x46d   : > { %15053 = vmatprep.mubr.msk.f32.mxu0 %vm333_vm2, %v18646_v40  ;;  %v19234_v40 = vpack.c.bf16 %v12540_v32, %v12539_v30  ;;  %v7246_v30 = vld [vmem:[#allocation2 + $0x1d8] sm:$0xff]  ;;  %v7247_v32 = vld [vmem:[#allocation2 + $0x1e0] sm:$0xff] }
 0x46f   : > { %16219 = vmatprep.subr.bf16.mxu1 %v19234_v40 }
 0x470   : > { %15054 = vmatmul.mubr.msk.f32.gmra.mrb[76].mxu0 %vm333_vm2, %v18650_v44  ;;  %v12542_v44 = vld [vmem:[%s20555_s7 + $0x58] sm:$0xff]  ;;  %16223 = vmatpush3.bf16.msra.mxu1 %v19234_v40 }
 0x471   : > { %15056 = vmatprep.mubr.msk.f32.mxu0 %vm333_vm2, %v18654_v46  ;;  %v7228_v46 = vld [vmem:[#allocation2 + $0x148] sm:$0xff] }
 0x474   : > { %15057 = vmatmul.mubr.msk.f32.gmra.mrb[78].mxu0 %vm333_vm2, %v18658_v55  ;;  %v16063_v55 = vpack.c.bf16 %v12501_v28, %v12500_v47  ;;  %v7244_v47 = vld [vmem:[#allocation2 + $0x1c8] sm:$0xff]  ;;  %v7245_v28 = vld [vmem:[#allocation2 + $0x1d0] sm:$0xff] }
 0x475   : > { %15059 = vmatprep.mubr.msk.f32.mxu0 %vm333_vm2, %v18662_v52  ;;  %v12502_v52 = vld [vmem:[%s20553_s5 + $0x220] sm:$0xff] }
 0x478   : > { %15060 = vmatmul.mubr.msk.f32.gmra.mrb[80].mxu0 %vm333_vm2, %v18666_v56  ;;  %v19242_v56 = vpack.c.bf16 %v12542_v44, %v12541_v41  ;;  %v7248_v41 = vld [vmem:[#allocation2 + $0x1e8] sm:$0xff]  ;;  %v7249_v44 = vld [vmem:[#allocation2 + $0x1f0] sm:$0xff] }
 0x479   : > { %15062 = vmatprep.mubr.msk.f32.mxu0 %vm333_vm2, %v18670_v6  ;;  %v12503_v6 = vld [vmem:[%s20553_s5 + $0x228] sm:$0xff] }
 0x47a   : > { %16220 = vmatprep.subr.bf16.mxu1 %v19242_v56 }
 0x47b   : > { %16224 = vmatpush3.bf16.msra.mxu1 %v19242_v56 }
 0x47c   : > { %15063 = vmatmul.mubr.msk.f32.gmra.mrb[82].mxu0 %vm333_vm2, %v18674_v59  ;;  %v12543_v59 = vld [vmem:[%s20555_s7 + $0x60] sm:$0xff] }
 0x47d   : > { %15065 = vmatprep.mubr.msk.f32.mxu0 %vm333_vm2, %v18678_v26  ;;  %v12544_v26 = vld [vmem:[%s20555_s7 + $0x68] sm:$0xff] }
 0x480   : > { %15066 = vmatmul.mubr.msk.f32.gmra.mrb[84].mxu0 %vm333_vm2, %v18682_v51  ;;  %v7229_v51 = vld [vmem:[#allocation2 + $0x150] sm:$0xff] }
 0x481   : > { %15068 = vmatprep.mubr.msk.f32.mxu0 %vm333_vm2, %v18686_v2  ;;  %v7230_v2 = vld [vmem:[#allocation2 + $0x158] sm:$0xff] }
 0x484   : > { %15069 = vmatmul.mubr.msk.f32.gmra.mrb[86].mxu0 %vm333_vm2, %v18690_v61  ;;  %v16067_v61 = vpack.c.bf16 %v12503_v6, %v12502_v52  ;;  %v7252_v52 = vld [vmem:[#allocation2 + $0x208] sm:$0xff]  ;;  %v7253_v6 = vld [vmem:[#allocation2 + $0x210] sm:$0xff] }
 0x485   : > { %15071 = vmatprep.mubr.msk.f32.mxu0 %vm333_vm2, %v18694_v53  ;;  %v12504_v53 = vld [vmem:[%s20553_s5 + $0x230] sm:$0xff] }
 0x488   : > { %15072 = vmatmul.mubr.msk.f32.gmra.mrb[88].mxu0 %vm333_vm2, %v18698_v42  ;;  %v19261_v42 = vpack.c.bf16 %v12544_v26, %v12543_v59  ;;  %v7254_v59 = vld [vmem:[#allocation2 + $0x218] sm:$0xff]  ;;  %v7257_v26 = vld [vmem:[#allocation2 + $0x230] sm:$0xff] }
 0x489   : > { %15074 = vmatprep.mubr.msk.f32.mxu0 %vm333_vm2, %v18702_v29  ;;  %v12505_v29 = vld [vmem:[%s20553_s5 + $0x238] sm:$0xff] }
 0x48a   : > { %v16071_v12 = vpack.c.bf16 %v12505_v29, %v12504_v53  ;;  %16221 = vmatprep.subr.bf16.mxu1 %v19261_v42 }
 0x48b   : > { %16225 = vmatpush3.bf16.msra.mxu1 %v19261_v42 }
 0x48c   : > { %15075 = vmatmul.mubr.msk.f32.gmra.mrb[90].mxu0 %vm333_vm2, %v18706_v10  ;;  %v12545_v10 = vld [vmem:[%s20555_s7 + $0x70] sm:$0xff] }
 0x48d   : > { %15077 = vmatprep.mubr.msk.f32.mxu0 %vm333_vm2, %v18940_v5  ;;  %v12546_v5 = vld [vmem:[%s20555_s7 + $0x78] sm:$0xff] }
 0x48e   : > { %v19276_v39 = vpack.c.bf16 %v12546_v5, %v12545_v10 }
 0x490   : > { %15078 = vmatmul.mubr.msk.f32.gmra.mrb[92].mxu0 %vm333_vm2, %v18944_v57  ;;  %v7231_v57 = vld [vmem:[#allocation2 + $0x160] sm:$0xff]  ;;  %16222 = vmatprep.subr.bf16.mxu1 %v19276_v39 }
 0x491   : > { %15080 = vmatprep.mubr.msk.f32.mxu0 %vm333_vm2, %v6863_v21  ;;  %16226 = vmatpush3.bf16.msra.mxu1 %v19276_v39  ;;  %v7241_v21 = vld [vmem:[#allocation2 + $0x1b0] sm:$0xff] }
 0x494   : > { %15081 = vmatmul.mubr.msk.f32.gmra.mrb[94].mxu0 %vm333_vm2, %v6864_v23  ;;  %v7242_v23 = vld [vmem:[#allocation2 + $0x1b8] sm:$0xff] }
 0x495   : > { %15099 = vmatprep.mubr.msk.f32.mxu0 %vm333_vm2, %v7227_v25  ;;  %v7243_v25 = vld [vmem:[#allocation2 + $0x1c0] sm:$0xff] }
 0x498   : > { %15100 = vmatmul.mubr.msk.f32.vlgmr.msra.gmra.mrb[64].mxu0 %vm333_vm2, %v7228_v46  ;;  %v7250_v46 = vld [vmem:[#allocation2 + $0x1f8] sm:$0xff] }
 0x499   : > { %16062 = vmatpush3.bf16.msra.mxu0 %v16059_v35  ;;  %15102 = vmatprep.mubr.msk.f32.mxu0 %vm333_vm2, %v7229_v51  ;;  %v7240_v35 = vld [vmem:[#allocation2 + $0x1a8] sm:$0xff]  ;;  %v7258_v51 = vld [vmem:[#allocation2 + $0x238] sm:$0xff] }
 0x49a   : > { %16064 = vmatprep.subr.bf16.mxu0 %v16063_v55 }
 0x49c   : > { %15103 = vmatmul.mubr.msk.f32.gmra.mrb[66].mxu0 %vm333_vm2, %v7230_v2 }
 0x49d   : > { %15105 = vmatprep.mubr.msk.f32.mxu0 %vm333_vm2, %v7231_v57  ;;  %16066 = vmatpush3.bf16.msra.mxu0 %v16063_v55  ;;  %v7251_v55 = vld [vmem:[#allocation2 + $0x200] sm:$0xff] }
 0x49e   : > { %16068 = vmatprep.subr.bf16.mxu0 %v16067_v61 }
 0x4a0   : > { %15106 = vmatmul.mubr.msk.f32.gmra.mrb[68].mxu0 %vm333_vm2, %v7232_v8  ;;  %v8219_v8 = vld [vmem:[%s20555_s7 + $0x28] sm:$0xff] }
 0x4a1   : > { %15108 = vmatprep.mubr.msk.f32.mxu0 %vm333_vm2, %v7233_v63  ;;  %16070 = vmatpush3.bf16.msra.mxu0 %v16067_v61 }
 0x4a2   : > { %16072 = vmatprep.subr.bf16.mxu0 %v16071_v12 }
 0x4a4   : > { %15109 = vmatmul.mubr.msk.f32.gmra.mrb[70].mxu0 %vm333_vm2, %v7234_v17 }
 0x4a5   : > { %15111 = vmatprep.mubr.msk.f32.mxu0 %vm333_vm2, %v7235_v7  ;;  %16074 = vmatpush3.bf16.msra.mxu0 %v16071_v12 }
 0x4a6   : > { %16076 = vmatprep.subr.bf16.mxu0 %v19234_v40 }
 0x4a8   : > { %15112 = vmatmul.mubr.msk.f32.gmra.mrb[72].mxu0 %vm333_vm2, %v7236_v58 }
 0x4a9   : > { %15114 = vmatprep.mubr.msk.f32.mxu0 %vm333_vm2, %v7237_v1 }
 0x4ac   : > { %15115 = vmatmul.mubr.msk.f32.gmra.mrb[74].mxu0 %vm333_vm2, %v7238_v15 }
 0x4ad   : > { %15117 = vmatprep.mubr.msk.f32.mxu0 %vm333_vm2, %v7239_v48 }
 0x4b0   : > { %15118 = vmatmul.mubr.msk.f32.gmra.mrb[76].mxu0 %vm333_vm2, %v7240_v35 }
 0x4b1   : > { %15120 = vmatprep.mubr.msk.f32.mxu0 %vm333_vm2, %v7241_v21 }
 0x4b4   : > { %15121 = vmatmul.mubr.msk.f32.gmra.mrb[78].mxu0 %vm333_vm2, %v7242_v23  ;;  %v8220_v23 = vld [vmem:[%s20555_s7 + $0x30] sm:$0xff] }
 0x4b5   : > { %15123 = vmatprep.mubr.msk.f32.mxu0 %vm333_vm2, %v7243_v25  ;;  %v8221_v25 = vld [vmem:[%s20555_s7 + $0x38] sm:$0xff] }
 0x4b8   : > { %15124 = vmatmul.mubr.msk.f32.gmra.mrb[80].mxu0 %vm333_vm2, %v7244_v47 }
 0x4b9   : > { %15126 = vmatprep.mubr.msk.f32.mxu0 %vm333_vm2, %v7245_v28 }
 0x4bc   : > { %15127 = vmatmul.mubr.msk.f32.gmra.mrb[82].mxu0 %vm333_vm2, %v7246_v30 }
 0x4bd   : > { %15129 = vmatprep.mubr.msk.f32.mxu0 %vm333_vm2, %v7247_v32 }
 0x4c0   : > { %15130 = vmatmul.mubr.msk.f32.gmra.mrb[84].mxu0 %vm333_vm2, %v7248_v41 }
 0x4c1   : > { %15132 = vmatprep.mubr.msk.f32.mxu0 %vm333_vm2, %v7249_v44 }
 0x4c4   : > { %15133 = vmatmul.mubr.msk.f32.gmra.mrb[86].mxu0 %vm333_vm2, %v7250_v46  ;;  %v16103_v46 = vpack.c.bf16 %v8221_v25, %v8220_v23 }
 0x4c5   : > { %15135 = vmatprep.mubr.msk.f32.mxu0 %vm333_vm2, %v7251_v55 }
 0x4c8   : > { %15136 = vmatmul.mubr.msk.f32.gmra.mrb[88].mxu0 %vm333_vm2, %v7252_v52 }
 0x4c9   : > { %15138 = vmatprep.mubr.msk.f32.mxu0 %vm333_vm2, %v7253_v6  ;;  %v12611_v6 = vld [vmem:[%s20555_s7 + $0x80] sm:$0xff] }
 0x4cc   : > { %15139 = vmatmul.mubr.msk.f32.gmra.mrb[90].mxu0 %vm333_vm2, %v7254_v59  ;;  %v12612_v59 = vld [vmem:[%s20555_s7 + $0x88] sm:$0xff] }
 0x4cd   : > { %15141 = vmatprep.mubr.msk.f32.mxu0 %vm333_vm2, %v19032_v0  ;;  %v20789_v0 = vld [vmem:[#allocation8_spill] sm:$0xff] }
 0x4d0   : > { %15142 = vmatmul.mubr.msk.f32.gmra.mrb[92].mxu0 %vm333_vm2, %v19036_v31  ;;  %v7651_v31 = vld [vmem:[#allocation2 + $0x350] sm:$0xff] }
 0x4d1   : > { %15144 = vmatprep.mubr.msk.f32.mxu0 %vm333_vm2, %v7257_v26 }
 0x4d4   : > { %15145 = vmatmul.mubr.msk.f32.gmra.mrb[94].mxu0 %vm333_vm2, %v7258_v51 }
 0x4d5   : > { %15163 = vmatprep.mubr.msk.f32.mxu0 %vm333_vm2, %v18738_v62  ;;  %v20787_v62 = vld [vmem:[#allocation34_spill] sm:$0xff] }
 0x4d8   : > { %15164 = vmatmul.mubr.msk.f32.vlgmr.msra.gmra.mrb[64].mxu0 %vm333_vm2, %v20759_v18  ;;  %v20790_v18 = vld [vmem:[#allocation10_spill] sm:$0xff] }
 0x4d9   : > { %15166 = vmatprep.mubr.msk.f32.mxu0 %vm333_vm2, %v18752_v22  ;;  %16078 = vmatpush3.bf16.msra.mxu0 %v19234_v40  ;;  %v20786_v22 = vld [vmem:[#allocation33_spill] sm:$0xff] }
 0x4da   : > { %16080 = vmatprep.subr.bf16.mxu0 %v19242_v56  ;;  %v8216_v40 = vld [vmem:[%s20555_s7 + $0x10] sm:$0xff] }
 0x4dc   : > { %15167 = vmatmul.mubr.msk.f32.gmra.mrb[66].mxu0 %vm333_vm2, %v18756_v33  ;;  %v20788_v33 = vld [vmem:[#allocation35_spill] sm:$0xff] }
 0x4dd   : > { %15169 = vmatprep.mubr.msk.f32.mxu0 %vm333_vm2, %v20760_v34  ;;  %16082 = vmatpush3.bf16.msra.mxu0 %v19242_v56  ;;  %v7652_v34 = vld [vmem:[#allocation2 + $0x358] sm:$0xff] }
 0x4de   : > { %16084 = vmatprep.subr.bf16.mxu0 %v19261_v42  ;;  %v8217_v56 = vld [vmem:[%s20555_s7 + $0x18] sm:$0xff] }
 0x4df   : > { %v16095_v5 = vpack.c.bf16 %v8217_v56, %v8216_v40 }
 0x4e0   : > { %15170 = vmatmul.mubr.msk.f32.gmra.mrb[68].mxu0 %vm333_vm2, %v20761_v11  ;;  %v8214_v11 = vld [vmem:[%s20555_s7] sm:$0xff] }
 0x4e1   : > { %15172 = vmatprep.mubr.msk.f32.mxu0 %vm333_vm2, %v20762_v38  ;;  %16086 = vmatpush3.bf16.msra.mxu0 %v19261_v42  ;;  %v8215_v38 = vld [vmem:[%s20555_s7 + $0x8] sm:$0xff] }
 0x4e2   : > { %16088 = vmatprep.subr.bf16.mxu0 %v19276_v39 }
 0x4e4   : > { %15173 = vmatmul.mubr.msk.f32.gmra.mrb[70].mxu0 %vm333_vm2, %v20763_v43  ;;  %v16091_v43 = vpack.c.bf16 %v8215_v38, %v8214_v11 }
 0x4e5   : > { %15175 = vmatprep.mubr.msk.f32.mxu0 %vm333_vm2, %v20764_v60  ;;  %16090 = vmatpush3.bf16.msra.mxu0 %v19276_v39  ;;  %v19389_v60 = vld [vmem:[%s20554_s6] ss:$0 sm:$0xff] }
 0x4e6   : > { %16092 = vmatprep.subr.bf16.mxu1 %v16091_v43  ;;  %v8218_v39 = vld [vmem:[%s20555_s7 + $0x20] sm:$0xff] }
 0x4e7   : > { %v16099_v48 = vpack.c.bf16 %v8219_v8, %v8218_v39 }
 0x4e8   : > { %15176 = vmatmul.mubr.msk.f32.gmra.mrb[72].mxu0 %vm333_vm2, %v20765_v9 }
 0x4e9   : > { %15178 = vmatprep.mubr.msk.f32.mxu0 %vm333_vm2, %v20766_v4 }
 0x4ec   : > { %15179 = vmatmul.mubr.msk.f32.gmra.mrb[74].mxu0 %vm333_vm2, %v20767_v16 }
 0x4ed   : > { %15181 = vmatprep.mubr.msk.f32.mxu0 %vm333_vm2, %v20768_v14 }
 0x4f0   : > { %15182 = vmatmul.mubr.msk.f32.gmra.mrb[76].mxu0 %vm333_vm2, %v20769_v20 }
 0x4f1   : > { %15184 = vmatprep.mubr.msk.f32.mxu0 %vm333_vm2, %v20770_v49 }
 0x4f4   : > { %15185 = vmatmul.mubr.msk.f32.gmra.mrb[78].mxu0 %vm333_vm2, %v20771_v24 }
 0x4f5   : > { %15187 = vmatprep.mubr.msk.f32.mxu0 %vm333_vm2, %v20772_v13 }
 0x4f8   : > { %15188 = vmatmul.mubr.msk.f32.gmra.mrb[80].mxu0 %vm333_vm2, %v20773_v27 }
 0x4f9   : > { %15190 = vmatprep.mubr.msk.f32.mxu0 %vm333_vm2, %v20774_v19 }
 0x4fc   : > { %15191 = vmatmul.mubr.msk.f32.gmra.mrb[82].mxu0 %vm333_vm2, %v20775_v37 }
 0x4fd   : > { %15193 = vmatprep.mubr.msk.f32.mxu0 %vm333_vm2, %v20776_v36 }
 0x500   : > { %15194 = vmatmul.mubr.msk.f32.gmra.mrb[84].mxu0 %vm333_vm2, %v20777_v45 }
 0x501   : > { %15196 = vmatprep.mubr.msk.f32.mxu0 %vm333_vm2, %v20778_v3 }
 0x504   : > { %15197 = vmatmul.mubr.msk.f32.gmra.mrb[86].mxu0 %vm333_vm2, %v20779_v50 }
 0x505   : > { %15199 = vmatprep.mubr.msk.f32.mxu0 %vm333_vm2, %v20780_v54 }
 0x508   : > { %15200 = vmatmul.mubr.msk.f32.gmra.mrb[88].mxu0 %vm333_vm2, %v20786_v22 }
 0x509   : > { %15202 = vmatprep.mubr.msk.f32.mxu0 %vm333_vm2, %v20787_v62 }
 0x50c   : > { %15203 = vmatmul.mubr.msk.f32.gmra.mrb[90].mxu0 %vm333_vm2, %v20788_v33 }
 0x50d   : > { %15205 = vmatprep.mubr.msk.f32.mxu0 %vm333_vm2, %v20789_v0 }
 0x510   : > { %15206 = vmatmul.mubr.msk.f32.gmra.mrb[92].mxu0 %vm333_vm2, %v20790_v18 }
 0x511   : > { %15208 = vmatprep.mubr.msk.f32.mxu0 %vm333_vm2, %v7651_v31  ;;  %v19487_v31 = vpack.c.bf16 %v12612_v59, %v12611_v6 }
 0x514   : > { %15209 = vmatmul.mubr.msk.f32.gmra.mrb[94].mxu0 %vm333_vm2, %v7652_v34 }
 0x5ab   : > { %v15165_v9 = vpop.f32.mrb[64].mxu0 }
 0x5ac   : > { %v8023_v4 = vadd.f32 %v15165_v9, %v19389_v60  ;;  %v7824_v16 = vpop.f32.mrb[65].mxu0 }
 0x5ad   : > { %v8022_v14 = vadd.f32 %v19389_v60, %v7824_v16 }
 0x5ae   : > { %v8055_v20 = vmax.f32 %v8023_v4, 0.0 }
 0x5af   : > { %v8054_v49 = vmax.f32 %v8022_v14, 0.0  ;;  %v15168_v24 = vpop.f32.mrb[66].mxu0 }
 0x5b0   : > { %8087 = vst.msk [vmem:[#allocation2 + $0x138] sm:$0xff] %vm333_vm2, %v8055_v20  ;;  %8151 = vst.msk [vmem:[#allocation2 + $0x257] sm:$0xff] %vm333_vm2, %v8055_v20  ;;  %v8025_v13 = vadd.f32 %v15168_v24, %v19389_v60  ;;  %v7834_v27 = vpop.f32.mrb[67].mxu0 }
 0x5b1   : > { %8119 = vst.msk [vmem:[#allocation2 + $0x19] sm:$0x7f] %vm818_vm4, %v8055_v20  ;;  %v8024_v19 = vadd.f32 %v19389_v60, %v7834_v27 }
 0x5b2   : > { %8086 = vst.msk [vmem:[#allocation2 + $0x130] sm:$0xff] %vm333_vm2, %v8054_v49  ;;  %8118 = vst.msk [vmem:[#allocation2 + $0x11] sm:$0xff] %vm333_vm2, %v8054_v49  ;;  %v8057_v37 = vmax.f32 %v8025_v13, 0.0 }
 0x5b3   : > { %8150 = vst.msk [vmem:[#allocation2 + $0x24f] sm:$0xfe] %vm850_vm5, %v8054_v49  ;;  %v8056_v36 = vmax.f32 %v8024_v19, 0.0  ;;  %v15171_v45 = vpop.f32.mrb[68].mxu0 }
 0x5b4   : > { %8089 = vst.msk [vmem:[#allocation2 + $0x148] sm:$0xff] %vm333_vm2, %v8057_v37  ;;  %8153 = vst.msk [vmem:[#allocation2 + $0x267] sm:$0xff] %vm333_vm2, %v8057_v37  ;;  %v8027_v3 = vadd.f32 %v15171_v45, %v19389_v60  ;;  %v7844_v50 = vpop.f32.mrb[69].mxu0 }
 0x5b5   : > { %8121 = vst.msk [vmem:[#allocation2 + $0x29] sm:$0x7f] %vm818_vm4, %v8057_v37  ;;  %v8026_v54 = vadd.f32 %v19389_v60, %v7844_v50 }
 0x5b6   : > { %8088 = vst.msk [vmem:[#allocation2 + $0x140] sm:$0xff] %vm333_vm2, %v8056_v36  ;;  %8120 = vst.msk [vmem:[#allocation2 + $0x21] sm:$0xff] %vm333_vm2, %v8056_v36  ;;  %v8059_v2 = vmax.f32 %v8027_v3, 0.0 }
 0x5b7   : > { %8152 = vst.msk [vmem:[#allocation2 + $0x25f] sm:$0xfe] %vm850_vm5, %v8056_v36  ;;  %v8058_v61 = vmax.f32 %v8026_v54, 0.0  ;;  %v15174_v53 = vpop.f32.mrb[70].mxu0  ;;  %v19427_v12 = vld [vmem:[#allocation2 + $0x138] sm:$0xff] }
 0x5b8   : > { %8091 = vst.msk [vmem:[#allocation2 + $0x158] sm:$0xff] %vm333_vm2, %v8059_v2  ;;  %8155 = vst.msk [vmem:[#allocation2 + $0x277] sm:$0xff] %vm333_vm2, %v8059_v2  ;;  %v8029_v42 = vadd.f32 %v15174_v53, %v19389_v60  ;;  %v7854_v29 = vpop.f32.mrb[71].mxu0 }
 0x5b9   : > { %8123 = vst.msk [vmem:[#allocation2 + $0x39] sm:$0x7f] %vm818_vm4, %v8059_v2  ;;  %v19419_v10 = vld [vmem:[#allocation2 + $0x130] sm:$0xff]  ;;  %v8028_v57 = vadd.f32 %v19389_v60, %v7854_v29 }
 0x5ba   : > { %8090 = vst.msk [vmem:[#allocation2 + $0x150] sm:$0xff] %vm333_vm2, %v8058_v61  ;;  %8122 = vst.msk [vmem:[#allocation2 + $0x31] sm:$0xff] %vm333_vm2, %v8058_v61  ;;  %15230 = vmatprep.mubr.msk.f32.mxu1 %vm333_vm2, %v19419_v10  ;;  %v8061_v63 = vmax.f32 %v8029_v42, 0.0 }
 0x5bb   : > { %8154 = vst.msk [vmem:[#allocation2 + $0x26f] sm:$0xfe] %vm850_vm5, %v8058_v61  ;;  %15231 = vmatmul.mubr.msk.f32.vlgmr.msra.gmra.mrb[32].mxu1 %vm333_vm2, %v19427_v12  ;;  %v8060_v17 = vmax.f32 %v8028_v57, 0.0  ;;  %v15177_v7 = vpop.f32.mrb[72].mxu0  ;;  %v19449_v21 = vld [vmem:[#allocation2 + $0x148] sm:$0xff] }
 0x5bc   : > { %16094 = vmatpush3.bf16.msra.mxu1 %v16091_v43  ;;  %8093 = vst.msk [vmem:[#allocation2 + $0x168] sm:$0xff] %vm333_vm2, %v8061_v63  ;;  %8157 = vst.msk [vmem:[#allocation2 + $0x287] sm:$0xff] %vm333_vm2, %v8061_v63  ;;  %v8031_v58 = vadd.f32 %v15177_v7, %v19389_v60  ;;  %v7864_v1 = vpop.f32.mrb[73].mxu0 }
 0x5bd   : > { %8125 = vst.msk [vmem:[#allocation2 + $0x49] sm:$0x7f] %vm818_vm4, %v8061_v63  ;;  %v19441_v15 = vld [vmem:[#allocation2 + $0x140] sm:$0xff]  ;;  %16096 = vmatprep.subr.bf16.mxu1 %v16095_v5  ;;  %v8030_v35 = vadd.f32 %v19389_v60, %v7864_v1 }
 0x5be   : > { %8092 = vst.msk [vmem:[#allocation2 + $0x160] sm:$0xff] %vm333_vm2, %v8060_v17  ;;  %8124 = vst.msk [vmem:[#allocation2 + $0x41] sm:$0xff] %vm333_vm2, %v8060_v17  ;;  %15233 = vmatprep.mubr.msk.f32.mxu1 %vm333_vm2, %v19441_v15  ;;  %v8063_v47 = vmax.f32 %v8031_v58, 0.0 }
 0x5bf   : > { %8156 = vst.msk [vmem:[#allocation2 + $0x27f] sm:$0xfe] %vm850_vm5, %v8060_v17  ;;  %15234 = vmatmul.mubr.msk.f32.gmra.mrb[34].mxu1 %vm333_vm2, %v19449_v21  ;;  %v8062_v28 = vmax.f32 %v8030_v35, 0.0  ;;  %v15180_v30 = vpop.f32.mrb[74].mxu0  ;;  %v19471_v52 = vld [vmem:[#allocation2 + $0x158] sm:$0xff] }
 0x5c0   : > { %16098 = vmatpush3.bf16.msra.mxu1 %v16095_v5  ;;  %8095 = vst.msk [vmem:[#allocation2 + $0x178] sm:$0xff] %vm333_vm2, %v8063_v47  ;;  %8159 = vst.msk [vmem:[#allocation2 + $0x297] sm:$0xff] %vm333_vm2, %v8063_v47  ;;  %v8033_v32 = vadd.f32 %v15180_v30, %v19389_v60  ;;  %v7874_v41 = vpop.f32.mrb[75].mxu0 }
 0x5c1   : > { %8127 = vst.msk [vmem:[#allocation2 + $0x59] sm:$0x7f] %vm818_vm4, %v8063_v47  ;;  %v19463_v44 = vld [vmem:[#allocation2 + $0x150] sm:$0xff]  ;;  %16100 = vmatprep.subr.bf16.mxu1 %v16099_v48  ;;  %v8032_v55 = vadd.f32 %v19389_v60, %v7874_v41 }
 0x5c2   : > { %8094 = vst.msk [vmem:[#allocation2 + $0x170] sm:$0xff] %vm333_vm2, %v8062_v28  ;;  %8126 = vst.msk [vmem:[#allocation2 + $0x51] sm:$0xff] %vm333_vm2, %v8062_v28  ;;  %15236 = vmatprep.mubr.msk.f32.mxu1 %vm333_vm2, %v19463_v44  ;;  %v8065_v26 = vmax.f32 %v8033_v32, 0.0 }
 0x5c3   : > { %8158 = vst.msk [vmem:[#allocation2 + $0x28f] sm:$0xfe] %vm850_vm5, %v8062_v28  ;;  %15237 = vmatmul.mubr.msk.f32.gmra.mrb[36].mxu1 %vm333_vm2, %v19471_v52  ;;  %v8064_v51 = vmax.f32 %v8032_v55, 0.0  ;;  %v15183_v22 = vpop.f32.mrb[76].mxu0  ;;  %v19495_v34 = vld [vmem:[#allocation2 + $0x168] sm:$0xff] }
 0x5c4   : > { %16102 = vmatpush3.bf16.msra.mxu1 %v16099_v48  ;;  %8097 = vst.msk [vmem:[#allocation2 + $0x188] sm:$0xff] %vm333_vm2, %v8065_v26  ;;  %8161 = vst.msk [vmem:[#allocation2 + $0x2a7] sm:$0xff] %vm333_vm2, %v8065_v26  ;;  %v8035_v62 = vadd.f32 %v15183_v22, %v19389_v60  ;;  %v7884_v33 = vpop.f32.mrb[77].mxu0 }
 0x5c5   : > { %8129 = vst.msk [vmem:[#allocation2 + $0x69] sm:$0x7f] %vm818_vm4, %v8065_v26  ;;  %v19485_v0 = vld [vmem:[#allocation2 + $0x160] sm:$0xff]  ;;  %16104 = vmatprep.subr.bf16.mxu1 %v16103_v46  ;;  %v8034_v18 = vadd.f32 %v19389_v60, %v7884_v33 }
 0x5c6   : > { %8096 = vst.msk [vmem:[#allocation2 + $0x180] sm:$0xff] %vm333_vm2, %v8064_v51  ;;  %8128 = vst.msk [vmem:[#allocation2 + $0x61] sm:$0xff] %vm333_vm2, %v8064_v51  ;;  %15239 = vmatprep.mubr.msk.f32.mxu1 %vm333_vm2, %v19485_v0  ;;  %v8067_v11 = vmax.f32 %v8035_v62, 0.0 }
 0x5c7   : > { %8160 = vst.msk [vmem:[#allocation2 + $0x29f] sm:$0xfe] %vm850_vm5, %v8064_v51  ;;  %15240 = vmatmul.mubr.msk.f32.gmra.mrb[38].mxu1 %vm333_vm2, %v19495_v34  ;;  %v8066_v38 = vmax.f32 %v8034_v18, 0.0  ;;  %v15186_v43 = vpop.f32.mrb[78].mxu0  ;;  %v19512_v20 = vld [vmem:[#allocation2 + $0x178] sm:$0xff] }
 0x5c8   : > { %16106 = vmatpush3.bf16.msra.mxu1 %v16103_v46  ;;  %8099 = vst.msk [vmem:[#allocation2 + $0x198] sm:$0xff] %vm333_vm2, %v8067_v11  ;;  %8163 = vst.msk [vmem:[#allocation2 + $0x2b7] sm:$0xff] %vm333_vm2, %v8067_v11  ;;  %v8037_v9 = vadd.f32 %v15186_v43, %v19389_v60  ;;  %v7894_v4 = vpop.f32.mrb[79].mxu0 }
 0x5c9   : > { %8131 = vst.msk [vmem:[#allocation2 + $0x79] sm:$0x7f] %vm818_vm4, %v8067_v11  ;;  %v19503_v16 = vld [vmem:[#allocation2 + $0x170] sm:$0xff]  ;;  %16108 = vmatprep.subr.bf16.mxu1 %v19487_v31  ;;  %v8036_v14 = vadd.f32 %v19389_v60, %v7894_v4 }
 0x5ca   : > { %8098 = vst.msk [vmem:[#allocation2 + $0x190] sm:$0xff] %vm333_vm2, %v8066_v38  ;;  %8130 = vst.msk [vmem:[#allocation2 + $0x71] sm:$0xff] %vm333_vm2, %v8066_v38  ;;  %15242 = vmatprep.mubr.msk.f32.mxu1 %vm333_vm2, %v19503_v16  ;;  %v8069_v49 = vmax.f32 %v8037_v9, 0.0 }
 0x5cb   : > { %8162 = vst.msk [vmem:[#allocation2 + $0x2af] sm:$0xfe] %vm850_vm5, %v8066_v38  ;;  %15243 = vmatmul.mubr.msk.f32.gmra.mrb[40].mxu1 %vm333_vm2, %v19512_v20  ;;  %v8068_v24 = vmax.f32 %v8036_v14, 0.0  ;;  %v15189_v13 = vpop.f32.mrb[80].mxu0  ;;  %v19528_v45 = vld [vmem:[#allocation2 + $0x188] sm:$0xff] }
 0x5cc   : > { %8101 = vst.msk [vmem:[#allocation2 + $0x1a8] sm:$0xff] %vm333_vm2, %v8069_v49  ;;  %8165 = vst.msk [vmem:[#allocation2 + $0x2c7] sm:$0xff] %vm333_vm2, %v8069_v49  ;;  %v8039_v27 = vadd.f32 %v15189_v13, %v19389_v60  ;;  %v7904_v19 = vpop.f32.mrb[81].mxu0 }
 0x5cd   : > { %8133 = vst.msk [vmem:[#allocation2 + $0x89] sm:$0x7f] %vm818_vm4, %v8069_v49  ;;  %v19520_v37 = vld [vmem:[#allocation2 + $0x180] sm:$0xff]  ;;  %v8038_v36 = vadd.f32 %v19389_v60, %v7904_v19 }
 0x5ce   : > { %8100 = vst.msk [vmem:[#allocation2 + $0x1a0] sm:$0xff] %vm333_vm2, %v8068_v24  ;;  %8132 = vst.msk [vmem:[#allocation2 + $0x81] sm:$0xff] %vm333_vm2, %v8068_v24  ;;  %15245 = vmatprep.mubr.msk.f32.mxu1 %vm333_vm2, %v19520_v37  ;;  %v8071_v3 = vmax.f32 %v8039_v27, 0.0 }
 0x5cf   : > { %8164 = vst.msk [vmem:[#allocation2 + $0x2bf] sm:$0xfe] %vm850_vm5, %v8068_v24  ;;  %15246 = vmatmul.mubr.msk.f32.gmra.mrb[42].mxu1 %vm333_vm2, %v19528_v45  ;;  %v8070_v50 = vmax.f32 %v8038_v36, 0.0  ;;  %v15192_v54 = vpop.f32.mrb[82].mxu0  ;;  %v19544_v53 = vld [vmem:[#allocation2 + $0x198] sm:$0xff] }
 0x5d0   : > { %8103 = vst.msk [vmem:[#allocation2 + $0x1b8] sm:$0xff] %vm333_vm2, %v8071_v3  ;;  %8167 = vst.msk [vmem:[#allocation2 + $0x2d7] sm:$0xff] %vm333_vm2, %v8071_v3  ;;  %v8041_v40 = vadd.f32 %v15192_v54, %v19389_v60  ;;  %v7914_v56 = vpop.f32.mrb[83].mxu0 }
 0x5d1   : > { %8135 = vst.msk [vmem:[#allocation2 + $0x99] sm:$0x7f] %vm818_vm4, %v8071_v3  ;;  %v19536_v2 = vld [vmem:[#allocation2 + $0x190] sm:$0xff]  ;;  %v8040_v61 = vadd.f32 %v19389_v60, %v7914_v56 }
 0x5d2   : > { %8102 = vst.msk [vmem:[#allocation2 + $0x1b0] sm:$0xff] %vm333_vm2, %v8070_v50  ;;  %8134 = vst.msk [vmem:[#allocation2 + $0x91] sm:$0xff] %vm333_vm2, %v8070_v50  ;;  %15248 = vmatprep.mubr.msk.f32.mxu1 %vm333_vm2, %v19536_v2  ;;  %v8073_v42 = vmax.f32 %v8041_v40, 0.0 }
 0x5d3   : > { %8166 = vst.msk [vmem:[#allocation2 + $0x2cf] sm:$0xfe] %vm850_vm5, %v8070_v50  ;;  %15249 = vmatmul.mubr.msk.f32.gmra.mrb[44].mxu1 %vm333_vm2, %v19544_v53  ;;  %v8072_v29 = vmax.f32 %v8040_v61, 0.0  ;;  %v15195_v5 = vpop.f32.mrb[84].mxu0  ;;  %v19560_v17 = vld [vmem:[#allocation2 + $0x1a8] sm:$0xff] }
 0x5d4   : > { %8105 = vst.msk [vmem:[#allocation2 + $0x1c8] sm:$0xff] %vm333_vm2, %v8073_v42  ;;  %8169 = vst.msk [vmem:[#allocation2 + $0x2e7] sm:$0xff] %vm333_vm2, %v8073_v42  ;;  %v8043_v57 = vadd.f32 %v15195_v5, %v19389_v60  ;;  %v7924_v39 = vpop.f32.mrb[85].mxu0 }
 0x5d5   : > { %8137 = vst.msk [vmem:[#allocation2 + $0xa9] sm:$0x7f] %vm818_vm4, %v8073_v42  ;;  %v19552_v8 = vld [vmem:[#allocation2 + $0x1a0] sm:$0xff]  ;;  %v8042_v63 = vadd.f32 %v19389_v60, %v7924_v39 }
 0x5d6   : > { %8104 = vst.msk [vmem:[#allocation2 + $0x1c0] sm:$0xff] %vm333_vm2, %v8072_v29  ;;  %8136 = vst.msk [vmem:[#allocation2 + $0xa1] sm:$0xff] %vm333_vm2, %v8072_v29  ;;  %15251 = vmatprep.mubr.msk.f32.mxu1 %vm333_vm2, %v19552_v8  ;;  %v8075_v7 = vmax.f32 %v8043_v57, 0.0  ;;  %v8182_v39 = vld [vmem:[#allocation2] sm:$0xff] }
 0x5d7   : > { %8168 = vst.msk [vmem:[#allocation2 + $0x2df] sm:$0xfe] %vm850_vm5, %v8072_v29  ;;  %15252 = vmatmul.mubr.msk.f32.gmra.mrb[46].mxu1 %vm333_vm2, %v19560_v17  ;;  %v8074_v58 = vmax.f32 %v8042_v63, 0.0  ;;  %v15198_v1 = vpop.f32.mrb[86].mxu0  ;;  %v19576_v47 = vld [vmem:[#allocation2 + $0x1b8] sm:$0xff] }
 0x5d8   : > { %8107 = vst.msk [vmem:[#allocation2 + $0x1d8] sm:$0xff] %vm333_vm2, %v8075_v7  ;;  %8171 = vst.msk [vmem:[#allocation2 + $0x2f7] sm:$0xff] %vm333_vm2, %v8075_v7  ;;  %v8045_v48 = vadd.f32 %v15198_v1, %v19389_v60  ;;  %v7934_v35 = vpop.f32.mrb[87].mxu0  ;;  %v8183_v1 = vld [vmem:[#allocation2 + $0x8] sm:$0xff] }
 0x5d9   : > { %8139 = vst.msk [vmem:[#allocation2 + $0xb9] sm:$0x7f] %vm818_vm4, %v8075_v7  ;;  %v19568_v23 = vld [vmem:[#allocation2 + $0x1b0] sm:$0xff]  ;;  %v8044_v25 = vadd.f32 %v19389_v60, %v7934_v35  ;;  %v12615_v35 = vld [vmem:[%s20555_s7 + $0xa0] sm:$0xff] }
 0x5da   : > { %8106 = vst.msk [vmem:[#allocation2 + $0x1d0] sm:$0xff] %vm333_vm2, %v8074_v58  ;;  %8138 = vst.msk [vmem:[#allocation2 + $0xb1] sm:$0xff] %vm333_vm2, %v8074_v58  ;;  %15254 = vmatprep.mubr.msk.f32.mxu1 %vm333_vm2, %v19568_v23  ;;  %v8077_v28 = vmax.f32 %v8045_v48, 0.0  ;;  %v12613_v7 = vld [vmem:[%s20555_s7 + $0x90] sm:$0xff] }
 0x5db   : > { %8170 = vst.msk [vmem:[#allocation2 + $0x2ef] sm:$0xfe] %vm850_vm5, %v8074_v58  ;;  %15255 = vmatmul.mubr.msk.f32.gmra.mrb[48].mxu1 %vm333_vm2, %v19576_v47  ;;  %v8076_v30 = vmax.f32 %v8044_v25, 0.0  ;;  %v15201_v32 = vpop.f32.mrb[88].mxu0  ;;  %v19592_v59 = vld [vmem:[#allocation2 + $0x1c8] sm:$0xff]  ;;  %v12614_v58 = vld [vmem:[%s20555_s7 + $0x98] sm:$0xff] }
 0x5dc   : > { %8109 = vst.msk [vmem:[#allocation2 + $0x1e8] sm:$0xff] %vm333_vm2, %v8077_v28  ;;  %8173 = vst.msk [vmem:[#allocation2 + $0x307] sm:$0xff] %vm333_vm2, %v8077_v28  ;;  %v8047_v41 = vadd.f32 %v15201_v32, %v19389_v60  ;;  %v7944_v46 = vpop.f32.mrb[89].mxu0  ;;  %v16111_v48 = vpack.c.bf16 %v12614_v58, %v12613_v7  ;;  %v12616_v25 = vld [vmem:[%s20555_s7 + $0xa8] sm:$0xff]  ;;  %v19685_v32 = vld [vmem:[#allocation2 + $0x18] sm:$0xff] }
 0x5dd   : > { %8141 = vst.msk [vmem:[#allocation2 + $0xc9] sm:$0x7f] %vm818_vm4, %v8077_v28  ;;  %v19584_v55 = vld [vmem:[#allocation2 + $0x1c0] sm:$0xff]  ;;  %v8046_v6 = vadd.f32 %v19389_v60, %v7944_v46  ;;  %v19680_v28 = vld [vmem:[#allocation2 + $0x10] sm:$0xff]  ;;  %v12618_v46 = vld [vmem:[%s20555_s7 + $0xb8] sm:$0xff] }
 0x5de   : > { %8108 = vst.msk [vmem:[#allocation2 + $0x1e0] sm:$0xff] %vm333_vm2, %v8076_v30  ;;  %8140 = vst.msk [vmem:[#allocation2 + $0xc1] sm:$0xff] %vm333_vm2, %v8076_v30  ;;  %15257 = vmatprep.mubr.msk.f32.mxu1 %vm333_vm2, %v19584_v55  ;;  %v8079_v26 = vmax.f32 %v8047_v41, 0.0  ;;  %v12617_v41 = vld [vmem:[%s20555_s7 + $0xb0] sm:$0xff] }
 0x5df   : > { %8172 = vst.msk [vmem:[#allocation2 + $0x2ff] sm:$0xfe] %vm850_vm5, %v8076_v30  ;;  %15258 = vmatmul.mubr.msk.f32.gmra.mrb[50].mxu1 %vm333_vm2, %v19592_v59  ;;  %v8078_v51 = vmax.f32 %v8046_v6, 0.0  ;;  %v15204_v22 = vpop.f32.mrb[90].mxu0  ;;  %v19608_v38 = vld [vmem:[#allocation2 + $0x1d8] sm:$0xff]  ;;  %v16115_v30 = vpack.c.bf16 %v12616_v25, %v12615_v35  ;;  %v19695_v6 = vld [vmem:[#allocation2 + $0x20] sm:$0xff] }
 0x5e0   : > { %8111 = vst.msk [vmem:[#allocation2 + $0x1f8] sm:$0xff] %vm333_vm2, %v8079_v26  ;;  %8175 = vst.msk [vmem:[#allocation2 + $0x317] sm:$0xff] %vm333_vm2, %v8079_v26  ;;  %v8049_v62 = vadd.f32 %v15204_v22, %v19389_v60  ;;  %v7954_v33 = vpop.f32.mrb[91].mxu0  ;;  %v12652_v22 = vld [vmem:[%s20555_s7 + $0xc8] sm:$0xff] }
 0x5e1   : > { %8143 = vst.msk [vmem:[#allocation2 + $0xd9] sm:$0x7f] %vm818_vm4, %v8079_v26  ;;  %v19600_v18 = vld [vmem:[#allocation2 + $0x1d0] sm:$0xff]  ;;  %v8048_v11 = vadd.f32 %v19389_v60, %v7954_v33  ;;  %v19699_v26 = vld [vmem:[#allocation2 + $0x28] sm:$0xff]  ;;  %v19777_v7 = vld [vmem:[#allocation2 + $0xb8] sm:$0xff] }
 0x5e2   : > { %8110 = vst.msk [vmem:[#allocation2 + $0x1f0] sm:$0xff] %vm333_vm2, %v8078_v51  ;;  %8142 = vst.msk [vmem:[#allocation2 + $0xd1] sm:$0xff] %vm333_vm2, %v8078_v51  ;;  %15260 = vmatprep.mubr.msk.f32.mxu1 %vm333_vm2, %v19600_v18  ;;  %v8081_v43 = vmax.f32 %v8049_v62, 0.0  ;;  %v19709_v62 = vld [vmem:[#allocation2 + $0x30] sm:$0xff] }
 0x5e3   : > { %8174 = vst.msk [vmem:[#allocation2 + $0x30f] sm:$0xfe] %vm850_vm5, %v8078_v51  ;;  %15261 = vmatmul.mubr.msk.f32.gmra.mrb[52].mxu1 %vm333_vm2, %v19608_v38  ;;  %v8080_v9 = vmax.f32 %v8048_v11, 0.0  ;;  %v15207_v4 = vpop.f32.mrb[92].mxu0  ;;  %v19624_v27 = vld [vmem:[#allocation2 + $0x1e8] sm:$0xff]  ;;  %v12651_v51 = vld [vmem:[%s20555_s7 + $0xc0] sm:$0xff] }
 0x5e4   : > { %8113 = vst.msk [vmem:[#allocation2 + $0x208] sm:$0xff] %vm333_vm2, %v8081_v43  ;;  %8177 = vst.msk [vmem:[#allocation2 + $0x327] sm:$0xff] %vm333_vm2, %v8081_v43  ;;  %v8051_v14 = vadd.f32 %v15207_v4, %v19389_v60  ;;  %v7964_v49 = vpop.f32.mrb[93].mxu0  ;;  %v16123_v33 = vpack.c.bf16 %v12652_v22, %v12651_v51  ;;  %v19713_v11 = vld [vmem:[#allocation2 + $0x38] sm:$0xff]  ;;  %v19725_v4 = vld [vmem:[#allocation2 + $0x50] sm:$0xff] }
 0x5e5   : > { %8145 = vst.msk [vmem:[#allocation2 + $0xe9] sm:$0x7f] %vm818_vm4, %v8081_v43  ;;  %v19616_v24 = vld [vmem:[#allocation2 + $0x1e0] sm:$0xff]  ;;  %v8050_v13 = vadd.f32 %v19389_v60, %v7964_v49  ;;  %v12653_v51 = vld [vmem:[%s20555_s7 + $0xd0] sm:$0xff]  ;;  %v12654_v22 = vld [vmem:[%s20555_s7 + $0xd8] sm:$0xff] }
 0x5e6   : > { %8112 = vst.msk [vmem:[#allocation2 + $0x200] sm:$0xff] %vm333_vm2, %v8080_v9  ;;  %8144 = vst.msk [vmem:[#allocation2 + $0xe1] sm:$0xff] %vm333_vm2, %v8080_v9  ;;  %15263 = vmatprep.mubr.msk.f32.mxu1 %vm333_vm2, %v19616_v24  ;;  %v8083_v19 = vmax.f32 %v8051_v14, 0.0  ;;  %v19717_v43 = vld [vmem:[#allocation2 + $0x40] sm:$0xff]  ;;  %v19729_v14 = vld [vmem:[#allocation2 + $0x58] sm:$0xff] }
 0x5e7   : > { %8176 = vst.msk [vmem:[#allocation2 + $0x31f] sm:$0xfe] %vm850_vm5, %v8080_v9  ;;  %15264 = vmatmul.mubr.msk.f32.gmra.mrb[54].mxu1 %vm333_vm2, %v19624_v27  ;;  %v8082_v36 = vmax.f32 %v8050_v13, 0.0  ;;  %v15210_v3 = vpop.f32.mrb[94].mxu0  ;;  %v19640_v61 = vld [vmem:[#allocation2 + $0x1f8] sm:$0xff]  ;;  %v19721_v9 = vld [vmem:[#allocation2 + $0x48] sm:$0xff] }
 0x5e8   : > { %8115 = vst.msk [vmem:[#allocation2 + $0x218] sm:$0xff] %vm333_vm2, %v8083_v19  ;;  %8179 = vst.msk [vmem:[#allocation2 + $0x337] sm:$0xff] %vm333_vm2, %v8083_v19  ;;  %v8053_v50 = vadd.f32 %v15210_v3, %v19389_v60  ;;  %v7974_v54 = vpop.f32.mrb[95].mxu0  ;;  %v19733_v49 = vld [vmem:[#allocation2 + $0x60] sm:$0xff]  ;;  %v19737_v13 = vld [vmem:[#allocation2 + $0x68] sm:$0xff] }
 0x5e9   : > { %8147 = vst.msk [vmem:[#allocation2 + $0xf9] sm:$0x7f] %vm818_vm4, %v8083_v19  ;;  %v19632_v40 = vld [vmem:[#allocation2 + $0x1f0] sm:$0xff]  ;;  %v8052_v56 = vadd.f32 %v19389_v60, %v7974_v54  ;;  %20792 = vst [vmem:[#allocation6_spill] sm:$0xff] %v19640_v61  ;;  %v19749_v3 = vld [vmem:[#allocation2 + $0x80] sm:$0xff] }
 0x5ea   : > { %20791 = vst [vmem:[#allocation5_spill] sm:$0xff] %v19632_v40  ;;  %8114 = vst.msk [vmem:[#allocation2 + $0x210] sm:$0xff] %vm333_vm2, %v8082_v36  ;;  %15266 = vmatprep.mubr.msk.f32.mxu1 %vm333_vm2, %v19632_v40  ;;  %v8085_v42 = vmax.f32 %v8053_v50, 0.0  ;;  %v19741_v19 = vld [vmem:[#allocation2 + $0x70] sm:$0xff]  ;;  %v19753_v50 = vld [vmem:[#allocation2 + $0x88] sm:$0xff] }
 0x5eb   : > { %8146 = vst.msk [vmem:[#allocation2 + $0xf1] sm:$0xff] %vm333_vm2, %v8082_v36  ;;  %15267 = vmatmul.mubr.msk.f32.gmra.mrb[56].mxu1 %vm333_vm2, %v19640_v61  ;;  %v8084_v29 = vmax.f32 %v8052_v56, 0.0  ;;  %v19654_v60 = vld [vmem:[#allocation2 + $0x208] sm:$0xff]  ;;  %v19757_v54 = vld [vmem:[#allocation2 + $0x90] sm:$0xff]  ;;  %v19761_v56 = vld [vmem:[#allocation2 + $0x98] sm:$0xff] }
 0x5ec   : > { %8178 = vst.msk [vmem:[#allocation2 + $0x32f] sm:$0xfe] %vm850_vm5, %v8082_v36  ;;  %20794 = vst [vmem:[#allocation4_spill] sm:$0xff] %v19654_v60  ;;  %v19745_v36 = vld [vmem:[#allocation2 + $0x78] sm:$0xff]  ;;  %v19781_v58 = vld [vmem:[#allocation2 + $0xc0] sm:$0xff] }
 0x5ed   : > { %8117 = vst.msk [vmem:[#allocation2 + $0x228] sm:$0xff] %vm333_vm2, %v8085_v42  ;;  %8181 = vst.msk [vmem:[#allocation2 + $0x347] sm:$0xff] %vm333_vm2, %v8085_v42  ;;  %v19647_v5 = vld [vmem:[#allocation2 + $0x200] sm:$0xff]  ;;  %v19793_v35 = vld [vmem:[#allocation2 + $0xd8] sm:$0xff] }
 0x5ee   : > { %8149 = vst.msk [vmem:[#allocation2 + $0x109] sm:$0x7f] %vm818_vm4, %v8085_v42  ;;  %20793 = vst [vmem:[#allocation3_spill] sm:$0xff] %v19647_v5  ;;  %15269 = vmatprep.mubr.msk.f32.mxu1 %vm333_vm2, %v19647_v5  ;;  %v19765_v42 = vld [vmem:[#allocation2 + $0xa0] sm:$0xff]  ;;  %v12656_v5 = vld [vmem:[%s20555_s7 + $0xe8] sm:$0xff] }
 0x5ef   : > { %8116 = vst.msk [vmem:[#allocation2 + $0x220] sm:$0xff] %vm333_vm2, %v8084_v29  ;;  %8148 = vst.msk [vmem:[#allocation2 + $0x101] sm:$0xff] %vm333_vm2, %v8084_v29  ;;  %15270 = vmatmul.mubr.msk.f32.gmra.mrb[58].mxu1 %vm333_vm2, %v19654_v60  ;;  %v19662_v63 = vld [vmem:[#allocation2 + $0x218] sm:$0xff]  ;;  %v19797_v25 = vld [vmem:[#allocation2 + $0xe0] sm:$0xff] }
 0x5f0   : > { %8180 = vst.msk [vmem:[#allocation2 + $0x33f] sm:$0xfe] %vm850_vm5, %v8084_v29  ;;  %20796 = vst [vmem:[#allocation9_spill] sm:$0xff] %v19662_v63  ;;  %v19769_v29 = vld [vmem:[#allocation2 + $0xa8] sm:$0xff]  ;;  %v12655_v60 = vld [vmem:[%s20555_s7 + $0xe0] sm:$0xff] }
 0x5f1   : > { %v19658_v57 = vld [vmem:[#allocation2 + $0x210] sm:$0xff]  ;;  %v19831_v40 = vld [vmem:[#allocation2 + $0x258] sm:$0xff] }
 0x5f2   : > { %20795 = vst [vmem:[#allocation7_spill] sm:$0xff] %v19658_v57  ;;  %15272 = vmatprep.mubr.msk.f32.mxu1 %vm333_vm2, %v19658_v57  ;;  %v16127_v57 = vpack.c.bf16 %v12654_v22, %v12653_v51  ;;  %v19827_v61 = vld [vmem:[#allocation2 + $0x250] sm:$0xff]  ;;  %20798 = vst [vmem:[#allocation12_spill] sm:$0xff] %v19831_v40  ;;  %v12658_v22 = vld [vmem:[%s20555_s7 + $0xf8] sm:$0xff] }
 0x5f3   : > { %15273 = vmatmul.mubr.msk.f32.gmra.mrb[60].mxu1 %vm333_vm2, %v19662_v63  ;;  %v8906_v63 = vld [vmem:[#allocation2 + $0x248] sm:$0xff]  ;;  %20797 = vst [vmem:[#allocation11_spill] sm:$0xff] %v19827_v61  ;;  %v12657_v51 = vld [vmem:[%s20555_s7 + $0xf0] sm:$0xff] }
 0x5f4   : > { %15291 = vmatprep.mubr.msk.f32.mxu1 %vm333_vm2, %v8182_v39  ;;  %v19773_v39 = vld [vmem:[#allocation2 + $0xb0] sm:$0xff] }
 0x5f7   : > { %15292 = vmatmul.mubr.msk.f32.vlgmr.msra.gmra.mrb[62].mxu1 %vm333_vm2, %v8183_v1  ;;  %v19785_v1 = vld [vmem:[#allocation2 + $0xc8] sm:$0xff] }
 0x5f8   : > { %16110 = vmatpush3.bf16.msra.mxu1 %v19487_v31  ;;  %15294 = vmatprep.mubr.msk.f32.mxu1 %vm333_vm2, %v19680_v28  ;;  %v16119_v31 = vpack.c.bf16 %v12618_v46, %v12617_v41  ;;  %v19805_v41 = vld [vmem:[#allocation2 + $0xf0] sm:$0xff]  ;;  %v8905_v46 = vld [vmem:[#allocation2 + $0x240] sm:$0xff] }
 0x5f9   : > { %16112 = vmatprep.subr.bf16.mxu1 %v16111_v48 }
 0x5fb   : > { %15295 = vmatmul.mubr.msk.f32.gmra.mrb[32].mxu1 %vm333_vm2, %v19685_v32 }
 0x5fc   : > { %15297 = vmatprep.mubr.msk.f32.mxu1 %vm333_vm2, %v19695_v6  ;;  %16114 = vmatpush3.bf16.msra.mxu1 %v16111_v48  ;;  %v19789_v48 = vld [vmem:[#allocation2 + $0xd0] sm:$0xff] }
 0x5fd   : > { %16116 = vmatprep.subr.bf16.mxu1 %v16115_v30 }
 0x5ff   : > { %15298 = vmatmul.mubr.msk.f32.gmra.mrb[34].mxu1 %vm333_vm2, %v19699_v26 }
 0x600   : > { %15300 = vmatprep.mubr.msk.f32.mxu1 %vm333_vm2, %v19709_v62  ;;  %16118 = vmatpush3.bf16.msra.mxu1 %v16115_v30  ;;  %v19801_v30 = vld [vmem:[#allocation2 + $0xe8] sm:$0xff] }
 0x601   : > { %16120 = vmatprep.subr.bf16.mxu1 %v16119_v31 }
 0x603   : > { %15301 = vmatmul.mubr.msk.f32.gmra.mrb[36].mxu1 %vm333_vm2, %v19713_v11 }
 0x604   : > { %15303 = vmatprep.mubr.msk.f32.mxu1 %vm333_vm2, %v19717_v43  ;;  %16122 = vmatpush3.bf16.msra.mxu1 %v16119_v31  ;;  %v19809_v31 = vld [vmem:[#allocation2 + $0xf8] sm:$0xff] }
 0x605   : > { %16124 = vmatprep.subr.bf16.mxu1 %v16123_v33 }
 0x607   : > { %15304 = vmatmul.mubr.msk.f32.gmra.mrb[38].mxu1 %vm333_vm2, %v19721_v9 }
 0x608   : > { %15306 = vmatprep.mubr.msk.f32.mxu1 %vm333_vm2, %v19725_v4 }
 0x60b   : > { %15307 = vmatmul.mubr.msk.f32.gmra.mrb[40].mxu1 %vm333_vm2, %v19729_v14 }
 0x60c   : > { %15309 = vmatprep.mubr.msk.f32.mxu1 %vm333_vm2, %v19733_v49 }
 0x60f   : > { %15310 = vmatmul.mubr.msk.f32.gmra.mrb[42].mxu1 %vm333_vm2, %v19737_v13 }
 0x610   : > { %15312 = vmatprep.mubr.msk.f32.mxu1 %vm333_vm2, %v19741_v19 }
 0x613   : > { %15313 = vmatmul.mubr.msk.f32.gmra.mrb[44].mxu1 %vm333_vm2, %v19745_v36 }
 0x614   : > { %15315 = vmatprep.mubr.msk.f32.mxu1 %vm333_vm2, %v19749_v3 }
 0x617   : > { %15316 = vmatmul.mubr.msk.f32.gmra.mrb[46].mxu1 %vm333_vm2, %v19753_v50 }
 0x618   : > { %15318 = vmatprep.mubr.msk.f32.mxu1 %vm333_vm2, %v19757_v54 }
 0x61b   : > { %15319 = vmatmul.mubr.msk.f32.gmra.mrb[48].mxu1 %vm333_vm2, %v19761_v56 }
 0x61c   : > { %15321 = vmatprep.mubr.msk.f32.mxu1 %vm333_vm2, %v19765_v42 }
 0x61f   : > { %15322 = vmatmul.mubr.msk.f32.gmra.mrb[50].mxu1 %vm333_vm2, %v19769_v29 }
 0x620   : > { %15324 = vmatprep.mubr.msk.f32.mxu1 %vm333_vm2, %v19773_v39 }
 0x623   : > { %15325 = vmatmul.mubr.msk.f32.gmra.mrb[52].mxu1 %vm333_vm2, %v19777_v7 }
 0x624   : > { %15327 = vmatprep.mubr.msk.f32.mxu1 %vm333_vm2, %v19781_v58 }
 0x627   : > { %15328 = vmatmul.mubr.msk.f32.gmra.mrb[54].mxu1 %vm333_vm2, %v19785_v1 }
 0x628   : > { %15330 = vmatprep.mubr.msk.f32.mxu1 %vm333_vm2, %v19789_v48 }
 0x62b   : > { %15331 = vmatmul.mubr.msk.f32.gmra.mrb[56].mxu1 %vm333_vm2, %v19793_v35 }
 0x62c   : > { %15333 = vmatprep.mubr.msk.f32.mxu1 %vm333_vm2, %v19797_v25 }
 0x62f   : > { %15334 = vmatmul.mubr.msk.f32.gmra.mrb[58].mxu1 %vm333_vm2, %v19801_v30 }
 0x630   : > { %15336 = vmatprep.mubr.msk.f32.mxu1 %vm333_vm2, %v19805_v41 }
 0x633   : > { %15337 = vmatmul.mubr.msk.f32.gmra.mrb[60].mxu1 %vm333_vm2, %v19809_v31 }
 0x634   : > { %15355 = vmatprep.mubr.msk.f32.mxu1 %vm333_vm2, %v8905_v46  ;;  %v16131_v46 = vpack.c.bf16 %v12656_v5, %v12655_v60  ;;  %v16135_v5 = vpack.c.bf16 %v12658_v22, %v12657_v51  ;;  %v19845_v60 = vld [vmem:[#allocation2 + $0x268] sm:$0xff]  ;;  %v19859_v51 = vld [vmem:[#allocation2 + $0x278] sm:$0xff]  ;;  %v19863_v22 = vld [vmem:[#allocation2 + $0x280] sm:$0xff] }
 0x635   : > { %20799 = vst [vmem:[#allocation13_spill] sm:$0xff] %v19845_v60  ;;  %20800 = vst [vmem:[#allocation14_spill] sm:$0xff] %v19863_v22 }
 0x637   : > { %15356 = vmatmul.mubr.msk.f32.vlgmr.msra.gmra.mrb[62].mxu1 %vm333_vm2, %v8906_v63  ;;  %v19841_v63 = vld [vmem:[#allocation2 + $0x260] sm:$0xff] }
 0x638   : > { %16126 = vmatpush3.bf16.msra.mxu1 %v16123_v33  ;;  %15358 = vmatprep.mubr.msk.f32.mxu1 %vm333_vm2, %v19827_v61  ;;  %v12691_v33 = vld [vmem:[%s20555_s7 + $0x100] sm:$0xff]  ;;  %v12692_v61 = vld [vmem:[%s20555_s7 + $0x108] sm:$0xff] }
 0x639   : > { %16128 = vmatprep.subr.bf16.mxu1 %v16127_v57 }
 0x63b   : > { %15359 = vmatmul.mubr.msk.f32.gmra.mrb[32].mxu1 %vm333_vm2, %v19831_v40  ;;  %v19855_v40 = vld [vmem:[#allocation2 + $0x270] sm:$0xff] }
 0x63c   : > { %15361 = vmatprep.mubr.msk.f32.mxu1 %vm333_vm2, %v19841_v63  ;;  %16130 = vmatpush3.bf16.msra.mxu1 %v16127_v57  ;;  %v16139_v57 = vpack.c.bf16 %v12692_v61, %v12691_v33  ;;  %v19875_v61 = vld [vmem:[#allocation2 + $0x298] sm:$0xff]  ;;  %v19879_v33 = vld [vmem:[#allocation2 + $0x2a0] sm:$0xff] }
 0x63d   : > { %16132 = vmatprep.subr.bf16.mxu1 %v16131_v46  ;;  %20803 = vst [vmem:[#allocation17_spill] sm:$0xff] %v19875_v61  ;;  %20804 = vst [vmem:[#allocation18_spill] sm:$0xff] %v19879_v33 }
 0x63f   : > { %15362 = vmatmul.mubr.msk.f32.gmra.mrb[34].mxu1 %vm333_vm2, %v19845_v60  ;;  %v19867_v60 = vld [vmem:[#allocation2 + $0x288] sm:$0xff] }
 0x640   : > { %15364 = vmatprep.mubr.msk.f32.mxu1 %vm333_vm2, %v19855_v40  ;;  %16134 = vmatpush3.bf16.msra.mxu1 %v16131_v46  ;;  %20801 = vst [vmem:[#allocation15_spill] sm:$0xff] %v19867_v60  ;;  %v19871_v46 = vld [vmem:[#allocation2 + $0x290] sm:$0xff] }
 0x641   : > { %16136 = vmatprep.subr.bf16.mxu1 %v16135_v5  ;;  %20802 = vst [vmem:[#allocation16_spill] sm:$0xff] %v19871_v46 }
 0x643   : > { %15365 = vmatmul.mubr.msk.f32.gmra.mrb[36].mxu1 %vm333_vm2, %v19859_v51 }
 0x644   : > { %15367 = vmatprep.mubr.msk.f32.mxu1 %vm333_vm2, %v19863_v22  ;;  %16138 = vmatpush3.bf16.msra.mxu1 %v16135_v5  ;;  %v19883_v5 = vld [vmem:[#allocation2 + $0x2a8] sm:$0xff] }
 0x645   : > { %16140 = vmatprep.subr.bf16.mxu1 %v16139_v57  ;;  %20805 = vst [vmem:[#allocation19_spill] sm:$0xff] %v19883_v5  ;;  %v12696_v22 = vld [vmem:[%s20555_s7 + $0x128] sm:$0xff] }
 0x647   : > { %15368 = vmatmul.mubr.msk.f32.gmra.mrb[38].mxu1 %vm333_vm2, %v19867_v60  ;;  %v19887_v60 = vld [vmem:[#allocation2 + $0x2b0] sm:$0xff] }
 0x648   : > { %15370 = vmatprep.mubr.msk.f32.mxu1 %vm333_vm2, %v19871_v46  ;;  %20806 = vst [vmem:[#allocation20_spill] sm:$0xff] %v19887_v60  ;;  %v19891_v46 = vld [vmem:[#allocation2 + $0x2b8] sm:$0xff] }
 0x649   : > { %20807 = vst [vmem:[#allocation21_spill] sm:$0xff] %v19891_v46 }
 0x64b   : > { %15371 = vmatmul.mubr.msk.f32.gmra.mrb[40].mxu1 %vm333_vm2, %v19875_v61  ;;  %v19895_v61 = vld [vmem:[#allocation2 + $0x2c0] sm:$0xff] }
 0x64c   : > { %15373 = vmatprep.mubr.msk.f32.mxu1 %vm333_vm2, %v19879_v33  ;;  %20808 = vst [vmem:[#allocation22_spill] sm:$0xff] %v19895_v61  ;;  %v19899_v33 = vld [vmem:[#allocation2 + $0x2c8] sm:$0xff] }
 0x64d   : > { %20809 = vst [vmem:[#allocation23_spill] sm:$0xff] %v19899_v33 }
 0x64f   : > { %15374 = vmatmul.mubr.msk.f32.gmra.mrb[42].mxu1 %vm333_vm2, %v19883_v5  ;;  %v19903_v5 = vld [vmem:[#allocation2 + $0x2d0] sm:$0xff] }
 0x650   : > { %15376 = vmatprep.mubr.msk.f32.mxu1 %vm333_vm2, %v19887_v60  ;;  %20810 = vst [vmem:[#allocation24_spill] sm:$0xff] %v19903_v5  ;;  %v19907_v60 = vld [vmem:[#allocation2 + $0x2d8] sm:$0xff] }
 0x651   : > { %20811 = vst [vmem:[#allocation25_spill] sm:$0xff] %v19907_v60 }
 0x653   : > { %15377 = vmatmul.mubr.msk.f32.gmra.mrb[44].mxu1 %vm333_vm2, %v19891_v46  ;;  %v19911_v46 = vld [vmem:[#allocation2 + $0x2e0] sm:$0xff] }
 0x654   : > { %15379 = vmatprep.mubr.msk.f32.mxu1 %vm333_vm2, %v19895_v61  ;;  %20812 = vst [vmem:[#allocation26_spill] sm:$0xff] %v19911_v46  ;;  %v19915_v61 = vld [vmem:[#allocation2 + $0x2e8] sm:$0xff] }
 0x655   : > { %20813 = vst [vmem:[#allocation27_spill] sm:$0xff] %v19915_v61 }
 0x657   : > { %15380 = vmatmul.mubr.msk.f32.gmra.mrb[46].mxu1 %vm333_vm2, %v19899_v33  ;;  %v19919_v33 = vld [vmem:[#allocation2 + $0x2f0] sm:$0xff] }
 0x658   : > { %15382 = vmatprep.mubr.msk.f32.mxu1 %vm333_vm2, %v19903_v5  ;;  %20814 = vst [vmem:[#allocation28_spill] sm:$0xff] %v19919_v33  ;;  %v19923_v5 = vld [vmem:[#allocation2 + $0x2f8] sm:$0xff] }
 0x659   : > { %20815 = vst [vmem:[#allocation29_spill] sm:$0xff] %v19923_v5 }
 0x65b   : > { %15383 = vmatmul.mubr.msk.f32.gmra.mrb[48].mxu1 %vm333_vm2, %v19907_v60  ;;  %v19927_v60 = vld [vmem:[#allocation2 + $0x300] sm:$0xff] }
 0x65c   : > { %15385 = vmatprep.mubr.msk.f32.mxu1 %vm333_vm2, %v19911_v46  ;;  %20816 = vst [vmem:[#allocation30_spill] sm:$0xff] %v19927_v60  ;;  %v19931_v46 = vld [vmem:[#allocation2 + $0x308] sm:$0xff] }
 0x65d   : > { %20817 = vst [vmem:[#allocation31_spill] sm:$0xff] %v19931_v46 }
 0x65f   : > { %15386 = vmatmul.mubr.msk.f32.gmra.mrb[50].mxu1 %vm333_vm2, %v19915_v61  ;;  %v19935_v61 = vld [vmem:[#allocation2 + $0x310] sm:$0xff] }
 0x660   : > { %15388 = vmatprep.mubr.msk.f32.mxu1 %vm333_vm2, %v19919_v33  ;;  %20818 = vst [vmem:[#allocation32_spill] sm:$0xff] %v19935_v61  ;;  %v19939_v33 = vld [vmem:[#allocation2 + $0x318] sm:$0xff] }
 0x661   : > { %20819 = vst [vmem:[#allocation33_spill] sm:$0xff] %v19939_v33 }
 0x663   : > { %15389 = vmatmul.mubr.msk.f32.gmra.mrb[52].mxu1 %vm333_vm2, %v19923_v5  ;;  %v19943_v5 = vld [vmem:[#allocation2 + $0x320] sm:$0xff] }
 0x664   : > { %15391 = vmatprep.mubr.msk.f32.mxu1 %vm333_vm2, %v19927_v60  ;;  %20820 = vst [vmem:[#allocation34_spill] sm:$0xff] %v19943_v5  ;;  %v19947_v60 = vld [vmem:[#allocation2 + $0x328] sm:$0xff] }
 0x665   : > { %20821 = vst [vmem:[#allocation35_spill] sm:$0xff] %v19947_v60 }
 0x667   : > { %15392 = vmatmul.mubr.msk.f32.gmra.mrb[54].mxu1 %vm333_vm2, %v19931_v46  ;;  %v19951_v46 = vld [vmem:[#allocation2 + $0x330] sm:$0xff] }
 0x668   : > { %15394 = vmatprep.mubr.msk.f32.mxu1 %vm333_vm2, %v19935_v61  ;;  %20822 = vst [vmem:[#allocation8_spill] sm:$0xff] %v19951_v46  ;;  %v19955_v61 = vld [vmem:[#allocation2 + $0x338] sm:$0xff] }
 0x669   : > { %20823 = vst [vmem:[#allocation10_spill] sm:$0xff] %v19955_v61 }
 0x66b   : > { %15395 = vmatmul.mubr.msk.f32.gmra.mrb[56].mxu1 %vm333_vm2, %v19939_v33  ;;  %v12693_v33 = vld [vmem:[%s20555_s7 + $0x110] sm:$0xff] }
 0x66c   : > { %15397 = vmatprep.mubr.msk.f32.mxu1 %vm333_vm2, %v19943_v5  ;;  %v12694_v5 = vld [vmem:[%s20555_s7 + $0x118] sm:$0xff] }
 0x66f   : > { %15398 = vmatmul.mubr.msk.f32.gmra.mrb[58].mxu1 %vm333_vm2, %v19947_v60  ;;  %v16143_v60 = vpack.c.bf16 %v12694_v5, %v12693_v33  ;;  %v12698_v33 = vld [vmem:[%s20555_s7 + $0x138] sm:$0xff]  ;;  %v12733_v5 = vld [vmem:[%s20555_s7 + $0x150] sm:$0xff] }
 0x670   : > { %15400 = vmatprep.mubr.msk.f32.mxu1 %vm333_vm2, %v19951_v46  ;;  %v12695_v46 = vld [vmem:[%s20555_s7 + $0x120] sm:$0xff] }
 0x673   : > { %15401 = vmatmul.mubr.msk.f32.gmra.mrb[60].mxu1 %vm333_vm2, %v19955_v61  ;;  %v16147_v61 = vpack.c.bf16 %v12696_v22, %v12695_v46  ;;  %v12732_v22 = vld [vmem:[%s20555_s7 + $0x148] sm:$0xff] }
 0x674   : > { %15419 = vmatprep.mubr.msk.f32.mxu1 %vm333_vm2, %v19680_v28  ;;  %v12697_v28 = vld [vmem:[%s20555_s7 + $0x130] sm:$0xff] }
 0x677   : > { %15420 = vmatmul.mubr.msk.f32.vlgmr.msra.gmra.mrb[62].mxu1 %vm333_vm2, %v19685_v32  ;;  %v16151_v32 = vpack.c.bf16 %v12698_v33, %v12697_v28  ;;  %v12734_v28 = vld [vmem:[%s20555_s7 + $0x158] sm:$0xff] }
 0x678   : > { %16142 = vmatpush3.bf16.msra.mxu1 %v16139_v57  ;;  %15422 = vmatprep.mubr.msk.f32.mxu1 %vm333_vm2, %v19695_v6  ;;  %v12731_v57 = vld [vmem:[%s20555_s7 + $0x140] sm:$0xff]  ;;  %v16159_v33 = vpack.c.bf16 %v12734_v28, %v12733_v5  ;;  %v12738_v5 = vld [vmem:[%s20555_s7 + $0x178] sm:$0xff] }
 0x679   : > { %16144 = vmatprep.subr.bf16.mxu1 %v16143_v60  ;;  %v16155_v46 = vpack.c.bf16 %v12732_v22, %v12731_v57  ;;  %v12736_v57 = vld [vmem:[%s20555_s7 + $0x168] sm:$0xff]  ;;  %v12811_v28 = vld [vmem:[%s20555_s7 + $0x1c0] sm:$0xff] }
 0x67b   : > { %15423 = vmatmul.mubr.msk.f32.gmra.mrb[32].mxu1 %vm333_vm2, %v19699_v26 }
 0x67c   : > { %15425 = vmatprep.mubr.msk.f32.mxu1 %vm333_vm2, %v19709_v62  ;;  %16146 = vmatpush3.bf16.msra.mxu1 %v16143_v60  ;;  %v20043_v60 = vld [vmem:[#allocation2 + $0x100] sm:$0xff] }
 0x67d   : > { %16148 = vmatprep.subr.bf16.mxu1 %v16147_v61 }
 0x67f   : > { %15426 = vmatmul.mubr.msk.f32.gmra.mrb[34].mxu1 %vm333_vm2, %v19713_v11 }
 0x680   : > { %15428 = vmatprep.mubr.msk.f32.mxu1 %vm333_vm2, %v19717_v43  ;;  %16150 = vmatpush3.bf16.msra.mxu1 %v16147_v61  ;;  %v20047_v61 = vld [vmem:[#allocation2 + $0x108] sm:$0xff] }
 0x681   : > { %16152 = vmatprep.subr.bf16.mxu1 %v16151_v32 }
 0x683   : > { %15429 = vmatmul.mubr.msk.f32.gmra.mrb[36].mxu1 %vm333_vm2, %v19721_v9 }
 0x684   : > { %15431 = vmatprep.mubr.msk.f32.mxu1 %vm333_vm2, %v19725_v4  ;;  %16154 = vmatpush3.bf16.msra.mxu1 %v16151_v32  ;;  %v12735_v32 = vld [vmem:[%s20555_s7 + $0x160] sm:$0xff] }
 0x685   : > { %16156 = vmatprep.subr.bf16.mxu1 %v16155_v46  ;;  %v16163_v22 = vpack.c.bf16 %v12736_v57, %v12735_v32  ;;  %v20833_v32 = vld [vmem:[#allocation14_spill] sm:$0xff] }
 0x687   : > { %15432 = vmatmul.mubr.msk.f32.gmra.mrb[38].mxu1 %vm333_vm2, %v19729_v14 }
 0x688   : > { %15434 = vmatprep.mubr.msk.f32.mxu1 %vm333_vm2, %v19733_v49 }
 0x68b   : > { %15435 = vmatmul.mubr.msk.f32.gmra.mrb[40].mxu1 %vm333_vm2, %v19737_v13 }
 0x68c   : > { %15437 = vmatprep.mubr.msk.f32.mxu1 %vm333_vm2, %v19741_v19 }
 0x68f   : > { %15438 = vmatmul.mubr.msk.f32.gmra.mrb[42].mxu1 %vm333_vm2, %v19745_v36 }
 0x690   : > { %15440 = vmatprep.mubr.msk.f32.mxu1 %vm333_vm2, %v19749_v3 }
 0x693   : > { %15441 = vmatmul.mubr.msk.f32.gmra.mrb[44].mxu1 %vm333_vm2, %v19753_v50 }
 0x694   : > { %15443 = vmatprep.mubr.msk.f32.mxu1 %vm333_vm2, %v19757_v54 }
 0x697   : > { %15444 = vmatmul.mubr.msk.f32.gmra.mrb[46].mxu1 %vm333_vm2, %v19761_v56 }
 0x698   : > { %15446 = vmatprep.mubr.msk.f32.mxu1 %vm333_vm2, %v19765_v42 }
 0x69b   : > { %15447 = vmatmul.mubr.msk.f32.gmra.mrb[48].mxu1 %vm333_vm2, %v19769_v29 }
 0x69c   : > { %15449 = vmatprep.mubr.msk.f32.mxu1 %vm333_vm2, %v19773_v39 }
 0x69f   : > { %15450 = vmatmul.mubr.msk.f32.gmra.mrb[50].mxu1 %vm333_vm2, %v19777_v7 }
 0x6a0   : > { %15452 = vmatprep.mubr.msk.f32.mxu1 %vm333_vm2, %v19781_v58 }
 0x6a3   : > { %15453 = vmatmul.mubr.msk.f32.gmra.mrb[52].mxu1 %vm333_vm2, %v19785_v1 }
 0x6a4   : > { %15455 = vmatprep.mubr.msk.f32.mxu1 %vm333_vm2, %v19789_v48 }
 0x6a7   : > { %15456 = vmatmul.mubr.msk.f32.gmra.mrb[54].mxu1 %vm333_vm2, %v19793_v35 }
 0x6a8   : > { %15458 = vmatprep.mubr.msk.f32.mxu1 %vm333_vm2, %v19797_v25 }
 0x6ab   : > { %15459 = vmatmul.mubr.msk.f32.gmra.mrb[56].mxu1 %vm333_vm2, %v19801_v30 }
 0x6ac   : > { %15461 = vmatprep.mubr.msk.f32.mxu1 %vm333_vm2, %v19805_v41 }
 0x6af   : > { %15462 = vmatmul.mubr.msk.f32.gmra.mrb[58].mxu1 %vm333_vm2, %v19809_v31 }
 0x6b0   : > { %15464 = vmatprep.mubr.msk.f32.mxu1 %vm333_vm2, %v20043_v60 }
 0x6b3   : > { %15465 = vmatmul.mubr.msk.f32.gmra.mrb[60].mxu1 %vm333_vm2, %v20047_v61 }
 0x6b4   : > { %15483 = vmatprep.mubr.msk.f32.mxu1 %vm333_vm2, %v19419_v10  ;;  %v12737_v10 = vld [vmem:[%s20555_s7 + $0x170] sm:$0xff] }
 0x6b7   : > { %15484 = vmatmul.mubr.msk.f32.vlgmr.msra.gmra.mrb[62].mxu1 %vm333_vm2, %v19427_v12  ;;  %v16167_v12 = vpack.c.bf16 %v12738_v5, %v12737_v10  ;;  %v20835_v10 = vld [vmem:[#allocation16_spill] sm:$0xff]  ;;  %v20836_v5 = vld [vmem:[#allocation17_spill] sm:$0xff] }
 0x6b8   : > { %16158 = vmatpush3.bf16.msra.mxu1 %v16155_v46  ;;  %15486 = vmatprep.mubr.msk.f32.mxu1 %vm333_vm2, %v19441_v15  ;;  %v12771_v15 = vld [vmem:[%s20555_s7 + $0x180] sm:$0xff]  ;;  %v12772_v46 = vld [vmem:[%s20555_s7 + $0x188] sm:$0xff] }
 0x6b9   : > { %16160 = vmatprep.subr.bf16.mxu1 %v16159_v33 }
 0x6bb   : > { %15487 = vmatmul.mubr.msk.f32.gmra.mrb[32].mxu1 %vm333_vm2, %v19449_v21  ;;  %v16171_v21 = vpack.c.bf16 %v12772_v46, %v12771_v15  ;;  %v20838_v15 = vld [vmem:[#allocation19_spill] sm:$0xff]  ;;  %v20839_v46 = vld [vmem:[#allocation20_spill] sm:$0xff] }
 0x6bc   : > { %15489 = vmatprep.mubr.msk.f32.mxu1 %vm333_vm2, %v19463_v44  ;;  %16162 = vmatpush3.bf16.msra.mxu1 %v16159_v33  ;;  %v20824_v44 = vld [vmem:[#allocation5_spill] sm:$0xff]  ;;  %v12812_v33 = vld [vmem:[%s20555_s7 + $0x1c8] sm:$0xff] }
 0x6bd   : > { %16164 = vmatprep.subr.bf16.mxu1 %v16163_v22  ;;  %v16187_v57 = vpack.c.bf16 %v12812_v33, %v12811_v28  ;;  %v20231_v28 = vld [vmem:[#allocation2 + $0x348] sm:$0xff]  ;;  %v12813_v33 = vld [vmem:[%s20555_s7 + $0x1d0] sm:$0xff] }
 0x6bf   : > { %15490 = vmatmul.mubr.msk.f32.gmra.mrb[34].mxu1 %vm333_vm2, %v19471_v52  ;;  %v20825_v52 = vld [vmem:[#allocation6_spill] sm:$0xff] }
 0x6c0   : > { %15492 = vmatprep.mubr.msk.f32.mxu1 %vm333_vm2, %v19485_v0  ;;  %16166 = vmatpush3.bf16.msra.mxu1 %v16163_v22  ;;  %v20826_v0 = vld [vmem:[#allocation3_spill] sm:$0xff] }
 0x6c1   : > { %16168 = vmatprep.subr.bf16.mxu1 %v16167_v12  ;;  %v20834_v22 = vld [vmem:[#allocation15_spill] sm:$0xff] }
 0x6c3   : > { %15493 = vmatmul.mubr.msk.f32.gmra.mrb[36].mxu1 %vm333_vm2, %v19495_v34  ;;  %v20827_v34 = vld [vmem:[#allocation4_spill] sm:$0xff] }
 0x6c4   : > { %15495 = vmatprep.mubr.msk.f32.mxu1 %vm333_vm2, %v19503_v16  ;;  %16170 = vmatpush3.bf16.msra.mxu1 %v16167_v12  ;;  %v20828_v16 = vld [vmem:[#allocation7_spill] sm:$0xff]  ;;  %v20837_v12 = vld [vmem:[#allocation18_spill] sm:$0xff] }
 0x6c5   : > { %16172 = vmatprep.subr.bf16.mxu1 %v16171_v21 }
 0x6c7   : > { %15496 = vmatmul.mubr.msk.f32.gmra.mrb[38].mxu1 %vm333_vm2, %v19512_v20  ;;  %v20829_v20 = vld [vmem:[#allocation9_spill] sm:$0xff] }
 0x6c8   : > { %15498 = vmatprep.mubr.msk.f32.mxu1 %vm333_vm2, %v19520_v37  ;;  %v20135_v37 = vld [vmem:[#allocation2 + $0x220] sm:$0xff] }
 0x6cb   : > { %15499 = vmatmul.mubr.msk.f32.gmra.mrb[40].mxu1 %vm333_vm2, %v19528_v45  ;;  %v20139_v45 = vld [vmem:[#allocation2 + $0x228] sm:$0xff] }
 0x6cc   : > { %15501 = vmatprep.mubr.msk.f32.mxu1 %vm333_vm2, %v19536_v2  ;;  %v12773_v2 = vld [vmem:[%s20555_s7 + $0x190] sm:$0xff] }
 0x6cf   : > { %15502 = vmatmul.mubr.msk.f32.gmra.mrb[42].mxu1 %vm333_vm2, %v19544_v53  ;;  %v12774_v53 = vld [vmem:[%s20555_s7 + $0x198] sm:$0xff] }
 0x6d0   : > { %15504 = vmatprep.mubr.msk.f32.mxu1 %vm333_vm2, %v19552_v8  ;;  %v20830_v8 = vld [vmem:[#allocation11_spill] sm:$0xff] }
 0x6d3   : > { %15505 = vmatmul.mubr.msk.f32.gmra.mrb[44].mxu1 %vm333_vm2, %v19560_v17  ;;  %v16175_v17 = vpack.c.bf16 %v12774_v53, %v12773_v2  ;;  %v20847_v2 = vld [vmem:[#allocation28_spill] sm:$0xff]  ;;  %v20848_v53 = vld [vmem:[#allocation29_spill] sm:$0xff] }
 0x6d4   : > { %15507 = vmatprep.mubr.msk.f32.mxu1 %vm333_vm2, %v19568_v23  ;;  %v12775_v23 = vld [vmem:[%s20555_s7 + $0x1a0] sm:$0xff] }
 0x6d7   : > { %15508 = vmatmul.mubr.msk.f32.gmra.mrb[46].mxu1 %vm333_vm2, %v19576_v47  ;;  %v12776_v47 = vld [vmem:[%s20555_s7 + $0x1a8] sm:$0xff] }
 0x6d8   : > { %15510 = vmatprep.mubr.msk.f32.mxu1 %vm333_vm2, %v19584_v55  ;;  %v20831_v55 = vld [vmem:[#allocation12_spill] sm:$0xff] }
 0x6db   : > { %15511 = vmatmul.mubr.msk.f32.gmra.mrb[48].mxu1 %vm333_vm2, %v19592_v59  ;;  %v16179_v59 = vpack.c.bf16 %v12776_v47, %v12775_v23  ;;  %v20851_v23 = vld [vmem:[#allocation32_spill] sm:$0xff]  ;;  %v20852_v47 = vld [vmem:[#allocation33_spill] sm:$0xff] }
 0x6dc   : > { %15513 = vmatprep.mubr.msk.f32.mxu1 %vm333_vm2, %v19600_v18  ;;  %v12777_v18 = vld [vmem:[%s20555_s7 + $0x1b0] sm:$0xff] }
 0x6df   : > { %15514 = vmatmul.mubr.msk.f32.gmra.mrb[50].mxu1 %vm333_vm2, %v19608_v38  ;;  %v12778_v38 = vld [vmem:[%s20555_s7 + $0x1b8] sm:$0xff] }
 0x6e0   : > { %15516 = vmatprep.mubr.msk.f32.mxu1 %vm333_vm2, %v19616_v24  ;;  %v20832_v24 = vld [vmem:[#allocation13_spill] sm:$0xff] }
 0x6e3   : > { %15517 = vmatmul.mubr.msk.f32.gmra.mrb[52].mxu1 %vm333_vm2, %v19624_v27  ;;  %v16183_v27 = vpack.c.bf16 %v12778_v38, %v12777_v18  ;;  %v20855_v18 = vld [vmem:[#allocation8_spill] sm:$0xff]  ;;  %v20856_v38 = vld [vmem:[#allocation10_spill] sm:$0xff] }
 0x6e4   : > { %15519 = vmatprep.mubr.msk.f32.mxu1 %vm333_vm2, %v20824_v44  ;;  %v20841_v44 = vld [vmem:[#allocation22_spill] sm:$0xff] }
 0x6e7   : > { %15520 = vmatmul.mubr.msk.f32.gmra.mrb[54].mxu1 %vm333_vm2, %v20825_v52  ;;  %v20842_v52 = vld [vmem:[#allocation23_spill] sm:$0xff] }
 0x6e8   : > { %15522 = vmatprep.mubr.msk.f32.mxu1 %vm333_vm2, %v20826_v0  ;;  %v20843_v0 = vld [vmem:[#allocation24_spill] sm:$0xff] }
 0x6eb   : > { %15523 = vmatmul.mubr.msk.f32.gmra.mrb[56].mxu1 %vm333_vm2, %v20827_v34  ;;  %v20844_v34 = vld [vmem:[#allocation25_spill] sm:$0xff] }
 0x6ec   : > { %15525 = vmatprep.mubr.msk.f32.mxu1 %vm333_vm2, %v20828_v16  ;;  %v20845_v16 = vld [vmem:[#allocation26_spill] sm:$0xff] }
 0x6ef   : > { %15526 = vmatmul.mubr.msk.f32.gmra.mrb[58].mxu1 %vm333_vm2, %v20829_v20  ;;  %v20846_v20 = vld [vmem:[#allocation27_spill] sm:$0xff] }
 0x6f0   : > { %15528 = vmatprep.mubr.msk.f32.mxu1 %vm333_vm2, %v20135_v37 }
 0x6f3   : > { %15529 = vmatmul.mubr.msk.f32.gmra.mrb[60].mxu1 %vm333_vm2, %v20139_v45 }
 0x6f4   : > { %15547 = vmatprep.mubr.msk.f32.mxu1 %vm333_vm2, %v20830_v8  ;;  %v20849_v8 = vld [vmem:[#allocation30_spill] sm:$0xff] }
 0x6f7   : > { %15548 = vmatmul.mubr.msk.f32.vlgmr.msra.gmra.mrb[62].mxu1 %vm333_vm2, %v20831_v55  ;;  %v20853_v55 = vld [vmem:[#allocation34_spill] sm:$0xff] }
 0x6f8   : > { %16174 = vmatpush3.bf16.msra.mxu1 %v16171_v21  ;;  %15550 = vmatprep.mubr.msk.f32.mxu1 %vm333_vm2, %v19841_v63  ;;  %v20840_v21 = vld [vmem:[#allocation21_spill] sm:$0xff] }
 0x6f9   : > { %16176 = vmatprep.subr.bf16.mxu1 %v16175_v17 }
 0x6fb   : > { %15551 = vmatmul.mubr.msk.f32.gmra.mrb[32].mxu1 %vm333_vm2, %v20832_v24 }
 0x6fc   : > { %15553 = vmatprep.mubr.msk.f32.mxu1 %vm333_vm2, %v19855_v40  ;;  %16178 = vmatpush3.bf16.msra.mxu1 %v16175_v17  ;;  %v20850_v17 = vld [vmem:[#allocation31_spill] sm:$0xff] }
 0x6fd   : > { %16180 = vmatprep.subr.bf16.mxu1 %v16179_v59 }
 0x6ff   : > { %15554 = vmatmul.mubr.msk.f32.gmra.mrb[34].mxu1 %vm333_vm2, %v19859_v51 }
 0x700   : > { %15556 = vmatprep.mubr.msk.f32.mxu1 %vm333_vm2, %v20833_v32  ;;  %16182 = vmatpush3.bf16.msra.mxu1 %v16179_v59  ;;  %v20854_v59 = vld [vmem:[#allocation35_spill] sm:$0xff] }
 0x701   : > { %16184 = vmatprep.subr.bf16.mxu1 %v16183_v27 }
 0x703   : > { %15557 = vmatmul.mubr.msk.f32.gmra.mrb[36].mxu1 %vm333_vm2, %v20834_v22 }
 0x704   : > { %15559 = vmatprep.mubr.msk.f32.mxu1 %vm333_vm2, %v20835_v10  ;;  %16186 = vmatpush3.bf16.msra.mxu1 %v16183_v27  ;;  %v20227_v27 = vld [vmem:[#allocation2 + $0x340] sm:$0xff] }
 0x705   : > { %16188 = vmatprep.subr.bf16.mxu1 %v16187_v57  ;;  %20857 = vst [vmem:[#allocation5_spill] sm:$0xff] %v20227_v27 }
 0x707   : > { %15560 = vmatmul.mubr.msk.f32.gmra.mrb[38].mxu1 %vm333_vm2, %v20836_v5 }
 0x708   : > { %15562 = vmatprep.mubr.msk.f32.mxu1 %vm333_vm2, %v20837_v12 }
 0x70b   : > { %15563 = vmatmul.mubr.msk.f32.gmra.mrb[40].mxu1 %vm333_vm2, %v20838_v15 }
 0x70c   : > { %15565 = vmatprep.mubr.msk.f32.mxu1 %vm333_vm2, %v20839_v46 }
 0x70f   : > { %15566 = vmatmul.mubr.msk.f32.gmra.mrb[42].mxu1 %vm333_vm2, %v20840_v21 }
 0x710   : > { %15568 = vmatprep.mubr.msk.f32.mxu1 %vm333_vm2, %v20841_v44 }
 0x713   : > { %15569 = vmatmul.mubr.msk.f32.gmra.mrb[44].mxu1 %vm333_vm2, %v20842_v52 }
 0x714   : > { %15571 = vmatprep.mubr.msk.f32.mxu1 %vm333_vm2, %v20843_v0 }
 0x717   : > { %15572 = vmatmul.mubr.msk.f32.gmra.mrb[46].mxu1 %vm333_vm2, %v20844_v34 }
 0x718   : > { %15574 = vmatprep.mubr.msk.f32.mxu1 %vm333_vm2, %v20845_v16 }
 0x71b   : > { %15575 = vmatmul.mubr.msk.f32.gmra.mrb[48].mxu1 %vm333_vm2, %v20846_v20 }
 0x71c   : > { %15577 = vmatprep.mubr.msk.f32.mxu1 %vm333_vm2, %v20847_v2 }
 0x71f   : > { %15578 = vmatmul.mubr.msk.f32.gmra.mrb[50].mxu1 %vm333_vm2, %v20848_v53 }
 0x720   : > { %15580 = vmatprep.mubr.msk.f32.mxu1 %vm333_vm2, %v20849_v8 }
 0x723   : > { %15581 = vmatmul.mubr.msk.f32.gmra.mrb[52].mxu1 %vm333_vm2, %v20850_v17 }
 0x724   : > { %15583 = vmatprep.mubr.msk.f32.mxu1 %vm333_vm2, %v20851_v23 }
 0x727   : > { %15584 = vmatmul.mubr.msk.f32.gmra.mrb[54].mxu1 %vm333_vm2, %v20852_v47  ;;  %v12816_v47 = vld [vmem:[%s20555_s7 + $0x1e8] sm:$0xff] }
 0x728   : > { %15586 = vmatprep.mubr.msk.f32.mxu1 %vm333_vm2, %v20853_v55 }
 0x72b   : > { %15587 = vmatmul.mubr.msk.f32.gmra.mrb[56].mxu1 %vm333_vm2, %v20854_v59  ;;  %v12814_v59 = vld [vmem:[%s20555_s7 + $0x1d8] sm:$0xff] }
 0x72c   : > { %15589 = vmatprep.mubr.msk.f32.mxu1 %vm333_vm2, %v20855_v18  ;;  %v8223_v18 = vld [vmem:[#allocation2 + $0x128] sm:$0xff]  ;;  %v16191_v55 = vpack.c.bf16 %v12814_v59, %v12813_v33  ;;  %v12817_v59 = vld [vmem:[%s20555_s7 + $0x1f0] sm:$0xff]  ;;  %v10894_v33 = vld [vmem:[#allocation2 + $0x1d8] sm:$0xff] }
 0x72f   : > { %15590 = vmatmul.mubr.msk.f32.gmra.mrb[58].mxu1 %vm333_vm2, %v20856_v38  ;;  %v8222_v38 = vld [vmem:[#allocation2 + $0x120] sm:$0xff] }
 0x730   : > { %15592 = vmatprep.mubr.msk.f32.mxu1 %vm333_vm2, %v20227_v27  ;;  %15227 = vmatprep.mubr.msk.f32.mxu0 %vm333_vm2, %v8222_v38  ;;  %v12815_v27 = vld [vmem:[%s20555_s7 + $0x1e0] sm:$0xff]  ;;  %v12818_v38 = vld [vmem:[%s20555_s7 + $0x1f8] sm:$0xff] }
 0x731   : > { %15228 = vmatmul.mubr.msk.f32.vlgmr.msra.gmra.mrb[96].mxu0 %vm333_vm2, %v8223_v18  ;;  %v10892_v18 = vld [vmem:[#allocation2 + $0x1c8] sm:$0xff] }
 0x733   : > { %15593 = vmatmul.mubr.msk.f32.gmra.mrb[60].mxu1 %vm333_vm2, %v20231_v28 }
 0x734   : > { %15611 = vmatprep.mubr.msk.f32.mxu1 %vm333_vm2, %v19695_v6  ;;  %v16195_v6 = vpack.c.bf16 %v12816_v47, %v12815_v27  ;;  %v10890_v47 = vld [vmem:[#allocation2 + $0x1b8] sm:$0xff]  ;;  %v10893_v27 = vld [vmem:[#allocation2 + $0x1d0] sm:$0xff] }
 0x737   : > { %15612 = vmatmul.mubr.msk.f32.vlgmr.msra.gmra.mrb[62].mxu1 %vm333_vm2, %v19699_v26  ;;  %v16199_v26 = vpack.c.bf16 %v12818_v38, %v12817_v59  ;;  %v10896_v59 = vld [vmem:[#allocation2 + $0x1e8] sm:$0xff]  ;;  %v10897_v38 = vld [vmem:[#allocation2 + $0x1f0] sm:$0xff] }
 0x738   : > { %16190 = vmatpush3.bf16.msra.mxu1 %v16187_v57  ;;  %15614 = vmatprep.mubr.msk.f32.mxu1 %vm333_vm2, %v19709_v62  ;;  %v12851_v62 = vld [vmem:[%s20555_s7 + $0x200] sm:$0xff]  ;;  %v12852_v57 = vld [vmem:[%s20555_s7 + $0x208] sm:$0xff] }
 0x739   : > { %16192 = vmatprep.subr.bf16.mxu1 %v16191_v55 }
 0x73b   : > { %15615 = vmatmul.mubr.msk.f32.gmra.mrb[32].mxu1 %vm333_vm2, %v19713_v11  ;;  %v16203_v11 = vpack.c.bf16 %v12852_v57, %v12851_v62  ;;  %v10899_v62 = vld [vmem:[#allocation2 + $0x200] sm:$0xff]  ;;  %v10900_v57 = vld [vmem:[#allocation2 + $0x208] sm:$0xff] }
 0x73c   : > { %15617 = vmatprep.mubr.msk.f32.mxu1 %vm333_vm2, %v19717_v43  ;;  %16194 = vmatpush3.bf16.msra.mxu1 %v16191_v55  ;;  %v10511_v43 = vld [vmem:[#allocation2 + $0x110] sm:$0xff]  ;;  %v10891_v55 = vld [vmem:[#allocation2 + $0x1c0] sm:$0xff] }
 0x73d   : > { %16196 = vmatprep.subr.bf16.mxu1 %v16195_v6 }
 0x73f   : > { %15618 = vmatmul.mubr.msk.f32.gmra.mrb[34].mxu1 %vm333_vm2, %v19721_v9  ;;  %v10512_v9 = vld [vmem:[#allocation2 + $0x118] sm:$0xff] }
 0x740   : > { %15620 = vmatprep.mubr.msk.f32.mxu1 %vm333_vm2, %v19725_v4  ;;  %16198 = vmatpush3.bf16.msra.mxu1 %v16195_v6  ;;  %v12853_v4 = vld [vmem:[%s20555_s7 + $0x210] sm:$0xff]  ;;  %v10895_v6 = vld [vmem:[#allocation2 + $0x1e0] sm:$0xff] }
 0x741   : > { %16200 = vmatprep.subr.bf16.mxu1 %v16199_v26 }
 0x743   : > { %15621 = vmatmul.mubr.msk.f32.gmra.mrb[36].mxu1 %vm333_vm2, %v19729_v14  ;;  %v12854_v14 = vld [vmem:[%s20555_s7 + $0x218] sm:$0xff] }
 0x744   : > { %15623 = vmatprep.mubr.msk.f32.mxu1 %vm333_vm2, %v19733_v49  ;;  %16202 = vmatpush3.bf16.msra.mxu1 %v16199_v26  ;;  %v10875_v49 = vld [vmem:[#allocation2 + $0x140] sm:$0xff]  ;;  %v10898_v26 = vld [vmem:[#allocation2 + $0x1f8] sm:$0xff] }
 0x745   : > { %16204 = vmatprep.subr.bf16.mxu1 %v16203_v11 }
 0x747   : > { %15624 = vmatmul.mubr.msk.f32.gmra.mrb[38].mxu1 %vm333_vm2, %v19737_v13  ;;  %v16207_v13 = vpack.c.bf16 %v12854_v14, %v12853_v4  ;;  %v10906_v4 = vld [vmem:[#allocation2 + $0x238] sm:$0xff] }
 0x748   : > { %15626 = vmatprep.mubr.msk.f32.mxu1 %vm333_vm2, %v19741_v19  ;;  %v10876_v19 = vld [vmem:[#allocation2 + $0x148] sm:$0xff] }
 0x74b   : > { %15627 = vmatmul.mubr.msk.f32.gmra.mrb[40].mxu1 %vm333_vm2, %v19745_v36  ;;  %v12855_v36 = vld [vmem:[%s20555_s7 + $0x220] sm:$0xff] }
 0x74c   : > { %15629 = vmatprep.mubr.msk.f32.mxu1 %vm333_vm2, %v19749_v3  ;;  %v12856_v3 = vld [vmem:[%s20555_s7 + $0x228] sm:$0xff] }
 0x74f   : > { %15630 = vmatmul.mubr.msk.f32.gmra.mrb[42].mxu1 %vm333_vm2, %v19753_v50  ;;  %v10877_v50 = vld [vmem:[#allocation2 + $0x150] sm:$0xff] }
 0x750   : > { %15632 = vmatprep.mubr.msk.f32.mxu1 %vm333_vm2, %v19757_v54  ;;  %v16211_v54 = vpack.c.bf16 %v12856_v3, %v12855_v36 }
 0x753   : > { %15633 = vmatmul.mubr.msk.f32.gmra.mrb[44].mxu1 %vm333_vm2, %v19761_v56  ;;  %v10878_v56 = vld [vmem:[#allocation2 + $0x158] sm:$0xff] }
 0x754   : > { %15635 = vmatprep.mubr.msk.f32.mxu1 %vm333_vm2, %v19765_v42  ;;  %v12857_v42 = vld [vmem:[%s20555_s7 + $0x230] sm:$0xff] }
 0x757   : > { %15636 = vmatmul.mubr.msk.f32.gmra.mrb[46].mxu1 %vm333_vm2, %v19769_v29  ;;  %v12858_v29 = vld [vmem:[%s20555_s7 + $0x238] sm:$0xff] }
 0x758   : > { %15638 = vmatprep.mubr.msk.f32.mxu1 %vm333_vm2, %v19773_v39  ;;  %v10879_v39 = vld [vmem:[#allocation2 + $0x160] sm:$0xff] }
 0x75b   : > { %15639 = vmatmul.mubr.msk.f32.gmra.mrb[48].mxu1 %vm333_vm2, %v19777_v7  ;;  %v16215_v7 = vpack.c.bf16 %v12858_v29, %v12857_v42 }
 0x75c   : > { %15641 = vmatprep.mubr.msk.f32.mxu1 %vm333_vm2, %v19781_v58  ;;  %v10880_v58 = vld [vmem:[#allocation2 + $0x168] sm:$0xff] }
 0x75f   : > { %15642 = vmatmul.mubr.msk.f32.gmra.mrb[50].mxu1 %vm333_vm2, %v19785_v1  ;;  %v10881_v1 = vld [vmem:[#allocation2 + $0x170] sm:$0xff] }
 0x760   : > { %15644 = vmatprep.mubr.msk.f32.mxu1 %vm333_vm2, %v19789_v48  ;;  %v10882_v48 = vld [vmem:[#allocation2 + $0x178] sm:$0xff] }
 0x763   : > { %15645 = vmatmul.mubr.msk.f32.gmra.mrb[52].mxu1 %vm333_vm2, %v19793_v35  ;;  %v10883_v35 = vld [vmem:[#allocation2 + $0x180] sm:$0xff] }
 0x764   : > { %15647 = vmatprep.mubr.msk.f32.mxu1 %vm333_vm2, %v19797_v25  ;;  %v10884_v25 = vld [vmem:[#allocation2 + $0x188] sm:$0xff] }
 0x767   : > { %15648 = vmatmul.mubr.msk.f32.gmra.mrb[54].mxu1 %vm333_vm2, %v19801_v30  ;;  %v10885_v30 = vld [vmem:[#allocation2 + $0x190] sm:$0xff] }
 0x768   : > { %15650 = vmatprep.mubr.msk.f32.mxu1 %vm333_vm2, %v19805_v41  ;;  %v10886_v41 = vld [vmem:[#allocation2 + $0x198] sm:$0xff] }
 0x76b   : > { %15651 = vmatmul.mubr.msk.f32.gmra.mrb[56].mxu1 %vm333_vm2, %v19809_v31  ;;  %v10887_v31 = vld [vmem:[#allocation2 + $0x1a0] sm:$0xff] }
 0x76c   : > { %15653 = vmatprep.mubr.msk.f32.mxu1 %vm333_vm2, %v20043_v60  ;;  %v10888_v60 = vld [vmem:[#allocation2 + $0x1a8] sm:$0xff] }
 0x76f   : > { %15654 = vmatmul.mubr.msk.f32.gmra.mrb[58].mxu1 %vm333_vm2, %v20047_v61  ;;  %v10889_v61 = vld [vmem:[#allocation2 + $0x1b0] sm:$0xff] }
 0x770   : > { %15656 = vmatprep.mubr.msk.f32.mxu1 %vm333_vm2, %v10511_v43  ;;  %v10902_v43 = vld [vmem:[#allocation2 + $0x218] sm:$0xff] }
 0x773   : > { %15657 = vmatmul.mubr.msk.f32.gmra.mrb[60].mxu1 %vm333_vm2, %v10512_v9  ;;  %v10905_v9 = vld [vmem:[#allocation2 + $0x230] sm:$0xff] }
 0x774   : > { %15675 = vmatprep.mubr.msk.f32.mxu1 %vm333_vm2, %v10875_v49 }
 0x777   : > { %15676 = vmatmul.mubr.msk.f32.vlgmr.msra.gmra.mrb[62].mxu1 %vm333_vm2, %v10876_v19 }
 0x778   : > { %16206 = vmatpush3.bf16.msra.mxu1 %v16203_v11  ;;  %15678 = vmatprep.mubr.msk.f32.mxu1 %vm333_vm2, %v10877_v50  ;;  %v10901_v11 = vld [vmem:[#allocation2 + $0x210] sm:$0xff] }
 0x779   : > { %16208 = vmatprep.subr.bf16.mxu1 %v16207_v13 }
 0x77b   : > { %15679 = vmatmul.mubr.msk.f32.gmra.mrb[32].mxu1 %vm333_vm2, %v10878_v56 }
 0x77c   : > { %15681 = vmatprep.mubr.msk.f32.mxu1 %vm333_vm2, %v10879_v39  ;;  %16210 = vmatpush3.bf16.msra.mxu1 %v16207_v13 }
 0x77d   : > { %16212 = vmatprep.subr.bf16.mxu1 %v16211_v54 }
 0x77f   : > { %15682 = vmatmul.mubr.msk.f32.gmra.mrb[34].mxu1 %vm333_vm2, %v10880_v58 }
 0x780   : > { %15684 = vmatprep.mubr.msk.f32.mxu1 %vm333_vm2, %v10881_v1  ;;  %16214 = vmatpush3.bf16.msra.mxu1 %v16211_v54 }
 0x781   : > { %16216 = vmatprep.subr.bf16.mxu1 %v16215_v7 }
 0x783   : > { %15685 = vmatmul.mubr.msk.f32.gmra.mrb[36].mxu1 %vm333_vm2, %v10882_v48 }
 0x784   : > { %15687 = vmatprep.mubr.msk.f32.mxu1 %vm333_vm2, %v10883_v35  ;;  %16218 = vmatpush3.bf16.msra.mxu1 %v16215_v7 }
 0x787   : > { %15688 = vmatmul.mubr.msk.f32.gmra.mrb[38].mxu1 %vm333_vm2, %v10884_v25 }
 0x788   : > { %15690 = vmatprep.mubr.msk.f32.mxu1 %vm333_vm2, %v10885_v30 }
 0x78b   : > { %15691 = vmatmul.mubr.msk.f32.gmra.mrb[40].mxu1 %vm333_vm2, %v10886_v41 }
 0x78c   : > { %15693 = vmatprep.mubr.msk.f32.mxu1 %vm333_vm2, %v10887_v31 }
 0x78f   : > { %15694 = vmatmul.mubr.msk.f32.gmra.mrb[42].mxu1 %vm333_vm2, %v10888_v60 }
 0x790   : > { %15696 = vmatprep.mubr.msk.f32.mxu1 %vm333_vm2, %v10889_v61 }
 0x793   : > { %15697 = vmatmul.mubr.msk.f32.gmra.mrb[44].mxu1 %vm333_vm2, %v10890_v47 }
 0x794   : > { %15699 = vmatprep.mubr.msk.f32.mxu1 %vm333_vm2, %v10891_v55 }
 0x797   : > { %15700 = vmatmul.mubr.msk.f32.gmra.mrb[46].mxu1 %vm333_vm2, %v10892_v18 }
 0x798   : > { %15702 = vmatprep.mubr.msk.f32.mxu1 %vm333_vm2, %v10893_v27 }
 0x79b   : > { %15703 = vmatmul.mubr.msk.f32.gmra.mrb[48].mxu1 %vm333_vm2, %v10894_v33 }
 0x79c   : > { %15705 = vmatprep.mubr.msk.f32.mxu1 %vm333_vm2, %v10895_v6 }
 0x79f   : > { %15706 = vmatmul.mubr.msk.f32.gmra.mrb[50].mxu1 %vm333_vm2, %v10896_v59 }
 0x7a0   : > { %15708 = vmatprep.mubr.msk.f32.mxu1 %vm333_vm2, %v10897_v38 }
 0x7a3   : > { %15709 = vmatmul.mubr.msk.f32.gmra.mrb[52].mxu1 %vm333_vm2, %v10898_v26 }
 0x7a4   : > { %15711 = vmatprep.mubr.msk.f32.mxu1 %vm333_vm2, %v10899_v62 }
 0x7a7   : > { %15712 = vmatmul.mubr.msk.f32.gmra.mrb[54].mxu1 %vm333_vm2, %v10900_v57 }
 0x7a8   : > { %15714 = vmatprep.mubr.msk.f32.mxu1 %vm333_vm2, %v10901_v11 }
 0x7ab   : > { %15715 = vmatmul.mubr.msk.f32.gmra.mrb[56].mxu1 %vm333_vm2, %v10902_v43 }
 0x7ac   : > { %15717 = vmatprep.mubr.msk.f32.mxu1 %vm333_vm2, %v20135_v37  ;;  %v20861_v37 = vld [vmem:[#allocation8_spill] sm:$0xff] }
 0x7af   : > { %15718 = vmatmul.mubr.msk.f32.gmra.mrb[58].mxu1 %vm333_vm2, %v20139_v45  ;;  %v20862_v45 = vld [vmem:[#allocation10_spill] sm:$0xff] }
 0x7b0   : > { %15720 = vmatprep.mubr.msk.f32.mxu1 %vm333_vm2, %v10905_v9 }
 0x7b3   : > { %15721 = vmatmul.mubr.msk.f32.gmra.mrb[60].mxu1 %vm333_vm2, %v10906_v4 }
 0x7b4   : > { %15739 = vmatprep.mubr.msk.f32.mxu1 %vm333_vm2, %v19841_v63  ;;  %v20859_v63 = vld [vmem:[#allocation34_spill] sm:$0xff] }
 0x7b7   : > { %15740 = vmatmul.mubr.msk.f32.vlgmr.msra.gmra.mrb[62].mxu1 %vm333_vm2, %v20832_v24  ;;  %v20863_v24 = vld [vmem:[#allocation5_spill] sm:$0xff] }
 0x7b8   : > { %15742 = vmatprep.mubr.msk.f32.mxu1 %vm333_vm2, %v19855_v40  ;;  %v20858_v40 = vld [vmem:[#allocation33_spill] sm:$0xff] }
 0x7bb   : > { %15743 = vmatmul.mubr.msk.f32.gmra.mrb[32].mxu1 %vm333_vm2, %v19859_v51  ;;  %v20860_v51 = vld [vmem:[#allocation35_spill] sm:$0xff] }
 0x7bc   : > { %15745 = vmatprep.mubr.msk.f32.mxu1 %vm333_vm2, %v20833_v32  ;;  %v11299_v32 = vld [vmem:[#allocation2 + $0x350] sm:$0xff] }
 0x7bf   : > { %15746 = vmatmul.mubr.msk.f32.gmra.mrb[34].mxu1 %vm333_vm2, %v20834_v22  ;;  %v11300_v22 = vld [vmem:[#allocation2 + $0x358] sm:$0xff] }
 0x7c0   : > { %15748 = vmatprep.mubr.msk.f32.mxu1 %vm333_vm2, %v20835_v10 }
 0x7c3   : > { %15749 = vmatmul.mubr.msk.f32.gmra.mrb[36].mxu1 %vm333_vm2, %v20836_v5 }
 0x7c4   : > { %15751 = vmatprep.mubr.msk.f32.mxu1 %vm333_vm2, %v20837_v12 }
 0x7c7   : > { %15752 = vmatmul.mubr.msk.f32.gmra.mrb[38].mxu1 %vm333_vm2, %v20838_v15  ;;  %v20440_v15 = vld [vmem:[%s20556_s8] ss:$0 sm:$0xff] }
 0x7c8   : > { %15754 = vmatprep.mubr.msk.f32.mxu1 %vm333_vm2, %v20839_v46 }
 0x7cb   : > { %15755 = vmatmul.mubr.msk.f32.gmra.mrb[40].mxu1 %vm333_vm2, %v20840_v21 }
 0x7cc   : > { %15757 = vmatprep.mubr.msk.f32.mxu1 %vm333_vm2, %v20841_v44 }
 0x7cf   : > { %15758 = vmatmul.mubr.msk.f32.gmra.mrb[42].mxu1 %vm333_vm2, %v20842_v52 }
 0x7d0   : > { %15760 = vmatprep.mubr.msk.f32.mxu1 %vm333_vm2, %v20843_v0 }
 0x7d3   : > { %15761 = vmatmul.mubr.msk.f32.gmra.mrb[44].mxu1 %vm333_vm2, %v20844_v34 }
 0x7d4   : > { %15763 = vmatprep.mubr.msk.f32.mxu1 %vm333_vm2, %v20845_v16 }
 0x7d7   : > { %15764 = vmatmul.mubr.msk.f32.gmra.mrb[46].mxu1 %vm333_vm2, %v20846_v20 }
 0x7d8   : > { %15766 = vmatprep.mubr.msk.f32.mxu1 %vm333_vm2, %v20847_v2 }
 0x7db   : > { %15767 = vmatmul.mubr.msk.f32.gmra.mrb[48].mxu1 %vm333_vm2, %v20848_v53 }
 0x7dc   : > { %15769 = vmatprep.mubr.msk.f32.mxu1 %vm333_vm2, %v20849_v8 }
 0x7df   : > { %15770 = vmatmul.mubr.msk.f32.gmra.mrb[50].mxu1 %vm333_vm2, %v20850_v17 }
 0x7e0   : > { %15772 = vmatprep.mubr.msk.f32.mxu1 %vm333_vm2, %v20851_v23 }
 0x7e3   : > { %15773 = vmatmul.mubr.msk.f32.gmra.mrb[52].mxu1 %vm333_vm2, %v20858_v40 }
 0x7e4   : > { %15775 = vmatprep.mubr.msk.f32.mxu1 %vm333_vm2, %v20859_v63 }
 0x7e7   : > { %15776 = vmatmul.mubr.msk.f32.gmra.mrb[54].mxu1 %vm333_vm2, %v20860_v51 }
 0x7e8   : > { %15778 = vmatprep.mubr.msk.f32.mxu1 %vm333_vm2, %v20861_v37 }
 0x7eb   : > { %15779 = vmatmul.mubr.msk.f32.gmra.mrb[56].mxu1 %vm333_vm2, %v20862_v45 }
 0x7ec   : > { %15781 = vmatprep.mubr.msk.f32.mxu1 %vm333_vm2, %v20863_v24 }
 0x7ef   : > { %15782 = vmatmul.mubr.msk.f32.gmra.mrb[58].mxu1 %vm333_vm2, %v20231_v28 }
 0x7f0   : > { %15784 = vmatprep.mubr.msk.f32.mxu1 %vm333_vm2, %v11299_v32 }
 0x7f3   : > { %15785 = vmatmul.mubr.msk.f32.gmra.mrb[60].mxu1 %vm333_vm2, %v11300_v22 }
 0x804   : > { %v15229_v10 = vpop.f32.mrb[96].mxu0 }
 0x805   : > { %v8425_v5 = vpop.f32.mrb[97].mxu0 }
 0x88a   : > { %v15741_v12 = vpop.f32.mrb[62].mxu1 }
 0x88b   : > { %v16259_v46 = vadd.f32 %v15741_v12, %v15229_v10  ;;  %v11472_v21 = vpop.f32.mrb[63].mxu1 }
 0x88c   : > { %v16260_v44 = vadd.f32 %v11472_v21, %v8425_v5 }
 0x88d   : > { %v11671_v52 = vadd.f32 %v16259_v46, %v20440_v15 }
 0x88e   : > { %v11670_v0 = vadd.f32 %v16260_v44, %v20440_v15  ;;  %v15744_v34 = vpop.f32.mrb[32].mxu1 }
 0x88f   : > { %11704 = vst.msk [vmem:[%s20447_s27 + $0x8] sm:$0xff] %vm11702_vm6, %v11671_v52  ;;  %v11673_v16 = vadd.f32 %v15744_v34, %v20440_v15  ;;  %v11482_v20 = vpop.f32.mrb[33].mxu1 }
 0x890   : > { %11703 = vst.msk [vmem:[%s20447_s27] sm:$0xff] %vm11702_vm6, %v11670_v0  ;;  %v11672_v2 = vadd.f32 %v20440_v15, %v11482_v20 }
 0x891   : > { %11706 = vst.msk [vmem:[%s20447_s27 + $0x18] sm:$0xff] %vm11702_vm6, %v11673_v16 }
 0x892   : > { %11705 = vst.msk [vmem:[%s20447_s27 + $0x10] sm:$0xff] %vm11702_vm6, %v11672_v2  ;;  %v15747_v53 = vpop.f32.mrb[34].mxu1 }
 0x893   : > { %v11675_v8 = vadd.f32 %v15747_v53, %v20440_v15  ;;  %v11492_v17 = vpop.f32.mrb[35].mxu1 }
 0x894   : > { %v11674_v23 = vadd.f32 %v20440_v15, %v11492_v17 }
 0x895   : > { %11708 = vst.msk [vmem:[%s20447_s27 + $0x28] sm:$0xff] %vm11702_vm6, %v11675_v8 }
 0x896   : > { %11707 = vst.msk [vmem:[%s20447_s27 + $0x20] sm:$0xff] %vm11702_vm6, %v11674_v23  ;;  %v15750_v28 = vpop.f32.mrb[36].mxu1 }
 0x897   : > { %v11677_v14 = vadd.f32 %v15750_v28, %v20440_v15  ;;  %v11502_v49 = vpop.f32.mrb[37].mxu1 }
 0x898   : > { %v11676_v13 = vadd.f32 %v20440_v15, %v11502_v49 }
 0x899   : > { %11710 = vst.msk [vmem:[%s20447_s27 + $0x38] sm:$0xff] %vm11702_vm6, %v11677_v14 }
 0x89a   : > { %11709 = vst.msk [vmem:[%s20447_s27 + $0x30] sm:$0xff] %vm11702_vm6, %v11676_v13  ;;  %v15753_v19 = vpop.f32.mrb[38].mxu1 }
 0x89b   : > { %v11679_v36 = vadd.f32 %v15753_v19, %v20440_v15  ;;  %v11512_v3 = vpop.f32.mrb[39].mxu1 }
 0x89c   : > { %v11678_v50 = vadd.f32 %v20440_v15, %v11512_v3 }
 0x89d   : > { %11712 = vst.msk [vmem:[%s20447_s27 + $0x48] sm:$0xff] %vm11702_vm6, %v11679_v36 }
 0x89e   : > { %11711 = vst.msk [vmem:[%s20447_s27 + $0x40] sm:$0xff] %vm11702_vm6, %v11678_v50  ;;  %v15756_v54 = vpop.f32.mrb[40].mxu1 }
 0x89f   : > { %v11681_v56 = vadd.f32 %v15756_v54, %v20440_v15  ;;  %v11522_v42 = vpop.f32.mrb[41].mxu1 }
 0x8a0   : > { %v11680_v29 = vadd.f32 %v20440_v15, %v11522_v42 }
 0x8a1   : > { %11714 = vst.msk [vmem:[%s20447_s27 + $0x58] sm:$0xff] %vm11702_vm6, %v11681_v56 }
 0x8a2   : > { %11713 = vst.msk [vmem:[%s20447_s27 + $0x50] sm:$0xff] %vm11702_vm6, %v11680_v29  ;;  %v15759_v39 = vpop.f32.mrb[42].mxu1 }
 0x8a3   : > { %v11683_v7 = vadd.f32 %v15759_v39, %v20440_v15  ;;  %v11532_v58 = vpop.f32.mrb[43].mxu1 }
 0x8a4   : > { %v11682_v1 = vadd.f32 %v20440_v15, %v11532_v58 }
 0x8a5   : > { %11716 = vst.msk [vmem:[%s20447_s27 + $0x68] sm:$0xff] %vm11702_vm6, %v11683_v7 }
 0x8a6   : > { %11715 = vst.msk [vmem:[%s20447_s27 + $0x60] sm:$0xff] %vm11702_vm6, %v11682_v1  ;;  %v15762_v48 = vpop.f32.mrb[44].mxu1 }
 0x8a7   : > { %v11685_v35 = vadd.f32 %v15762_v48, %v20440_v15  ;;  %v11542_v25 = vpop.f32.mrb[45].mxu1 }
 0x8a8   : > { %v11684_v30 = vadd.f32 %v20440_v15, %v11542_v25 }
 0x8a9   : > { %11718 = vst.msk [vmem:[%s20447_s27 + $0x78] sm:$0xff] %vm11702_vm6, %v11685_v35 }
 0x8aa   : > { %11717 = vst.msk [vmem:[%s20447_s27 + $0x70] sm:$0xff] %vm11702_vm6, %v11684_v30  ;;  %v15765_v41 = vpop.f32.mrb[46].mxu1 }
 0x8ab   : > { %v11687_v31 = vadd.f32 %v15765_v41, %v20440_v15  ;;  %v11552_v60 = vpop.f32.mrb[47].mxu1 }
 0x8ac   : > { %v11686_v61 = vadd.f32 %v20440_v15, %v11552_v60 }
 0x8ad   : > { %11720 = vst.msk [vmem:[%s20447_s27 + $0x88] sm:$0xff] %vm11702_vm6, %v11687_v31 }
 0x8ae   : > { %11719 = vst.msk [vmem:[%s20447_s27 + $0x80] sm:$0xff] %vm11702_vm6, %v11686_v61  ;;  %v15768_v47 = vpop.f32.mrb[48].mxu1 }
 0x8af   : > { %v11689_v55 = vadd.f32 %v15768_v47, %v20440_v15  ;;  %v11562_v18 = vpop.f32.mrb[49].mxu1 }
 0x8b0   : > { %v11688_v27 = vadd.f32 %v20440_v15, %v11562_v18 }
 0x8b1   : > { %11722 = vst.msk [vmem:[%s20447_s27 + $0x98] sm:$0xff] %vm11702_vm6, %v11689_v55 }
 0x8b2   : > { %11721 = vst.msk [vmem:[%s20447_s27 + $0x90] sm:$0xff] %vm11702_vm6, %v11688_v27  ;;  %v15771_v33 = vpop.f32.mrb[50].mxu1 }
 0x8b3   : > { %v11691_v6 = vadd.f32 %v15771_v33, %v20440_v15  ;;  %v11572_v59 = vpop.f32.mrb[51].mxu1 }
 0x8b4   : > { %v11690_v38 = vadd.f32 %v20440_v15, %v11572_v59 }
 0x8b5   : > { %11724 = vst.msk [vmem:[%s20447_s27 + $0xa8] sm:$0xff] %vm11702_vm6, %v11691_v6 }
 0x8b6   : > { %11723 = vst.msk [vmem:[%s20447_s27 + $0xa0] sm:$0xff] %vm11702_vm6, %v11690_v38  ;;  %v15774_v26 = vpop.f32.mrb[52].mxu1 }
 0x8b7   : > { %v11693_v62 = vadd.f32 %v15774_v26, %v20440_v15  ;;  %v11582_v57 = vpop.f32.mrb[53].mxu1 }
 0x8b8   : > { %v11692_v11 = vadd.f32 %v20440_v15, %v11582_v57 }
 0x8b9   : > { %11726 = vst.msk [vmem:[%s20447_s27 + $0xb8] sm:$0xff] %vm11702_vm6, %v11693_v62 }
 0x8ba   : > { %11725 = vst.msk [vmem:[%s20447_s27 + $0xb0] sm:$0xff] %vm11702_vm6, %v11692_v11  ;;  %v15777_v43 = vpop.f32.mrb[54].mxu1 }
 0x8bb   : > { %v11695_v9 = vadd.f32 %v15777_v43, %v20440_v15  ;;  %v11592_v4 = vpop.f32.mrb[55].mxu1 }
 0x8bc   : > { %v11694_v40 = vadd.f32 %v20440_v15, %v11592_v4 }
 0x8bd   : > { %11728 = vst.msk [vmem:[%s20447_s27 + $0xc8] sm:$0xff] %vm11702_vm6, %v11695_v9 }
 0x8be   : > { %11727 = vst.msk [vmem:[%s20447_s27 + $0xc0] sm:$0xff] %vm11702_vm6, %v11694_v40  ;;  %v15780_v63 = vpop.f32.mrb[56].mxu1 }
 0x8bf   : > { %v11697_v51 = vadd.f32 %v15780_v63, %v20440_v15  ;;  %v11602_v37 = vpop.f32.mrb[57].mxu1 }
 0x8c0   : > { %v11696_v45 = vadd.f32 %v20440_v15, %v11602_v37 }
 0x8c1   : > { %11730 = vst.msk [vmem:[%s20447_s27 + $0xd8] sm:$0xff] %vm11702_vm6, %v11697_v51 }
 0x8c2   : > { %11729 = vst.msk [vmem:[%s20447_s27 + $0xd0] sm:$0xff] %vm11702_vm6, %v11696_v45  ;;  %v15783_v24 = vpop.f32.mrb[58].mxu1 }
 0x8c3   : > { %v11699_v32 = vadd.f32 %v15783_v24, %v20440_v15  ;;  %v11612_v22 = vpop.f32.mrb[59].mxu1 }
 0x8c4   : > { %v11698_v10 = vadd.f32 %v20440_v15, %v11612_v22 }
 0x8c5   : > { %11732 = vst.msk [vmem:[%s20447_s27 + $0xe8] sm:$0xff] %vm11702_vm6, %v11699_v32 }
 0x8c6   : > { %11731 = vst.msk [vmem:[%s20447_s27 + $0xe0] sm:$0xff] %vm11702_vm6, %v11698_v10  ;;  %v15786_v5 = vpop.f32.mrb[60].mxu1 }
 0x8c7   : > { %v11701_v12 = vadd.f32 %v15786_v5, %v20440_v15  ;;  %v11622_v46 = vpop.f32.mrb[61].mxu1 }
 0x8c8   : > { %v11700_v21 = vadd.f32 %v20440_v15, %v11622_v46 }
 0x8c9   : > { %11734 = vst.msk [vmem:[%s20447_s27 + $0xf8] sm:$0xff] %vm11702_vm6, %v11701_v12 }
 0x8ca   : > { %11733 = vst.msk [vmem:[%s20447_s27 + $0xf0] sm:$0xff] %vm11702_vm6, %v11700_v21 }
 0x8cb PF: > { %s19_s30 = sadd.s32 1, %s17010_s30  }
 0x8cc   : > { %p16_p4 = scmp.ge.s32.totalorder %s19_s30, 4  }
 0x8ce   :  { %18 = sbr.rel (!%p16_p4) target bundleno = 1 (0x1), region = 121 }

</bundles_post_ra>
